<compile_context>
chip_gen: v6e
topology: v6e:2x2x1
jax: 0.10.0
libtpu: 0.0.40
codegen_flags: <defaults>
</compile_context>

<pallas_src>
import jax
import jax.numpy as jnp
from jax.experimental import pallas as pl
from jax.experimental.pallas import tpu as pltpu


X_ROWS = 2408   # 48*48 valid flattened rows + 104 zero rows for chunked over-reads
CIN_PAD = 8     # input channels zero-padded 3 -> 8 (8-aligned MXU K)


# ----------------------------------------------------------------------------
# Fused ONet kernel (one image per grid step)
# ----------------------------------------------------------------------------
def _onet_kernel(x_ref, w1_ref, b1_ref, w2_ref, b2_ref, w3_ref, b3_ref,
                 w4_ref, b4_ref, wfc_ref, bfc_ref, wh_ref, bh_ref, al_ref,
                 out_ref,
                 c1, p1, c2, p2, c3, p3, c4):
    f32 = jnp.float32
    bf16 = jnp.bfloat16

    # Pad strips that are read downstream (only via zero-weighted selection
    # columns or never-selected max entries) but never written by conv/pool.
    # Keep them finite every step; every other scratch row is overwritten with
    # finite data each image before being read.
    p1[552:560, :] = jnp.zeros((8, 32), f32)
    c2[504:512, :] = jnp.zeros((8, 64), f32)
    p2[160:168, :] = jnp.zeros((8, 64), f32)
    c3[128:136, :] = jnp.zeros((8, 64), f32)
    p3[32:40, :] = jnp.zeros((8, 64), f32)

    def conv_prelu(src, dst, w_r, b_r, alpha, wl, kh, kw, ho, chunk):
        """Valid conv (stride 1) + bias + PReLU on a row-flattened NHWC tile.

        Rows are laid out flat as h*wl + w (wl a multiple of 8).  `chunk`
        output rows are computed per trip: the kh*kw taps are accumulated MXU
        matmuls (bf16 operands, f32 accumulation) over shifted slices of one
        contiguous (chunk+kh-1)*wl source window -- no im2col.  Junk columns
        (w >= valid width) and overshoot rows from the last trip hold finite
        garbage and are never selected downstream.
        """
        trips = -(-ho // chunk)
        m_rows = chunk * wl
        clen = (chunk + kh - 1) * wl + 8
        bias = b_r[...]                                   # (1, Cout) f32

        def body(t, carry):
            start = pl.multiple_of(t * m_rows, 8)
            win = src[pl.ds(start, clen), :]              # (clen, Cin) f32
            acc = None
            for dy in range(kh):
                for dx in range(kw):
                    off = dy * wl + dx
                    lhs = win[off:off + m_rows, :].astype(bf16)
                    r = jnp.dot(lhs, w_r[dy * kw + dx],
                                preferred_element_type=f32)
                    acc = r if acc is None else acc + r
            y = acc + bias
            dst[pl.ds(start, m_rows), :] = jnp.where(y > 0, y, alpha * y)
            return carry

        jax.lax.fori_loop(0, trips, body, 0)

    def maxpool(src, dst, wl_in, wl_out, k, s, n_out):
        """k x k / stride-s max pool on the row-flattened layout.

        Window max = elementwise max of k*k shifted slices of a contiguous
        chunk; the stride-s column downsample is a tiny 0/1 selection matmul
        instead of a strided sublane gather.  Kept per-output-row (small cost;
        expanding the selection matmul blows up its FLOPs quadratically).
        """
        clen = k * wl_in + 8
        q_idx = jax.lax.broadcasted_iota(jnp.int32, (wl_out, wl_in), 0)
        w_idx = jax.lax.broadcasted_iota(jnp.int32, (wl_out, wl_in), 1)
        sel = ((w_idx == q_idx * s) & (q_idx < n_out)).astype(f32)

        def body(p, carry):
            start = pl.multiple_of(p * (s * wl_in), 8)
            win = src[pl.ds(start, clen), :]
            m = None
            for i in range(k):
                for j in range(k):
                    v = win[i * wl_in + j: i * wl_in + j + wl_in, :]
                    m = v if m is None else jnp.maximum(m, v)
            dst_start = pl.multiple_of(p * wl_out, 8)
            dst[pl.ds(dst_start, wl_out), :] = jnp.dot(
                sel, m, preferred_element_type=f32)
            return carry

        jax.lax.fori_loop(0, n_out, body, 0)

    al1, al2, al3, al4, alfc = (al_ref[i] for i in range(5))

    conv_prelu(x_ref, c1, w1_ref, b1_ref, al1, 48, 3, 3, 46, 8)  # 48x48x3 -> 46x46x32
    maxpool(c1, p1, 48, 24, 2, 2, 23)                            #         -> 23x23x32
    conv_prelu(p1, c2, w2_ref, b2_ref, al2, 24, 3, 3, 21, 7)     #         -> 21x21x64
    maxpool(c2, p2, 24, 16, 3, 2, 10)                            #         -> 10x10x64
    conv_prelu(p2, c3, w3_ref, b3_ref, al3, 16, 3, 3, 8, 8)      #         ->  8x8x64
    maxpool(c3, p3, 16, 8, 2, 2, 4)                              #         ->  4x4x64
    conv_prelu(p3, c4, w4_ref, b4_ref, al4, 8, 2, 2, 3, 3)       #         ->  3x3x128

    # FC over the 3x3x128 map: 9 accumulated (1,128)x(128,256) MXU matmuls.
    # Flatten order is (H,W,C) -- equivalent permutation of the synthetic fc_w.
    c4v = c4[...]                                     # (24, 128) f32, width-8 layout
    feat = bfc_ref[...]                               # (1, 256) f32
    for dy in range(3):
        for dx in range(3):
            feat = feat + jnp.dot(
                c4v[dy * 8 + dx: dy * 8 + dx + 1, :].astype(bf16),
                wfc_ref[dy * 3 + dx], preferred_element_type=f32)
    feat = jnp.where(feat > 0, feat, alfc * feat)

    # Fused heads: one (1,256)x(256,8) matmul; cols 0:2 = cls, 2:6 = reg.
    logits = jnp.dot(feat.astype(bf16), wh_ref[...],
                     preferred_element_type=f32) + bh_ref[...]
    cl = logits[:, 0:2]
    cl = cl - jnp.max(cl, axis=1, keepdims=True)
    e = jnp.exp(cl)
    probs = e / jnp.sum(e, axis=1, keepdims=True)
    out_ref[...] = logits
    out_ref[:, 0:2] = probs


# ----------------------------------------------------------------------------
# Wrapper
# ----------------------------------------------------------------------------
@jax.jit
def onet_forward(x_nchw, params):
    n = x_nchw.shape[0]
    f32 = jnp.float32
    bf16 = jnp.bfloat16

    # NCHW -> row-flattened NHWC; zero-pad rows (2304 -> 2408) and channels
    # (3 -> 8).  Mathematically inert, keeps every contraction 8-aligned and
    # covers the chunked shifted-slice over-read at the last conv1 trip.
    x = jnp.transpose(x_nchw, (0, 2, 3, 1)).astype(f32).reshape(n, 48 * 48, 3)
    x = jnp.pad(x, ((0, 0), (0, X_ROWS - 48 * 48), (0, CIN_PAD - 3)))

    # Weights: bf16 MXU operands; biases / PReLU slopes stay f32 (VPU side).
    w1 = jnp.pad(params["w1"], ((0, 0), (0, 0), (0, CIN_PAD - 3), (0, 0)))
    w1 = w1.reshape(9, CIN_PAD, 32).astype(bf16)
    w2 = params["w2"].reshape(9, 32, 64).astype(bf16)
    w3 = params["w3"].reshape(9, 64, 64).astype(bf16)
    w4 = params["w4"].reshape(4, 64, 128).astype(bf16)
    wfc = params["fc_w"].reshape(9, 128, 256).astype(bf16)
    b1 = params["b1"].reshape(1, 32).astype(f32)
    b2 = params["b2"].reshape(1, 64).astype(f32)
    b3 = params["b3"].reshape(1, 64).astype(f32)
    b4 = params["b4"].reshape(1, 128).astype(f32)
    bfc = params["fc_b"].reshape(1, 256).astype(f32)
    # fused cls/reg head weight: cols 0:2 = cls, 2:6 = reg, 6:8 zero padding
    wh = jnp.concatenate(
        [params["cls_w"], params["reg_w"], jnp.zeros((256, 2), f32)],
        axis=1).astype(bf16)
    bh = jnp.concatenate(
        [params["cls_b"], params["reg_b"], jnp.zeros((2,), f32)]).reshape(1, 8)
    bh = bh.astype(f32)
    alphas = jnp.concatenate(
        [params["a1"], params["a2"], params["a3"], params["a4"],
         params["a_fc"], jnp.zeros((3,), f32)]).astype(f32)

    def c3d(b):
        return (0, 0, 0)

    def c2d(b):
        return (0, 0)

    out = pl.pallas_call(
        _onet_kernel,
        out_shape=jax.ShapeDtypeStruct((n, 1, 8), f32),
        grid=(n,),
        in_specs=[
            pl.BlockSpec((None, X_ROWS, CIN_PAD), lambda b: (b, 0, 0)),
            pl.BlockSpec((9, CIN_PAD, 32), c3d),
            pl.BlockSpec((1, 32), c2d),
            pl.BlockSpec((9, 32, 64), c3d),
            pl.BlockSpec((1, 64), c2d),
            pl.BlockSpec((9, 64, 64), c3d),
            pl.BlockSpec((1, 64), c2d),
            pl.BlockSpec((4, 64, 128), c3d),
            pl.BlockSpec((1, 128), c2d),
            pl.BlockSpec((9, 128, 256), c3d),
            pl.BlockSpec((1, 256), c2d),
            pl.BlockSpec((256, 8), c2d),
            pl.BlockSpec((1, 8), c2d),
            pl.BlockSpec(memory_space=pltpu.MemorySpace.SMEM),
        ],
        out_specs=pl.BlockSpec((None, 1, 8), lambda b: (b, 0, 0)),
        scratch_shapes=[
            pltpu.VMEM((2304, 32), f32),   # conv1 out (46x46x32 + 2 junk rows, width 48)
            pltpu.VMEM((560, 32), f32),    # pool1 out (23x23x32, width 24)
            pltpu.VMEM((512, 64), f32),    # conv2 out (21x21x64, width 24)
            pltpu.VMEM((168, 64), f32),    # pool2 out (10x10x64, width 16)
            pltpu.VMEM((136, 64), f32),    # conv3 out ( 8x8x64,  width 16)
            pltpu.VMEM((40, 64), f32),     # pool3 out ( 4x4x64,  width 8)
            pltpu.VMEM((24, 128), f32),    # conv4 out ( 3x3x128, width 8)
        ],
        compiler_params=pltpu.CompilerParams(
            dimension_semantics=("parallel",),
            vmem_limit_bytes=32 * 1024 * 1024,
        ),
    )(x, w1, b1, w2, b2, w3, b3, w4, b4, wfc, bfc, wh, bh, alphas)

    cls = out[:, 0, 0:2]
    reg = out[:, 0, 2:6]
    return cls, reg


# ----------------------------------------------------------------------------
# Pure-JAX f32 reference (same weight layout) for the in-script self check
# ----------------------------------------------------------------------------
def onet_reference(x_nchw, params):
    f32 = jnp.float32
    x = jnp.transpose(x_nchw, (0, 2, 3, 1)).astype(f32)

    def conv_prelu(x, w, b, a):
        y = jax.lax.conv_general_dilated(
            x, w, window_strides=(1, 1), padding="VALID",
            dimension_numbers=("NHWC", "HWIO", "NHWC"))
        y = y + b
        return jnp.where(y > 0, y, a * y)

    def pool(x, k, s):
        return jax.lax.reduce_window(
            x, -jnp.inf, jax.lax.max, (1, k, k, 1), (1, s, s, 1), "VALID")

    x = conv_prelu(x, params["w1"], params["b1"], params["a1"])
    x = pool(x, 2, 2)
    x = conv_prelu(x, params["w2"], params["b2"], params["a2"])
    x = pool(x, 3, 2)
    x = conv_prelu(x, params["w3"], params["b3"], params["a3"])
    x = pool(x, 2, 2)
    x = conv_prelu(x, params["w4"], params["b4"], params["a4"])

    n = x.shape[0]
    feat = x.reshape(n, 3 * 3 * 128) @ params["fc_w"].reshape(3 * 3 * 128, 256)
    feat = feat + params["fc_b"]
    feat = jnp.where(feat > 0, feat, params["a_fc"] * feat)
    cls = jax.nn.softmax(feat @ params["cls_w"] + params["cls_b"], axis=1)
    reg = feat @ params["reg_w"] + params["reg_b"]
    return cls, reg


def init_params(key):
    ks = jax.random.split(key, 16)
    s = 0.05
    f32 = jnp.float32
    return {
        "w1": jax.random.normal(ks[0], (3, 3, 3, 32), f32) * s,
        "b1": jax.random.normal(ks[1], (32,), f32) * s,
        "w2": jax.random.normal(ks[2], (3, 3, 32, 64), f32) * s,
        "b2": jax.random.normal(ks[3], (64,), f32) * s,
        "w3": jax.random.normal(ks[4], (3, 3, 64, 64), f32) * s,
        "b3": jax.random.normal(ks[5], (64,), f32) * s,
        "w4": jax.random.normal(ks[6], (2, 2, 64, 128), f32) * s,
        "b4": jax.random.normal(ks[7], (128,), f32) * s,
        # stored HWC-major (3,3,128,256); PyTorch flattens (C,H,W) -- equivalent
        # permutation for synthetic weights (permute rows to load a real ckpt).
        "fc_w": jax.random.normal(ks[8], (3, 3, 128, 256), f32) * s,
        "fc_b": jax.random.normal(ks[9], (256,), f32) * s,
        "cls_w": jax.random.normal(ks[10], (256, 2), f32) * s,
        "cls_b": jax.random.normal(ks[11], (2,), f32) * s,
        "reg_w": jax.random.normal(ks[12], (256, 4), f32) * s,
        "reg_b": jax.random.normal(ks[13], (4,), f32) * s,
        # nn.PReLU() default: single slope 0.25 per layer
        "a1": jnp.full((1,), 0.25, f32),
        "a2": jnp.full((1,), 0.25, f32),
        "a3": jnp.full((1,), 0.25, f32),
        "a4": jnp.full((1,), 0.25, f32),
        "a_fc": jnp.full((1,), 0.25, f32),
    }


if __name__ == "__main__":
    # ONet requires 48x48 inputs (3x3 spatial map before the FC layer).
    kx, kp = jax.random.split(jax.random.PRNGKey(0))
    x = jax.random.normal(kx, (2, 3, 48, 48), jnp.float32)
    params = init_params(kp)

    cls, reg = onet_forward(x, params)
    jax.block_until_ready((cls, reg))

    assert cls.shape == (2, 2) and reg.shape == (2, 4)
    assert bool(jnp.allclose(jnp.sum(cls, axis=1), 1.0, atol=1e-5))

    # numerical self-check against the pure-f32 JAX reference (kernel uses
    # bf16 MXU operands with f32 accumulation, hence the looser tolerance)
    cls_ref, reg_ref = jax.jit(onet_reference)(x, params)
    assert bool(jnp.allclose(cls, cls_ref, atol=1e-2, rtol=5e-2))
    assert bool(jnp.allclose(reg, reg_ref, atol=1e-2, rtol=5e-2))

    print("KERNEL_OK")
</pallas_src>

<mosaic_0001>
module attributes {stable_mosaic.version = 11 : i64} {
  func.func @_onet_kernel(%arg0: i32, %arg1: memref<1x2408x8xf32, #tpu.memory_space<vmem>>, %arg2: memref<9x8x32xbf16, #tpu.memory_space<vmem>>, %arg3: memref<1x32xf32, #tpu.memory_space<vmem>>, %arg4: memref<9x32x64xbf16, #tpu.memory_space<vmem>>, %arg5: memref<1x64xf32, #tpu.memory_space<vmem>>, %arg6: memref<9x64x64xbf16, #tpu.memory_space<vmem>>, %arg7: memref<1x64xf32, #tpu.memory_space<vmem>>, %arg8: memref<4x64x128xbf16, #tpu.memory_space<vmem>>, %arg9: memref<1x128xf32, #tpu.memory_space<vmem>>, %arg10: memref<9x128x256xbf16, #tpu.memory_space<vmem>>, %arg11: memref<1x256xf32, #tpu.memory_space<vmem>>, %arg12: memref<256x8xbf16, #tpu.memory_space<vmem>>, %arg13: memref<1x8xf32, #tpu.memory_space<vmem>>, %arg14: memref<8xf32, #tpu.memory_space<smem>>, %arg15: memref<1x1x8xf32, #tpu.memory_space<vmem>>, %arg16: memref<2304x32xf32, #tpu.memory_space<vmem>>, %arg17: memref<560x32xf32, #tpu.memory_space<vmem>>, %arg18: memref<512x64xf32, #tpu.memory_space<vmem>>, %arg19: memref<168x64xf32, #tpu.memory_space<vmem>>, %arg20: memref<136x64xf32, #tpu.memory_space<vmem>>, %arg21: memref<40x64xf32, #tpu.memory_space<vmem>>, %arg22: memref<24x128xf32, #tpu.memory_space<vmem>>) attributes {dimension_semantics = [#tpu.dimension_semantics<parallel>], iteration_bounds = array<i64: 2>, scalar_prefetch = 0 : i64, scratch_operands = 7 : i64, tpu.core_type = #tpu.core_type<tc>, window_params = [{transform_indices = @transform_0, window_bounds = array<i64: 1, 2408, 8>}, {pipeline_mode = #tpu.pipeline_mode<synchronous>, transform_indices = @transform_1, window_bounds = array<i64: 9, 8, 32>}, {pipeline_mode = #tpu.pipeline_mode<synchronous>, transform_indices = @transform_2, window_bounds = array<i64: 1, 32>}, {pipeline_mode = #tpu.pipeline_mode<synchronous>, transform_indices = @transform_3, window_bounds = array<i64: 9, 32, 64>}, {pipeline_mode = #tpu.pipeline_mode<synchronous>, transform_indices = @transform_4, window_bounds = array<i64: 1, 64>}, {pipeline_mode = #tpu.pipeline_mode<synchronous>, transform_indices = @transform_5, window_bounds = array<i64: 9, 64, 64>}, {pipeline_mode = #tpu.pipeline_mode<synchronous>, transform_indices = @transform_6, window_bounds = array<i64: 1, 64>}, {pipeline_mode = #tpu.pipeline_mode<synchronous>, transform_indices = @transform_7, window_bounds = array<i64: 4, 64, 128>}, {pipeline_mode = #tpu.pipeline_mode<synchronous>, transform_indices = @transform_8, window_bounds = array<i64: 1, 128>}, {pipeline_mode = #tpu.pipeline_mode<synchronous>, transform_indices = @transform_9, window_bounds = array<i64: 9, 128, 256>}, {pipeline_mode = #tpu.pipeline_mode<synchronous>, transform_indices = @transform_10, window_bounds = array<i64: 1, 256>}, {pipeline_mode = #tpu.pipeline_mode<synchronous>, transform_indices = @transform_11, window_bounds = array<i64: 256, 8>}, {pipeline_mode = #tpu.pipeline_mode<synchronous>, transform_indices = @transform_12, window_bounds = array<i64: 1, 8>}, {transform_indices = @transform_13, window_bounds = array<i64: 8>}, {transform_indices = @transform_14, window_bounds = array<i64: 1, 1, 8>}]} {
    %cst = arith.constant 0.000000e+00 : f32
    %0 = vector.broadcast %cst : f32 to vector<8x32xf32>
    %c552 = arith.constant 552 : index
    %c0 = arith.constant 0 : index
    %1 = vector.load %arg17[%c552, %c0] : memref<560x32xf32, #tpu.memory_space<vmem>>, vector<8x32xf32>
    tpu.vector_store %arg17[%c552, %c0], %0 {strides = array<i32>} : memref<560x32xf32, #tpu.memory_space<vmem>>, vector<8x32xf32>,
    %cst_0 = arith.constant 0.000000e+00 : f32
    %2 = vector.broadcast %cst_0 : f32 to vector<8x64xf32>
    %c504 = arith.constant 504 : index
    %c0_1 = arith.constant 0 : index
    %3 = vector.load %arg18[%c504, %c0_1] : memref<512x64xf32, #tpu.memory_space<vmem>>, vector<8x64xf32>
    tpu.vector_store %arg18[%c504, %c0_1], %2 {strides = array<i32>} : memref<512x64xf32, #tpu.memory_space<vmem>>, vector<8x64xf32>,
    %cst_2 = arith.constant 0.000000e+00 : f32
    %4 = vector.broadcast %cst_2 : f32 to vector<8x64xf32>
    %c160 = arith.constant 160 : index
    %c0_3 = arith.constant 0 : index
    %5 = vector.load %arg19[%c160, %c0_3] : memref<168x64xf32, #tpu.memory_space<vmem>>, vector<8x64xf32>
    tpu.vector_store %arg19[%c160, %c0_3], %4 {strides = array<i32>} : memref<168x64xf32, #tpu.memory_space<vmem>>, vector<8x64xf32>,
    %cst_4 = arith.constant 0.000000e+00 : f32
    %6 = vector.broadcast %cst_4 : f32 to vector<8x64xf32>
    %c128 = arith.constant 128 : index
    %c0_5 = arith.constant 0 : index
    %7 = vector.load %arg20[%c128, %c0_5] : memref<136x64xf32, #tpu.memory_space<vmem>>, vector<8x64xf32>
    tpu.vector_store %arg20[%c128, %c0_5], %6 {strides = array<i32>} : memref<136x64xf32, #tpu.memory_space<vmem>>, vector<8x64xf32>,
    %cst_6 = arith.constant 0.000000e+00 : f32
    %8 = vector.broadcast %cst_6 : f32 to vector<8x64xf32>
    %c32 = arith.constant 32 : index
    %c0_7 = arith.constant 0 : index
    %9 = vector.load %arg21[%c32, %c0_7] : memref<40x64xf32, #tpu.memory_space<vmem>>, vector<8x64xf32>
    tpu.vector_store %arg21[%c32, %c0_7], %8 {strides = array<i32>} : memref<40x64xf32, #tpu.memory_space<vmem>>, vector<8x64xf32>,
    %c0_8 = arith.constant 0 : index
    %10 = memref.load %arg14[%c0_8] : memref<8xf32, #tpu.memory_space<smem>>
    %c1 = arith.constant 1 : index
    %11 = memref.load %arg14[%c1] : memref<8xf32, #tpu.memory_space<smem>>
    %c2 = arith.constant 2 : index
    %12 = memref.load %arg14[%c2] : memref<8xf32, #tpu.memory_space<smem>>
    %c3 = arith.constant 3 : index
    %13 = memref.load %arg14[%c3] : memref<8xf32, #tpu.memory_space<smem>>
    %c4 = arith.constant 4 : index
    %14 = memref.load %arg14[%c4] : memref<8xf32, #tpu.memory_space<smem>>
    %c0_9 = arith.constant 0 : index
    %c0_10 = arith.constant 0 : index
    %15 = vector.load %arg3[%c0_9, %c0_10] : memref<1x32xf32, #tpu.memory_space<vmem>>, vector<1x32xf32>
    %c0_i32 = arith.constant 0 : i32
    %c6_i32 = arith.constant 6 : i32
    %16 = arith.addi %c0_i32, %c6_i32 : i32
    %c1_i32 = arith.constant 1 : i32
    scf.for %arg23 = %c0_i32 to %16 step %c1_i32  : i32 {
      %c384_i32 = arith.constant 384 : i32
      %238 = arith.muli %arg23, %c384_i32 : i32
      %239 = tpu.assume_multiple %238, 8 : i32
      %c0_147 = arith.constant 0 : index
      %240 = arith.index_cast %239 : i32 to index
      %c0_148 = arith.constant 0 : index
      %241 = vector.load %arg1[%c0_147, %240, %c0_148] : memref<1x2408x8xf32, #tpu.memory_space<vmem>>, vector<1x488x8xf32>
      %242 = vector.shape_cast %241 : vector<1x488x8xf32> to vector<488x8xf32>
      %243 = vector.extract_strided_slice %242 {offsets = [0, 0], sizes = [384, 8], strides = [1, 1]} : vector<488x8xf32> to vector<384x8xf32>
      %244 = arith.truncf %243 : vector<384x8xf32> to vector<384x8xbf16>
      %c0_149 = arith.constant 0 : index
      %c0_150 = arith.constant 0 : index
      %c0_151 = arith.constant 0 : index
      %245 = vector.load %arg2[%c0_149, %c0_150, %c0_151] : memref<9x8x32xbf16, #tpu.memory_space<vmem>>, vector<1x8x32xbf16>
      %246 = vector.shape_cast %245 : vector<1x8x32xbf16> to vector<8x32xbf16>
      %cst_152 = arith.constant dense<0.000000e+00> : vector<384x32xf32>
      %247 = tpu.matmul %244, %246, %cst_152 {dimension_numbers = #tpu.dot_dimension_numbers<[1], [0], [0], [1], [0, 0, 1, 1], [], []>} : vector<384x8xbf16>, vector<8x32xbf16>, vector<384x32xf32> -> vector<384x32xf32>
      %248 = vector.extract_strided_slice %242 {offsets = [1, 0], sizes = [384, 8], strides = [1, 1]} : vector<488x8xf32> to vector<384x8xf32>
      %249 = arith.truncf %248 : vector<384x8xf32> to vector<384x8xbf16>
      %c1_153 = arith.constant 1 : index
      %c0_154 = arith.constant 0 : index
      %c0_155 = arith.constant 0 : index
      %250 = vector.load %arg2[%c1_153, %c0_154, %c0_155] : memref<9x8x32xbf16, #tpu.memory_space<vmem>>, vector<1x8x32xbf16>
      %251 = vector.shape_cast %250 : vector<1x8x32xbf16> to vector<8x32xbf16>
      %cst_156 = arith.constant dense<0.000000e+00> : vector<384x32xf32>
      %252 = tpu.matmul %249, %251, %cst_156 {dimension_numbers = #tpu.dot_dimension_numbers<[1], [0], [0], [1], [0, 0, 1, 1], [], []>} : vector<384x8xbf16>, vector<8x32xbf16>, vector<384x32xf32> -> vector<384x32xf32>
      %253 = arith.addf %247, %252 : vector<384x32xf32>
      %254 = vector.extract_strided_slice %242 {offsets = [2, 0], sizes = [384, 8], strides = [1, 1]} : vector<488x8xf32> to vector<384x8xf32>
      %255 = arith.truncf %254 : vector<384x8xf32> to vector<384x8xbf16>
      %c2_157 = arith.constant 2 : index
      %c0_158 = arith.constant 0 : index
      %c0_159 = arith.constant 0 : index
      %256 = vector.load %arg2[%c2_157, %c0_158, %c0_159] : memref<9x8x32xbf16, #tpu.memory_space<vmem>>, vector<1x8x32xbf16>
      %257 = vector.shape_cast %256 : vector<1x8x32xbf16> to vector<8x32xbf16>
      %cst_160 = arith.constant dense<0.000000e+00> : vector<384x32xf32>
      %258 = tpu.matmul %255, %257, %cst_160 {dimension_numbers = #tpu.dot_dimension_numbers<[1], [0], [0], [1], [0, 0, 1, 1], [], []>} : vector<384x8xbf16>, vector<8x32xbf16>, vector<384x32xf32> -> vector<384x32xf32>
      %259 = arith.addf %253, %258 : vector<384x32xf32>
      %260 = vector.extract_strided_slice %242 {offsets = [48, 0], sizes = [384, 8], strides = [1, 1]} : vector<488x8xf32> to vector<384x8xf32>
      %261 = arith.truncf %260 : vector<384x8xf32> to vector<384x8xbf16>
      %c3_161 = arith.constant 3 : index
      %c0_162 = arith.constant 0 : index
      %c0_163 = arith.constant 0 : index
      %262 = vector.load %arg2[%c3_161, %c0_162, %c0_163] : memref<9x8x32xbf16, #tpu.memory_space<vmem>>, vector<1x8x32xbf16>
      %263 = vector.shape_cast %262 : vector<1x8x32xbf16> to vector<8x32xbf16>
      %cst_164 = arith.constant dense<0.000000e+00> : vector<384x32xf32>
      %264 = tpu.matmul %261, %263, %cst_164 {dimension_numbers = #tpu.dot_dimension_numbers<[1], [0], [0], [1], [0, 0, 1, 1], [], []>} : vector<384x8xbf16>, vector<8x32xbf16>, vector<384x32xf32> -> vector<384x32xf32>
      %265 = arith.addf %259, %264 : vector<384x32xf32>
      %266 = vector.extract_strided_slice %242 {offsets = [49, 0], sizes = [384, 8], strides = [1, 1]} : vector<488x8xf32> to vector<384x8xf32>
      %267 = arith.truncf %266 : vector<384x8xf32> to vector<384x8xbf16>
      %c4_165 = arith.constant 4 : index
      %c0_166 = arith.constant 0 : index
      %c0_167 = arith.constant 0 : index
      %268 = vector.load %arg2[%c4_165, %c0_166, %c0_167] : memref<9x8x32xbf16, #tpu.memory_space<vmem>>, vector<1x8x32xbf16>
      %269 = vector.shape_cast %268 : vector<1x8x32xbf16> to vector<8x32xbf16>
      %cst_168 = arith.constant dense<0.000000e+00> : vector<384x32xf32>
      %270 = tpu.matmul %267, %269, %cst_168 {dimension_numbers = #tpu.dot_dimension_numbers<[1], [0], [0], [1], [0, 0, 1, 1], [], []>} : vector<384x8xbf16>, vector<8x32xbf16>, vector<384x32xf32> -> vector<384x32xf32>
      %271 = arith.addf %265, %270 : vector<384x32xf32>
      %272 = vector.extract_strided_slice %242 {offsets = [50, 0], sizes = [384, 8], strides = [1, 1]} : vector<488x8xf32> to vector<384x8xf32>
      %273 = arith.truncf %272 : vector<384x8xf32> to vector<384x8xbf16>
      %c5_169 = arith.constant 5 : index
      %c0_170 = arith.constant 0 : index
      %c0_171 = arith.constant 0 : index
      %274 = vector.load %arg2[%c5_169, %c0_170, %c0_171] : memref<9x8x32xbf16, #tpu.memory_space<vmem>>, vector<1x8x32xbf16>
      %275 = vector.shape_cast %274 : vector<1x8x32xbf16> to vector<8x32xbf16>
      %cst_172 = arith.constant dense<0.000000e+00> : vector<384x32xf32>
      %276 = tpu.matmul %273, %275, %cst_172 {dimension_numbers = #tpu.dot_dimension_numbers<[1], [0], [0], [1], [0, 0, 1, 1], [], []>} : vector<384x8xbf16>, vector<8x32xbf16>, vector<384x32xf32> -> vector<384x32xf32>
      %277 = arith.addf %271, %276 : vector<384x32xf32>
      %278 = vector.extract_strided_slice %242 {offsets = [96, 0], sizes = [384, 8], strides = [1, 1]} : vector<488x8xf32> to vector<384x8xf32>
      %279 = arith.truncf %278 : vector<384x8xf32> to vector<384x8xbf16>
      %c6_173 = arith.constant 6 : index
      %c0_174 = arith.constant 0 : index
      %c0_175 = arith.constant 0 : index
      %280 = vector.load %arg2[%c6_173, %c0_174, %c0_175] : memref<9x8x32xbf16, #tpu.memory_space<vmem>>, vector<1x8x32xbf16>
      %281 = vector.shape_cast %280 : vector<1x8x32xbf16> to vector<8x32xbf16>
      %cst_176 = arith.constant dense<0.000000e+00> : vector<384x32xf32>
      %282 = tpu.matmul %279, %281, %cst_176 {dimension_numbers = #tpu.dot_dimension_numbers<[1], [0], [0], [1], [0, 0, 1, 1], [], []>} : vector<384x8xbf16>, vector<8x32xbf16>, vector<384x32xf32> -> vector<384x32xf32>
      %283 = arith.addf %277, %282 : vector<384x32xf32>
      %284 = vector.extract_strided_slice %242 {offsets = [97, 0], sizes = [384, 8], strides = [1, 1]} : vector<488x8xf32> to vector<384x8xf32>
      %285 = arith.truncf %284 : vector<384x8xf32> to vector<384x8xbf16>
      %c7_177 = arith.constant 7 : index
      %c0_178 = arith.constant 0 : index
      %c0_179 = arith.constant 0 : index
      %286 = vector.load %arg2[%c7_177, %c0_178, %c0_179] : memref<9x8x32xbf16, #tpu.memory_space<vmem>>, vector<1x8x32xbf16>
      %287 = vector.shape_cast %286 : vector<1x8x32xbf16> to vector<8x32xbf16>
      %cst_180 = arith.constant dense<0.000000e+00> : vector<384x32xf32>
      %288 = tpu.matmul %285, %287, %cst_180 {dimension_numbers = #tpu.dot_dimension_numbers<[1], [0], [0], [1], [0, 0, 1, 1], [], []>} : vector<384x8xbf16>, vector<8x32xbf16>, vector<384x32xf32> -> vector<384x32xf32>
      %289 = arith.addf %283, %288 : vector<384x32xf32>
      %290 = vector.extract_strided_slice %242 {offsets = [98, 0], sizes = [384, 8], strides = [1, 1]} : vector<488x8xf32> to vector<384x8xf32>
      %291 = arith.truncf %290 : vector<384x8xf32> to vector<384x8xbf16>
      %c8_181 = arith.constant 8 : index
      %c0_182 = arith.constant 0 : index
      %c0_183 = arith.constant 0 : index
      %292 = vector.load %arg2[%c8_181, %c0_182, %c0_183] : memref<9x8x32xbf16, #tpu.memory_space<vmem>>, vector<1x8x32xbf16>
      %293 = vector.shape_cast %292 : vector<1x8x32xbf16> to vector<8x32xbf16>
      %cst_184 = arith.constant dense<0.000000e+00> : vector<384x32xf32>
      %294 = tpu.matmul %291, %293, %cst_184 {dimension_numbers = #tpu.dot_dimension_numbers<[1], [0], [0], [1], [0, 0, 1, 1], [], []>} : vector<384x8xbf16>, vector<8x32xbf16>, vector<384x32xf32> -> vector<384x32xf32>
      %295 = arith.addf %289, %294 : vector<384x32xf32>
      %296 = vector.broadcast %15 : vector<1x32xf32> to vector<384x32xf32>
      %297 = arith.addf %295, %296 : vector<384x32xf32>
      %cst_185 = arith.constant 0.000000e+00 : f32
      %298 = vector.broadcast %cst_185 : f32 to vector<384x32xf32>
      %299 = arith.cmpf ogt, %297, %298 : vector<384x32xf32>
      %300 = vector.broadcast %10 : f32 to vector<384x32xf32>
      %301 = arith.mulf %300, %297 : vector<384x32xf32>
      %302 = arith.select %299, %297, %301 : vector<384x32xi1>, vector<384x32xf32>
      %303 = arith.index_cast %239 : i32 to index
      %c0_186 = arith.constant 0 : index
      %304 = vector.load %arg16[%303, %c0_186] : memref<2304x32xf32, #tpu.memory_space<vmem>>, vector<384x32xf32>
      tpu.vector_store %arg16[%303, %c0_186], %302 {strides = array<i32>} : memref<2304x32xf32, #tpu.memory_space<vmem>>, vector<384x32xf32>,
    }
    %c6_i32_11 = arith.constant 6 : i32
    %17 = tpu.iota {dimensions = array<i32: 0>} : vector<24x48xi32>
    %18 = tpu.iota {dimensions = array<i32: 1>} : vector<24x48xi32>
    %c2_i32 = arith.constant 2 : i32
    %19 = vector.broadcast %c2_i32 : i32 to vector<24x48xi32>
    %20 = arith.muli %17, %19 : vector<24x48xi32>
    %21 = arith.cmpi eq, %18, %20 : vector<24x48xi32>
    %c23_i32 = arith.constant 23 : i32
    %22 = vector.broadcast %c23_i32 : i32 to vector<24x48xi32>
    %23 = arith.cmpi slt, %17, %22 : vector<24x48xi32>
    %24 = arith.andi %21, %23 : vector<24x48xi1>
    %25 = arith.extui %24 : vector<24x48xi1> to vector<24x48xi32>
    %26 = arith.sitofp %25 : vector<24x48xi32> to vector<24x48xf32>
    %c0_i32_12 = arith.constant 0 : i32
    %c23_i32_13 = arith.constant 23 : i32
    %27 = arith.addi %c0_i32_12, %c23_i32_13 : i32
    %c1_i32_14 = arith.constant 1 : i32
    scf.for %arg23 = %c0_i32_12 to %27 step %c1_i32_14  : i32 {
      %c96_i32 = arith.constant 96 : i32
      %238 = arith.muli %arg23, %c96_i32 : i32
      %239 = tpu.assume_multiple %238, 8 : i32
      %240 = arith.index_cast %239 : i32 to index
      %c0_147 = arith.constant 0 : index
      %241 = vector.load %arg16[%240, %c0_147] : memref<2304x32xf32, #tpu.memory_space<vmem>>, vector<104x32xf32>
      %242 = vector.extract_strided_slice %241 {offsets = [0, 0], sizes = [48, 32], strides = [1, 1]} : vector<104x32xf32> to vector<48x32xf32>
      %243 = vector.extract_strided_slice %241 {offsets = [1, 0], sizes = [48, 32], strides = [1, 1]} : vector<104x32xf32> to vector<48x32xf32>
      %244 = arith.maximumf %242, %243 : vector<48x32xf32>
      %245 = vector.extract_strided_slice %241 {offsets = [48, 0], sizes = [48, 32], strides = [1, 1]} : vector<104x32xf32> to vector<48x32xf32>
      %246 = arith.maximumf %244, %245 : vector<48x32xf32>
      %247 = vector.extract_strided_slice %241 {offsets = [49, 0], sizes = [48, 32], strides = [1, 1]} : vector<104x32xf32> to vector<48x32xf32>
      %248 = arith.maximumf %246, %247 : vector<48x32xf32>
      %c24_i32_148 = arith.constant 24 : i32
      %249 = arith.muli %arg23, %c24_i32_148 : i32
      %250 = tpu.assume_multiple %249, 8 : i32
      %cst_149 = arith.constant dense<0.000000e+00> : vector<24x32xf32>
      %251 = tpu.matmul %26, %248, %cst_149 {dimension_numbers = #tpu.dot_dimension_numbers<[1], [0], [0], [1], [0, 0, 1, 1], [], []>} : vector<24x48xf32>, vector<48x32xf32>, vector<24x32xf32> -> vector<24x32xf32>
      %252 = arith.index_cast %250 : i32 to index
      %c0_150 = arith.constant 0 : index
      %253 = vector.load %arg17[%252, %c0_150] : memref<560x32xf32, #tpu.memory_space<vmem>>, vector<24x32xf32>
      tpu.vector_store %arg17[%252, %c0_150], %251 {strides = array<i32>} : memref<560x32xf32, #tpu.memory_space<vmem>>, vector<24x32xf32>,
    }
    %c23_i32_15 = arith.constant 23 : i32
    %c0_16 = arith.constant 0 : index
    %c0_17 = arith.constant 0 : index
    %28 = vector.load %arg5[%c0_16, %c0_17] : memref<1x64xf32, #tpu.memory_space<vmem>>, vector<1x64xf32>
    %c0_i32_18 = arith.constant 0 : i32
    %c3_i32 = arith.constant 3 : i32
    %29 = arith.addi %c0_i32_18, %c3_i32 : i32
    %c1_i32_19 = arith.constant 1 : i32
    scf.for %arg23 = %c0_i32_18 to %29 step %c1_i32_19  : i32 {
      %c168_i32 = arith.constant 168 : i32
      %238 = arith.muli %arg23, %c168_i32 : i32
      %239 = tpu.assume_multiple %238, 8 : i32
      %240 = arith.index_cast %239 : i32 to index
      %c0_147 = arith.constant 0 : index
      %241 = vector.load %arg17[%240, %c0_147] : memref<560x32xf32, #tpu.memory_space<vmem>>, vector<224x32xf32>
      %242 = vector.extract_strided_slice %241 {offsets = [0, 0], sizes = [168, 32], strides = [1, 1]} : vector<224x32xf32> to vector<168x32xf32>
      %243 = arith.truncf %242 : vector<168x32xf32> to vector<168x32xbf16>
      %c0_148 = arith.constant 0 : index
      %c0_149 = arith.constant 0 : index
      %c0_150 = arith.constant 0 : index
      %244 = vector.load %arg4[%c0_148, %c0_149, %c0_150] : memref<9x32x64xbf16, #tpu.memory_space<vmem>>, vector<1x32x64xbf16>
      %245 = vector.shape_cast %244 : vector<1x32x64xbf16> to vector<32x64xbf16>
      %cst_151 = arith.constant dense<0.000000e+00> : vector<168x64xf32>
      %246 = tpu.matmul %243, %245, %cst_151 {dimension_numbers = #tpu.dot_dimension_numbers<[1], [0], [0], [1], [0, 0, 1, 1], [], []>} : vector<168x32xbf16>, vector<32x64xbf16>, vector<168x64xf32> -> vector<168x64xf32>
      %247 = vector.extract_strided_slice %241 {offsets = [1, 0], sizes = [168, 32], strides = [1, 1]} : vector<224x32xf32> to vector<168x32xf32>
      %248 = arith.truncf %247 : vector<168x32xf32> to vector<168x32xbf16>
      %c1_152 = arith.constant 1 : index
      %c0_153 = arith.constant 0 : index
      %c0_154 = arith.constant 0 : index
      %249 = vector.load %arg4[%c1_152, %c0_153, %c0_154] : memref<9x32x64xbf16, #tpu.memory_space<vmem>>, vector<1x32x64xbf16>
      %250 = vector.shape_cast %249 : vector<1x32x64xbf16> to vector<32x64xbf16>
      %cst_155 = arith.constant dense<0.000000e+00> : vector<168x64xf32>
      %251 = tpu.matmul %248, %250, %cst_155 {dimension_numbers = #tpu.dot_dimension_numbers<[1], [0], [0], [1], [0, 0, 1, 1], [], []>} : vector<168x32xbf16>, vector<32x64xbf16>, vector<168x64xf32> -> vector<168x64xf32>
      %252 = arith.addf %246, %251 : vector<168x64xf32>
      %253 = vector.extract_strided_slice %241 {offsets = [2, 0], sizes = [168, 32], strides = [1, 1]} : vector<224x32xf32> to vector<168x32xf32>
      %254 = arith.truncf %253 : vector<168x32xf32> to vector<168x32xbf16>
      %c2_156 = arith.constant 2 : index
      %c0_157 = arith.constant 0 : index
      %c0_158 = arith.constant 0 : index
      %255 = vector.load %arg4[%c2_156, %c0_157, %c0_158] : memref<9x32x64xbf16, #tpu.memory_space<vmem>>, vector<1x32x64xbf16>
      %256 = vector.shape_cast %255 : vector<1x32x64xbf16> to vector<32x64xbf16>
      %cst_159 = arith.constant dense<0.000000e+00> : vector<168x64xf32>
      %257 = tpu.matmul %254, %256, %cst_159 {dimension_numbers = #tpu.dot_dimension_numbers<[1], [0], [0], [1], [0, 0, 1, 1], [], []>} : vector<168x32xbf16>, vector<32x64xbf16>, vector<168x64xf32> -> vector<168x64xf32>
      %258 = arith.addf %252, %257 : vector<168x64xf32>
      %259 = vector.extract_strided_slice %241 {offsets = [24, 0], sizes = [168, 32], strides = [1, 1]} : vector<224x32xf32> to vector<168x32xf32>
      %260 = arith.truncf %259 : vector<168x32xf32> to vector<168x32xbf16>
      %c3_160 = arith.constant 3 : index
      %c0_161 = arith.constant 0 : index
      %c0_162 = arith.constant 0 : index
      %261 = vector.load %arg4[%c3_160, %c0_161, %c0_162] : memref<9x32x64xbf16, #tpu.memory_space<vmem>>, vector<1x32x64xbf16>
      %262 = vector.shape_cast %261 : vector<1x32x64xbf16> to vector<32x64xbf16>
      %cst_163 = arith.constant dense<0.000000e+00> : vector<168x64xf32>
      %263 = tpu.matmul %260, %262, %cst_163 {dimension_numbers = #tpu.dot_dimension_numbers<[1], [0], [0], [1], [0, 0, 1, 1], [], []>} : vector<168x32xbf16>, vector<32x64xbf16>, vector<168x64xf32> -> vector<168x64xf32>
      %264 = arith.addf %258, %263 : vector<168x64xf32>
      %265 = vector.extract_strided_slice %241 {offsets = [25, 0], sizes = [168, 32], strides = [1, 1]} : vector<224x32xf32> to vector<168x32xf32>
      %266 = arith.truncf %265 : vector<168x32xf32> to vector<168x32xbf16>
      %c4_164 = arith.constant 4 : index
      %c0_165 = arith.constant 0 : index
      %c0_166 = arith.constant 0 : index
      %267 = vector.load %arg4[%c4_164, %c0_165, %c0_166] : memref<9x32x64xbf16, #tpu.memory_space<vmem>>, vector<1x32x64xbf16>
      %268 = vector.shape_cast %267 : vector<1x32x64xbf16> to vector<32x64xbf16>
      %cst_167 = arith.constant dense<0.000000e+00> : vector<168x64xf32>
      %269 = tpu.matmul %266, %268, %cst_167 {dimension_numbers = #tpu.dot_dimension_numbers<[1], [0], [0], [1], [0, 0, 1, 1], [], []>} : vector<168x32xbf16>, vector<32x64xbf16>, vector<168x64xf32> -> vector<168x64xf32>
      %270 = arith.addf %264, %269 : vector<168x64xf32>
      %271 = vector.extract_strided_slice %241 {offsets = [26, 0], sizes = [168, 32], strides = [1, 1]} : vector<224x32xf32> to vector<168x32xf32>
      %272 = arith.truncf %271 : vector<168x32xf32> to vector<168x32xbf16>
      %c5_168 = arith.constant 5 : index
      %c0_169 = arith.constant 0 : index
      %c0_170 = arith.constant 0 : index
      %273 = vector.load %arg4[%c5_168, %c0_169, %c0_170] : memref<9x32x64xbf16, #tpu.memory_space<vmem>>, vector<1x32x64xbf16>
      %274 = vector.shape_cast %273 : vector<1x32x64xbf16> to vector<32x64xbf16>
      %cst_171 = arith.constant dense<0.000000e+00> : vector<168x64xf32>
      %275 = tpu.matmul %272, %274, %cst_171 {dimension_numbers = #tpu.dot_dimension_numbers<[1], [0], [0], [1], [0, 0, 1, 1], [], []>} : vector<168x32xbf16>, vector<32x64xbf16>, vector<168x64xf32> -> vector<168x64xf32>
      %276 = arith.addf %270, %275 : vector<168x64xf32>
      %277 = vector.extract_strided_slice %241 {offsets = [48, 0], sizes = [168, 32], strides = [1, 1]} : vector<224x32xf32> to vector<168x32xf32>
      %278 = arith.truncf %277 : vector<168x32xf32> to vector<168x32xbf16>
      %c6_172 = arith.constant 6 : index
      %c0_173 = arith.constant 0 : index
      %c0_174 = arith.constant 0 : index
      %279 = vector.load %arg4[%c6_172, %c0_173, %c0_174] : memref<9x32x64xbf16, #tpu.memory_space<vmem>>, vector<1x32x64xbf16>
      %280 = vector.shape_cast %279 : vector<1x32x64xbf16> to vector<32x64xbf16>
      %cst_175 = arith.constant dense<0.000000e+00> : vector<168x64xf32>
      %281 = tpu.matmul %278, %280, %cst_175 {dimension_numbers = #tpu.dot_dimension_numbers<[1], [0], [0], [1], [0, 0, 1, 1], [], []>} : vector<168x32xbf16>, vector<32x64xbf16>, vector<168x64xf32> -> vector<168x64xf32>
      %282 = arith.addf %276, %281 : vector<168x64xf32>
      %283 = vector.extract_strided_slice %241 {offsets = [49, 0], sizes = [168, 32], strides = [1, 1]} : vector<224x32xf32> to vector<168x32xf32>
      %284 = arith.truncf %283 : vector<168x32xf32> to vector<168x32xbf16>
      %c7_176 = arith.constant 7 : index
      %c0_177 = arith.constant 0 : index
      %c0_178 = arith.constant 0 : index
      %285 = vector.load %arg4[%c7_176, %c0_177, %c0_178] : memref<9x32x64xbf16, #tpu.memory_space<vmem>>, vector<1x32x64xbf16>
      %286 = vector.shape_cast %285 : vector<1x32x64xbf16> to vector<32x64xbf16>
      %cst_179 = arith.constant dense<0.000000e+00> : vector<168x64xf32>
      %287 = tpu.matmul %284, %286, %cst_179 {dimension_numbers = #tpu.dot_dimension_numbers<[1], [0], [0], [1], [0, 0, 1, 1], [], []>} : vector<168x32xbf16>, vector<32x64xbf16>, vector<168x64xf32> -> vector<168x64xf32>
      %288 = arith.addf %282, %287 : vector<168x64xf32>
      %289 = vector.extract_strided_slice %241 {offsets = [50, 0], sizes = [168, 32], strides = [1, 1]} : vector<224x32xf32> to vector<168x32xf32>
      %290 = arith.truncf %289 : vector<168x32xf32> to vector<168x32xbf16>
      %c8_180 = arith.constant 8 : index
      %c0_181 = arith.constant 0 : index
      %c0_182 = arith.constant 0 : index
      %291 = vector.load %arg4[%c8_180, %c0_181, %c0_182] : memref<9x32x64xbf16, #tpu.memory_space<vmem>>, vector<1x32x64xbf16>
      %292 = vector.shape_cast %291 : vector<1x32x64xbf16> to vector<32x64xbf16>
      %cst_183 = arith.constant dense<0.000000e+00> : vector<168x64xf32>
      %293 = tpu.matmul %290, %292, %cst_183 {dimension_numbers = #tpu.dot_dimension_numbers<[1], [0], [0], [1], [0, 0, 1, 1], [], []>} : vector<168x32xbf16>, vector<32x64xbf16>, vector<168x64xf32> -> vector<168x64xf32>
      %294 = arith.addf %288, %293 : vector<168x64xf32>
      %295 = vector.broadcast %28 : vector<1x64xf32> to vector<168x64xf32>
      %296 = arith.addf %294, %295 : vector<168x64xf32>
      %cst_184 = arith.constant 0.000000e+00 : f32
      %297 = vector.broadcast %cst_184 : f32 to vector<168x64xf32>
      %298 = arith.cmpf ogt, %296, %297 : vector<168x64xf32>
      %299 = vector.broadcast %11 : f32 to vector<168x64xf32>
      %300 = arith.mulf %299, %296 : vector<168x64xf32>
      %301 = arith.select %298, %296, %300 : vector<168x64xi1>, vector<168x64xf32>
      %302 = arith.index_cast %239 : i32 to index
      %c0_185 = arith.constant 0 : index
      %303 = vector.load %arg18[%302, %c0_185] : memref<512x64xf32, #tpu.memory_space<vmem>>, vector<168x64xf32>
      tpu.vector_store %arg18[%302, %c0_185], %301 {strides = array<i32>} : memref<512x64xf32, #tpu.memory_space<vmem>>, vector<168x64xf32>,
    }
    %c3_i32_20 = arith.constant 3 : i32
    %30 = tpu.iota {dimensions = array<i32: 0>} : vector<16x24xi32>
    %31 = tpu.iota {dimensions = array<i32: 1>} : vector<16x24xi32>
    %c2_i32_21 = arith.constant 2 : i32
    %32 = vector.broadcast %c2_i32_21 : i32 to vector<16x24xi32>
    %33 = arith.muli %30, %32 : vector<16x24xi32>
    %34 = arith.cmpi eq, %31, %33 : vector<16x24xi32>
    %c10_i32 = arith.constant 10 : i32
    %35 = vector.broadcast %c10_i32 : i32 to vector<16x24xi32>
    %36 = arith.cmpi slt, %30, %35 : vector<16x24xi32>
    %37 = arith.andi %34, %36 : vector<16x24xi1>
    %38 = arith.extui %37 : vector<16x24xi1> to vector<16x24xi32>
    %39 = arith.sitofp %38 : vector<16x24xi32> to vector<16x24xf32>
    %c0_i32_22 = arith.constant 0 : i32
    %c10_i32_23 = arith.constant 10 : i32
    %40 = arith.addi %c0_i32_22, %c10_i32_23 : i32
    %c1_i32_24 = arith.constant 1 : i32
    scf.for %arg23 = %c0_i32_22 to %40 step %c1_i32_24  : i32 {
      %c48_i32 = arith.constant 48 : i32
      %238 = arith.muli %arg23, %c48_i32 : i32
      %239 = tpu.assume_multiple %238, 8 : i32
      %240 = arith.index_cast %239 : i32 to index
      %c0_147 = arith.constant 0 : index
      %241 = vector.load %arg18[%240, %c0_147] : memref<512x64xf32, #tpu.memory_space<vmem>>, vector<80x64xf32>
      %242 = vector.extract_strided_slice %241 {offsets = [0, 0], sizes = [24, 64], strides = [1, 1]} : vector<80x64xf32> to vector<24x64xf32>
      %243 = vector.extract_strided_slice %241 {offsets = [1, 0], sizes = [24, 64], strides = [1, 1]} : vector<80x64xf32> to vector<24x64xf32>
      %244 = arith.maximumf %242, %243 : vector<24x64xf32>
      %245 = vector.extract_strided_slice %241 {offsets = [2, 0], sizes = [24, 64], strides = [1, 1]} : vector<80x64xf32> to vector<24x64xf32>
      %246 = arith.maximumf %244, %245 : vector<24x64xf32>
      %247 = vector.extract_strided_slice %241 {offsets = [24, 0], sizes = [24, 64], strides = [1, 1]} : vector<80x64xf32> to vector<24x64xf32>
      %248 = arith.maximumf %246, %247 : vector<24x64xf32>
      %249 = vector.extract_strided_slice %241 {offsets = [25, 0], sizes = [24, 64], strides = [1, 1]} : vector<80x64xf32> to vector<24x64xf32>
      %250 = arith.maximumf %248, %249 : vector<24x64xf32>
      %251 = vector.extract_strided_slice %241 {offsets = [26, 0], sizes = [24, 64], strides = [1, 1]} : vector<80x64xf32> to vector<24x64xf32>
      %252 = arith.maximumf %250, %251 : vector<24x64xf32>
      %253 = vector.extract_strided_slice %241 {offsets = [48, 0], sizes = [24, 64], strides = [1, 1]} : vector<80x64xf32> to vector<24x64xf32>
      %254 = arith.maximumf %252, %253 : vector<24x64xf32>
      %255 = vector.extract_strided_slice %241 {offsets = [49, 0], sizes = [24, 64], strides = [1, 1]} : vector<80x64xf32> to vector<24x64xf32>
      %256 = arith.maximumf %254, %255 : vector<24x64xf32>
      %257 = vector.extract_strided_slice %241 {offsets = [50, 0], sizes = [24, 64], strides = [1, 1]} : vector<80x64xf32> to vector<24x64xf32>
      %258 = arith.maximumf %256, %257 : vector<24x64xf32>
      %c16_i32 = arith.constant 16 : i32
      %259 = arith.muli %arg23, %c16_i32 : i32
      %260 = tpu.assume_multiple %259, 8 : i32
      %cst_148 = arith.constant dense<0.000000e+00> : vector<16x64xf32>
      %261 = tpu.matmul %39, %258, %cst_148 {dimension_numbers = #tpu.dot_dimension_numbers<[1], [0], [0], [1], [0, 0, 1, 1], [], []>} : vector<16x24xf32>, vector<24x64xf32>, vector<16x64xf32> -> vector<16x64xf32>
      %262 = arith.index_cast %260 : i32 to index
      %c0_149 = arith.constant 0 : index
      %263 = vector.load %arg19[%262, %c0_149] : memref<168x64xf32, #tpu.memory_space<vmem>>, vector<16x64xf32>
      tpu.vector_store %arg19[%262, %c0_149], %261 {strides = array<i32>} : memref<168x64xf32, #tpu.memory_space<vmem>>, vector<16x64xf32>,
    }
    %c10_i32_25 = arith.constant 10 : i32
    %c0_26 = arith.constant 0 : index
    %c0_27 = arith.constant 0 : index
    %41 = vector.load %arg7[%c0_26, %c0_27] : memref<1x64xf32, #tpu.memory_space<vmem>>, vector<1x64xf32>
    %c0_i32_28 = arith.constant 0 : i32
    %c128_i32 = arith.constant 128 : i32
    %42 = arith.muli %c0_i32_28, %c128_i32 : i32
    %43 = tpu.assume_multiple %42, 8 : i32
    %44 = arith.index_cast %43 : i32 to index
    %c0_29 = arith.constant 0 : index
    %45 = vector.load %arg19[%44, %c0_29] : memref<168x64xf32, #tpu.memory_space<vmem>>, vector<168x64xf32>
    %46 = vector.extract_strided_slice %45 {offsets = [0, 0], sizes = [128, 64], strides = [1, 1]} : vector<168x64xf32> to vector<128x64xf32>
    %47 = arith.truncf %46 : vector<128x64xf32> to vector<128x64xbf16>
    %c0_30 = arith.constant 0 : index
    %c0_31 = arith.constant 0 : index
    %c0_32 = arith.constant 0 : index
    %48 = vector.load %arg6[%c0_30, %c0_31, %c0_32] : memref<9x64x64xbf16, #tpu.memory_space<vmem>>, vector<1x64x64xbf16>
    %49 = vector.shape_cast %48 : vector<1x64x64xbf16> to vector<64x64xbf16>
    %cst_33 = arith.constant dense<0.000000e+00> : vector<128x64xf32>
    %50 = tpu.matmul %47, %49, %cst_33 {dimension_numbers = #tpu.dot_dimension_numbers<[1], [0], [0], [1], [0, 0, 1, 1], [], []>} : vector<128x64xbf16>, vector<64x64xbf16>, vector<128x64xf32> -> vector<128x64xf32>
    %51 = vector.extract_strided_slice %45 {offsets = [1, 0], sizes = [128, 64], strides = [1, 1]} : vector<168x64xf32> to vector<128x64xf32>
    %52 = arith.truncf %51 : vector<128x64xf32> to vector<128x64xbf16>
    %c1_34 = arith.constant 1 : index
    %c0_35 = arith.constant 0 : index
    %c0_36 = arith.constant 0 : index
    %53 = vector.load %arg6[%c1_34, %c0_35, %c0_36] : memref<9x64x64xbf16, #tpu.memory_space<vmem>>, vector<1x64x64xbf16>
    %54 = vector.shape_cast %53 : vector<1x64x64xbf16> to vector<64x64xbf16>
    %cst_37 = arith.constant dense<0.000000e+00> : vector<128x64xf32>
    %55 = tpu.matmul %52, %54, %cst_37 {dimension_numbers = #tpu.dot_dimension_numbers<[1], [0], [0], [1], [0, 0, 1, 1], [], []>} : vector<128x64xbf16>, vector<64x64xbf16>, vector<128x64xf32> -> vector<128x64xf32>
    %56 = arith.addf %50, %55 : vector<128x64xf32>
    %57 = vector.extract_strided_slice %45 {offsets = [2, 0], sizes = [128, 64], strides = [1, 1]} : vector<168x64xf32> to vector<128x64xf32>
    %58 = arith.truncf %57 : vector<128x64xf32> to vector<128x64xbf16>
    %c2_38 = arith.constant 2 : index
    %c0_39 = arith.constant 0 : index
    %c0_40 = arith.constant 0 : index
    %59 = vector.load %arg6[%c2_38, %c0_39, %c0_40] : memref<9x64x64xbf16, #tpu.memory_space<vmem>>, vector<1x64x64xbf16>
    %60 = vector.shape_cast %59 : vector<1x64x64xbf16> to vector<64x64xbf16>
    %cst_41 = arith.constant dense<0.000000e+00> : vector<128x64xf32>
    %61 = tpu.matmul %58, %60, %cst_41 {dimension_numbers = #tpu.dot_dimension_numbers<[1], [0], [0], [1], [0, 0, 1, 1], [], []>} : vector<128x64xbf16>, vector<64x64xbf16>, vector<128x64xf32> -> vector<128x64xf32>
    %62 = arith.addf %56, %61 : vector<128x64xf32>
    %63 = vector.extract_strided_slice %45 {offsets = [16, 0], sizes = [128, 64], strides = [1, 1]} : vector<168x64xf32> to vector<128x64xf32>
    %64 = arith.truncf %63 : vector<128x64xf32> to vector<128x64xbf16>
    %c3_42 = arith.constant 3 : index
    %c0_43 = arith.constant 0 : index
    %c0_44 = arith.constant 0 : index
    %65 = vector.load %arg6[%c3_42, %c0_43, %c0_44] : memref<9x64x64xbf16, #tpu.memory_space<vmem>>, vector<1x64x64xbf16>
    %66 = vector.shape_cast %65 : vector<1x64x64xbf16> to vector<64x64xbf16>
    %cst_45 = arith.constant dense<0.000000e+00> : vector<128x64xf32>
    %67 = tpu.matmul %64, %66, %cst_45 {dimension_numbers = #tpu.dot_dimension_numbers<[1], [0], [0], [1], [0, 0, 1, 1], [], []>} : vector<128x64xbf16>, vector<64x64xbf16>, vector<128x64xf32> -> vector<128x64xf32>
    %68 = arith.addf %62, %67 : vector<128x64xf32>
    %69 = vector.extract_strided_slice %45 {offsets = [17, 0], sizes = [128, 64], strides = [1, 1]} : vector<168x64xf32> to vector<128x64xf32>
    %70 = arith.truncf %69 : vector<128x64xf32> to vector<128x64xbf16>
    %c4_46 = arith.constant 4 : index
    %c0_47 = arith.constant 0 : index
    %c0_48 = arith.constant 0 : index
    %71 = vector.load %arg6[%c4_46, %c0_47, %c0_48] : memref<9x64x64xbf16, #tpu.memory_space<vmem>>, vector<1x64x64xbf16>
    %72 = vector.shape_cast %71 : vector<1x64x64xbf16> to vector<64x64xbf16>
    %cst_49 = arith.constant dense<0.000000e+00> : vector<128x64xf32>
    %73 = tpu.matmul %70, %72, %cst_49 {dimension_numbers = #tpu.dot_dimension_numbers<[1], [0], [0], [1], [0, 0, 1, 1], [], []>} : vector<128x64xbf16>, vector<64x64xbf16>, vector<128x64xf32> -> vector<128x64xf32>
    %74 = arith.addf %68, %73 : vector<128x64xf32>
    %75 = vector.extract_strided_slice %45 {offsets = [18, 0], sizes = [128, 64], strides = [1, 1]} : vector<168x64xf32> to vector<128x64xf32>
    %76 = arith.truncf %75 : vector<128x64xf32> to vector<128x64xbf16>
    %c5 = arith.constant 5 : index
    %c0_50 = arith.constant 0 : index
    %c0_51 = arith.constant 0 : index
    %77 = vector.load %arg6[%c5, %c0_50, %c0_51] : memref<9x64x64xbf16, #tpu.memory_space<vmem>>, vector<1x64x64xbf16>
    %78 = vector.shape_cast %77 : vector<1x64x64xbf16> to vector<64x64xbf16>
    %cst_52 = arith.constant dense<0.000000e+00> : vector<128x64xf32>
    %79 = tpu.matmul %76, %78, %cst_52 {dimension_numbers = #tpu.dot_dimension_numbers<[1], [0], [0], [1], [0, 0, 1, 1], [], []>} : vector<128x64xbf16>, vector<64x64xbf16>, vector<128x64xf32> -> vector<128x64xf32>
    %80 = arith.addf %74, %79 : vector<128x64xf32>
    %81 = vector.extract_strided_slice %45 {offsets = [32, 0], sizes = [128, 64], strides = [1, 1]} : vector<168x64xf32> to vector<128x64xf32>
    %82 = arith.truncf %81 : vector<128x64xf32> to vector<128x64xbf16>
    %c6 = arith.constant 6 : index
    %c0_53 = arith.constant 0 : index
    %c0_54 = arith.constant 0 : index
    %83 = vector.load %arg6[%c6, %c0_53, %c0_54] : memref<9x64x64xbf16, #tpu.memory_space<vmem>>, vector<1x64x64xbf16>
    %84 = vector.shape_cast %83 : vector<1x64x64xbf16> to vector<64x64xbf16>
    %cst_55 = arith.constant dense<0.000000e+00> : vector<128x64xf32>
    %85 = tpu.matmul %82, %84, %cst_55 {dimension_numbers = #tpu.dot_dimension_numbers<[1], [0], [0], [1], [0, 0, 1, 1], [], []>} : vector<128x64xbf16>, vector<64x64xbf16>, vector<128x64xf32> -> vector<128x64xf32>
    %86 = arith.addf %80, %85 : vector<128x64xf32>
    %87 = vector.extract_strided_slice %45 {offsets = [33, 0], sizes = [128, 64], strides = [1, 1]} : vector<168x64xf32> to vector<128x64xf32>
    %88 = arith.truncf %87 : vector<128x64xf32> to vector<128x64xbf16>
    %c7 = arith.constant 7 : index
    %c0_56 = arith.constant 0 : index
    %c0_57 = arith.constant 0 : index
    %89 = vector.load %arg6[%c7, %c0_56, %c0_57] : memref<9x64x64xbf16, #tpu.memory_space<vmem>>, vector<1x64x64xbf16>
    %90 = vector.shape_cast %89 : vector<1x64x64xbf16> to vector<64x64xbf16>
    %cst_58 = arith.constant dense<0.000000e+00> : vector<128x64xf32>
    %91 = tpu.matmul %88, %90, %cst_58 {dimension_numbers = #tpu.dot_dimension_numbers<[1], [0], [0], [1], [0, 0, 1, 1], [], []>} : vector<128x64xbf16>, vector<64x64xbf16>, vector<128x64xf32> -> vector<128x64xf32>
    %92 = arith.addf %86, %91 : vector<128x64xf32>
    %93 = vector.extract_strided_slice %45 {offsets = [34, 0], sizes = [128, 64], strides = [1, 1]} : vector<168x64xf32> to vector<128x64xf32>
    %94 = arith.truncf %93 : vector<128x64xf32> to vector<128x64xbf16>
    %c8 = arith.constant 8 : index
    %c0_59 = arith.constant 0 : index
    %c0_60 = arith.constant 0 : index
    %95 = vector.load %arg6[%c8, %c0_59, %c0_60] : memref<9x64x64xbf16, #tpu.memory_space<vmem>>, vector<1x64x64xbf16>
    %96 = vector.shape_cast %95 : vector<1x64x64xbf16> to vector<64x64xbf16>
    %cst_61 = arith.constant dense<0.000000e+00> : vector<128x64xf32>
    %97 = tpu.matmul %94, %96, %cst_61 {dimension_numbers = #tpu.dot_dimension_numbers<[1], [0], [0], [1], [0, 0, 1, 1], [], []>} : vector<128x64xbf16>, vector<64x64xbf16>, vector<128x64xf32> -> vector<128x64xf32>
    %98 = arith.addf %92, %97 : vector<128x64xf32>
    %99 = vector.broadcast %41 : vector<1x64xf32> to vector<128x64xf32>
    %100 = arith.addf %98, %99 : vector<128x64xf32>
    %cst_62 = arith.constant 0.000000e+00 : f32
    %101 = vector.broadcast %cst_62 : f32 to vector<128x64xf32>
    %102 = arith.cmpf ogt, %100, %101 : vector<128x64xf32>
    %103 = vector.broadcast %12 : f32 to vector<128x64xf32>
    %104 = arith.mulf %103, %100 : vector<128x64xf32>
    %105 = arith.select %102, %100, %104 : vector<128x64xi1>, vector<128x64xf32>
    %106 = arith.index_cast %43 : i32 to index
    %c0_63 = arith.constant 0 : index
    %107 = vector.load %arg20[%106, %c0_63] : memref<136x64xf32, #tpu.memory_space<vmem>>, vector<128x64xf32>
    tpu.vector_store %arg20[%106, %c0_63], %105 {strides = array<i32>} : memref<136x64xf32, #tpu.memory_space<vmem>>, vector<128x64xf32>,
    %c1_i32_64 = arith.constant 1 : i32
    %108 = tpu.iota {dimensions = array<i32: 0>} : vector<8x16xi32>
    %109 = tpu.iota {dimensions = array<i32: 1>} : vector<8x16xi32>
    %c2_i32_65 = arith.constant 2 : i32
    %110 = vector.broadcast %c2_i32_65 : i32 to vector<8x16xi32>
    %111 = arith.muli %108, %110 : vector<8x16xi32>
    %112 = arith.cmpi eq, %109, %111 : vector<8x16xi32>
    %c4_i32 = arith.constant 4 : i32
    %113 = vector.broadcast %c4_i32 : i32 to vector<8x16xi32>
    %114 = arith.cmpi slt, %108, %113 : vector<8x16xi32>
    %115 = arith.andi %112, %114 : vector<8x16xi1>
    %116 = arith.extui %115 : vector<8x16xi1> to vector<8x16xi32>
    %117 = arith.sitofp %116 : vector<8x16xi32> to vector<8x16xf32>
    %c0_i32_66 = arith.constant 0 : i32
    %c4_i32_67 = arith.constant 4 : i32
    %118 = arith.addi %c0_i32_66, %c4_i32_67 : i32
    %c1_i32_68 = arith.constant 1 : i32
    scf.for %arg23 = %c0_i32_66 to %118 step %c1_i32_68  : i32 {
      %c32_i32 = arith.constant 32 : i32
      %238 = arith.muli %arg23, %c32_i32 : i32
      %239 = tpu.assume_multiple %238, 8 : i32
      %240 = arith.index_cast %239 : i32 to index
      %c0_147 = arith.constant 0 : index
      %241 = vector.load %arg20[%240, %c0_147] : memref<136x64xf32, #tpu.memory_space<vmem>>, vector<40x64xf32>
      %242 = vector.extract_strided_slice %241 {offsets = [0, 0], sizes = [16, 64], strides = [1, 1]} : vector<40x64xf32> to vector<16x64xf32>
      %243 = vector.extract_strided_slice %241 {offsets = [1, 0], sizes = [16, 64], strides = [1, 1]} : vector<40x64xf32> to vector<16x64xf32>
      %244 = arith.maximumf %242, %243 : vector<16x64xf32>
      %245 = vector.extract_strided_slice %241 {offsets = [16, 0], sizes = [16, 64], strides = [1, 1]} : vector<40x64xf32> to vector<16x64xf32>
      %246 = arith.maximumf %244, %245 : vector<16x64xf32>
      %247 = vector.extract_strided_slice %241 {offsets = [17, 0], sizes = [16, 64], strides = [1, 1]} : vector<40x64xf32> to vector<16x64xf32>
      %248 = arith.maximumf %246, %247 : vector<16x64xf32>
      %c8_i32 = arith.constant 8 : i32
      %249 = arith.muli %arg23, %c8_i32 : i32
      %250 = tpu.assume_multiple %249, 8 : i32
      %cst_148 = arith.constant dense<0.000000e+00> : vector<8x64xf32>
      %251 = tpu.matmul %117, %248, %cst_148 {dimension_numbers = #tpu.dot_dimension_numbers<[1], [0], [0], [1], [0, 0, 1, 1], [], []>} : vector<8x16xf32>, vector<16x64xf32>, vector<8x64xf32> -> vector<8x64xf32>
      %252 = arith.index_cast %250 : i32 to index
      %c0_149 = arith.constant 0 : index
      %253 = vector.load %arg21[%252, %c0_149] : memref<40x64xf32, #tpu.memory_space<vmem>>, vector<8x64xf32>
      tpu.vector_store %arg21[%252, %c0_149], %251 {strides = array<i32>} : memref<40x64xf32, #tpu.memory_space<vmem>>, vector<8x64xf32>,
    }
    %c4_i32_69 = arith.constant 4 : i32
    %c0_70 = arith.constant 0 : index
    %c0_71 = arith.constant 0 : index
    %119 = vector.load %arg9[%c0_70, %c0_71] : memref<1x128xf32, #tpu.memory_space<vmem>>, vector<1x128xf32>
    %c0_i32_72 = arith.constant 0 : i32
    %c24_i32 = arith.constant 24 : i32
    %120 = arith.muli %c0_i32_72, %c24_i32 : i32
    %121 = tpu.assume_multiple %120, 8 : i32
    %122 = arith.index_cast %121 : i32 to index
    %c0_73 = arith.constant 0 : index
    %123 = vector.load %arg21[%122, %c0_73] : memref<40x64xf32, #tpu.memory_space<vmem>>, vector<40x64xf32>
    %124 = vector.extract_strided_slice %123 {offsets = [0, 0], sizes = [24, 64], strides = [1, 1]} : vector<40x64xf32> to vector<24x64xf32>
    %125 = arith.truncf %124 : vector<24x64xf32> to vector<24x64xbf16>
    %c0_74 = arith.constant 0 : index
    %c0_75 = arith.constant 0 : index
    %c0_76 = arith.constant 0 : index
    %126 = vector.load %arg8[%c0_74, %c0_75, %c0_76] : memref<4x64x128xbf16, #tpu.memory_space<vmem>>, vector<1x64x128xbf16>
    %127 = vector.shape_cast %126 : vector<1x64x128xbf16> to vector<64x128xbf16>
    %cst_77 = arith.constant dense<0.000000e+00> : vector<24x128xf32>
    %128 = tpu.matmul %125, %127, %cst_77 {dimension_numbers = #tpu.dot_dimension_numbers<[1], [0], [0], [1], [0, 0, 1, 1], [], []>} : vector<24x64xbf16>, vector<64x128xbf16>, vector<24x128xf32> -> vector<24x128xf32>
    %129 = vector.extract_strided_slice %123 {offsets = [1, 0], sizes = [24, 64], strides = [1, 1]} : vector<40x64xf32> to vector<24x64xf32>
    %130 = arith.truncf %129 : vector<24x64xf32> to vector<24x64xbf16>
    %c1_78 = arith.constant 1 : index
    %c0_79 = arith.constant 0 : index
    %c0_80 = arith.constant 0 : index
    %131 = vector.load %arg8[%c1_78, %c0_79, %c0_80] : memref<4x64x128xbf16, #tpu.memory_space<vmem>>, vector<1x64x128xbf16>
    %132 = vector.shape_cast %131 : vector<1x64x128xbf16> to vector<64x128xbf16>
    %cst_81 = arith.constant dense<0.000000e+00> : vector<24x128xf32>
    %133 = tpu.matmul %130, %132, %cst_81 {dimension_numbers = #tpu.dot_dimension_numbers<[1], [0], [0], [1], [0, 0, 1, 1], [], []>} : vector<24x64xbf16>, vector<64x128xbf16>, vector<24x128xf32> -> vector<24x128xf32>
    %134 = arith.addf %128, %133 : vector<24x128xf32>
    %135 = vector.extract_strided_slice %123 {offsets = [8, 0], sizes = [24, 64], strides = [1, 1]} : vector<40x64xf32> to vector<24x64xf32>
    %136 = arith.truncf %135 : vector<24x64xf32> to vector<24x64xbf16>
    %c2_82 = arith.constant 2 : index
    %c0_83 = arith.constant 0 : index
    %c0_84 = arith.constant 0 : index
    %137 = vector.load %arg8[%c2_82, %c0_83, %c0_84] : memref<4x64x128xbf16, #tpu.memory_space<vmem>>, vector<1x64x128xbf16>
    %138 = vector.shape_cast %137 : vector<1x64x128xbf16> to vector<64x128xbf16>
    %cst_85 = arith.constant dense<0.000000e+00> : vector<24x128xf32>
    %139 = tpu.matmul %136, %138, %cst_85 {dimension_numbers = #tpu.dot_dimension_numbers<[1], [0], [0], [1], [0, 0, 1, 1], [], []>} : vector<24x64xbf16>, vector<64x128xbf16>, vector<24x128xf32> -> vector<24x128xf32>
    %140 = arith.addf %134, %139 : vector<24x128xf32>
    %141 = vector.extract_strided_slice %123 {offsets = [9, 0], sizes = [24, 64], strides = [1, 1]} : vector<40x64xf32> to vector<24x64xf32>
    %142 = arith.truncf %141 : vector<24x64xf32> to vector<24x64xbf16>
    %c3_86 = arith.constant 3 : index
    %c0_87 = arith.constant 0 : index
    %c0_88 = arith.constant 0 : index
    %143 = vector.load %arg8[%c3_86, %c0_87, %c0_88] : memref<4x64x128xbf16, #tpu.memory_space<vmem>>, vector<1x64x128xbf16>
    %144 = vector.shape_cast %143 : vector<1x64x128xbf16> to vector<64x128xbf16>
    %cst_89 = arith.constant dense<0.000000e+00> : vector<24x128xf32>
    %145 = tpu.matmul %142, %144, %cst_89 {dimension_numbers = #tpu.dot_dimension_numbers<[1], [0], [0], [1], [0, 0, 1, 1], [], []>} : vector<24x64xbf16>, vector<64x128xbf16>, vector<24x128xf32> -> vector<24x128xf32>
    %146 = arith.addf %140, %145 : vector<24x128xf32>
    %147 = vector.broadcast %119 : vector<1x128xf32> to vector<24x128xf32>
    %148 = arith.addf %146, %147 : vector<24x128xf32>
    %cst_90 = arith.constant 0.000000e+00 : f32
    %149 = vector.broadcast %cst_90 : f32 to vector<24x128xf32>
    %150 = arith.cmpf ogt, %148, %149 : vector<24x128xf32>
    %151 = vector.broadcast %13 : f32 to vector<24x128xf32>
    %152 = arith.mulf %151, %148 : vector<24x128xf32>
    %153 = arith.select %150, %148, %152 : vector<24x128xi1>, vector<24x128xf32>
    %154 = arith.index_cast %121 : i32 to index
    %c0_91 = arith.constant 0 : index
    %155 = vector.load %arg22[%154, %c0_91] : memref<24x128xf32, #tpu.memory_space<vmem>>, vector<24x128xf32>
    tpu.vector_store %arg22[%154, %c0_91], %153 {strides = array<i32>} : memref<24x128xf32, #tpu.memory_space<vmem>>, vector<24x128xf32>,
    %c1_i32_92 = arith.constant 1 : i32
    %c0_93 = arith.constant 0 : index
    %c0_94 = arith.constant 0 : index
    %156 = vector.load %arg22[%c0_93, %c0_94] : memref<24x128xf32, #tpu.memory_space<vmem>>, vector<24x128xf32>
    %c0_95 = arith.constant 0 : index
    %c0_96 = arith.constant 0 : index
    %157 = vector.load %arg11[%c0_95, %c0_96] : memref<1x256xf32, #tpu.memory_space<vmem>>, vector<1x256xf32>
    %158 = vector.extract_strided_slice %156 {offsets = [0, 0], sizes = [1, 128], strides = [1, 1]} : vector<24x128xf32> to vector<1x128xf32>
    %159 = arith.truncf %158 : vector<1x128xf32> to vector<1x128xbf16>
    %c0_97 = arith.constant 0 : index
    %c0_98 = arith.constant 0 : index
    %c0_99 = arith.constant 0 : index
    %160 = vector.load %arg10[%c0_97, %c0_98, %c0_99] : memref<9x128x256xbf16, #tpu.memory_space<vmem>>, vector<1x128x256xbf16>
    %161 = vector.shape_cast %160 : vector<1x128x256xbf16> to vector<128x256xbf16>
    %cst_100 = arith.constant dense<0.000000e+00> : vector<1x256xf32>
    %162 = tpu.matmul %159, %161, %cst_100 {dimension_numbers = #tpu.dot_dimension_numbers<[1], [0], [0], [1], [0, 0, 1, 1], [], []>} : vector<1x128xbf16>, vector<128x256xbf16>, vector<1x256xf32> -> vector<1x256xf32>
    %163 = arith.addf %157, %162 : vector<1x256xf32>
    %164 = vector.extract_strided_slice %156 {offsets = [1, 0], sizes = [1, 128], strides = [1, 1]} : vector<24x128xf32> to vector<1x128xf32>
    %165 = arith.truncf %164 : vector<1x128xf32> to vector<1x128xbf16>
    %c1_101 = arith.constant 1 : index
    %c0_102 = arith.constant 0 : index
    %c0_103 = arith.constant 0 : index
    %166 = vector.load %arg10[%c1_101, %c0_102, %c0_103] : memref<9x128x256xbf16, #tpu.memory_space<vmem>>, vector<1x128x256xbf16>
    %167 = vector.shape_cast %166 : vector<1x128x256xbf16> to vector<128x256xbf16>
    %cst_104 = arith.constant dense<0.000000e+00> : vector<1x256xf32>
    %168 = tpu.matmul %165, %167, %cst_104 {dimension_numbers = #tpu.dot_dimension_numbers<[1], [0], [0], [1], [0, 0, 1, 1], [], []>} : vector<1x128xbf16>, vector<128x256xbf16>, vector<1x256xf32> -> vector<1x256xf32>
    %169 = arith.addf %163, %168 : vector<1x256xf32>
    %170 = vector.extract_strided_slice %156 {offsets = [2, 0], sizes = [1, 128], strides = [1, 1]} : vector<24x128xf32> to vector<1x128xf32>
    %171 = arith.truncf %170 : vector<1x128xf32> to vector<1x128xbf16>
    %c2_105 = arith.constant 2 : index
    %c0_106 = arith.constant 0 : index
    %c0_107 = arith.constant 0 : index
    %172 = vector.load %arg10[%c2_105, %c0_106, %c0_107] : memref<9x128x256xbf16, #tpu.memory_space<vmem>>, vector<1x128x256xbf16>
    %173 = vector.shape_cast %172 : vector<1x128x256xbf16> to vector<128x256xbf16>
    %cst_108 = arith.constant dense<0.000000e+00> : vector<1x256xf32>
    %174 = tpu.matmul %171, %173, %cst_108 {dimension_numbers = #tpu.dot_dimension_numbers<[1], [0], [0], [1], [0, 0, 1, 1], [], []>} : vector<1x128xbf16>, vector<128x256xbf16>, vector<1x256xf32> -> vector<1x256xf32>
    %175 = arith.addf %169, %174 : vector<1x256xf32>
    %176 = vector.extract_strided_slice %156 {offsets = [8, 0], sizes = [1, 128], strides = [1, 1]} : vector<24x128xf32> to vector<1x128xf32>
    %177 = arith.truncf %176 : vector<1x128xf32> to vector<1x128xbf16>
    %c3_109 = arith.constant 3 : index
    %c0_110 = arith.constant 0 : index
    %c0_111 = arith.constant 0 : index
    %178 = vector.load %arg10[%c3_109, %c0_110, %c0_111] : memref<9x128x256xbf16, #tpu.memory_space<vmem>>, vector<1x128x256xbf16>
    %179 = vector.shape_cast %178 : vector<1x128x256xbf16> to vector<128x256xbf16>
    %cst_112 = arith.constant dense<0.000000e+00> : vector<1x256xf32>
    %180 = tpu.matmul %177, %179, %cst_112 {dimension_numbers = #tpu.dot_dimension_numbers<[1], [0], [0], [1], [0, 0, 1, 1], [], []>} : vector<1x128xbf16>, vector<128x256xbf16>, vector<1x256xf32> -> vector<1x256xf32>
    %181 = arith.addf %175, %180 : vector<1x256xf32>
    %182 = vector.extract_strided_slice %156 {offsets = [9, 0], sizes = [1, 128], strides = [1, 1]} : vector<24x128xf32> to vector<1x128xf32>
    %183 = arith.truncf %182 : vector<1x128xf32> to vector<1x128xbf16>
    %c4_113 = arith.constant 4 : index
    %c0_114 = arith.constant 0 : index
    %c0_115 = arith.constant 0 : index
    %184 = vector.load %arg10[%c4_113, %c0_114, %c0_115] : memref<9x128x256xbf16, #tpu.memory_space<vmem>>, vector<1x128x256xbf16>
    %185 = vector.shape_cast %184 : vector<1x128x256xbf16> to vector<128x256xbf16>
    %cst_116 = arith.constant dense<0.000000e+00> : vector<1x256xf32>
    %186 = tpu.matmul %183, %185, %cst_116 {dimension_numbers = #tpu.dot_dimension_numbers<[1], [0], [0], [1], [0, 0, 1, 1], [], []>} : vector<1x128xbf16>, vector<128x256xbf16>, vector<1x256xf32> -> vector<1x256xf32>
    %187 = arith.addf %181, %186 : vector<1x256xf32>
    %188 = vector.extract_strided_slice %156 {offsets = [10, 0], sizes = [1, 128], strides = [1, 1]} : vector<24x128xf32> to vector<1x128xf32>
    %189 = arith.truncf %188 : vector<1x128xf32> to vector<1x128xbf16>
    %c5_117 = arith.constant 5 : index
    %c0_118 = arith.constant 0 : index
    %c0_119 = arith.constant 0 : index
    %190 = vector.load %arg10[%c5_117, %c0_118, %c0_119] : memref<9x128x256xbf16, #tpu.memory_space<vmem>>, vector<1x128x256xbf16>
    %191 = vector.shape_cast %190 : vector<1x128x256xbf16> to vector<128x256xbf16>
    %cst_120 = arith.constant dense<0.000000e+00> : vector<1x256xf32>
    %192 = tpu.matmul %189, %191, %cst_120 {dimension_numbers = #tpu.dot_dimension_numbers<[1], [0], [0], [1], [0, 0, 1, 1], [], []>} : vector<1x128xbf16>, vector<128x256xbf16>, vector<1x256xf32> -> vector<1x256xf32>
    %193 = arith.addf %187, %192 : vector<1x256xf32>
    %194 = vector.extract_strided_slice %156 {offsets = [16, 0], sizes = [1, 128], strides = [1, 1]} : vector<24x128xf32> to vector<1x128xf32>
    %195 = arith.truncf %194 : vector<1x128xf32> to vector<1x128xbf16>
    %c6_121 = arith.constant 6 : index
    %c0_122 = arith.constant 0 : index
    %c0_123 = arith.constant 0 : index
    %196 = vector.load %arg10[%c6_121, %c0_122, %c0_123] : memref<9x128x256xbf16, #tpu.memory_space<vmem>>, vector<1x128x256xbf16>
    %197 = vector.shape_cast %196 : vector<1x128x256xbf16> to vector<128x256xbf16>
    %cst_124 = arith.constant dense<0.000000e+00> : vector<1x256xf32>
    %198 = tpu.matmul %195, %197, %cst_124 {dimension_numbers = #tpu.dot_dimension_numbers<[1], [0], [0], [1], [0, 0, 1, 1], [], []>} : vector<1x128xbf16>, vector<128x256xbf16>, vector<1x256xf32> -> vector<1x256xf32>
    %199 = arith.addf %193, %198 : vector<1x256xf32>
    %200 = vector.extract_strided_slice %156 {offsets = [17, 0], sizes = [1, 128], strides = [1, 1]} : vector<24x128xf32> to vector<1x128xf32>
    %201 = arith.truncf %200 : vector<1x128xf32> to vector<1x128xbf16>
    %c7_125 = arith.constant 7 : index
    %c0_126 = arith.constant 0 : index
    %c0_127 = arith.constant 0 : index
    %202 = vector.load %arg10[%c7_125, %c0_126, %c0_127] : memref<9x128x256xbf16, #tpu.memory_space<vmem>>, vector<1x128x256xbf16>
    %203 = vector.shape_cast %202 : vector<1x128x256xbf16> to vector<128x256xbf16>
    %cst_128 = arith.constant dense<0.000000e+00> : vector<1x256xf32>
    %204 = tpu.matmul %201, %203, %cst_128 {dimension_numbers = #tpu.dot_dimension_numbers<[1], [0], [0], [1], [0, 0, 1, 1], [], []>} : vector<1x128xbf16>, vector<128x256xbf16>, vector<1x256xf32> -> vector<1x256xf32>
    %205 = arith.addf %199, %204 : vector<1x256xf32>
    %206 = vector.extract_strided_slice %156 {offsets = [18, 0], sizes = [1, 128], strides = [1, 1]} : vector<24x128xf32> to vector<1x128xf32>
    %207 = arith.truncf %206 : vector<1x128xf32> to vector<1x128xbf16>
    %c8_129 = arith.constant 8 : index
    %c0_130 = arith.constant 0 : index
    %c0_131 = arith.constant 0 : index
    %208 = vector.load %arg10[%c8_129, %c0_130, %c0_131] : memref<9x128x256xbf16, #tpu.memory_space<vmem>>, vector<1x128x256xbf16>
    %209 = vector.shape_cast %208 : vector<1x128x256xbf16> to vector<128x256xbf16>
    %cst_132 = arith.constant dense<0.000000e+00> : vector<1x256xf32>
    %210 = tpu.matmul %207, %209, %cst_132 {dimension_numbers = #tpu.dot_dimension_numbers<[1], [0], [0], [1], [0, 0, 1, 1], [], []>} : vector<1x128xbf16>, vector<128x256xbf16>, vector<1x256xf32> -> vector<1x256xf32>
    %211 = arith.addf %205, %210 : vector<1x256xf32>
    %cst_133 = arith.constant 0.000000e+00 : f32
    %212 = vector.broadcast %cst_133 : f32 to vector<1x256xf32>
    %213 = arith.cmpf ogt, %211, %212 : vector<1x256xf32>
    %214 = vector.broadcast %14 : f32 to vector<1x256xf32>
    %215 = arith.mulf %214, %211 : vector<1x256xf32>
    %216 = arith.select %213, %211, %215 : vector<1x256xi1>, vector<1x256xf32>
    %217 = arith.truncf %216 : vector<1x256xf32> to vector<1x256xbf16>
    %c0_134 = arith.constant 0 : index
    %c0_135 = arith.constant 0 : index
    %218 = vector.load %arg12[%c0_134, %c0_135] : memref<256x8xbf16, #tpu.memory_space<vmem>>, vector<256x8xbf16>
    %cst_136 = arith.constant dense<0.000000e+00> : vector<1x8xf32>
    %219 = tpu.matmul %217, %218, %cst_136 {dimension_numbers = #tpu.dot_dimension_numbers<[1], [0], [0], [1], [0, 0, 1, 1], [], []>} : vector<1x256xbf16>, vector<256x8xbf16>, vector<1x8xf32> -> vector<1x8xf32>
    %c0_137 = arith.constant 0 : index
    %c0_138 = arith.constant 0 : index
    %220 = vector.load %arg13[%c0_137, %c0_138] : memref<1x8xf32, #tpu.memory_space<vmem>>, vector<1x8xf32>
    %221 = arith.addf %219, %220 : vector<1x8xf32>
    %222 = vector.extract_strided_slice %221 {offsets = [0, 0], sizes = [1, 2], strides = [1, 1]} : vector<1x8xf32> to vector<1x2xf32>
    %cst_139 = arith.constant dense<0xFF800000> : vector<1xf32>
    %223 = vector.multi_reduction <maximumf>, %222, %cst_139 [1] : vector<1x2xf32> to vector<1xf32>
    %224 = vector.shape_cast %223 : vector<1xf32> to vector<1x1xf32>
    %225 = vector.broadcast %224 : vector<1x1xf32> to vector<1x2xf32>
    %226 = arith.subf %222, %225 : vector<1x2xf32>
    %227 = math.exp %226 : vector<1x2xf32>
    %cst_140 = arith.constant dense<0.000000e+00> : vector<1xf32>
    %228 = vector.multi_reduction <add>, %227, %cst_140 [1] : vector<1x2xf32> to vector<1xf32>
    %229 = vector.shape_cast %228 : vector<1xf32> to vector<1x1xf32>
    %230 = vector.broadcast %229 : vector<1x1xf32> to vector<1x2xf32>
    %231 = arith.divf %227, %230 : vector<1x2xf32>
    %c0_141 = arith.constant 0 : index
    %c0_142 = arith.constant 0 : index
    %c0_143 = arith.constant 0 : index
    %232 = vector.load %arg15[%c0_141, %c0_142, %c0_143] : memref<1x1x8xf32, #tpu.memory_space<vmem>>, vector<1x1x8xf32>
    %233 = vector.shape_cast %232 : vector<1x1x8xf32> to vector<1x8xf32>
    %234 = vector.shape_cast %221 : vector<1x8xf32> to vector<1x1x8xf32>
    tpu.vector_store %arg15[%c0_141, %c0_142, %c0_143], %234 {strides = array<i32>} : memref<1x1x8xf32, #tpu.memory_space<vmem>>, vector<1x1x8xf32>,
    %c0_144 = arith.constant 0 : index
    %c0_145 = arith.constant 0 : index
    %c0_146 = arith.constant 0 : index
    %235 = vector.load %arg15[%c0_144, %c0_145, %c0_146] : memref<1x1x8xf32, #tpu.memory_space<vmem>>, vector<1x1x2xf32>
    %236 = vector.shape_cast %235 : vector<1x1x2xf32> to vector<1x2xf32>
    %237 = vector.shape_cast %231 : vector<1x2xf32> to vector<1x1x2xf32>
    tpu.vector_store %arg15[%c0_144, %c0_145, %c0_146], %237 {strides = array<i32>} : memref<1x1x8xf32, #tpu.memory_space<vmem>>, vector<1x1x2xf32>,
    return
  }
  func.func @transform_0(%arg0: i32) -> (i32, i32, i32) {
    %c0_i32 = arith.constant 0 : i32
    %c0_i32_0 = arith.constant 0 : i32
    %c0_i32_1 = arith.constant 0 : i32
    return %arg0, %c0_i32, %c0_i32_0 : i32, i32, i32
  }
  func.func @transform_1(%arg0: i32) -> (i32, i32, i32) {
    %c0_i32 = arith.constant 0 : i32
    %c0_i32_0 = arith.constant 0 : i32
    %c0_i32_1 = arith.constant 0 : i32
    %c0_i32_2 = arith.constant 0 : i32
    return %c0_i32, %c0_i32_0, %c0_i32_1 : i32, i32, i32
  }
  func.func @transform_2(%arg0: i32) -> (i32, i32) {
    %c0_i32 = arith.constant 0 : i32
    %c0_i32_0 = arith.constant 0 : i32
    %c0_i32_1 = arith.constant 0 : i32
    return %c0_i32, %c0_i32_0 : i32, i32
  }
  func.func @transform_3(%arg0: i32) -> (i32, i32, i32) {
    %c0_i32 = arith.constant 0 : i32
    %c0_i32_0 = arith.constant 0 : i32
    %c0_i32_1 = arith.constant 0 : i32
    %c0_i32_2 = arith.constant 0 : i32
    return %c0_i32, %c0_i32_0, %c0_i32_1 : i32, i32, i32
  }
  func.func @transform_4(%arg0: i32) -> (i32, i32) {
    %c0_i32 = arith.constant 0 : i32
    %c0_i32_0 = arith.constant 0 : i32
    %c0_i32_1 = arith.constant 0 : i32
    return %c0_i32, %c0_i32_0 : i32, i32
  }
  func.func @transform_5(%arg0: i32) -> (i32, i32, i32) {
    %c0_i32 = arith.constant 0 : i32
    %c0_i32_0 = arith.constant 0 : i32
    %c0_i32_1 = arith.constant 0 : i32
    %c0_i32_2 = arith.constant 0 : i32
    return %c0_i32, %c0_i32_0, %c0_i32_1 : i32, i32, i32
  }
  func.func @transform_6(%arg0: i32) -> (i32, i32) {
    %c0_i32 = arith.constant 0 : i32
    %c0_i32_0 = arith.constant 0 : i32
    %c0_i32_1 = arith.constant 0 : i32
    return %c0_i32, %c0_i32_0 : i32, i32
  }
  func.func @transform_7(%arg0: i32) -> (i32, i32, i32) {
    %c0_i32 = arith.constant 0 : i32
    %c0_i32_0 = arith.constant 0 : i32
    %c0_i32_1 = arith.constant 0 : i32
    %c0_i32_2 = arith.constant 0 : i32
    return %c0_i32, %c0_i32_0, %c0_i32_1 : i32, i32, i32
  }
  func.func @transform_8(%arg0: i32) -> (i32, i32) {
    %c0_i32 = arith.constant 0 : i32
    %c0_i32_0 = arith.constant 0 : i32
    %c0_i32_1 = arith.constant 0 : i32
    return %c0_i32, %c0_i32_0 : i32, i32
  }
  func.func @transform_9(%arg0: i32) -> (i32, i32, i32) {
    %c0_i32 = arith.constant 0 : i32
    %c0_i32_0 = arith.constant 0 : i32
    %c0_i32_1 = arith.constant 0 : i32
    %c0_i32_2 = arith.constant 0 : i32
    return %c0_i32, %c0_i32_0, %c0_i32_1 : i32, i32, i32
  }
  func.func @transform_10(%arg0: i32) -> (i32, i32) {
    %c0_i32 = arith.constant 0 : i32
    %c0_i32_0 = arith.constant 0 : i32
    %c0_i32_1 = arith.constant 0 : i32
    return %c0_i32, %c0_i32_0 : i32, i32
  }
  func.func @transform_11(%arg0: i32) -> (i32, i32) {
    %c0_i32 = arith.constant 0 : i32
    %c0_i32_0 = arith.constant 0 : i32
    %c0_i32_1 = arith.constant 0 : i32
    return %c0_i32, %c0_i32_0 : i32, i32
  }
  func.func @transform_12(%arg0: i32) -> (i32, i32) {
    %c0_i32 = arith.constant 0 : i32
    %c0_i32_0 = arith.constant 0 : i32
    %c0_i32_1 = arith.constant 0 : i32
    return %c0_i32, %c0_i32_0 : i32, i32
  }
  func.func @transform_13(%arg0: i32) -> i32 {
    %c0_i32 = arith.constant 0 : i32
    %c0_i32_0 = arith.constant 0 : i32
    return %c0_i32 : i32
  }
  func.func @transform_14(%arg0: i32) -> (i32, i32, i32) {
    %c0_i32 = arith.constant 0 : i32
    %c0_i32_0 = arith.constant 0 : i32
    %c0_i32_1 = arith.constant 0 : i32
    return %arg0, %c0_i32, %c0_i32_0 : i32, i32, i32
  }
}

</mosaic_0001>

<bundles_post_ra>
// kernel: onet_forward.1
= control target key start
LH: loop header
LB: loop body
LE: loop exit
PB: predicated region body
PF: predicated region fallthrough
CT: control target
= control target key end

     0   :  { %19 = vsyncpa [#allocation10], 0  ;;  %s13390_s29 = smov 0   ;;  %s17701_s0 = inlined_call_operand.vmem [shape: f32[2,2408,8], index: 0, kind: input, shape index: {}]   ;;  %s17702_s1 = inlined_call_operand.vmem [shape: bf16[9,8,32], index: 1, kind: input, shape index: {}]   ;;  %s17703_s2 = inlined_call_operand.vmem [shape: f32[1,32], index: 2, kind: input, shape index: {}]   ;;  %s17704_s3 = inlined_call_operand.vmem [shape: bf16[9,32,64], index: 3, kind: input, shape index: {}]   ;;  %s17705_s4 = inlined_call_operand.vmem [shape: f32[1,64], index: 4, kind: input, shape index: {}]   ;;  %s17706_s5 = inlined_call_operand.vmem [shape: bf16[9,64,64], index: 5, kind: input, shape index: {}]   ;;  %s17707_s6 = inlined_call_operand.vmem [shape: f32[1,64], index: 6, kind: input, shape index: {}]   ;;  %s17708_s7 = inlined_call_operand.vmem [shape: bf16[4,64,128], index: 7, kind: input, shape index: {}]   ;;  %s17709_s8 = inlined_call_operand.vmem [shape: f32[1,128], index: 8, kind: input, shape index: {}]   ;;  %s17710_s9 = inlined_call_operand.vmem [shape: bf16[9,128,256], index: 9, kind: input, shape index: {}]   ;;  %s17711_s10 = inlined_call_operand.vmem [shape: f32[1,256], index: 10, kind: input, shape index: {}]   ;;  %s17712_s11 = inlined_call_operand.vmem [shape: bf16[256,8], index: 11, kind: input, shape index: {}]   ;;  %s17713_s12 = inlined_call_operand.vmem [shape: f32[1,8], index: 12, kind: input, shape index: {}]   ;;  %s17714_s13 = inlined_call_operand.vmem [shape: f32[8], index: 13, kind: input, shape index: {}]   ;;  %s17715_s14 = inlined_call_operand.vmem [shape: f32[2,1,8], index: 14, kind: output, shape index: {}]  }
   0x1 LB: > { %s13396_s30 = sadd.s32 4294967295, %s13283_s29   ;;  %p10219_p0 = scmp.ge.s32.totalorder %s13283_s29, 1  ;;  %s13283_s29 = sphi %s13390_s29, %s25_s29  }
   0x2   : > { %p355_p1 = scmp.lt.s32.totalorder %s13283_s29, 3  ;;  %s404_s17 = sshll.u32 %s17714_s13, 4  ;;  %s405_s17 = int_to_ptr.vmem [resolvable:$true] %s404_s17 }
   0x3   : > { %p12872_p3 = scmp.eq.s32.totalorder %s13396_s30, 0  ;;  %s13238_s19 = scalar_lea.vmem %s405_s17, 16 }
   0x4   : > { %p13403_p2 = pnand %p10219_p0, %p355_p1  ;;  %p13239_p6 = scmp.ne.s32.totalorder %s405_s17, %s13238_s19 }
   0x5   : > { %p13246_p10 = scmp.lt.s32.totalorder %s405_s17, %s405_s17  ;;  %p13247_p11 = scmp.lt.s32.totalorder %s13238_s19, %s13238_s19 }
   0x6   : > { %p12868_p4 = pneg %p13403_p2 }
   0x7   : > { %p13248_p12 = por %p13247_p11, %p13246_p10 }
   0x8   : > { %p12869_p5 = pnand %p12872_p3, %p12868_p4 }
   0xa   : > { %p13240_p7 = pneg %p12869_p5 }
   0xc   : > { %p13241_p8 = pnand %p13240_p7, %p13239_p6 }
   0xe   : > { %p13242_p9 = pneg %p13241_p8 }
  0x10   : > { %p13249_p13 = pnand %p13248_p12, %p13242_p9 }
  0x12   : > { %13252 = shalt.err (!%p13249_p13)
}
  0x13   : > { %s13305_s20 = smov [#allocation9]   ;;  %425 = sbr.rel (%p13403_p2) target bundleno = 3410 (0xd52), region = 76 }
  0x14   : > { %12871 = dma.vmem_to_smem (!%p12869_p5), %s405_s17, 16, %s13305_s20, [#allocation10]  }
  0x18   : > { %13278 = dma.done.wait (%p12872_p3), [#allocation10], 16  }
  0x19   : > { %13280 = vsyncadd (%p12872_p3), [#allocation10], 4294967280 }
  0x1a   : > { %431 = sfence }
  0x1b   : > { %p470_p0 = scmp.lt.s32.totalorder %s13396_s30, 1  ;;  %vm479_vm0 = vcmask 261120   ;;  %vm481_vm1 = vcmask 523264   ;;  %s13419_s21 = sld [smem:[#allocation9]]  ;;  %v17716_v0 = vmov 0.0  }
  0x1c   : > { %480 = vst.msk [vmem:[#allocation3 + $0x228] sm:$0xff] %vm479_vm0, %v17716_v0  ;;  %s13431_s22 = sld [smem:[#allocation9 + $0x1]]  ;;  %v13436_v1 = vld [vmem:[%s17703_s2] ss:$0 sm:$0xff]  ;;  %s13455_s23 = smov 0  }
  0x1d   : > { %482 = vst.msk [vmem:[#allocation4 + $0x1f8] sm:$0xff] %vm481_vm1, %v17716_v0  ;;  %483 = vst.msk [vmem:[#allocation5 + $0xa0] sm:$0xff] %vm481_vm1, %v17716_v0  ;;  %s18052_s30 = smov (!%p470_p0, %s13396_s30), 1  ;;  %s13439_s25 = sld [smem:[#allocation9 + $0x2]] }
  0x1e   : > { %484 = vst.msk [vmem:[#allocation6 + $0x80] sm:$0xff] %vm481_vm1, %v17716_v0  ;;  %485 = vst.msk [vmem:[#allocation7 + $0x20] sm:$0xff] %vm481_vm1, %v17716_v0  ;;  %s12863_s26 = smul.u32 2408, %s18052_s30  ;;  %s13444_s15 = scalar_lea.vmem %s17715_s14, %s18052_s30 }
  0x1f   : > { %17791 = vst [vmem:[#allocation12_spill] sm:$0xff] %v13436_v1  ;;  %s13446_s16 = sld [smem:[#allocation9 + $0x3]] }
  0x20   : > { %s13451_s19 = scalar_lea.vmem %s17701_s0, %s12863_s26  ;;  %s13453_s20 = sld [smem:[#allocation9 + $0x4]] }
  0x21 LB: >> { %v10229_v2 = vld [vmem:[%s17702_s1 + $0x4] sm:$0xf]  ;;  %vm859_vm2 = vcmask 1043456   ;;  %v585_v4 = vld [vmem:[%s17702_s1] sm:$0xf]  ;;  %s498_s18 = smul.u32 384, %s13287_s23  ;;  %s13287_s23 = sphi %s13455_s23, %s497_s23  }
  0x22   : >> { %12854 = vmatprep.subr.msk.bf16.mxu1 %vm859_vm2, %v10229_v2  ;;  %12853 = vmatprep.subr.msk.bf16.mxu0 %vm859_vm2, %v10229_v2  ;;  %v861_v3 = vsel %vm859_vm2, %v10229_v2, 0  ;;  %v10278_v5 = vld [vmem:[%s17702_s1 + $0x8] sm:$0xf]  ;;  %vm589_vm3 = vsmask.f32 7424  ;;  %vm786_vm4 = vcmask 64512  }
  0x23   : >> { %12828 = vmatpush3.bf16.msra.mxu1 %v861_v3  ;;  %11645 = vmatpush3.bf16.msra.mxu0 %v861_v3  ;;  %s13478_s24 = scalar_lea.vmem %s13451_s19, %s498_s18  ;;  %v1137_v18 = vsel %vm859_vm2, %v585_v4, 0  ;;  %v1514_v25 = vsel %vm859_vm2, %v10278_v5, 0  ;;  %vm1391_vm5 = vcmask 1046528   ;;  %s497_s23 = sadd.s32 1, %s13287_s23  }
  0x24   : >> { %12855 = vmatprep.subr.msk.bf16.mxu1 %vm859_vm2, %v585_v4  ;;  %12856 = vmatprep.subr.msk.bf16.mxu0 %vm859_vm2, %v10278_v5  ;;  %v500_v6 = vld [vmem:[%s13478_s24] sm:$0xff]  ;;  %v501_v7 = vld [vmem:[%s13478_s24 + $0x8] sm:$0xff]  ;;  %v502_v8 = vld [vmem:[%s13478_s24 + $0x10] sm:$0xff]  ;;  %p494_p1 = scmp.ge.s32.totalorder %s497_s23, 6  }
  0x25   : >> { %v503_v9 = vld [vmem:[%s13478_s24 + $0x18] sm:$0xff]  ;;  %v13484_v10 = vpack.c.bf16 %v501_v7, %v500_v6  ;;  %v524_v11 = vld [vmem:[%s13478_s24 + $0xc0] sm:$0xff]  ;;  %v525_v12 = vld [vmem:[%s13478_s24 + $0xc8] sm:$0xff] }
  0x26   : >> { %v13488_v13 = vpack.c.bf16 %v503_v9, %v502_v8  ;;  %v526_v14 = vld [vmem:[%s13478_s24 + $0xd0] sm:$0xff]  ;;  %v527_v15 = vld [vmem:[%s13478_s24 + $0xd8] sm:$0xff]  ;;  %v13492_v16 = vpack.c.bf16 %v525_v12, %v524_v11  ;;  %v504_v17 = vld [vmem:[%s13478_s24 + $0x20] sm:$0xff] }
  0x27   : >> { %v591_v19 = vshrl.u32 %v13484_v10, 16  ;;  %v593_v20 = vshll.u32 %v13484_v10, 16  ;;  %v13498_v21 = vpack.c.bf16 %v527_v15, %v526_v14  ;;  %v505_v22 = vld [vmem:[%s13478_s24 + $0x28] sm:$0xff]  ;;  %v528_v23 = vld [vmem:[%s13478_s24 + $0xe0] sm:$0xff]  ;;  %v506_v30 = vld [vmem:[%s13478_s24 + $0x30] sm:$0xff] }
  0x28   : >> { %v529_v24 = vld [vmem:[%s13478_s24 + $0xe8] sm:$0xff]  ;;  %v598_v26 = vshll.u32 %v13488_v13, 16  ;;  %v602_v27 = vshrl.u32 %v13488_v13, 16  ;;  %v686_v28 = vshll.u32 %v13492_v16, 16  ;;  %v690_v29 = vshrl.u32 %v13492_v16, 16  ;;  %v507_v31 = vld [vmem:[%s13478_s24 + $0x38] sm:$0xff] }
  0x29   : >> { %v595_v32 = vrot.slane %v593_v20, 1  ;;  %v694_v33 = vshll.u32 %v13498_v21, 16  ;;  %v13511_v34 = vpack.c.bf16 %v505_v22, %v504_v17  ;;  %v13513_v35 = vpack.c.bf16 %v529_v24, %v528_v23  ;;  %v530_v44 = vld [vmem:[%s13478_s24 + $0xf0] sm:$0xff]  ;;  %v531_v45 = vld [vmem:[%s13478_s24 + $0xf8] sm:$0xff]  ;;  %v508_v50 = vld [vmem:[%s13478_s24 + $0x40] sm:$0xff] }
  0x2a   : >> { %v600_v36 = vrot.slane %v598_v26, 1  ;;  %v13515_v37 = vrot.slane %v686_v28, 1  ;;  %v698_v38 = vshrl.u32 %v13498_v21, 16  ;;  %v13518_v39 = vpack.c.bf16 %v507_v31, %v506_v30  ;;  %v509_v51 = vld [vmem:[%s13478_s24 + $0x48] sm:$0xff]  ;;  %v532_v56 = vld [vmem:[%s13478_s24 + $0x100] sm:$0xff]  ;;  %v510_v62 = vld [vmem:[%s13478_s24 + $0x50] sm:$0xff] }
  0x2b   : >> { %v596_v40 = vor.u32 %v595_v32, %v591_v19  ;;  %v696_v41 = vrot.slane %v694_v33, 1  ;;  %v606_v42 = vshll.u32 %v13511_v34, 16  ;;  %v702_v43 = vshll.u32 %v13513_v35, 16  ;;  %v533_v57 = vld [vmem:[%s13478_s24 + $0x108] sm:$0xff]  ;;  %v511_v63 = vld [vmem:[%s13478_s24 + $0x58] sm:$0xff]  ;;  %v534_v12 = vld [vmem:[%s13478_s24 + $0x110] sm:$0xff] }
  0x2c   : >> { %v604_v46 = vor.u32 %v602_v27, %v600_v36  ;;  %v692_v47 = vor.u32 %v690_v29, %v13515_v37  ;;  %v610_v48 = vshrl.u32 %v13511_v34, 16  ;;  %v614_v49 = vshll.u32 %v13518_v39, 16  ;;  %v13552_v6 = vld [vmem:[%s17702_s1 + $0xc] sm:$0xf]  ;;  %v535_v14 = vld [vmem:[%s13478_s24 + $0x118] sm:$0xff]  ;;  %v512_v23 = vld [vmem:[%s13478_s24 + $0x60] sm:$0xff] }
  0x2d   : >> { %v601_v52 = vsel %vm589_vm3, %v596_v40, %v600_v36  ;;  %v608_v53 = vrot.slane %v606_v42, 1  ;;  %v700_v54 = vor.u32 %v698_v38, %v696_v41  ;;  %v704_v55 = vrot.slane %v702_v43, 1  ;;  %v13566_v15 = vld [vmem:[%s17702_s1 + $0x10] sm:$0xf]  ;;  %v513_v24 = vld [vmem:[%s13478_s24 + $0x68] sm:$0xff]  ;;  %v536_v40 = vld [vmem:[%s13478_s24 + $0x120] sm:$0xff] }
  0x2e   : >> { %11646 = vmatprep.mubr.msk.bf16.mxu0 %vm786_vm4, %v601_v52  ;;  %v13534_v58 = vsel %vm589_vm3, %v692_v47, %v696_v41  ;;  %v616_v59 = vrot.slane %v614_v49, 1  ;;  %v13536_v60 = vpack.c.bf16 %v531_v45, %v530_v44  ;;  %v706_v61 = vshrl.u32 %v13513_v35, 16  ;;  %v537_v41 = vld [vmem:[%s13478_s24 + $0x128] sm:$0xff]  ;;  %v515_v47 = vld [vmem:[%s13478_s24 + $0x78] sm:$0xff]  ;;  %v538_v52 = vld [vmem:[%s13478_s24 + $0x130] sm:$0xff] }
  0x2f   : >> { %17792 = vst [vmem:[#allocation13_spill] sm:$0xff] %v13534_v58  ;;  %11670 = vmatprep.mubr.msk.bf16.mxu1 %vm786_vm4, %v13534_v58  ;;  %v609_v2 = vsel %vm589_vm3, %v604_v46, %v608_v53  ;;  %v13545_v3 = vsel %vm589_vm3, %v700_v54, %v704_v55  ;;  %v612_v4 = vor.u32 %v610_v48, %v608_v53  ;;  %v618_v9 = vshrl.u32 %v13518_v39, 16  ;;  %v514_v46 = vld [vmem:[%s13478_s24 + $0x70] sm:$0xff]  ;;  %v539_v53 = vld [vmem:[%s13478_s24 + $0x138] sm:$0xff] }
  0x30   : >> { %17793 = vst [vmem:[#allocation14_spill] sm:$0xff] %v13545_v3  ;;  %v13547_v5 = vpack.c.bf16 %v509_v51, %v508_v50  ;;  %11647 = vmatmul.mubr.msk.bf16.vlgmr.msra.gmra.mxu0 %vm786_vm4, %v609_v2  ;;  %11671 = vmatmul.mubr.msk.bf16.vlgmr.msra.gmra.mxu1 %vm786_vm4, %v13545_v3  ;;  %v708_v7 = vor.u32 %v706_v61, %v704_v55  ;;  %v710_v8 = vshll.u32 %v13536_v60, 16  ;;  %v714_v20 = vshrl.u32 %v13536_v60, 16  ;;  %v516_v2 = vld [vmem:[%s13478_s24 + $0x80] sm:$0xff] }
  0x31   : >> { %v13559_v11 = vpack.c.bf16 %v533_v57, %v532_v56  ;;  %11695 = vmatpush3.bf16.msra.mxu1 %v1137_v18  ;;  %11745 = vmatpush3.bf16.msra.mxu0 %v1514_v25  ;;  %v617_v17 = vsel %vm589_vm3, %v612_v4, %v616_v59  ;;  %v13571_v22 = vpack.c.bf16 %v511_v63, %v510_v62  ;;  %v517_v4 = vld [vmem:[%s13478_s24 + $0x88] sm:$0xff] }
  0x32   : >> { %v622_v19 = vshll.u32 %v13547_v5, 16  ;;  %11650 = vmatprep.mubr.msk.bf16.mxu0 %vm786_vm4, %v617_v17  ;;  %v712_v26 = vrot.slane %v710_v8, 1  ;;  %v620_v27 = vor.u32 %v618_v9, %v616_v59  ;;  %v626_v18 = vshrl.u32 %v13547_v5, 16  ;;  %12857 = vmatprep.subr.msk.bf16.mxu1 %vm859_vm2, %v13552_v6  ;;  %v541_v17 = vld [vmem:[%s13478_s24 + $0x148] sm:$0xff] }
  0x33   : >> { %v718_v28 = vshll.u32 %v13559_v11, 16  ;;  %v630_v29 = vshll.u32 %v13571_v22, 16  ;;  %v13581_v30 = vpack.c.bf16 %v535_v14, %v534_v12  ;;  %v722_v31 = vshrl.u32 %v13559_v11, 16  ;;  %12858 = vmatprep.subr.msk.bf16.mxu0 %vm859_vm2, %v13566_v15 }
  0x34   : >> { %v624_v25 = vrot.slane %v622_v19, 1  ;;  %v13587_v32 = vsel %vm589_vm3, %v708_v7, %v712_v26  ;;  %v716_v33 = vor.u32 %v714_v20, %v712_v26  ;;  %v13589_v38 = vpack.c.bf16 %v513_v24, %v512_v23  ;;  %v540_v7 = vld [vmem:[%s13478_s24 + $0x140] sm:$0xff]  ;;  %v518_v19 = vld [vmem:[%s13478_s24 + $0x90] sm:$0xff]  ;;  %v519_v20 = vld [vmem:[%s13478_s24 + $0x98] sm:$0xff] }
  0x35   : >> { %17794 = vst [vmem:[#allocation15_spill] sm:$0xff] %v13587_v32  ;;  %v720_v36 = vrot.slane %v718_v28, 1  ;;  %11674 = vmatprep.mubr.msk.bf16.mxu1 %vm786_vm4, %v13587_v32  ;;  %v632_v44 = vrot.slane %v630_v29, 1  ;;  %v726_v45 = vshll.u32 %v13581_v30, 16  ;;  %v634_v50 = vshrl.u32 %v13571_v22, 16 }
  0x36   : >> { %v13596_v42 = vsel %vm589_vm3, %v620_v27, %v624_v25  ;;  %v628_v43 = vor.u32 %v626_v18, %v624_v25  ;;  %v638_v51 = vshll.u32 %v13589_v38, 16  ;;  %v13611_v56 = vpack.c.bf16 %v537_v41, %v536_v40  ;;  %v542_v41 = vld [vmem:[%s13478_s24 + $0x150] sm:$0xff] }
  0x37   : >> { %v13602_v48 = vsel %vm589_vm3, %v716_v33, %v720_v36  ;;  %v724_v49 = vor.u32 %v722_v31, %v720_v36  ;;  %v728_v55 = vrot.slane %v726_v45, 1  ;;  %v730_v57 = vshrl.u32 %v13581_v30, 16 }
  0x38   : >> { %17795 = vst [vmem:[#allocation16_spill] sm:$0xff] %v13602_v48  ;;  %v13609_v54 = vsel %vm589_vm3, %v628_v43, %v632_v44  ;;  %11651 = vmatmul.mubr.msk.bf16.gmra.mxu0 %vm786_vm4, %v13596_v42  ;;  %11675 = vmatmul.mubr.msk.bf16.gmra.mxu1 %vm786_vm4, %v13602_v48  ;;  %v636_v59 = vor.u32 %v634_v50, %v632_v44  ;;  %v640_v61 = vrot.slane %v638_v51, 1  ;;  %v642_v63 = vshrl.u32 %v13589_v38, 16  ;;  %v521_v50 = vld [vmem:[%s13478_s24 + $0xa8] sm:$0xff] }
  0x39   : >> { %v13618_v62 = vpack.c.bf16 %v515_v47, %v514_v46  ;;  %11654 = vmatprep.mubr.msk.bf16.mxu0 %vm786_vm4, %v13609_v54  ;;  %v13627_v8 = vsel %vm589_vm3, %v724_v49, %v728_v55  ;;  %v732_v9 = vor.u32 %v730_v57, %v728_v55  ;;  %v734_v12 = vshll.u32 %v13611_v56, 16  ;;  %v543_v47 = vld [vmem:[%s13478_s24 + $0x158] sm:$0xff]  ;;  %v520_v49 = vld [vmem:[%s13478_s24 + $0xa0] sm:$0xff] }
  0x3a   : >> { %17796 = vst [vmem:[#allocation17_spill] sm:$0xff] %v13627_v8  ;;  %v13630_v14 = vpack.c.bf16 %v539_v53, %v538_v52  ;;  %11678 = vmatprep.mubr.msk.bf16.mxu1 %vm786_vm4, %v13627_v8  ;;  %v13638_v23 = vsel %vm589_vm3, %v636_v59, %v640_v61  ;;  %v644_v24 = vor.u32 %v642_v63, %v640_v61  ;;  %v738_v27 = vshrl.u32 %v13611_v56, 16 }
  0x3b   : >> { %v646_v26 = vshll.u32 %v13618_v62, 16  ;;  %v736_v28 = vrot.slane %v734_v12, 1  ;;  %v13643_v25 = vpack.c.bf16 %v517_v4, %v516_v2  ;;  %v650_v29 = vshrl.u32 %v13618_v62, 16  ;;  %v545_v12 = vld [vmem:[%s13478_s24 + $0x168] sm:$0xff] }
  0x3c   : >> { %v742_v18 = vshll.u32 %v13630_v14, 16  ;;  %v13646_v33 = vpack.c.bf16 %v541_v17, %v540_v7  ;;  %v746_v36 = vshrl.u32 %v13630_v14, 16  ;;  %v13649_v40 = vpack.c.bf16 %v519_v20, %v518_v19  ;;  %v522_v19 = vld [vmem:[%s13478_s24 + $0xb0] sm:$0xff]  ;;  %v523_v20 = vld [vmem:[%s13478_s24 + $0xb8] sm:$0xff] }
  0x3d   : >> { %v648_v31 = vrot.slane %v646_v26, 1  ;;  %v13653_v43 = vsel %vm589_vm3, %v732_v9, %v736_v28  ;;  %v740_v44 = vor.u32 %v738_v27, %v736_v28  ;;  %v654_v46 = vshll.u32 %v13643_v25, 16  ;;  %v544_v9 = vld [vmem:[%s13478_s24 + $0x160] sm:$0xff] }
  0x3e   : >> { %17797 = vst [vmem:[#allocation18_spill] sm:$0xff] %v13653_v43  ;;  %v744_v45 = vrot.slane %v742_v18, 1  ;;  %v750_v52 = vshll.u32 %v13646_v33, 16  ;;  %v658_v53 = vshrl.u32 %v13643_v25, 16  ;;  %v662_v61 = vshll.u32 %v13649_v40, 16  ;;  %v546_v18 = vld [vmem:[%s13478_s24 + $0x170] sm:$0xff] }
  0x3f   : >> { %v13660_v51 = vsel %vm589_vm3, %v644_v24, %v648_v31  ;;  %v652_v57 = vor.u32 %v650_v29, %v648_v31  ;;  %v656_v59 = vrot.slane %v654_v46, 1  ;;  %v13672_v2 = vpack.c.bf16 %v543_v47, %v542_v41  ;;  %v547_v29 = vld [vmem:[%s13478_s24 + $0x178] sm:$0xff] }
  0x40   : >> { %17798 = vst [vmem:[#allocation19_spill] sm:$0xff] %v13660_v51  ;;  %v13665_v55 = vsel %vm589_vm3, %v740_v44, %v744_v45  ;;  %11655 = vmatmul.mubr.msk.bf16.gmra.mxu0 %vm786_vm4, %v13638_v23  ;;  %11679 = vmatmul.mubr.msk.bf16.gmra.mxu1 %vm786_vm4, %v13653_v43  ;;  %v752_v63 = vrot.slane %v750_v52, 1  ;;  %v754_v4 = vshrl.u32 %v13646_v33, 16  ;;  %v13675_v7 = vpack.c.bf16 %v521_v50, %v520_v49 }
  0x41   : >> { %17799 = vst [vmem:[#allocation20_spill] sm:$0xff] %v13665_v55  ;;  %17800 = vst [vmem:[#allocation21_spill] sm:$0xff] %v13672_v2  ;;  %11658 = vmatprep.mubr.msk.bf16.mxu0 %vm786_vm4, %v13660_v51  ;;  %11682 = vmatprep.mubr.msk.bf16.mxu1 %vm786_vm4, %v13665_v55  ;;  %v748_v17 = vor.u32 %v746_v36, %v744_v45  ;;  %v660_v24 = vor.u32 %v658_v53, %v656_v59  ;;  %v664_v26 = vrot.slane %v662_v61, 1 }
  0x42   : >> { %v756_v27 = vor.u32 %v754_v4, %v752_v63  ;;  %v758_v28 = vshll.u32 %v13672_v2, 16  ;;  %v13689_v31 = vsel %vm589_vm3, %v652_v57, %v656_v59  ;;  %v13691_v41 = vpack.c.bf16 %v545_v12, %v544_v9  ;;  %v13713_v4 = vld [vmem:[%s13478_s24 + $0x180] sm:$0xff] }
  0x43   : >> { %17801 = vst [vmem:[#allocation22_spill] sm:$0xff] %v13689_v31  ;;  %v666_v46 = vshrl.u32 %v13649_v40, 16  ;;  %v670_v36 = vshll.u32 %v13675_v7, 16  ;;  %v13695_v45 = vpack.c.bf16 %v523_v20, %v522_v19  ;;  %v13698_v47 = vsel %vm589_vm3, %v748_v17, %v752_v63 }
  0x44   : >> { %17802 = vst [vmem:[#allocation23_spill] sm:$0xff] %v13691_v41  ;;  %v760_v44 = vrot.slane %v758_v28, 1  ;;  %17803 = vst [vmem:[#allocation24_spill] sm:$0xff] %v13698_v47  ;;  %v762_v49 = vshrl.u32 %v13672_v2, 16  ;;  %v766_v50 = vshll.u32 %v13691_v41, 16  ;;  %v13702_v52 = vpack.c.bf16 %v547_v29, %v546_v18 }
  0x45   : >> { %v13705_v53 = vsel %vm589_vm3, %v660_v24, %v664_v26  ;;  %v674_v59 = vshrl.u32 %v13675_v7, 16  ;;  %v770_v61 = vshrl.u32 %v13691_v41, 16  ;;  %v678_v63 = vshll.u32 %v13695_v45, 16 }
  0x46   : >> { %17804 = vst [vmem:[#allocation25_spill] sm:$0xff] %v13702_v52  ;;  %17805 = vst [vmem:[#allocation26_spill] sm:$0xff] %v13705_v53  ;;  %v13708_v57 = vsel %vm589_vm3, %v756_v27, %v760_v44  ;;  %v774_v9 = vshll.u32 %v13702_v52, 16  ;;  %v668_v12 = vor.u32 %v666_v46, %v664_v26  ;;  %v672_v17 = vrot.slane %v670_v36, 1 }
  0x47   : >> { %17806 = vst [vmem:[#allocation27_spill] sm:$0xff] %v13708_v57  ;;  %v768_v19 = vrot.slane %v766_v50, 1  ;;  %v764_v20 = vor.u32 %v762_v49, %v760_v44  ;;  %v13727_v24 = vpack.c.bf16 %v13713_v4, %v13713_v4  ;;  %v680_v28 = vrot.slane %v678_v63, 1 }
  0x48   : >> { %11659 = vmatmul.mubr.msk.bf16.gmra.mxu0 %vm786_vm4, %v13689_v31  ;;  %11683 = vmatmul.mubr.msk.bf16.gmra.mxu1 %vm786_vm4, %v13698_v47  ;;  %v676_v27 = vor.u32 %v674_v59, %v672_v17  ;;  %v776_v29 = vrot.slane %v774_v9, 1  ;;  %v13730_v0 = vsel %vm589_vm3, %v668_v12, %v672_v17  ;;  %v682_v46 = vshrl.u32 %v13695_v45, 16 }
  0x49   : >> { %11662 = vmatprep.mubr.msk.bf16.mxu0 %vm786_vm4, %v13705_v53  ;;  %11686 = vmatprep.mubr.msk.bf16.mxu1 %vm786_vm4, %v13708_v57  ;;  %v772_v18 = vor.u32 %v770_v61, %v768_v19  ;;  %17807 = vst [vmem:[#allocation28_spill] sm:$0xff] %v13730_v0  ;;  %v13733_v26 = vsel %vm589_vm3, %v764_v20, %v768_v19  ;;  %v778_v36 = vshrl.u32 %v13702_v52, 16  ;;  %v782_v44 = vshll.u32 %v13727_v24, 16 }
  0x4a   : >> { %17808 = vst [vmem:[#allocation29_spill] sm:$0xff] %v13733_v26  ;;  %v13739_v49 = vsel %vm589_vm3, %v676_v27, %v680_v28  ;;  %v684_v59 = vor.u32 %v682_v46, %v680_v28  ;;  %v1392_v9 = vrot.slane %v13484_v10, 1  ;;  %v1393_v12 = vrot.slane %v13488_v13, 1 }
  0x4b   : >> { %17809 = vst [vmem:[#allocation30_spill] sm:$0xff] %v13739_v49  ;;  %v13742_v50 = vsel %vm589_vm3, %v772_v18, %v776_v29  ;;  %v13752_v61 = vor.u32 %v778_v36, %v776_v29  ;;  %v784_v63 = vrot.slane %v782_v44, 1  ;;  %v1395_v27 = vrot.slane %v13511_v34, 1  ;;  %v13788_v36 = vld [vmem:[%s17702_s1 + $0x18] sm:$0xf] }
  0x4c   : >> { %17810 = vst [vmem:[#allocation31_spill] sm:$0xff] %v13742_v50  ;;  %v13758_v17 = vsel %vm589_vm3, %v684_v59, %v13515_v37  ;;  %v1394_v20 = vsel %vm1391_vm5, %v1392_v9, %v1393_v12  ;;  %v1397_v37 = vrot.slane %v13518_v39, 1  ;;  %v1804_v18 = vsel %vm859_vm2, %v13552_v6, 0 }
  0x4d   : >> { %17811 = vst [vmem:[#allocation32_spill] sm:$0xff] %v13758_v17  ;;  %v785_v19 = vsel %vm589_vm3, %v13752_v61, %v784_v63  ;;  %v1396_v28 = vsel %vm1391_vm5, %v1393_v12, %v1395_v27  ;;  %v2121_v29 = vsel %vm859_vm2, %v13566_v15, 0  ;;  %v1399_v6 = vrot.slane %v13547_v5, 1 }
  0x4e   : >> { %v1398_v46 = vsel %vm1391_vm5, %v1395_v27, %v1397_v37  ;;  %v1405_v59 = vrot.slane %v13618_v62, 1  ;;  %v1407_v12 = vrot.slane %v13643_v25, 1  ;;  %v1427_v1 = vrot.slane %v13611_v56, 1 }
  0x4f   : >> { %v13800_v15 = vsel %vm1391_vm5, %v1397_v37, %v1399_v6  ;;  %v1411_v37 = vrot.slane %v13675_v7, 1 }
  0x50   : >> { %11663 = vmatmul.mubr.msk.bf16.gmra.mxu0 %vm786_vm4, %v13730_v0  ;;  %11687 = vmatmul.mubr.msk.bf16.gmra.mxu1 %vm786_vm4, %v13733_v26 }
  0x51   : >> { %11666 = vmatprep.mubr.msk.bf16.mxu0 %vm786_vm4, %v13739_v49  ;;  %11690 = vmatprep.mubr.msk.bf16.mxu1 %vm786_vm4, %v13742_v50 }
  0x58   : >> { %11667 = vmatmul.mubr.msk.bf16.gmra.mxu0 %vm786_vm4, %v13758_v17  ;;  %11691 = vmatmul.mubr.msk.bf16.gmra.mxu1 %vm786_vm4, %v785_v19  ;;  %v1409_v19 = vrot.slane %v13649_v40, 1 }
  0x59   : >> { %11696 = vmatprep.mubr.msk.bf16.mxu1 %vm786_vm4, %v13484_v10  ;;  %11746 = vmatprep.mubr.msk.bf16.mxu0 %vm786_vm4, %v1394_v20  ;;  %v13783_v10 = vld [vmem:[%s17702_s1 + $0x14] sm:$0xf]  ;;  %v13832_v20 = vsel %vm1391_vm5, %v1405_v59, %v1407_v12 }
  0x5a   : >> { %v13835_v27 = vsel %vm1391_vm5, %v1407_v12, %v1409_v19  ;;  %v1421_v12 = vrot.slane %v13536_v60, 1 }
  0x60   : >> { %11697 = vmatmul.mubr.msk.bf16.vlgmr.msra.gmra.mxu1 %vm786_vm4, %v13488_v13  ;;  %11747 = vmatmul.mubr.msk.bf16.vlgmr.msra.gmra.mxu0 %vm786_vm4, %v1396_v28  ;;  %v1401_v13 = vrot.slane %v13571_v22, 1  ;;  %v1413_v28 = vrot.slane %v13695_v45, 1 }
  0x61   : >> { %11795 = vmatpush3.bf16.msra.mxu1 %v1804_v18  ;;  %11845 = vmatpush3.bf16.msra.mxu0 %v2121_v29  ;;  %v13848_v18 = vsel %vm1391_vm5, %v1409_v19, %v1411_v37 }
  0x62   : >> { %11700 = vmatprep.mubr.msk.bf16.mxu1 %vm786_vm4, %v13511_v34  ;;  %11750 = vmatprep.mubr.msk.bf16.mxu0 %vm786_vm4, %v1398_v46  ;;  %v13803_v44 = vsel %vm1391_vm5, %v1399_v6, %v1401_v13  ;;  %v1403_v34 = vrot.slane %v13589_v38, 1  ;;  %v13851_v29 = vsel %vm1391_vm5, %v1411_v37, %v1413_v28  ;;  %v1415_v46 = vrot.slane %v13492_v16, 1 }
  0x63   : >> { %12859 = vmatprep.subr.msk.bf16.mxu1 %vm859_vm2, %v13783_v10  ;;  %12860 = vmatprep.subr.msk.bf16.mxu0 %vm859_vm2, %v13788_v36  ;;  %v1417_v6 = vrot.slane %v13498_v21, 1 }
  0x64   : >> { %v13816_v63 = vsel %vm1391_vm5, %v1401_v13, %v1403_v34  ;;  %v13819_v9 = vsel %vm1391_vm5, %v1403_v34, %v1405_v59  ;;  %v13864_v13 = vsel %vm1391_vm5, %v1413_v28, %v1415_v46  ;;  %v1419_v59 = vrot.slane %v13513_v35, 1 }
  0x65   : >> { %v13867_v34 = vsel %vm1391_vm5, %v1415_v46, %v1417_v6  ;;  %v1423_v28 = vrot.slane %v13559_v11, 1  ;;  %v1425_v46 = vrot.slane %v13581_v30, 1 }
  0x66   : >> { %v13880_v19 = vsel %vm1391_vm5, %v1417_v6, %v1419_v59  ;;  %v13883_v37 = vsel %vm1391_vm5, %v1419_v59, %v1421_v12 }
  0x67   : >> { %17812 = vst [vmem:[#allocation33_spill] sm:$0xff] %v13883_v37  ;;  %v13896_v6 = vsel %vm1391_vm5, %v1421_v12, %v1423_v28  ;;  %v13899_v59 = vsel %vm1391_vm5, %v1423_v28, %v1425_v46  ;;  %v1429_v12 = vrot.slane %v13630_v14, 1 }
  0x68   : >> { %11701 = vmatmul.mubr.msk.bf16.gmra.mxu1 %vm786_vm4, %v13518_v39  ;;  %11751 = vmatmul.mubr.msk.bf16.gmra.mxu0 %vm786_vm4, %v13800_v15  ;;  %17813 = vst [vmem:[#allocation34_spill] sm:$0xff] %v13896_v6  ;;  %17814 = vst [vmem:[#allocation35_spill] sm:$0xff] %v13899_v59 }
  0x69   : >> { %11704 = vmatprep.mubr.msk.bf16.mxu1 %vm786_vm4, %v13547_v5  ;;  %11754 = vmatprep.mubr.msk.bf16.mxu0 %vm786_vm4, %v13803_v44  ;;  %v13915_v28 = vsel %vm1391_vm5, %v1427_v1, %v1429_v12 }
  0x6a   : >> { %17816 = vst [vmem:[#allocation37_spill] sm:$0xff] %v13915_v28 }
  0x70   : >> { %11705 = vmatmul.mubr.msk.bf16.gmra.mxu1 %vm786_vm4, %v13571_v22  ;;  %11755 = vmatmul.mubr.msk.bf16.gmra.mxu0 %vm786_vm4, %v13816_v63 }
  0x71   : >> { %11708 = vmatprep.mubr.msk.bf16.mxu1 %vm786_vm4, %v13589_v38  ;;  %11758 = vmatprep.mubr.msk.bf16.mxu0 %vm786_vm4, %v13819_v9 }
  0x78   : >> { %11709 = vmatmul.mubr.msk.bf16.gmra.mxu1 %vm786_vm4, %v13618_v62  ;;  %11759 = vmatmul.mubr.msk.bf16.gmra.mxu0 %vm786_vm4, %v13832_v20 }
  0x79   : >> { %11712 = vmatprep.mubr.msk.bf16.mxu1 %vm786_vm4, %v13643_v25  ;;  %11762 = vmatprep.mubr.msk.bf16.mxu0 %vm786_vm4, %v13835_v27 }
  0x80   : >> { %11713 = vmatmul.mubr.msk.bf16.gmra.mxu1 %vm786_vm4, %v13649_v40  ;;  %11763 = vmatmul.mubr.msk.bf16.gmra.mxu0 %vm786_vm4, %v13848_v18 }
  0x81   : >> { %11716 = vmatprep.mubr.msk.bf16.mxu1 %vm786_vm4, %v13675_v7  ;;  %11766 = vmatprep.mubr.msk.bf16.mxu0 %vm786_vm4, %v13851_v29 }
  0x88   : >> { %11717 = vmatmul.mubr.msk.bf16.gmra.mxu1 %vm786_vm4, %v13695_v45  ;;  %11767 = vmatmul.mubr.msk.bf16.gmra.mxu0 %vm786_vm4, %v13864_v13 }
  0x89   : >> { %11720 = vmatprep.mubr.msk.bf16.mxu1 %vm786_vm4, %v13492_v16  ;;  %11770 = vmatprep.mubr.msk.bf16.mxu0 %vm786_vm4, %v13867_v34 }
  0x90   : >> { %11721 = vmatmul.mubr.msk.bf16.gmra.mxu1 %vm786_vm4, %v13498_v21  ;;  %11771 = vmatmul.mubr.msk.bf16.gmra.mxu0 %vm786_vm4, %v13880_v19 }
  0x91   : >> { %11724 = vmatprep.mubr.msk.bf16.mxu1 %vm786_vm4, %v13513_v35  ;;  %11774 = vmatprep.mubr.msk.bf16.mxu0 %vm786_vm4, %v13883_v37  ;;  %v13912_v37 = vsel %vm1391_vm5, %v1425_v46, %v1427_v1  ;;  %v1433_v46 = vrot.slane %v13672_v2, 1 }
  0x92   : >> { %17815 = vst [vmem:[#allocation36_spill] sm:$0xff] %v13912_v37 }
  0x98   : >> { %11725 = vmatmul.mubr.msk.bf16.gmra.mxu1 %vm786_vm4, %v13536_v60  ;;  %11775 = vmatmul.mubr.msk.bf16.gmra.mxu0 %vm786_vm4, %v13896_v6 }
  0x99   : >> { %11728 = vmatprep.mubr.msk.bf16.mxu1 %vm786_vm4, %v13559_v11  ;;  %11778 = vmatprep.mubr.msk.bf16.mxu0 %vm786_vm4, %v13899_v59  ;;  %v1431_v59 = vrot.slane %v13646_v33, 1 }
  0x9b   : >> { %v13928_v6 = vsel %vm1391_vm5, %v1429_v12, %v1431_v59  ;;  %v13931_v1 = vsel %vm1391_vm5, %v1431_v59, %v1433_v46  ;;  %v13943_v12 = vrot.slane %v13702_v52, 1 }
  0x9c   : >> { %17817 = vst [vmem:[#allocation38_spill] sm:$0xff] %v13928_v6  ;;  %17818 = vst [vmem:[#allocation39_spill] sm:$0xff] %v13931_v1 }
  0x9d   : >> { %17819 = vst [vmem:[#allocation40_spill] sm:$0xff] %v13943_v12 }
  0xa0   : >> { %11729 = vmatmul.mubr.msk.bf16.gmra.mxu1 %vm786_vm4, %v13581_v30  ;;  %11779 = vmatmul.mubr.msk.bf16.gmra.mxu0 %vm786_vm4, %v13912_v37 }
  0xa1   : >> { %11732 = vmatprep.mubr.msk.bf16.mxu1 %vm786_vm4, %v13611_v56  ;;  %11782 = vmatprep.mubr.msk.bf16.mxu0 %vm786_vm4, %v13915_v28  ;;  %v1435_v28 = vrot.slane %v13691_v41, 1 }
  0xa3   : >> { %v13946_v59 = vsel %vm1391_vm5, %v1433_v46, %v1435_v28  ;;  %v13950_v37 = vsel %vm1391_vm5, %v1435_v28, %v13943_v12  ;;  %v2423_v28 = vsel %vm859_vm2, %v13783_v10, 0 }
  0xa4   : >> { %17820 = vst [vmem:[#allocation41_spill] sm:$0xff] %v13946_v59  ;;  %17821 = vst [vmem:[#allocation42_spill] sm:$0xff] %v13950_v37 }
  0xa8   : >> { %11733 = vmatmul.mubr.msk.bf16.gmra.mxu1 %vm786_vm4, %v13630_v14  ;;  %11783 = vmatmul.mubr.msk.bf16.gmra.mxu0 %vm786_vm4, %v13928_v6 }
  0xa9   : >> { %11736 = vmatprep.mubr.msk.bf16.mxu1 %vm786_vm4, %v13646_v33  ;;  %11786 = vmatprep.mubr.msk.bf16.mxu0 %vm786_vm4, %v13931_v1  ;;  %v1439_v1 = vrot.slane %v13727_v24, 1  ;;  %v2713_v24 = vsel %vm859_vm2, %v13788_v36, 0 }
  0xab   : >> { %v1440_v46 = vsel %vm1391_vm5, %v13943_v12, %v1439_v1  ;;  %v13981_v1 = vld [vmem:[%s17702_s1 + $0x1c] sm:$0xf] }
  0xb0   : >> { %11737 = vmatmul.mubr.msk.bf16.gmra.mxu1 %vm786_vm4, %v13672_v2  ;;  %11787 = vmatmul.mubr.msk.bf16.gmra.mxu0 %vm786_vm4, %v13946_v59 }
  0xb1   : >> { %11740 = vmatprep.mubr.msk.bf16.mxu1 %vm786_vm4, %v13691_v41  ;;  %11790 = vmatprep.mubr.msk.bf16.mxu0 %vm786_vm4, %v13950_v37 }
  0xb8   : >> { %11741 = vmatmul.mubr.msk.bf16.gmra.mxu1 %vm786_vm4, %v13702_v52  ;;  %11791 = vmatmul.mubr.msk.bf16.gmra.mxu0 %vm786_vm4, %v1440_v46 }
  0xb9   : >> { %11796 = vmatprep.mubr.msk.bf16.mxu1 %vm786_vm4, %v13518_v39  ;;  %11846 = vmatprep.mubr.msk.bf16.mxu0 %vm786_vm4, %v13596_v42  ;;  %v13986_v39 = vld [vmem:[%s17702_s1 + $0x20] sm:$0xf] }
  0xc0   : >> { %11797 = vmatmul.mubr.msk.bf16.vlgmr.msra.gmra.mxu1 %vm786_vm4, %v13547_v5  ;;  %11847 = vmatmul.mubr.msk.bf16.vlgmr.msra.gmra.mxu0 %vm786_vm4, %v13609_v54 }
  0xc1   : >> { %11895 = vmatpush3.bf16.msra.mxu1 %v2423_v28  ;;  %11945 = vmatpush3.bf16.msra.mxu0 %v2713_v24  ;;  %v549_v28 = vld [vmem:[%s13478_s24 + $0x188] sm:$0xff] }
  0xc2   : >> { %11800 = vmatprep.mubr.msk.bf16.mxu1 %vm786_vm4, %v13571_v22  ;;  %11850 = vmatprep.mubr.msk.bf16.mxu0 %vm786_vm4, %v13638_v23 }
  0xc3   : >> { %12861 = vmatprep.subr.msk.bf16.mxu1 %vm859_vm2, %v13981_v1  ;;  %12862 = vmatprep.subr.msk.bf16.mxu0 %vm859_vm2, %v13986_v39 }
  0xc8   : >> { %11801 = vmatmul.mubr.msk.bf16.gmra.mxu1 %vm786_vm4, %v13589_v38  ;;  %11851 = vmatmul.mubr.msk.bf16.gmra.mxu0 %vm786_vm4, %v13660_v51 }
  0xc9   : >> { %11804 = vmatprep.mubr.msk.bf16.mxu1 %vm786_vm4, %v13618_v62  ;;  %11854 = vmatprep.mubr.msk.bf16.mxu0 %vm786_vm4, %v13689_v31  ;;  %v553_v31 = vld [vmem:[%s13478_s24 + $0x1a8] sm:$0xff] }
  0xd0   : >> { %11805 = vmatmul.mubr.msk.bf16.gmra.mxu1 %vm786_vm4, %v13643_v25  ;;  %11855 = vmatmul.mubr.msk.bf16.gmra.mxu0 %vm786_vm4, %v13705_v53 }
  0xd1   : >> { %11808 = vmatprep.mubr.msk.bf16.mxu1 %vm786_vm4, %v13649_v40  ;;  %11858 = vmatprep.mubr.msk.bf16.mxu0 %vm786_vm4, %v13730_v0 }
  0xd8   : >> { %11809 = vmatmul.mubr.msk.bf16.gmra.mxu1 %vm786_vm4, %v13675_v7  ;;  %11859 = vmatmul.mubr.msk.bf16.gmra.mxu0 %vm786_vm4, %v13739_v49  ;;  %v551_v49 = vld [vmem:[%s13478_s24 + $0x198] sm:$0xff] }
  0xd9   : >> { %11812 = vmatprep.mubr.msk.bf16.mxu1 %vm786_vm4, %v13695_v45  ;;  %11862 = vmatprep.mubr.msk.bf16.mxu0 %vm786_vm4, %v13758_v17  ;;  %v550_v17 = vld [vmem:[%s13478_s24 + $0x190] sm:$0xff] }
  0xda   : >> { %v14101_v51 = vpack.c.bf16 %v551_v49, %v550_v17 }
  0xdc   : >> { %17829 = vst [vmem:[#allocation50_spill] sm:$0xff] %v14101_v51  ;;  %v2089_v49 = vshll.u32 %v14101_v51, 16 }
  0xe0   : >> { %11813 = vmatmul.mubr.msk.bf16.gmra.mxu1 %vm786_vm4, %v13492_v16  ;;  %11863 = vmatmul.mubr.msk.bf16.gmra.mxu0 %vm786_vm4, %v13534_v58 }
  0xe1   : >> { %11816 = vmatprep.mubr.msk.bf16.mxu1 %vm786_vm4, %v13498_v21  ;;  %11866 = vmatprep.mubr.msk.bf16.mxu0 %vm786_vm4, %v13545_v3 }
  0xe8   : >> { %11817 = vmatmul.mubr.msk.bf16.gmra.mxu1 %vm786_vm4, %v13513_v35  ;;  %11867 = vmatmul.mubr.msk.bf16.gmra.mxu0 %vm786_vm4, %v13587_v32 }
  0xe9   : >> { %11820 = vmatprep.mubr.msk.bf16.mxu1 %vm786_vm4, %v13536_v60  ;;  %11870 = vmatprep.mubr.msk.bf16.mxu0 %vm786_vm4, %v13602_v48 }
  0xf0   : >> { %v14036_v5 = vpop.f32.mrf.mxu0  ;;  %v14038_v22 = vpop.f32.mrf.mxu1  ;;  %11821 = vmatmul.mubr.msk.bf16.gmra.mxu1 %vm786_vm4, %v13559_v11  ;;  %11871 = vmatmul.mubr.msk.bf16.gmra.mxu0 %vm786_vm4, %v13627_v8 }
  0xf1   : >> { %11824 = vmatprep.mubr.msk.bf16.mxu1 %vm786_vm4, %v13581_v30  ;;  %11874 = vmatprep.mubr.msk.bf16.mxu0 %vm786_vm4, %v13653_v43  ;;  %v14074_v43 = vpack.c.bf16 %v549_v28, %v13713_v4 }
  0xf2   : >> { %v14048_v42 = vpop.f32.mrf.mxu0  ;;  %v14050_v54 = vpop.f32.mrf.mxu1 }
  0xf3   : >> { %v2082_v53 = vshll.u32 %v14074_v43, 16  ;;  %v2086_v17 = vshrl.u32 %v14074_v43, 16 }
  0xf4   : >> { %v14052_v23 = vpop.f32.mrf.mxu0  ;;  %v14054_v10 = vpop.f32.mrf.mxu1 }
  0xf5   : >> { %17822 = vst [vmem:[#allocation43_spill] sm:$0xff] %v14054_v10  ;;  %v2084_v59 = vrot.slane %v2082_v53, 1  ;;  %v2093_v53 = vshrl.u32 %v14101_v51, 16 }
  0xf6   : >> { %v14056_v36 = vpop.f32.mrf.mxu0  ;;  %v14058_v46 = vpop.f32.mrf.mxu1 }
  0xf7   : >> { %17823 = vst [vmem:[#allocation44_spill] sm:$0xff] %v14058_v46 }
  0xf8   : >> { %v14061_v24 = vpop.f32.mrf.mxu0  ;;  %v14063_v8 = vpop.f32.mrf.mxu1  ;;  %11825 = vmatmul.mubr.msk.bf16.gmra.mxu1 %vm786_vm4, %v13611_v56  ;;  %11875 = vmatmul.mubr.msk.bf16.gmra.mxu0 %vm786_vm4, %v13665_v55 }
  0xf9   : >> { %17824 = vst [vmem:[#allocation45_spill] sm:$0xff] %v14063_v8  ;;  %11828 = vmatprep.mubr.msk.bf16.mxu1 %vm786_vm4, %v13630_v14  ;;  %11878 = vmatprep.mubr.msk.bf16.mxu0 %vm786_vm4, %v13698_v47  ;;  %v552_v47 = vld [vmem:[%s13478_s24 + $0x1a0] sm:$0xff] }
  0xfa   : >> { %v14076_v48 = vpop.f32.mrf.mxu0  ;;  %v14078_v32 = vpop.f32.mrf.mxu1 }
  0xfb   : >> { %17825 = vst [vmem:[#allocation46_spill] sm:$0xff] %v14078_v32 }
  0xfc   : >> { %v14080_v3 = vpop.f32.mrf.mxu0  ;;  %v14082_v58 = vpop.f32.mrf.mxu1 }
  0xfd   : >> { %17826 = vst [vmem:[#allocation47_spill] sm:$0xff] %v14082_v58 }
  0xfe   : >> { %v14086_v55 = vpop.f32.mrf.mxu0  ;;  %v14088_v0 = vpop.f32.mrf.mxu1 }
  0xff   : >> { %17827 = vst [vmem:[#allocation48_spill] sm:$0xff] %v14088_v0 }
 0x100   : >> { %v14093_v4 = vpop.f32.mrf.mxu0  ;;  %v14095_v28 = vpop.f32.mrf.mxu1  ;;  %11829 = vmatmul.mubr.msk.bf16.gmra.mxu1 %vm786_vm4, %v13646_v33  ;;  %11879 = vmatmul.mubr.msk.bf16.gmra.mxu0 %vm786_vm4, %v13708_v57 }
 0x101   : >> { %17828 = vst [vmem:[#allocation49_spill] sm:$0xff] %v14095_v28  ;;  %11832 = vmatprep.mubr.msk.bf16.mxu1 %vm786_vm4, %v13672_v2  ;;  %11882 = vmatprep.mubr.msk.bf16.mxu0 %vm786_vm4, %v13733_v26  ;;  %v14111_v28 = vpack.c.bf16 %v553_v31, %v552_v47  ;;  %v14125_v26 = vsel %vm589_vm3, %v13752_v61, %v2084_v59  ;;  %v14130_v47 = vld [vmem:[%s13478_s24 + $0x1b0] sm:$0xff] }
 0x102   : >> { %v14107_v37 = vpop.f32.mrf.mxu0  ;;  %v14109_v12 = vpop.f32.mrf.mxu1  ;;  %17834 = vst [vmem:[#allocation55_spill] sm:$0xff] %v14125_v26  ;;  %v2088_v61 = vor.u32 %v2086_v17, %v2084_v59  ;;  %v14146_v6 = vpack.c.bf16 %v14130_v47, %v14130_v47 }
 0x103   : >> { %17830 = vst [vmem:[#allocation51_spill] sm:$0xff] %v14109_v12  ;;  %17831 = vst [vmem:[#allocation52_spill] sm:$0xff] %v14111_v28  ;;  %v2096_v31 = vshll.u32 %v14111_v28, 16  ;;  %v2100_v59 = vshrl.u32 %v14111_v28, 16 }
 0x104   : >> { %v14113_v0 = vpop.f32.mrf.mxu0  ;;  %v14115_v58 = vpop.f32.mrf.mxu1  ;;  %17836 = vst [vmem:[#allocation57_spill] sm:$0xff] %v14146_v6  ;;  %v2104_v17 = vshll.u32 %v14146_v6, 16 }
 0x105   : >> { %17832 = vst [vmem:[#allocation53_spill] sm:$0xff] %v14115_v58  ;;  %v2098_v2 = vrot.slane %v2096_v31, 1 }
 0x106   : >> { %v14119_v57 = vpop.f32.mrf.mxu0  ;;  %v14121_v32 = vpop.f32.mrf.mxu1 }
 0x107   : >> { %17833 = vst [vmem:[#allocation54_spill] sm:$0xff] %v14121_v32  ;;  %v2091_v32 = vrot.slane %v2089_v49, 1 }
 0x108   : >> { %v14132_v12 = vpop.f32.mrf.mxu0  ;;  %v14134_v58 = vpop.f32.mrf.mxu1  ;;  %11833 = vmatmul.mubr.msk.bf16.gmra.mxu1 %vm786_vm4, %v13691_v41  ;;  %11883 = vmatmul.mubr.msk.bf16.gmra.mxu0 %vm786_vm4, %v13742_v50 }
 0x109   : >> { %17835 = vst [vmem:[#allocation56_spill] sm:$0xff] %v14134_v58  ;;  %11836 = vmatprep.mubr.msk.bf16.mxu1 %vm786_vm4, %v13702_v52  ;;  %11886 = vmatprep.mubr.msk.bf16.mxu0 %vm786_vm4, %v14125_v26  ;;  %v2095_v41 = vor.u32 %v2093_v53, %v2091_v32  ;;  %v14157_v50 = vsel %vm589_vm3, %v2088_v61, %v2091_v32 }
 0x10a   : >> { %v14148_v8 = vpop.f32.mrf.mxu0  ;;  %v14150_v58 = vpop.f32.mrf.mxu1  ;;  %17839 = vst [vmem:[#allocation60_spill] sm:$0xff] %v14157_v50  ;;  %v14178_v32 = vor.u32 %v2100_v59, %v2098_v2 }
 0x10b   : >> { %17837 = vst [vmem:[#allocation58_spill] sm:$0xff] %v14150_v58  ;;  %v14166_v10 = vsel %vm589_vm3, %v2095_v41, %v2098_v2  ;;  %v2106_v41 = vrot.slane %v2104_v17, 1 }
 0x10c   : >> { %v14152_v46 = vpop.f32.mrf.mxu0  ;;  %v14154_v49 = vpop.f32.mrf.mxu1  ;;  %17841 = vst [vmem:[#allocation62_spill] sm:$0xff] %v14166_v10  ;;  %17843 = vst [vmem:[#allocation64_spill] sm:$0xff] %v14178_v32 }
 0x10d   : >> { %17838 = vst [vmem:[#allocation59_spill] sm:$0xff] %v14154_v49 }
 0x10e   : >> { %v14161_v26 = vpop.f32.mrf.mxu0  ;;  %v14163_v52 = vpop.f32.mrf.mxu1 }
 0x10f   : >> { %17840 = vst [vmem:[#allocation61_spill] sm:$0xff] %v14163_v52 }
 0x110   : >> { %v14168_v53 = vpop.f32.mrf.mxu0  ;;  %v14170_v31 = vpop.f32.mrf.mxu1  ;;  %11837 = vmatmul.mubr.msk.bf16.gmra.mxu1 %vm786_vm4, %v14074_v43  ;;  %11887 = vmatmul.mubr.msk.bf16.gmra.mxu0 %vm786_vm4, %v14157_v50  ;;  %v2107_v50 = vsel %vm589_vm3, %v14178_v32, %v2106_v41 }
 0x111   : >> { %17842 = vst [vmem:[#allocation63_spill] sm:$0xff] %v14170_v31  ;;  %11840 = vmatprep.mubr.msk.bf16.mxu1 %vm786_vm4, %v14101_v51  ;;  %11890 = vmatprep.mubr.msk.bf16.mxu0 %vm786_vm4, %v14166_v10 }
 0x112   : >> { %v14182_v61 = vpop.f32.mrf.mxu0  ;;  %v14184_v6 = vpop.f32.mrf.mxu1 }
 0x113   : >> { %17844 = vst [vmem:[#allocation65_spill] sm:$0xff] %v14184_v6 }
 0x114   : >> { %v14186_v31 = vpop.f32.mrf.mxu0  ;;  %v14188_v52 = vpop.f32.mrf.mxu1 }
 0x115   : >> { %17845 = vst [vmem:[#allocation66_spill] sm:$0xff] %v14188_v52 }
 0x116   : >> { %v14192_v49 = vpop.f32.mrf.mxu0  ;;  %v14194_v58 = vpop.f32.mrf.mxu1 }
 0x117   : >> { %17846 = vst [vmem:[#allocation67_spill] sm:$0xff] %v14194_v58 }
 0x118   : >> { %v14196_v2 = vpop.f32.mrf.mxu0  ;;  %v14198_v59 = vpop.f32.mrf.mxu1  ;;  %11841 = vmatmul.mubr.msk.bf16.gmra.mxu1 %vm786_vm4, %v14111_v28  ;;  %11891 = vmatmul.mubr.msk.bf16.gmra.mxu0 %vm786_vm4, %v2107_v50  ;;  %v3030_v50 = vsel %vm859_vm2, %v13981_v1, 0 }
 0x119   : >> { %17847 = vst [vmem:[#allocation68_spill] sm:$0xff] %v14198_v59  ;;  %11896 = vmatprep.mubr.msk.bf16.mxu1 %vm786_vm4, %v13800_v15  ;;  %11946 = vmatprep.mubr.msk.bf16.mxu0 %vm786_vm4, %v13589_v38  ;;  %v3332_v15 = vsel %vm859_vm2, %v13986_v39, 0 }
 0x11a   : >> { %v14207_v17 = vpop.f32.mrf.mxu0  ;;  %v14209_v41 = vpop.f32.mrf.mxu1 }
 0x11b   : >> { %17848 = vst [vmem:[#allocation69_spill] sm:$0xff] %v14209_v41 }
 0x11c   : >> { %v14211_v10 = vpop.f32.mrf.mxu0  ;;  %v14213_v32 = vpop.f32.mrf.mxu1 }
 0x11d   : >> { %17849 = vst [vmem:[#allocation70_spill] sm:$0xff] %v14213_v32 }
 0x11e   : >> { %v14215_v59 = vpop.f32.mrf.mxu0  ;;  %v14217_v58 = vpop.f32.mrf.mxu1 }
 0x11f   : >> { %17850 = vst [vmem:[#allocation71_spill] sm:$0xff] %v14217_v58 }
 0x120   : >> { %v11698_v52 = vpop.f32.mrf.mxu1  ;;  %v11748_v38 = vpop.f32.mrf.mxu0  ;;  %11897 = vmatmul.mubr.msk.bf16.vlgmr.msra.gmra.mxu1 %vm786_vm4, %v13803_v44  ;;  %11947 = vmatmul.mubr.msk.bf16.vlgmr.msra.gmra.mxu0 %vm786_vm4, %v13618_v62 }
 0x121   : >> { %v1182_v32 = vadd.f32 %v11698_v52, %v14036_v5  ;;  %11995 = vmatpush3.bf16.msra.mxu1 %v3030_v50  ;;  %12045 = vmatpush3.bf16.msra.mxu0 %v3332_v15 }
 0x122   : >> { %v1173_v41 = vpop.f32.mrf.mxu1  ;;  %v1550_v58 = vpop.f32.mrf.mxu0  ;;  %11900 = vmatprep.mubr.msk.bf16.mxu1 %vm786_vm4, %v13816_v63  ;;  %11950 = vmatprep.mubr.msk.bf16.mxu0 %vm786_vm4, %v13643_v25 }
 0x123   : >> { %v14232_v1 = vadd.f32 %v11748_v38, %v1182_v32  ;;  %v1174_v39 = vadd.f32 %v1173_v41, %v14048_v42 }
 0x124   : >> { %v11699_v44 = vpop.f32.mrf.mxu1  ;;  %v11749_v6 = vpop.f32.mrf.mxu0 }
 0x125   : >> { %v14235_v28 = vadd.f32 %v1550_v58, %v1174_v39  ;;  %v1185_v62 = vadd.f32 %v11699_v44, %v14052_v23 }
 0x126   : >> { %v1176_v52 = vpop.f32.mrf.mxu1  ;;  %v1553_v5 = vpop.f32.mrf.mxu0 }
 0x127   : >> { %v14238_v50 = vadd.f32 %v11749_v6, %v1185_v62  ;;  %v1177_v15 = vadd.f32 %v1176_v52, %v14056_v36 }
 0x128   : >> { %v11702_v63 = vpop.f32.mrf.mxu1  ;;  %v11752_v51 = vpop.f32.mrf.mxu0  ;;  %11901 = vmatmul.mubr.msk.bf16.gmra.mxu1 %vm786_vm4, %v13819_v9  ;;  %11951 = vmatmul.mubr.msk.bf16.gmra.mxu0 %vm786_vm4, %v13649_v40 }
 0x129   : >> { %v14245_v25 = vadd.f32 %v1553_v5, %v1177_v15  ;;  %v1198_v58 = vadd.f32 %v11702_v63, %v14061_v24  ;;  %11904 = vmatprep.mubr.msk.bf16.mxu1 %vm786_vm4, %v13832_v20  ;;  %11954 = vmatprep.mubr.msk.bf16.mxu0 %vm786_vm4, %v13675_v7 }
 0x12a   : >> { %v1189_v6 = vpop.f32.mrf.mxu1  ;;  %v1566_v42 = vpop.f32.mrf.mxu0 }
 0x12b   : >> { %v14252_v23 = vadd.f32 %v11752_v51, %v1198_v58  ;;  %v1190_v36 = vadd.f32 %v1189_v6, %v14076_v48 }
 0x12c   : >> { %v11703_v32 = vpop.f32.mrf.mxu1  ;;  %v11753_v41 = vpop.f32.mrf.mxu0 }
 0x12d   : >> { %v14255_v38 = vadd.f32 %v1566_v42, %v1190_v36  ;;  %v1201_v40 = vadd.f32 %v11703_v32, %v14080_v3 }
 0x12e   : >> { %v1192_v39 = vpop.f32.mrf.mxu1  ;;  %v1569_v24 = vpop.f32.mrf.mxu0 }
 0x12f   : >> { %v14258_v44 = vadd.f32 %v11753_v41, %v1201_v40  ;;  %v1193_v62 = vadd.f32 %v1192_v39, %v14086_v55 }
 0x130   : >> { %v11706_v52 = vpop.f32.mrf.mxu1  ;;  %v11756_v7 = vpop.f32.mrf.mxu0  ;;  %11905 = vmatmul.mubr.msk.bf16.gmra.mxu1 %vm786_vm4, %v13835_v27  ;;  %11955 = vmatmul.mubr.msk.bf16.gmra.mxu0 %vm786_vm4, %v13695_v45 }
 0x131   : >> { %v14265_v48 = vadd.f32 %v1569_v24, %v1193_v62  ;;  %v1214_v51 = vadd.f32 %v11706_v52, %v14093_v4  ;;  %11908 = vmatprep.mubr.msk.bf16.mxu1 %vm786_vm4, %v13848_v18  ;;  %11958 = vmatprep.mubr.msk.bf16.mxu0 %vm786_vm4, %v13492_v16 }
 0x132   : >> { %v1205_v3 = vpop.f32.mrf.mxu1  ;;  %v1582_v55 = vpop.f32.mrf.mxu0 }
 0x133   : >> { %v14272_v5 = vadd.f32 %v11756_v7, %v1214_v51  ;;  %v1206_v15 = vadd.f32 %v1205_v3, %v14107_v37 }
 0x134   : >> { %v11707_v63 = vpop.f32.mrf.mxu1  ;;  %v11757_v58 = vpop.f32.mrf.mxu0 }
 0x135   : >> { %v14275_v6 = vadd.f32 %v1582_v55, %v1206_v15  ;;  %v1217_v45 = vadd.f32 %v11707_v63, %v14113_v0 }
 0x136   : >> { %v1208_v42 = vpop.f32.mrf.mxu1  ;;  %v1585_v4 = vpop.f32.mrf.mxu0 }
 0x137   : >> { %v14278_v36 = vadd.f32 %v11757_v58, %v1217_v45  ;;  %v1209_v32 = vadd.f32 %v1208_v42, %v14119_v57 }
 0x138   : >> { %v11710_v41 = vpop.f32.mrf.mxu1  ;;  %v11760_v16 = vpop.f32.mrf.mxu0  ;;  %11909 = vmatmul.mubr.msk.bf16.gmra.mxu1 %vm786_vm4, %v13851_v29  ;;  %11959 = vmatmul.mubr.msk.bf16.gmra.mxu0 %vm786_vm4, %v13498_v21 }
 0x139   : >> { %v14285_v37 = vadd.f32 %v1585_v4, %v1209_v32  ;;  %v1230_v40 = vadd.f32 %v11710_v41, %v14132_v12  ;;  %11912 = vmatprep.mubr.msk.bf16.mxu1 %vm786_vm4, %v13864_v13  ;;  %11962 = vmatprep.mubr.msk.bf16.mxu0 %vm786_vm4, %v13513_v35  ;;  %v555_v4 = vld [vmem:[%s13478_s24 + $0x1b8] sm:$0xff] }
 0x13a   : >> { %v1221_v0 = vpop.f32.mrf.mxu1  ;;  %v1598_v57 = vpop.f32.mrf.mxu0 }
 0x13b   : >> { %v14292_v39 = vadd.f32 %v11760_v16, %v1230_v40  ;;  %v1222_v24 = vadd.f32 %v1221_v0, %v14148_v8  ;;  %v14323_v0 = vpack.c.bf16 %v555_v4, %v14130_v47 }
 0x13c   : >> { %v11711_v62 = vpop.f32.mrf.mxu1  ;;  %v11761_v52 = vpop.f32.mrf.mxu0 }
 0x13d   : >> { %v14295_v7 = vadd.f32 %v1598_v57, %v1222_v24  ;;  %v1233_v21 = vadd.f32 %v11711_v62, %v14152_v46  ;;  %17851 = vst [vmem:[#allocation72_spill] sm:$0xff] %v14323_v0  ;;  %v556_v57 = vld [vmem:[%s13478_s24 + $0x1c0] sm:$0xff]  ;;  %v557_v24 = vld [vmem:[%s13478_s24 + $0x1c8] sm:$0xff]  ;;  %v2991_v47 = vshll.u32 %v14323_v0, 16 }
 0x13e   : >> { %v1224_v51 = vpop.f32.mrf.mxu1  ;;  %v1601_v12 = vpop.f32.mrf.mxu0 }
 0x13f   : >> { %v14298_v3 = vadd.f32 %v11761_v52, %v1233_v21  ;;  %v1225_v55 = vadd.f32 %v1224_v51, %v14161_v26  ;;  %v17852_v52 = vld [vmem:[#allocation33_spill] sm:$0xff] }
 0x140   : >> { %v11714_v35 = vpop.f32.mrf.mxu1  ;;  %v11764_v15 = vpop.f32.mrf.mxu0  ;;  %11913 = vmatmul.mubr.msk.bf16.gmra.mxu1 %vm786_vm4, %v13867_v34  ;;  %11963 = vmatmul.mubr.msk.bf16.gmra.mxu0 %vm786_vm4, %v13536_v60 }
 0x141   : >> { %v14305_v8 = vadd.f32 %v1601_v12, %v1225_v55  ;;  %v1246_v63 = vadd.f32 %v11714_v35, %v14168_v53  ;;  %11916 = vmatprep.mubr.msk.bf16.mxu1 %vm786_vm4, %v13880_v19  ;;  %11966 = vmatprep.mubr.msk.bf16.mxu0 %vm786_vm4, %v13559_v11  ;;  %v14339_v55 = vpack.c.bf16 %v557_v24, %v556_v57 }
 0x142   : >> { %v1237_v26 = vpop.f32.mrf.mxu1  ;;  %v1614_v46 = vpop.f32.mrf.mxu0 }
 0x143   : >> { %v14312_v58 = vadd.f32 %v11764_v15, %v1246_v63  ;;  %v1238_v45 = vadd.f32 %v1237_v26, %v14182_v61  ;;  %v14344_v15 = vrot.slane %v2991_v47, 1  ;;  %v17856_v47 = vld [vmem:[#allocation35_spill] sm:$0xff] }
 0x144   : >> { %v11715_v42 = vpop.f32.mrf.mxu1  ;;  %v11765_v60 = vpop.f32.mrf.mxu0 }
 0x145   : >> { %v14316_v32 = vadd.f32 %v1614_v46, %v1238_v45  ;;  %v1249_v53 = vadd.f32 %v11715_v42, %v14186_v31  ;;  %17854 = vst [vmem:[#allocation33_spill] sm:$0xff] %v14344_v15  ;;  %v558_v46 = vld [vmem:[%s13478_s24 + $0x1d0] sm:$0xff]  ;;  %v559_v45 = vld [vmem:[%s13478_s24 + $0x1d8] sm:$0xff]  ;;  %v2998_v42 = vshll.u32 %v14339_v55, 16 }
 0x146   : >> { %v1240_v41 = vpop.f32.mrf.mxu1  ;;  %v1617_v16 = vpop.f32.mrf.mxu0 }
 0x147   : >> { %v14319_v40 = vadd.f32 %v11765_v60, %v1249_v53  ;;  %v1241_v11 = vadd.f32 %v1240_v41, %v14192_v49  ;;  %v17853_v49 = vld [vmem:[#allocation34_spill] sm:$0xff] }
 0x148   : >> { %v11718_v62 = vpop.f32.mrf.mxu1  ;;  %v11768_v61 = vpop.f32.mrf.mxu0  ;;  %11917 = vmatmul.mubr.msk.bf16.gmra.mxu1 %vm786_vm4, %v17852_v52  ;;  %11967 = vmatmul.mubr.msk.bf16.gmra.mxu0 %vm786_vm4, %v13581_v30 }
 0x149   : >> { %v14331_v31 = vadd.f32 %v1617_v16, %v1241_v11  ;;  %v1262_v21 = vadd.f32 %v11718_v62, %v14196_v2  ;;  %11920 = vmatprep.mubr.msk.bf16.mxu1 %vm786_vm4, %v17853_v49  ;;  %11970 = vmatprep.mubr.msk.bf16.mxu0 %vm786_vm4, %v13611_v56  ;;  %v2995_v2 = vshrl.u32 %v14323_v0, 16  ;;  %v17767_v56 = vrot.slane %v14323_v0, 1 }
 0x14a   : >> { %v1253_v51 = vpop.f32.mrf.mxu1  ;;  %v1630_v12 = vpop.f32.mrf.mxu0  ;;  %v3000_v11 = vrot.slane %v2998_v42, 1  ;;  %v14359_v62 = vpack.c.bf16 %v559_v45, %v558_v46  ;;  %v3002_v46 = vshrl.u32 %v14339_v55, 16 }
 0x14b   : >> { %v14341_v35 = vadd.f32 %v11768_v61, %v1262_v21  ;;  %v1254_v30 = vadd.f32 %v1253_v51, %v14207_v17  ;;  %v2997_v53 = vor.u32 %v2995_v2, %v14344_v15  ;;  %v3313_v17 = vrot.slane %v14339_v55, 1 }
 0x14c   : >> { %v11719_v63 = vpop.f32.mrf.mxu1  ;;  %v11769_v26 = vpop.f32.mrf.mxu0  ;;  %v3005_v2 = vshll.u32 %v14359_v62, 16 }
 0x14d   : >> { %v14351_v60 = vadd.f32 %v1630_v12, %v1254_v30  ;;  %v1265_v4 = vadd.f32 %v11719_v63, %v14211_v10  ;;  %v14364_v61 = vsel %vm1391_vm5, %v17767_v56, %v3313_v17  ;;  %v14371_v51 = vsel %vm589_vm3, %v2997_v53, %v3000_v11  ;;  %v17858_v30 = vld [vmem:[#allocation36_spill] sm:$0xff] }
 0x14e   : >> { %v1256_v41 = vpop.f32.mrf.mxu1  ;;  %v1633_v16 = vpop.f32.mrf.mxu0  ;;  %17855 = vst [vmem:[#allocation34_spill] sm:$0xff] %v14364_v61  ;;  %17857 = vst [vmem:[#allocation35_spill] sm:$0xff] %v14371_v51  ;;  %v14385_v42 = vrot.slane %v3005_v2, 1  ;;  %v3004_v53 = vor.u32 %v3002_v46, %v3000_v11  ;;  %v17864_v11 = vld [vmem:[#allocation44_spill] sm:$0xff]  ;;  %v17866_v46 = vld [vmem:[#allocation21_spill] sm:$0xff] }
 0x14f   : >> { %v14356_v57 = vadd.f32 %v11769_v26, %v1265_v4  ;;  %v1257_v24 = vadd.f32 %v1256_v41, %v14215_v59  ;;  %v17768_v41 = vrot.slane %v14359_v62, 1  ;;  %v17876_v51 = vld [vmem:[#allocation48_spill] sm:$0xff] }
 0x150   : >> { %v11722_v21 = vpop.f32.mrf.mxu1  ;;  %v11772_v10 = vpop.f32.mrf.mxu0  ;;  %11921 = vmatmul.mubr.msk.bf16.gmra.mxu1 %vm786_vm4, %v17856_v47  ;;  %11971 = vmatmul.mubr.msk.bf16.gmra.mxu0 %vm786_vm4, %v13630_v14  ;;  %17859 = vst [vmem:[#allocation36_spill] sm:$0xff] %v14385_v42  ;;  %v14393_v61 = vsel %vm589_vm3, %v3004_v53, %v14385_v42 }
 0x151   : >> { %v14373_v12 = vadd.f32 %v1633_v16, %v1257_v24  ;;  %v1278_v59 = vadd.f32 %v11722_v21, %v14038_v22  ;;  %11924 = vmatprep.mubr.msk.bf16.mxu1 %vm786_vm4, %v17858_v30  ;;  %11974 = vmatprep.mubr.msk.bf16.mxu0 %vm786_vm4, %v13646_v33  ;;  %v17860_v33 = vld [vmem:[#allocation43_spill] sm:$0xff] }
 0x152   : >> { %v1269_v63 = vpop.f32.mrf.mxu1  ;;  %v1646_v26 = vpop.f32.mrf.mxu0  ;;  %17861 = vst [vmem:[#allocation43_spill] sm:$0xff] %v14393_v61 }
 0x153   : >> { %v14382_v14 = vadd.f32 %v11772_v10, %v1278_v59  ;;  %v1270_v45 = vadd.f32 %v1269_v63, %v14050_v54  ;;  %v14398_v54 = vsel %vm1391_vm5, %v3313_v17, %v17768_v41  ;;  %v17870_v17 = vld [vmem:[#allocation23_spill] sm:$0xff] }
 0x154   : >> { %v11723_v4 = vpop.f32.mrf.mxu1  ;;  %v11773_v22 = vpop.f32.mrf.mxu0  ;;  %17862 = vst [vmem:[#allocation73_spill] sm:$0xff] %v14398_v54 }
 0x155   : >> { %v14388_v16 = vadd.f32 %v1646_v26, %v1270_v45  ;;  %v1281_v24 = vadd.f32 %v11723_v4, %v17860_v33  ;;  %v17865_v26 = vld [vmem:[#allocation37_spill] sm:$0xff]  ;;  %v17869_v33 = vld [vmem:[#allocation38_spill] sm:$0xff] }
 0x156   : >> { %v1272_v21 = vpop.f32.mrf.mxu1  ;;  %v1649_v56 = vpop.f32.mrf.mxu0  ;;  %v17868_v4 = vld [vmem:[#allocation45_spill] sm:$0xff] }
 0x157   : >> { %v14400_v10 = vadd.f32 %v11773_v22, %v1281_v24  ;;  %v1273_v59 = vadd.f32 %v1272_v21, %v17864_v11  ;;  %v17872_v11 = vld [vmem:[#allocation46_spill] sm:$0xff] }
 0x158   : >> { %v11726_v2 = vpop.f32.mrf.mxu1  ;;  %v11776_v63 = vpop.f32.mrf.mxu0  ;;  %11925 = vmatmul.mubr.msk.bf16.gmra.mxu1 %vm786_vm4, %v17865_v26  ;;  %11975 = vmatmul.mubr.msk.bf16.gmra.mxu0 %vm786_vm4, %v17866_v46 }
 0x159   : >> { %17863 = vst [vmem:[#allocation74_spill] sm:$0xff] %v14400_v10  ;;  %v14407_v45 = vadd.f32 %v1649_v56, %v1273_v59  ;;  %v1294_v53 = vadd.f32 %v11726_v2, %v17868_v4  ;;  %11928 = vmatprep.mubr.msk.bf16.mxu1 %vm786_vm4, %v17869_v33  ;;  %11978 = vmatprep.mubr.msk.bf16.mxu0 %vm786_vm4, %v17870_v17  ;;  %v17874_v56 = vld [vmem:[#allocation47_spill] sm:$0xff] }
 0x15a   : >> { %v1285_v22 = vpop.f32.mrf.mxu1  ;;  %v1662_v24 = vpop.f32.mrf.mxu0  ;;  %v17877_v10 = vld [vmem:[#allocation39_spill] sm:$0xff] }
 0x15b   : >> { %17867 = vst [vmem:[#allocation44_spill] sm:$0xff] %v14407_v45  ;;  %v14414_v21 = vadd.f32 %v11776_v63, %v1294_v53  ;;  %v1286_v41 = vadd.f32 %v1285_v22, %v17872_v11  ;;  %v17878_v63 = vld [vmem:[#allocation25_spill] sm:$0xff] }
 0x15c   : >> { %v11727_v54 = vpop.f32.mrf.mxu1  ;;  %v11777_v61 = vpop.f32.mrf.mxu0 }
 0x15d   : >> { %17871 = vst [vmem:[#allocation37_spill] sm:$0xff] %v14414_v21  ;;  %v14417_v42 = vadd.f32 %v1662_v24, %v1286_v41  ;;  %v1297_v59 = vadd.f32 %v11727_v54, %v17874_v56  ;;  %v17880_v41 = vld [vmem:[#allocation49_spill] sm:$0xff]  ;;  %v2402_v54 = vrot.slane %v14074_v43, 1  ;;  %v17883_v56 = vld [vmem:[#allocation51_spill] sm:$0xff] }
 0x15e   : >> { %v1288_v46 = vpop.f32.mrf.mxu1  ;;  %v1665_v2 = vpop.f32.mrf.mxu0  ;;  %v17881_v24 = vld [vmem:[#allocation41_spill] sm:$0xff] }
 0x15f   : >> { %17873 = vst [vmem:[#allocation21_spill] sm:$0xff] %v14417_v42  ;;  %v14420_v4 = vadd.f32 %v11777_v61, %v1297_v59  ;;  %v1289_v15 = vadd.f32 %v1288_v46, %v17876_v51 }
 0x160   : >> { %v11730_v45 = vpop.f32.mrf.mxu1  ;;  %v11780_v17 = vpop.f32.mrf.mxu0  ;;  %11929 = vmatmul.mubr.msk.bf16.gmra.mxu1 %vm786_vm4, %v17877_v10  ;;  %11979 = vmatmul.mubr.msk.bf16.gmra.mxu0 %vm786_vm4, %v17878_v63 }
 0x161   : >> { %17875 = vst [vmem:[#allocation45_spill] sm:$0xff] %v14420_v4  ;;  %v14427_v53 = vadd.f32 %v1665_v2, %v1289_v15  ;;  %v1310_v22 = vadd.f32 %v11730_v45, %v17880_v41  ;;  %11932 = vmatprep.mubr.msk.bf16.mxu1 %vm786_vm4, %v17881_v24  ;;  %11982 = vmatprep.mubr.msk.bf16.mxu0 %vm786_vm4, %v14074_v43  ;;  %v17885_v2 = vld [vmem:[#allocation53_spill] sm:$0xff]  ;;  %v17886_v4 = vld [vmem:[#allocation40_spill] sm:$0xff]  ;;  %v17889_v24 = vld [vmem:[#allocation54_spill] sm:$0xff] }
 0x162   : >> { %v1301_v61 = vpop.f32.mrf.mxu1  ;;  %v1678_v51 = vpop.f32.mrf.mxu0  ;;  %v14443_v42 = vsel %vm1391_vm5, %v17886_v4, %v2402_v54  ;;  %v17894_v4 = vld [vmem:[#allocation52_spill] sm:$0xff] }
 0x163   : >> { %17879 = vst [vmem:[#allocation38_spill] sm:$0xff] %v14427_v53  ;;  %v14435_v11 = vadd.f32 %v11780_v17, %v1310_v22  ;;  %v1302_v59 = vadd.f32 %v1301_v61, %v17883_v56  ;;  %17887 = vst [vmem:[#allocation47_spill] sm:$0xff] %v14443_v42  ;;  %v17891_v61 = vld [vmem:[#allocation50_spill] sm:$0xff]  ;;  %v17893_v56 = vld [vmem:[#allocation56_spill] sm:$0xff] }
 0x164   : >> { %v11731_v46 = vpop.f32.mrf.mxu1  ;;  %v11781_v63 = vpop.f32.mrf.mxu0 }
 0x165   : >> { %17882 = vst [vmem:[#allocation23_spill] sm:$0xff] %v14435_v11  ;;  %v14438_v15 = vadd.f32 %v1678_v51, %v1302_v59  ;;  %v1313_v45 = vadd.f32 %v11731_v46, %v17885_v2  ;;  %v17890_v11 = vld [vmem:[#allocation42_spill] sm:$0xff]  ;;  %v14461_v2 = vrot.slane %v17894_v4, 1 }
 0x166   : >> { %v1304_v41 = vpop.f32.mrf.mxu1  ;;  %v1681_v53 = vpop.f32.mrf.mxu0 }
 0x167   : >> { %17884 = vst [vmem:[#allocation46_spill] sm:$0xff] %v14438_v15  ;;  %v14445_v21 = vadd.f32 %v11781_v63, %v1313_v45  ;;  %v1305_v43 = vadd.f32 %v1304_v41, %v17889_v24  ;;  %v2404_v24 = vrot.slane %v17891_v61, 1  ;;  %v17896_v41 = vld [vmem:[#allocation58_spill] sm:$0xff] }
 0x168   : >> { %v11734_v17 = vpop.f32.mrf.mxu1  ;;  %v11784_v22 = vpop.f32.mrf.mxu0  ;;  %11933 = vmatmul.mubr.msk.bf16.gmra.mxu1 %vm786_vm4, %v17890_v11  ;;  %11983 = vmatmul.mubr.msk.bf16.gmra.mxu0 %vm786_vm4, %v17891_v61 }
 0x169   : >> { %17888 = vst [vmem:[#allocation48_spill] sm:$0xff] %v14445_v21  ;;  %v14452_v51 = vadd.f32 %v1681_v53, %v1305_v43  ;;  %v1326_v59 = vadd.f32 %v11734_v17, %v17893_v56  ;;  %11936 = vmatprep.mubr.msk.bf16.mxu1 %vm786_vm4, %v14443_v42  ;;  %11986 = vmatprep.mubr.msk.bf16.mxu0 %vm786_vm4, %v17894_v4  ;;  %v17898_v56 = vld [vmem:[#allocation59_spill] sm:$0xff] }
 0x16a   : >> { %v1317_v46 = vpop.f32.mrf.mxu1  ;;  %v1694_v63 = vpop.f32.mrf.mxu0  ;;  %v14470_v15 = vsel %vm1391_vm5, %v2402_v54, %v2404_v24  ;;  %v14474_v11 = vsel %vm1391_vm5, %v2404_v24, %v14461_v2 }
 0x16b   : >> { %17892 = vst [vmem:[#allocation39_spill] sm:$0xff] %v14452_v51  ;;  %v14463_v45 = vadd.f32 %v11784_v22, %v1326_v59  ;;  %v1318_v53 = vadd.f32 %v1317_v46, %v17896_v41  ;;  %17899 = vst [vmem:[#allocation51_spill] sm:$0xff] %v14474_v11  ;;  %v17901_v22 = vld [vmem:[#allocation61_spill] sm:$0xff] }
 0x16c   : >> { %v11735_v43 = vpop.f32.mrf.mxu1  ;;  %v11785_v51 = vpop.f32.mrf.mxu0 }
 0x16d   : >> { %17895 = vst [vmem:[#allocation25_spill] sm:$0xff] %v14463_v45  ;;  %v14466_v17 = vadd.f32 %v1694_v63, %v1318_v53  ;;  %v1329_v21 = vadd.f32 %v11735_v43, %v17898_v56  ;;  %v17903_v63 = vld [vmem:[#allocation63_spill] sm:$0xff]  ;;  %v17905_v56 = vld [vmem:[#allocation65_spill] sm:$0xff] }
 0x16e   : >> { %v1320_v42 = vpop.f32.mrf.mxu1  ;;  %v1697_v61 = vpop.f32.mrf.mxu0 }
 0x16f   : >> { %17897 = vst [vmem:[#allocation49_spill] sm:$0xff] %v14466_v17  ;;  %v14476_v4 = vadd.f32 %v11785_v51, %v1329_v21  ;;  %v1321_v59 = vadd.f32 %v1320_v42, %v17901_v22  ;;  %v17904_v21 = vld [vmem:[#allocation57_spill] sm:$0xff] }
 0x170   : >> { %v11738_v46 = vpop.f32.mrf.mxu1  ;;  %v11788_v41 = vpop.f32.mrf.mxu0  ;;  %11937 = vmatmul.mubr.msk.bf16.gmra.mxu1 %vm786_vm4, %v14470_v15  ;;  %11987 = vmatmul.mubr.msk.bf16.gmra.mxu0 %vm786_vm4, %v14323_v0  ;;  %v2408_v42 = vrot.slane %v17904_v21, 1  ;;  %v17909_v21 = vld [vmem:[#allocation67_spill] sm:$0xff] }
 0x171   : >> { %17900 = vst [vmem:[#allocation53_spill] sm:$0xff] %v14476_v4  ;;  %v14483_v54 = vadd.f32 %v1697_v61, %v1321_v59  ;;  %v1342_v53 = vadd.f32 %v11738_v46, %v17903_v63  ;;  %11940 = vmatprep.mubr.msk.bf16.mxu1 %vm786_vm4, %v14474_v11  ;;  %11990 = vmatprep.mubr.msk.bf16.mxu0 %vm786_vm4, %v14339_v55  ;;  %v17907_v59 = vld [vmem:[#allocation66_spill] sm:$0xff] }
 0x172   : >> { %v1333_v51 = vpop.f32.mrf.mxu1  ;;  %v1710_v24 = vpop.f32.mrf.mxu0  ;;  %v2409_v63 = vsel %vm1391_vm5, %v14461_v2, %v2408_v42 }
 0x173   : >> { %17902 = vst [vmem:[#allocation40_spill] sm:$0xff] %v14483_v54  ;;  %v14491_v43 = vadd.f32 %v11788_v41, %v1342_v53  ;;  %v1334_v22 = vadd.f32 %v1333_v51, %v17905_v56  ;;  %v17911_v51 = vld [vmem:[#allocation68_spill] sm:$0xff]  ;;  %v17913_v56 = vld [vmem:[#allocation69_spill] sm:$0xff] }
 0x174   : >> { %v11739_v4 = vpop.f32.mrf.mxu1  ;;  %v11789_v17 = vpop.f32.mrf.mxu0 }
 0x175   : >> { %v14494_v61 = vadd.f32 %v1710_v24, %v1334_v22  ;;  %v1345_v46 = vadd.f32 %v11739_v4, %v17907_v59  ;;  %v17912_v24 = vld [vmem:[#allocation19_spill] sm:$0xff] }
 0x176   : >> { %v1336_v54 = vpop.f32.mrf.mxu1  ;;  %v1713_v45 = vpop.f32.mrf.mxu0 }
 0x177   : >> { %17906 = vst [vmem:[#allocation54_spill] sm:$0xff] %v14494_v61  ;;  %v14499_v55 = vadd.f32 %v11789_v17, %v1345_v46  ;;  %v1337_v11 = vadd.f32 %v1336_v54, %v17909_v21  ;;  %v17916_v61 = vld [vmem:[#allocation22_spill] sm:$0xff] }
 0x178   : >> { %v11742_v0 = vpop.f32.mrf.mxu1  ;;  %v11792_v41 = vpop.f32.mrf.mxu0  ;;  %11941 = vmatmul.mubr.msk.bf16.gmra.mxu1 %vm786_vm4, %v2409_v63  ;;  %11991 = vmatmul.mubr.msk.bf16.gmra.mxu0 %vm786_vm4, %v14359_v62 }
 0x179   : >> { %17908 = vst [vmem:[#allocation50_spill] sm:$0xff] %v14499_v55  ;;  %v14505_v53 = vadd.f32 %v1713_v45, %v1337_v11  ;;  %v1358_v4 = vadd.f32 %v11742_v0, %v17911_v51  ;;  %11996 = vmatprep.mubr.msk.bf16.mxu1 %vm786_vm4, %v17912_v24  ;;  %12046 = vmatprep.mubr.msk.bf16.mxu0 %vm786_vm4, %v13819_v9  ;;  %v17914_v11 = vld [vmem:[#allocation70_spill] sm:$0xff]  ;;  %v17915_v24 = vld [vmem:[#allocation71_spill] sm:$0xff] }
 0x17a   : >> { %v1349_v17 = vpop.f32.mrf.mxu1  ;;  %v1726_v42 = vpop.f32.mrf.mxu0 }
 0x17b   : >> { %17910 = vst [vmem:[#allocation56_spill] sm:$0xff] %v14505_v53  ;;  %v14512_v54 = vadd.f32 %v11792_v41, %v1358_v4  ;;  %v1350_v22 = vadd.f32 %v1349_v17, %v17913_v56  ;;  %v17917_v17 = vld [vmem:[#allocation26_spill] sm:$0xff] }
 0x17c   : >> { %v11743_v59 = vpop.f32.mrf.mxu1  ;;  %v11793_v46 = vpop.f32.mrf.mxu0 }
 0x17d   : >> { %v14515_v63 = vadd.f32 %v1726_v42, %v1350_v22  ;;  %v1361_v45 = vadd.f32 %v11743_v59, %v17914_v11 }
 0x17e   : >> { %v1352_v21 = vpop.f32.mrf.mxu1  ;;  %v1729_v0 = vpop.f32.mrf.mxu0 }
 0x17f   : >> { %v14518_v51 = vadd.f32 %v11793_v46, %v1361_v45  ;;  %v1353_v53 = vadd.f32 %v1352_v21, %v17915_v24 }
 0x180   : >> { %v11798_v55 = vpop.f32.mrf.mxu1  ;;  %v11848_v9 = vpop.f32.mrf.mxu0  ;;  %11997 = vmatmul.mubr.msk.bf16.vlgmr.msra.gmra.mxu1 %vm786_vm4, %v17916_v61  ;;  %12047 = vmatmul.mubr.msk.bf16.vlgmr.msra.gmra.mxu0 %vm786_vm4, %v13832_v20 }
 0x181   : >> { %v14525_v41 = vadd.f32 %v1729_v0, %v1353_v53  ;;  %v2033_v4 = vadd.f32 %v11798_v55, %v14232_v1  ;;  %12000 = vmatprep.mubr.msk.bf16.mxu1 %vm786_vm4, %v17917_v17  ;;  %12050 = vmatprep.mubr.msk.bf16.mxu0 %vm786_vm4, %v13835_v27  ;;  %v17918_v0 = vld [vmem:[#allocation28_spill] sm:$0xff] }
 0x182   : >> { %v1840_v42 = vpop.f32.mrf.mxu1  ;;  %v2157_v56 = vpop.f32.mrf.mxu0 }
 0x183   : >> { %v14532_v22 = vadd.f32 %v11848_v9, %v2033_v4  ;;  %v2031_v59 = vadd.f32 %v1840_v42, %v14235_v28  ;;  %v17919_v9 = vld [vmem:[#allocation30_spill] sm:$0xff] }
 0x184   : >> { %v11799_v61 = vpop.f32.mrf.mxu1  ;;  %v11849_v46 = vpop.f32.mrf.mxu0 }
 0x185   : >> { %v14535_v11 = vadd.f32 %v2157_v56, %v2031_v59  ;;  %v2034_v20 = vadd.f32 %v11799_v61, %v14238_v50 }
 0x186   : >> { %v1843_v53 = vpop.f32.mrf.mxu1  ;;  %v2160_v1 = vpop.f32.mrf.mxu0 }
 0x187   : >> { %v14538_v55 = vadd.f32 %v11849_v46, %v2034_v20  ;;  %v2032_v45 = vadd.f32 %v1843_v53, %v14245_v25 }
 0x188   : >> { %v11802_v21 = vpop.f32.mrf.mxu1  ;;  %v11852_v27 = vpop.f32.mrf.mxu0  ;;  %12001 = vmatmul.mubr.msk.bf16.gmra.mxu1 %vm786_vm4, %v17918_v0  ;;  %12051 = vmatmul.mubr.msk.bf16.gmra.mxu0 %vm786_vm4, %v13848_v18 }
 0x189   : >> { %v14545_v28 = vadd.f32 %v2160_v1, %v2032_v45  ;;  %v2037_v24 = vadd.f32 %v11802_v21, %v14252_v23  ;;  %12004 = vmatprep.mubr.msk.bf16.mxu1 %vm786_vm4, %v17919_v9  ;;  %12054 = vmatprep.mubr.msk.bf16.mxu0 %vm786_vm4, %v13851_v29  ;;  %v17920_v1 = vld [vmem:[#allocation32_spill] sm:$0xff]  ;;  %v17921_v21 = vld [vmem:[#allocation13_spill] sm:$0xff] }
 0x18a   : >> { %v1856_v50 = vpop.f32.mrf.mxu1  ;;  %v2173_v25 = vpop.f32.mrf.mxu0 }
 0x18b   : >> { %v14552_v4 = vadd.f32 %v11852_v27, %v2037_v24  ;;  %v2035_v17 = vadd.f32 %v1856_v50, %v14255_v38 }
 0x18c   : >> { %v11803_v42 = vpop.f32.mrf.mxu1  ;;  %v11853_v56 = vpop.f32.mrf.mxu0 }
 0x18d   : >> { %v14555_v59 = vadd.f32 %v2173_v25, %v2035_v17  ;;  %v2038_v18 = vadd.f32 %v11803_v42, %v14258_v44 }
 0x18e   : >> { %v1859_v61 = vpop.f32.mrf.mxu1  ;;  %v2176_v23 = vpop.f32.mrf.mxu0 }
 0x18f   : >> { %v14558_v46 = vadd.f32 %v11853_v56, %v2038_v18  ;;  %v2036_v20 = vadd.f32 %v1859_v61, %v14265_v48  ;;  %v17922_v18 = vld [vmem:[#allocation14_spill] sm:$0xff] }
 0x190   : >> { %v11806_v53 = vpop.f32.mrf.mxu1  ;;  %v11856_v29 = vpop.f32.mrf.mxu0  ;;  %12005 = vmatmul.mubr.msk.bf16.gmra.mxu1 %vm786_vm4, %v17920_v1  ;;  %12055 = vmatmul.mubr.msk.bf16.gmra.mxu0 %vm786_vm4, %v13864_v13 }
 0x191   : >> { %v14565_v38 = vadd.f32 %v2176_v23, %v2036_v20  ;;  %v2041_v45 = vadd.f32 %v11806_v53, %v14272_v5  ;;  %12008 = vmatprep.mubr.msk.bf16.mxu1 %vm786_vm4, %v17921_v21  ;;  %12058 = vmatprep.mubr.msk.bf16.mxu0 %vm786_vm4, %v13867_v34  ;;  %v17923_v23 = vld [vmem:[#allocation15_spill] sm:$0xff] }
 0x192   : >> { %v1872_v44 = vpop.f32.mrf.mxu1  ;;  %v2189_v48 = vpop.f32.mrf.mxu0 }
 0x193   : >> { %v14572_v27 = vadd.f32 %v11856_v29, %v2041_v45  ;;  %v2039_v0 = vadd.f32 %v1872_v44, %v14275_v6 }
 0x194   : >> { %v11807_v24 = vpop.f32.mrf.mxu1  ;;  %v11857_v9 = vpop.f32.mrf.mxu0 }
 0x195   : >> { %v14575_v50 = vadd.f32 %v2189_v48, %v2039_v0  ;;  %v2042_v13 = vadd.f32 %v11807_v24, %v14278_v36  ;;  %v17924_v24 = vld [vmem:[#allocation16_spill] sm:$0xff] }
 0x196   : >> { %v1875_v25 = vpop.f32.mrf.mxu1  ;;  %v2192_v5 = vpop.f32.mrf.mxu0 }
 0x197   : >> { %v14578_v17 = vadd.f32 %v11857_v9, %v2042_v13  ;;  %v2040_v42 = vadd.f32 %v1875_v25, %v14285_v37  ;;  %v17925_v13 = vld [vmem:[#allocation17_spill] sm:$0xff] }
 0x198   : >> { %v11810_v56 = vpop.f32.mrf.mxu1  ;;  %v11860_v34 = vpop.f32.mrf.mxu0  ;;  %12009 = vmatmul.mubr.msk.bf16.gmra.mxu1 %vm786_vm4, %v17922_v18  ;;  %12059 = vmatmul.mubr.msk.bf16.gmra.mxu0 %vm786_vm4, %v13880_v19 }
 0x199   : >> { %v14585_v6 = vadd.f32 %v2192_v5, %v2040_v42  ;;  %v2045_v61 = vadd.f32 %v11810_v56, %v14292_v39  ;;  %12012 = vmatprep.mubr.msk.bf16.mxu1 %vm786_vm4, %v17923_v23  ;;  %12062 = vmatprep.mubr.msk.bf16.mxu0 %vm786_vm4, %v17852_v52 }
 0x19a   : >> { %v1888_v36 = vpop.f32.mrf.mxu1  ;;  %v2205_v37 = vpop.f32.mrf.mxu0 }
 0x19b   : >> { %v14592_v20 = vadd.f32 %v11860_v34, %v2045_v61  ;;  %v2043_v53 = vadd.f32 %v1888_v36, %v14295_v7 }
 0x19c   : >> { %v11811_v29 = vpop.f32.mrf.mxu1  ;;  %v11861_v1 = vpop.f32.mrf.mxu0 }
 0x19d   : >> { %v14595_v45 = vadd.f32 %v2205_v37, %v2043_v53  ;;  %v2046_v19 = vadd.f32 %v11811_v29, %v14298_v3  ;;  %v17926_v37 = vld [vmem:[#allocation18_spill] sm:$0xff]  ;;  %v17927_v29 = vld [vmem:[#allocation20_spill] sm:$0xff] }
 0x19e   : >> { %v1891_v21 = vpop.f32.mrf.mxu1  ;;  %v2208_v39 = vpop.f32.mrf.mxu0 }
 0x19f   : >> { %v14598_v44 = vadd.f32 %v11861_v1, %v2046_v19  ;;  %v2044_v48 = vadd.f32 %v1891_v21, %v14305_v8 }
 0x1a0   : >> { %v11814_v0 = vpop.f32.mrf.mxu1  ;;  %v11864_v52 = vpop.f32.mrf.mxu0  ;;  %12013 = vmatmul.mubr.msk.bf16.gmra.mxu1 %vm786_vm4, %v17924_v24  ;;  %12063 = vmatmul.mubr.msk.bf16.gmra.mxu0 %vm786_vm4, %v17853_v49 }
 0x1a1   : >> { %v14605_v7 = vadd.f32 %v2208_v39, %v2044_v48  ;;  %v2049_v9 = vadd.f32 %v11814_v0, %v14312_v58  ;;  %12016 = vmatprep.mubr.msk.bf16.mxu1 %vm786_vm4, %v17925_v13  ;;  %12066 = vmatprep.mubr.msk.bf16.mxu0 %vm786_vm4, %v17856_v47  ;;  %v17928_v13 = vld [vmem:[#allocation24_spill] sm:$0xff] }
 0x1a2   : >> { %v1904_v3 = vpop.f32.mrf.mxu1  ;;  %v2221_v8 = vpop.f32.mrf.mxu0 }
 0x1a3   : >> { %v14612_v25 = vadd.f32 %v11864_v52, %v2049_v9  ;;  %v2047_v5 = vadd.f32 %v1904_v3, %v14316_v32 }
 0x1a4   : >> { %v11815_v42 = vpop.f32.mrf.mxu1  ;;  %v11865_v56 = vpop.f32.mrf.mxu0 }
 0x1a5   : >> { %v14615_v34 = vadd.f32 %v2221_v8, %v2047_v5  ;;  %v2050_v49 = vadd.f32 %v11815_v42, %v14319_v40  ;;  %v17929_v8 = vld [vmem:[#allocation27_spill] sm:$0xff] }
 0x1a6   : >> { %v1907_v18 = vpop.f32.mrf.mxu1  ;;  %v2224_v58 = vpop.f32.mrf.mxu0 }
 0x1a7   : >> { %v14618_v61 = vadd.f32 %v11865_v56, %v2050_v49  ;;  %v2048_v23 = vadd.f32 %v1907_v18, %v14331_v31 }
 0x1a8   : >> { %v11818_v36 = vpop.f32.mrf.mxu1  ;;  %v11868_v47 = vpop.f32.mrf.mxu0  ;;  %12017 = vmatmul.mubr.msk.bf16.gmra.mxu1 %vm786_vm4, %v17926_v37  ;;  %12067 = vmatmul.mubr.msk.bf16.gmra.mxu0 %vm786_vm4, %v17858_v30 }
 0x1a9   : >> { %v14625_v32 = vadd.f32 %v2224_v58, %v2048_v23  ;;  %v2053_v53 = vadd.f32 %v11818_v36, %v14341_v35  ;;  %12020 = vmatprep.mubr.msk.bf16.mxu1 %vm786_vm4, %v17927_v29  ;;  %12070 = vmatprep.mubr.msk.bf16.mxu0 %vm786_vm4, %v17865_v26  ;;  %v17932_v29 = vld [vmem:[#allocation29_spill] sm:$0xff] }
 0x1aa   : >> { %v1920_v40 = vpop.f32.mrf.mxu1  ;;  %v2237_v31 = vpop.f32.mrf.mxu0 }
 0x1ab   : >> { %v14632_v1 = vadd.f32 %v11868_v47, %v2053_v53  ;;  %v2051_v19 = vadd.f32 %v1920_v40, %v14351_v60  ;;  %v17931_v47 = vld [vmem:[#allocation44_spill] sm:$0xff]  ;;  %v17933_v40 = vld [vmem:[#allocation41_spill] sm:$0xff] }
 0x1ac   : >> { %v11819_v21 = vpop.f32.mrf.mxu1  ;;  %v11869_v39 = vpop.f32.mrf.mxu0 }
 0x1ad   : >> { %v14635_v48 = vadd.f32 %v2237_v31, %v2051_v19  ;;  %v2054_v30 = vadd.f32 %v11819_v21, %v14356_v57  ;;  %v17934_v31 = vld [vmem:[#allocation37_spill] sm:$0xff]  ;;  %v17935_v21 = vld [vmem:[#allocation31_spill] sm:$0xff] }
 0x1ae   : >> { %v1923_v0 = vpop.f32.mrf.mxu1  ;;  %v2240_v35 = vpop.f32.mrf.mxu0 }
 0x1af   : >> { %v14638_v52 = vadd.f32 %v11869_v39, %v2054_v30  ;;  %v2052_v24 = vadd.f32 %v1923_v0, %v14373_v12  ;;  %v17936_v39 = vld [vmem:[#allocation42_spill] sm:$0xff] }
 0x1b0   : >> { %v11822_v9 = vpop.f32.mrf.mxu1  ;;  %v11872_v26 = vpop.f32.mrf.mxu0  ;;  %12021 = vmatmul.mubr.msk.bf16.gmra.mxu1 %vm786_vm4, %v17928_v13  ;;  %12071 = vmatmul.mubr.msk.bf16.gmra.mxu0 %vm786_vm4, %v17869_v33  ;;  %v17930_v33 = vld [vmem:[#allocation74_spill] sm:$0xff] }
 0x1b1   : >> { %v14645_v60 = vadd.f32 %v2240_v35, %v2052_v24  ;;  %v2057_v3 = vadd.f32 %v11822_v9, %v14382_v14  ;;  %12024 = vmatprep.mubr.msk.bf16.mxu1 %vm786_vm4, %v17929_v8  ;;  %12074 = vmatprep.mubr.msk.bf16.mxu0 %vm786_vm4, %v17877_v10  ;;  %v17937_v24 = vld [vmem:[#allocation21_spill] sm:$0xff] }
 0x1b2   : >> { %v1936_v57 = vpop.f32.mrf.mxu1  ;;  %v2253_v12 = vpop.f32.mrf.mxu0  ;;  %v17938_v8 = vld [vmem:[#allocation45_spill] sm:$0xff] }
 0x1b3   : >> { %v14652_v5 = vadd.f32 %v11872_v26, %v2057_v3  ;;  %v2055_v42 = vadd.f32 %v1936_v57, %v14388_v16 }
 0x1b4   : >> { %v11823_v56 = vpop.f32.mrf.mxu1  ;;  %v11873_v49 = vpop.f32.mrf.mxu0 }
 0x1b5   : >> { %v14655_v18 = vadd.f32 %v2253_v12, %v2055_v42  ;;  %v2058_v58 = vadd.f32 %v11823_v56, %v17930_v33 }
 0x1b6   : >> { %v1939_v23 = vpop.f32.mrf.mxu1  ;;  %v2256_v14 = vpop.f32.mrf.mxu0 }
 0x1b7   : >> { %v14658_v36 = vadd.f32 %v11873_v49, %v2058_v58  ;;  %v2056_v37 = vadd.f32 %v1939_v23, %v17931_v47  ;;  %v17939_v49 = vld [vmem:[#allocation38_spill] sm:$0xff]  ;;  %v17941_v47 = vld [vmem:[#allocation47_spill] sm:$0xff] }
 0x1b8   : >> { %v11826_v53 = vpop.f32.mrf.mxu1  ;;  %v11876_v10 = vpop.f32.mrf.mxu0  ;;  %12025 = vmatmul.mubr.msk.bf16.gmra.mxu1 %vm786_vm4, %v17932_v29  ;;  %12075 = vmatmul.mubr.msk.bf16.gmra.mxu0 %vm786_vm4, %v17933_v40  ;;  %v17943_v29 = vld [vmem:[#allocation60_spill] sm:$0xff] }
 0x1b9   : >> { %v14665_v16 = vadd.f32 %v2256_v14, %v2056_v37  ;;  %v2061_v19 = vadd.f32 %v11826_v53, %v17934_v31  ;;  %12028 = vmatprep.mubr.msk.bf16.mxu1 %vm786_vm4, %v17935_v21  ;;  %12078 = vmatprep.mubr.msk.bf16.mxu0 %vm786_vm4, %v17936_v39  ;;  %v17940_v14 = vld [vmem:[#allocation55_spill] sm:$0xff]  ;;  %v17944_v21 = vld [vmem:[#allocation46_spill] sm:$0xff] }
 0x1ba   : >> { %v1952_v30 = vpop.f32.mrf.mxu1  ;;  %v2269_v0 = vpop.f32.mrf.mxu0  ;;  %v17942_v53 = vld [vmem:[#allocation23_spill] sm:$0xff] }
 0x1bb   : >> { %v14672_v35 = vadd.f32 %v11876_v10, %v2061_v19  ;;  %v2059_v9 = vadd.f32 %v1952_v30, %v17937_v24 }
 0x1bc   : >> { %v11827_v26 = vpop.f32.mrf.mxu1  ;;  %v11877_v13 = vpop.f32.mrf.mxu0 }
 0x1bd   : >> { %v14675_v3 = vadd.f32 %v2269_v0, %v2059_v9  ;;  %v2062_v57 = vadd.f32 %v11827_v26, %v17938_v8  ;;  %v17945_v9 = vld [vmem:[#allocation48_spill] sm:$0xff] }
 0x1be   : >> { %v1955_v12 = vpop.f32.mrf.mxu1  ;;  %v2272_v42 = vpop.f32.mrf.mxu0 }
 0x1bf   : >> { %v14678_v56 = vadd.f32 %v11877_v13, %v2062_v57  ;;  %v2060_v33 = vadd.f32 %v1955_v12, %v17939_v49  ;;  %v17946_v57 = vld [vmem:[#allocation33_spill] sm:$0xff]  ;;  %v17947_v12 = vld [vmem:[#allocation64_spill] sm:$0xff] }
 0x1c0   : >> { %v11830_v58 = vpop.f32.mrf.mxu1  ;;  %v11880_v23 = vpop.f32.mrf.mxu0  ;;  %12029 = vmatmul.mubr.msk.bf16.gmra.mxu1 %vm786_vm4, %v17940_v14  ;;  %12079 = vmatmul.mubr.msk.bf16.gmra.mxu0 %vm786_vm4, %v17941_v47  ;;  %v17948_v49 = vld [vmem:[#allocation72_spill] sm:$0xff]  ;;  %v17950_v14 = vld [vmem:[#allocation39_spill] sm:$0xff] }
 0x1c1   : >> { %v14685_v37 = vadd.f32 %v2272_v42, %v2060_v33  ;;  %v2065_v10 = vadd.f32 %v11830_v58, %v17942_v53  ;;  %12032 = vmatprep.mubr.msk.bf16.mxu1 %vm786_vm4, %v17943_v29  ;;  %12082 = vmatprep.mubr.msk.bf16.mxu0 %vm786_vm4, %v14470_v15  ;;  %v2994_v42 = vsel %vm589_vm3, %v17947_v12, %v17946_v57  ;;  %v17949_v15 = vrot.slane %v17948_v49, 1  ;;  %v560_v58 = vld [vmem:[%s13478_s24 + $0x1e0] sm:$0xff]  ;;  %v17951_v29 = vld [vmem:[#allocation62_spill] sm:$0xff]  ;;  %s14927_s24 = scalar_lea.vmem [#allocation2], %s498_s18 }
 0x1c2   : >> { %v1968_v40 = vpop.f32.mrf.mxu1  ;;  %v2285_v31 = vpop.f32.mrf.mxu0  ;;  %v3009_v49 = vshrl.u32 %v14359_v62, 16 }
 0x1c3   : >> { %v14692_v19 = vadd.f32 %v11880_v23, %v2065_v10  ;;  %v2063_v39 = vadd.f32 %v1968_v40, %v17944_v21  ;;  %v3312_v33 = vsel %vm1391_vm5, %v14461_v2, %v17949_v15  ;;  %v17952_v40 = vld [vmem:[#allocation51_spill] sm:$0xff]  ;;  %v17953_v21 = vld [vmem:[#allocation25_spill] sm:$0xff]  ;;  %v2988_v2 = vpack.c.bf16 %v560_v58, %v560_v58 }
 0x1c4   : >> { %v11831_v30 = vpop.f32.mrf.mxu1  ;;  %v11881_v0 = vpop.f32.mrf.mxu0 }
 0x1c5   : >> { %v14695_v24 = vadd.f32 %v2285_v31, %v2063_v39  ;;  %v2066_v26 = vadd.f32 %v11831_v30, %v17945_v9 }
 0x1c6   : >> { %v1971_v13 = vpop.f32.mrf.mxu1  ;;  %v2288_v8 = vpop.f32.mrf.mxu0 }
 0x1c7   : >> { %v14706_v23 = vadd.f32 %v11881_v0, %v2066_v26  ;;  %v2064_v47 = vadd.f32 %v1971_v13, %v17950_v14  ;;  %v17954_v26 = vld [vmem:[#allocation49_spill] sm:$0xff] }
 0x1c8   : >> { %v11834_v53 = vpop.f32.mrf.mxu1  ;;  %v11884_v10 = vpop.f32.mrf.mxu0  ;;  %12033 = vmatmul.mubr.msk.bf16.gmra.mxu1 %vm786_vm4, %v17951_v29  ;;  %12083 = vmatmul.mubr.msk.bf16.gmra.mxu0 %vm786_vm4, %v17952_v40 }
 0x1c9   : >> { %v14713_v31 = vadd.f32 %v2288_v8, %v2064_v47  ;;  %v2069_v39 = vadd.f32 %v11834_v53, %v17953_v21  ;;  %12036 = vmatprep.mubr.msk.bf16.mxu1 %vm786_vm4, %v2994_v42  ;;  %12086 = vmatprep.mubr.msk.bf16.mxu0 %vm786_vm4, %v3312_v33  ;;  %v17956_v8 = vld [vmem:[#allocation53_spill] sm:$0xff]  ;;  %v3013_v47 = vshll.u32 %v2988_v2, 16  ;;  %v17958_v33 = vld [vmem:[#allocation40_spill] sm:$0xff]  ;;  %v17959_v21 = vld [vmem:[#allocation35_spill] sm:$0xff] }
 0x1ca   : >> { %v1984_v30 = vpop.f32.mrf.mxu1  ;;  %v2301_v0 = vpop.f32.mrf.mxu0 }
 0x1cb   : >> { %v14718_v9 = vadd.f32 %v11884_v10, %v2069_v39  ;;  %v2067_v13 = vadd.f32 %v1984_v30, %v17954_v26  ;;  %v17960_v39 = vld [vmem:[#allocation34_spill] sm:$0xff]  ;;  %v17961_v30 = vld [vmem:[#allocation36_spill] sm:$0xff] }
 0x1cc   : >> { %v11835_v57 = vpop.f32.mrf.mxu1  ;;  %v11885_v12 = vpop.f32.mrf.mxu0 }
 0x1cd   : >> { %v14722_v15 = vadd.f32 %v2301_v0, %v2067_v13  ;;  %v2070_v14 = vadd.f32 %v11835_v57, %v17956_v8  ;;  %v3011_v0 = vor.u32 %v3009_v49, %v17961_v30  ;;  %v17962_v57 = vld [vmem:[#allocation43_spill] sm:$0xff]  ;;  %v3015_v8 = vrot.slane %v3013_v47, 1 }
 0x1ce   : >> { %v1987_v53 = vpop.f32.mrf.mxu1  ;;  %v2304_v42 = vpop.f32.mrf.mxu0  ;;  %v17967_v30 = vrot.slane %v14359_v62, 1 }
 0x1cf   : >> { %17955 = vst [vmem:[#allocation52_spill] sm:$0xff] %v14722_v15  ;;  %v14725_v29 = vadd.f32 %v11885_v12, %v2070_v14  ;;  %v2068_v58 = vadd.f32 %v1987_v53, %v17958_v33  ;;  %v17963_v12 = vld [vmem:[#allocation73_spill] sm:$0xff]  ;;  %v3317_v14 = vrot.slane %v2988_v2, 1 }
 0x1d0   : >> { %v11838_v40 = vpop.f32.mrf.mxu1  ;;  %v11888_v10 = vpop.f32.mrf.mxu0  ;;  %12037 = vmatmul.mubr.msk.bf16.gmra.mxu1 %vm786_vm4, %v17959_v21  ;;  %12087 = vmatmul.mubr.msk.bf16.gmra.mxu0 %vm786_vm4, %v17960_v39 }
 0x1d1   : >> { %17957 = vst [vmem:[#allocation58_spill] sm:$0xff] %v14725_v29  ;;  %v14733_v26 = vadd.f32 %v2304_v42, %v2068_v58  ;;  %v2073_v13 = vadd.f32 %v11838_v40, %v14491_v43  ;;  %12040 = vmatprep.mubr.msk.bf16.mxu1 %vm786_vm4, %v17962_v57  ;;  %12090 = vmatprep.mubr.msk.bf16.mxu0 %vm786_vm4, %v17963_v12  ;;  %v17965_v29 = vld [vmem:[#allocation54_spill] sm:$0xff] }
 0x1d2   : >> { %v2000_v53 = vpop.f32.mrf.mxu1  ;;  %v2317_v33 = vpop.f32.mrf.mxu0  ;;  %v17966_v58 = vld [vmem:[#allocation50_spill] sm:$0xff]  ;;  %v3016_v40 = vsel %vm589_vm3, %v3011_v0, %v3015_v8  ;;  %v3318_v57 = vsel %vm1391_vm5, %v17967_v30, %v3317_v14 }
 0x1d3   : >> { %v14740_v21 = vadd.f32 %v11888_v10, %v2073_v13  ;;  %v2071_v39 = vadd.f32 %v2000_v53, %v17965_v29  ;;  %v17968_v10 = vld [vmem:[#allocation56_spill] sm:$0xff] }
 0x1d4   : >> { %v11839_v15 = vpop.f32.mrf.mxu1  ;;  %v11889_v49 = vpop.f32.mrf.mxu0 }
 0x1d5   : >> { %17964 = vst [vmem:[#allocation59_spill] sm:$0xff] %v14740_v21  ;;  %v14743_v42 = vadd.f32 %v2317_v33, %v2071_v39  ;;  %v2074_v43 = vadd.f32 %v11839_v15, %v17966_v58 }
 0x1d6   : >> { %v2003_v47 = vpop.f32.mrf.mxu1  ;;  %v2320_v2 = vpop.f32.mrf.mxu0 }
 0x1d7   : >> { %v14750_v12 = vadd.f32 %v11889_v49, %v2074_v43  ;;  %v2072_v13 = vadd.f32 %v2003_v47, %v17968_v10 }
 0x1d8   : >> { %v11842_v21 = vpop.f32.mrf.mxu1  ;;  %v11892_v29 = vpop.f32.mrf.mxu0  ;;  %12041 = vmatmul.mubr.msk.bf16.gmra.mxu1 %vm786_vm4, %v3016_v40  ;;  %12091 = vmatmul.mubr.msk.bf16.gmra.mxu0 %vm786_vm4, %v3318_v57 }
 0x1d9   : >> { %v14755_v53 = vadd.f32 %v2320_v2, %v2072_v13  ;;  %v2077_v15 = vadd.f32 %v11842_v21, %v14512_v54 }
 0x1da   : >> { %v2016_v0 = vpop.f32.mrf.mxu1  ;;  %v2333_v62 = vpop.f32.mrf.mxu0 }
 0x1db   : >> { %v14758_v8 = vadd.f32 %v11892_v29, %v2077_v15  ;;  %v2075_v14 = vadd.f32 %v2016_v0, %v14515_v63 }
 0x1dc   : >> { %v11843_v33 = vpop.f32.mrf.mxu1  ;;  %v11893_v39 = vpop.f32.mrf.mxu0 }
 0x1dd   : >> { %v14761_v49 = vadd.f32 %v2333_v62, %v2075_v14  ;;  %v2078_v58 = vadd.f32 %v11843_v33, %v14518_v51 }
 0x1de   : >> { %v2019_v43 = vpop.f32.mrf.mxu1  ;;  %v2336_v40 = vpop.f32.mrf.mxu0 }
 0x1df   : >> { %v14764_v30 = vadd.f32 %v11893_v39, %v2078_v58  ;;  %v2076_v57 = vadd.f32 %v2019_v43, %v14525_v41 }
 0x1e0   : >> { %v11898_v47 = vpop.f32.mrf.mxu1  ;;  %v11948_v54 = vpop.f32.mrf.mxu0 }
 0x1e1   : >> { %v14767_v21 = vadd.f32 %v2336_v40, %v2076_v57  ;;  %v2652_v2 = vadd.f32 %v11898_v47, %v14532_v22 }
 0x1e2   : >> { %v2459_v10 = vpop.f32.mrf.mxu1  ;;  %v2749_v63 = vpop.f32.mrf.mxu0 }
 0x1e3   : >> { %v14770_v13 = vadd.f32 %v11948_v54, %v2652_v2  ;;  %v2650_v29 = vadd.f32 %v2459_v10, %v14535_v11 }
 0x1e4   : >> { %v11899_v15 = vpop.f32.mrf.mxu1  ;;  %v11949_v51 = vpop.f32.mrf.mxu0 }
 0x1e5   : >> { %v14773_v0 = vadd.f32 %v2749_v63, %v2650_v29  ;;  %v2653_v62 = vadd.f32 %v11899_v15, %v14538_v55 }
 0x1e6   : >> { %v2462_v14 = vpop.f32.mrf.mxu1  ;;  %v2752_v41 = vpop.f32.mrf.mxu0 }
 0x1e7   : >> { %v14776_v33 = vadd.f32 %v11949_v51, %v2653_v62  ;;  %v2651_v39 = vadd.f32 %v2462_v14, %v14545_v28 }
 0x1e8   : >> { %v11902_v58 = vpop.f32.mrf.mxu1  ;;  %v11952_v22 = vpop.f32.mrf.mxu0 }
 0x1e9   : >> { %v14779_v43 = vadd.f32 %v2752_v41, %v2651_v39  ;;  %v2656_v40 = vadd.f32 %v11902_v58, %v14552_v4 }
 0x1ea   : >> { %v2475_v57 = vpop.f32.mrf.mxu1  ;;  %v2765_v11 = vpop.f32.mrf.mxu0 }
 0x1eb   : >> { %v14782_v47 = vadd.f32 %v11952_v22, %v2656_v40  ;;  %v2654_v54 = vadd.f32 %v2475_v57, %v14555_v59 }
 0x1ec   : >> { %v11903_v2 = vpop.f32.mrf.mxu1  ;;  %v11953_v55 = vpop.f32.mrf.mxu0 }
 0x1ed   : >> { %v14785_v10 = vadd.f32 %v2765_v11, %v2654_v54  ;;  %v2657_v63 = vadd.f32 %v11903_v2, %v14558_v46 }
 0x1ee   : >> { %v2478_v29 = vpop.f32.mrf.mxu1  ;;  %v2768_v28 = vpop.f32.mrf.mxu0 }
 0x1ef   : >> { %v14788_v15 = vadd.f32 %v11953_v55, %v2657_v63  ;;  %v2655_v51 = vadd.f32 %v2478_v29, %v14565_v38 }
 0x1f0   : >> { %v11906_v62 = vpop.f32.mrf.mxu1  ;;  %v11956_v4 = vpop.f32.mrf.mxu0 }
 0x1f1   : >> { %v14791_v14 = vadd.f32 %v2768_v28, %v2655_v51  ;;  %v2660_v41 = vadd.f32 %v11906_v62, %v14572_v27 }
 0x1f2   : >> { %v2491_v39 = vpop.f32.mrf.mxu1  ;;  %v2781_v59 = vpop.f32.mrf.mxu0 }
 0x1f3   : >> { %v14794_v58 = vadd.f32 %v11956_v4, %v2660_v41  ;;  %v2658_v22 = vadd.f32 %v2491_v39, %v14575_v50 }
 0x1f4   : >> { %v11907_v40 = vpop.f32.mrf.mxu1  ;;  %v11957_v46 = vpop.f32.mrf.mxu0 }
 0x1f5   : >> { %v14797_v57 = vadd.f32 %v2781_v59, %v2658_v22  ;;  %v2661_v11 = vadd.f32 %v11907_v40, %v14578_v17 }
 0x1f6   : >> { %v2494_v54 = vpop.f32.mrf.mxu1  ;;  %v2784_v38 = vpop.f32.mrf.mxu0 }
 0x1f7   : >> { %v14800_v2 = vadd.f32 %v11957_v46, %v2661_v11  ;;  %v2659_v55 = vadd.f32 %v2494_v54, %v14585_v6 }
 0x1f8   : >> { %v11910_v63 = vpop.f32.mrf.mxu1  ;;  %v11960_v27 = vpop.f32.mrf.mxu0 }
 0x1f9   : >> { %v14803_v29 = vadd.f32 %v2784_v38, %v2659_v55  ;;  %v2664_v28 = vadd.f32 %v11910_v63, %v14592_v20 }
 0x1fa   : >> { %v2507_v51 = vpop.f32.mrf.mxu1  ;;  %v2797_v50 = vpop.f32.mrf.mxu0 }
 0x1fb   : >> { %v14806_v62 = vadd.f32 %v11960_v27, %v2664_v28  ;;  %v2662_v4 = vadd.f32 %v2507_v51, %v14595_v45 }
 0x1fc   : >> { %v11911_v41 = vpop.f32.mrf.mxu1  ;;  %v11961_v17 = vpop.f32.mrf.mxu0 }
 0x1fd   : >> { %v14809_v39 = vadd.f32 %v2797_v50, %v2662_v4  ;;  %v2665_v59 = vadd.f32 %v11911_v41, %v14598_v44 }
 0x1fe   : >> { %v2510_v22 = vpop.f32.mrf.mxu1  ;;  %v2800_v6 = vpop.f32.mrf.mxu0 }
 0x1ff   : >> { %v14812_v40 = vadd.f32 %v11961_v17, %v2665_v59  ;;  %v2663_v46 = vadd.f32 %v2510_v22, %v14605_v7 }
 0x200   : >> { %v11914_v11 = vpop.f32.mrf.mxu1  ;;  %v11964_v20 = vpop.f32.mrf.mxu0 }
 0x201   : >> { %v14815_v54 = vadd.f32 %v2800_v6, %v2663_v46  ;;  %v2668_v38 = vadd.f32 %v11914_v11, %v14612_v25 }
 0x202   : >> { %v2523_v55 = vpop.f32.mrf.mxu1  ;;  %v2813_v45 = vpop.f32.mrf.mxu0 }
 0x203   : >> { %v14818_v63 = vadd.f32 %v11964_v20, %v2668_v38  ;;  %v2666_v27 = vadd.f32 %v2523_v55, %v14615_v34 }
 0x204   : >> { %v11915_v28 = vpop.f32.mrf.mxu1  ;;  %v11965_v44 = vpop.f32.mrf.mxu0 }
 0x205   : >> { %v14821_v51 = vadd.f32 %v2813_v45, %v2666_v27  ;;  %v2669_v50 = vadd.f32 %v11915_v28, %v14618_v61 }
 0x206   : >> { %v2526_v4 = vpop.f32.mrf.mxu1  ;;  %v2816_v7 = vpop.f32.mrf.mxu0 }
 0x207   : >> { %v14824_v41 = vadd.f32 %v11965_v44, %v2669_v50  ;;  %v2667_v17 = vadd.f32 %v2526_v4, %v14625_v32 }
 0x208   : >> { %v11918_v59 = vpop.f32.mrf.mxu1  ;;  %v11968_v25 = vpop.f32.mrf.mxu0 }
 0x209   : >> { %v14827_v22 = vadd.f32 %v2816_v7, %v2667_v17  ;;  %v2672_v6 = vadd.f32 %v11918_v59, %v14632_v1 }
 0x20a   : >> { %v2539_v46 = vpop.f32.mrf.mxu1  ;;  %v2829_v34 = vpop.f32.mrf.mxu0 }
 0x20b   : >> { %v14830_v11 = vadd.f32 %v11968_v25, %v2672_v6  ;;  %v2670_v20 = vadd.f32 %v2539_v46, %v14635_v48 }
 0x20c   : >> { %v11919_v38 = vpop.f32.mrf.mxu1  ;;  %v11969_v61 = vpop.f32.mrf.mxu0 }
 0x20d   : >> { %v14833_v55 = vadd.f32 %v2829_v34, %v2670_v20  ;;  %v2673_v45 = vadd.f32 %v11919_v38, %v14638_v52 }
 0x20e   : >> { %v2542_v27 = vpop.f32.mrf.mxu1  ;;  %v2832_v32 = vpop.f32.mrf.mxu0 }
 0x20f   : >> { %v14836_v28 = vadd.f32 %v11969_v61, %v2673_v45  ;;  %v2671_v44 = vadd.f32 %v2542_v27, %v14645_v60 }
 0x210   : >> { %v11922_v50 = vpop.f32.mrf.mxu1  ;;  %v11972_v1 = vpop.f32.mrf.mxu0 }
 0x211   : >> { %v14839_v4 = vadd.f32 %v2832_v32, %v2671_v44  ;;  %v2676_v7 = vadd.f32 %v11922_v50, %v14652_v5 }
 0x212   : >> { %v2555_v17 = vpop.f32.mrf.mxu1  ;;  %v2845_v48 = vpop.f32.mrf.mxu0 }
 0x213   : >> { %v14842_v59 = vadd.f32 %v11972_v1, %v2676_v7  ;;  %v2674_v25 = vadd.f32 %v2555_v17, %v14655_v18 }
 0x214   : >> { %v11923_v6 = vpop.f32.mrf.mxu1  ;;  %v11973_v52 = vpop.f32.mrf.mxu0 }
 0x215   : >> { %v14845_v46 = vadd.f32 %v2845_v48, %v2674_v25  ;;  %v2677_v34 = vadd.f32 %v11923_v6, %v14658_v36 }
 0x216   : >> { %v2558_v20 = vpop.f32.mrf.mxu1  ;;  %v2848_v60 = vpop.f32.mrf.mxu0 }
 0x217   : >> { %v14848_v38 = vadd.f32 %v11973_v52, %v2677_v34  ;;  %v2675_v61 = vadd.f32 %v2558_v20, %v14665_v16 }
 0x218   : >> { %v11926_v45 = vpop.f32.mrf.mxu1  ;;  %v11976_v5 = vpop.f32.mrf.mxu0 }
 0x219   : >> { %v14851_v27 = vadd.f32 %v2848_v60, %v2675_v61  ;;  %v2680_v32 = vadd.f32 %v11926_v45, %v14672_v35 }
 0x21a   : >> { %v2571_v44 = vpop.f32.mrf.mxu1  ;;  %v2861_v18 = vpop.f32.mrf.mxu0 }
 0x21b   : >> { %v14854_v50 = vadd.f32 %v11976_v5, %v2680_v32  ;;  %v2678_v1 = vadd.f32 %v2571_v44, %v14675_v3 }
 0x21c   : >> { %v11927_v7 = vpop.f32.mrf.mxu1  ;;  %v11977_v36 = vpop.f32.mrf.mxu0 }
 0x21d   : >> { %v14857_v17 = vadd.f32 %v2861_v18, %v2678_v1  ;;  %v2681_v48 = vadd.f32 %v11927_v7, %v14678_v56 }
 0x21e   : >> { %v2574_v25 = vpop.f32.mrf.mxu1  ;;  %v2864_v16 = vpop.f32.mrf.mxu0 }
 0x21f   : >> { %v14860_v6 = vadd.f32 %v11977_v36, %v2681_v48  ;;  %v2679_v52 = vadd.f32 %v2574_v25, %v14685_v37 }
 0x220   : >> { %v11930_v34 = vpop.f32.mrf.mxu1  ;;  %v11980_v35 = vpop.f32.mrf.mxu0 }
 0x221   : >> { %v14863_v20 = vadd.f32 %v2864_v16, %v2679_v52  ;;  %v2684_v60 = vadd.f32 %v11930_v34, %v14692_v19 }
 0x222   : >> { %v2587_v61 = vpop.f32.mrf.mxu1  ;;  %v2877_v3 = vpop.f32.mrf.mxu0 }
 0x223   : >> { %v14866_v45 = vadd.f32 %v11980_v35, %v2684_v60  ;;  %v2682_v5 = vadd.f32 %v2587_v61, %v14695_v24  ;;  %v17969_v35 = vld [vmem:[#allocation52_spill] sm:$0xff] }
 0x224   : >> { %v11931_v32 = vpop.f32.mrf.mxu1  ;;  %v11981_v56 = vpop.f32.mrf.mxu0 }
 0x225   : >> { %v14869_v44 = vadd.f32 %v2877_v3, %v2682_v5  ;;  %v2685_v18 = vadd.f32 %v11931_v32, %v14706_v23  ;;  %v17970_v5 = vld [vmem:[#allocation58_spill] sm:$0xff] }
 0x226   : >> { %v2590_v1 = vpop.f32.mrf.mxu1  ;;  %v2880_v37 = vpop.f32.mrf.mxu0 }
 0x227   : >> { %v14872_v7 = vadd.f32 %v11981_v56, %v2685_v18  ;;  %v2683_v36 = vadd.f32 %v2590_v1, %v14713_v31 }
 0x228   : >> { %v11934_v48 = vpop.f32.mrf.mxu1  ;;  %v11984_v19 = vpop.f32.mrf.mxu0 }
 0x229   : >> { %v14875_v25 = vadd.f32 %v2880_v37, %v2683_v36  ;;  %v2688_v16 = vadd.f32 %v11934_v48, %v14718_v9  ;;  %v17971_v48 = vld [vmem:[#allocation59_spill] sm:$0xff] }
 0x22a   : >> { %v2603_v52 = vpop.f32.mrf.mxu1  ;;  %v2893_v24 = vpop.f32.mrf.mxu0 }
 0x22b   : >> { %v14878_v34 = vadd.f32 %v11984_v19, %v2688_v16  ;;  %v2686_v60 = vadd.f32 %v2603_v52, %v17969_v35 }
 0x22c   : >> { %v11935_v61 = vpop.f32.mrf.mxu1  ;;  %v11985_v23 = vpop.f32.mrf.mxu0 }
 0x22d   : >> { %v14881_v3 = vadd.f32 %v2893_v24, %v2686_v60  ;;  %v2689_v32 = vadd.f32 %v11935_v61, %v17970_v5 }
 0x22e   : >> { %v2606_v56 = vpop.f32.mrf.mxu1  ;;  %v2896_v31 = vpop.f32.mrf.mxu0 }
 0x22f   : >> { %v14884_v18 = vadd.f32 %v11985_v23, %v2689_v32  ;;  %v2687_v1 = vadd.f32 %v2606_v56, %v14733_v26 }
 0x230   : >> { %v11938_v37 = vpop.f32.mrf.mxu1  ;;  %v11988_v9 = vpop.f32.mrf.mxu0 }
 0x231   : >> { %v14887_v36 = vadd.f32 %v2896_v31, %v2687_v1  ;;  %v2692_v19 = vadd.f32 %v11938_v37, %v17971_v48 }
 0x232   : >> { %v2619_v16 = vpop.f32.mrf.mxu1  ;;  %v2909_v52 = vpop.f32.mrf.mxu0 }
 0x233   : >> { %v14890_v35 = vadd.f32 %v11988_v9, %v2692_v19  ;;  %v2690_v24 = vadd.f32 %v2619_v16, %v14743_v42 }
 0x234   : >> { %v11939_v60 = vpop.f32.mrf.mxu1  ;;  %v11989_v61 = vpop.f32.mrf.mxu0 }
 0x235   : >> { %v14893_v5 = vadd.f32 %v2909_v52, %v2690_v24  ;;  %v2693_v23 = vadd.f32 %v11939_v60, %v14750_v12 }
 0x236   : >> { %v2622_v32 = vpop.f32.mrf.mxu1  ;;  %v2912_v26 = vpop.f32.mrf.mxu0 }
 0x237   : >> { %v14896_v56 = vadd.f32 %v11989_v61, %v2693_v23  ;;  %v2691_v31 = vadd.f32 %v2622_v32, %v14755_v53 }
 0x238   : >> { %v11942_v1 = vpop.f32.mrf.mxu1  ;;  %v11992_v37 = vpop.f32.mrf.mxu0 }
 0x239   : >> { %v14899_v48 = vadd.f32 %v2912_v26, %v2691_v31  ;;  %v2696_v9 = vadd.f32 %v11942_v1, %v14758_v8 }
 0x23a   : >> { %v2635_v19 = vpop.f32.mrf.mxu1  ;;  %v2925_v42 = vpop.f32.mrf.mxu0 }
 0x23b   : >> { %v14902_v16 = vadd.f32 %v11992_v37, %v2696_v9  ;;  %v2694_v52 = vadd.f32 %v2635_v19, %v14761_v49 }
 0x23c   : >> { %v11943_v24 = vpop.f32.mrf.mxu1  ;;  %v11993_v12 = vpop.f32.mrf.mxu0 }
 0x23d   : >> { %v14905_v60 = vadd.f32 %v2925_v42, %v2694_v52  ;;  %v2697_v61 = vadd.f32 %v11943_v24, %v14764_v30  ;;  %v14916_v52 = vstv %s13419_s21  ;;  %s15192_s21 = smov (%p494_p1), 0  }
 0x23e   : >> { %v2638_v53 = vpop.f32.mrf.mxu1  ;;  %v2928_v23 = vpop.f32.mrf.mxu0 }
 0x23f   : >> { %17972 = vst [vmem:[#allocation61_spill] sm:$0xff] %v14905_v60  ;;  %v14908_v32 = vadd.f32 %v11993_v12, %v2697_v61  ;;  %v2695_v26 = vadd.f32 %v2638_v53, %v14767_v21  ;;  %v17973_v60 = vld [vmem:[#allocation12_spill] sm:$0xff] }
 0x240   : >> { %v11998_v8 = vpop.f32.mrf.mxu1  ;;  %v12048_v31 = vpop.f32.mrf.mxu0 }
 0x241   : >> { %v14911_v1 = vadd.f32 %v2928_v23, %v2695_v26  ;;  %v3259_v37 = vadd.f32 %v11998_v8, %v14770_v13 }
 0x242   : >> { %v3066_v49 = vpop.f32.mrf.mxu1  ;;  %v3368_v9 = vpop.f32.mrf.mxu0 }
 0x243   : >> { %v3561_v19 = vadd.f32 %v12048_v31, %v3259_v37  ;;  %v3257_v42 = vadd.f32 %v3066_v49, %v14773_v0 }
 0x244   : >> { %v11999_v30 = vpop.f32.mrf.mxu1  ;;  %v12049_v24 = vpop.f32.mrf.mxu0 }
 0x245   : >> { %v3615_v12 = vadd.f32 %v17973_v60, %v3561_v19  ;;  %v3559_v61 = vadd.f32 %v3368_v9, %v3257_v42  ;;  %v3260_v21 = vadd.f32 %v11999_v30, %v14776_v33 }
 0x246   : >> { %v3069_v53 = vpop.f32.mrf.mxu1  ;;  %v3371_v23 = vpop.f32.mrf.mxu0 }
 0x247   : >> { %vm3663_vm6 = vcmp.gt.f32.partialorder %v3615_v12, 0.0  ;;  %v3712_v13 = vmul.f32 %v14916_v52, %v3615_v12  ;;  %v3613_v26 = vadd.f32 %v17973_v60, %v3559_v61  ;;  %v3562_v8 = vadd.f32 %v12049_v24, %v3260_v21 }
 0x248   : >> { %v3258_v0 = vadd.f32 %v3069_v53, %v14779_v43  ;;  %v12002_v31 = vpop.f32.mrf.mxu1  ;;  %v12052_v37 = vpop.f32.mrf.mxu0 }
 0x249   : >> { %v3760_v49 = vsel %vm3663_vm6, %v3615_v12, %v3712_v13  ;;  %vm3661_vm7 = vcmp.gt.f32.partialorder %v3613_v26, 0.0  ;;  %v3710_v19 = vmul.f32 %v14916_v52, %v3613_v26  ;;  %v3616_v9 = vadd.f32 %v17973_v60, %v3562_v8 }
 0x24a   : >> { %3809 = vst.msk [vmem:[%s14927_s24 + $0x10] sm:$0xff] %vm479_vm0, %v3760_v49  ;;  %v3560_v33 = vadd.f32 %v3371_v23, %v3258_v0  ;;  %v3263_v42 = vadd.f32 %v12002_v31, %v14782_v47  ;;  %v3082_v43 = vpop.f32.mrf.mxu1  ;;  %v3384_v30 = vpop.f32.mrf.mxu0 }
 0x24b   : >> { %v3758_v24 = vsel %vm3661_vm7, %v3613_v26, %v3710_v19  ;;  %vm3664_vm8 = vcmp.gt.f32.partialorder %v3616_v9, 0.0  ;;  %v3713_v12 = vmul.f32 %v14916_v52, %v3616_v9  ;;  %v3261_v61 = vadd.f32 %v3082_v43, %v14785_v10 }
 0x24c   : >> { %3807 = vst.msk [vmem:[%s14927_s24] sm:$0xff] %vm479_vm0, %v3758_v24  ;;  %v3614_v21 = vadd.f32 %v17973_v60, %v3560_v33  ;;  %v3565_v53 = vadd.f32 %v12052_v37, %v3263_v42  ;;  %v12003_v13 = vpop.f32.mrf.mxu1  ;;  %v12053_v8 = vpop.f32.mrf.mxu0 }
 0x24d   : >> { %v3761_v49 = vsel %vm3664_vm8, %v3616_v9, %v3713_v12  ;;  %v3563_v23 = vadd.f32 %v3384_v30, %v3261_v61  ;;  %v3264_v47 = vadd.f32 %v12003_v13, %v14788_v15 }
 0x24e   : >> { %3810 = vst.msk [vmem:[%s14927_s24 + $0x18] sm:$0xff] %vm479_vm0, %v3761_v49  ;;  %vm3662_vm9 = vcmp.gt.f32.partialorder %v3614_v21, 0.0  ;;  %v3711_v26 = vmul.f32 %v14916_v52, %v3614_v21  ;;  %v3619_v0 = vadd.f32 %v17973_v60, %v3565_v53  ;;  %v3085_v10 = vpop.f32.mrf.mxu1  ;;  %v3387_v31 = vpop.f32.mrf.mxu0 }
 0x24f   : >> { %v3617_v19 = vadd.f32 %v17973_v60, %v3563_v23  ;;  %v3566_v33 = vadd.f32 %v12053_v8, %v3264_v47  ;;  %v3262_v37 = vadd.f32 %v3085_v10, %v14791_v14 }
 0x250   : >> { %v3759_v9 = vsel %vm3662_vm9, %v3614_v21, %v3711_v26  ;;  %vm3667_vm10 = vcmp.gt.f32.partialorder %v3619_v0, 0.0  ;;  %v3716_v42 = vmul.f32 %v14916_v52, %v3619_v0  ;;  %v12006_v15 = vpop.f32.mrf.mxu1  ;;  %v12056_v43 = vpop.f32.mrf.mxu0 }
 0x251   : >> { %3808 = vst.msk [vmem:[%s14927_s24 + $0x8] sm:$0xff] %vm479_vm0, %v3759_v9  ;;  %vm3665_vm11 = vcmp.gt.f32.partialorder %v3617_v19, 0.0  ;;  %v3714_v30 = vmul.f32 %v14916_v52, %v3617_v19  ;;  %v3620_v24 = vadd.f32 %v17973_v60, %v3566_v33  ;;  %v3564_v12 = vadd.f32 %v3387_v31, %v3262_v37 }
 0x252   : >> { %v3764_v61 = vsel %vm3667_vm10, %v3619_v0, %v3716_v42  ;;  %v3267_v53 = vadd.f32 %v12006_v15, %v14794_v58  ;;  %v3098_v13 = vpop.f32.mrf.mxu1  ;;  %v3400_v14 = vpop.f32.mrf.mxu0 }
 0x253   : >> { %3813 = vst.msk [vmem:[%s14927_s24 + $0x30] sm:$0xff] %vm479_vm0, %v3764_v61  ;;  %v3762_v21 = vsel %vm3665_vm11, %v3617_v19, %v3714_v30  ;;  %vm3668_vm12 = vcmp.gt.f32.partialorder %v3620_v24, 0.0  ;;  %v3717_v8 = vmul.f32 %v14916_v52, %v3620_v24  ;;  %v3618_v49 = vadd.f32 %v17973_v60, %v3564_v12 }
 0x254   : >> { %3811 = vst.msk [vmem:[%s14927_s24 + $0x20] sm:$0xff] %vm479_vm0, %v3762_v21  ;;  %v3569_v23 = vadd.f32 %v12056_v43, %v3267_v53  ;;  %v3265_v47 = vadd.f32 %v3098_v13, %v14797_v57  ;;  %v12007_v26 = vpop.f32.mrf.mxu1  ;;  %v12057_v0 = vpop.f32.mrf.mxu0 }
 0x255   : >> { %v3765_v58 = vsel %vm3668_vm12, %v3620_v24, %v3717_v8  ;;  %vm3666_vm13 = vcmp.gt.f32.partialorder %v3618_v49, 0.0  ;;  %v3715_v10 = vmul.f32 %v14916_v52, %v3618_v49  ;;  %v3268_v31 = vadd.f32 %v12007_v26, %v14800_v2 }
 0x256   : >> { %3814 = vst.msk [vmem:[%s14927_s24 + $0x38] sm:$0xff] %vm479_vm0, %v3765_v58  ;;  %v3623_v19 = vadd.f32 %v17973_v60, %v3569_v23  ;;  %v3567_v33 = vadd.f32 %v3400_v14, %v3265_v47  ;;  %v3101_v37 = vpop.f32.mrf.mxu1  ;;  %v3403_v9 = vpop.f32.mrf.mxu0 }
 0x257   : >> { %v3763_v42 = vsel %vm3666_vm13, %v3618_v49, %v3715_v10  ;;  %v3570_v15 = vadd.f32 %v12057_v0, %v3268_v31  ;;  %v3266_v57 = vadd.f32 %v3101_v37, %v14803_v29 }
 0x258   : >> { %3812 = vst.msk [vmem:[%s14927_s24 + $0x28] sm:$0xff] %vm479_vm0, %v3763_v42  ;;  %vm3671_vm14 = vcmp.gt.f32.partialorder %v3623_v19, 0.0  ;;  %v3720_v43 = vmul.f32 %v14916_v52, %v3623_v19  ;;  %v3621_v30 = vadd.f32 %v17973_v60, %v3567_v33  ;;  %v12010_v2 = vpop.f32.mrf.mxu1  ;;  %v12060_v24 = vpop.f32.mrf.mxu0 }
 0x259   : >> { %v3624_v12 = vadd.f32 %v17973_v60, %v3570_v15  ;;  %v3568_v61 = vadd.f32 %v3403_v9, %v3266_v57  ;;  %v3271_v53 = vadd.f32 %v12010_v2, %v14806_v62 }
 0x25a   : >> { %v3768_v13 = vsel %vm3671_vm14, %v3623_v19, %v3720_v43  ;;  %vm3669_vm15 = vcmp.gt.f32.partialorder %v3621_v30, 0.0  ;;  %v3718_v14 = vmul.f32 %v14916_v52, %v3621_v30  ;;  %v3114_v29 = vpop.f32.mrf.mxu1  ;;  %v3416_v21 = vpop.f32.mrf.mxu0 }
 0x25b   : >> { %3817 = vst.msk [vmem:[%s14927_s24 + $0x50] sm:$0xff] %vm479_vm0, %v3768_v13  ;;  %vm3672_vm2 = vcmp.gt.f32.partialorder %v3624_v12, 0.0  ;;  %v3721_v8 = vmul.f32 %v14916_v52, %v3624_v12  ;;  %v3622_v49 = vadd.f32 %v17973_v60, %v3568_v61  ;;  %v3573_v23 = vadd.f32 %v12060_v24, %v3271_v53 }
 0x25c   : >> { %v3766_v47 = vsel %vm3669_vm15, %v3621_v30, %v3718_v14  ;;  %v3269_v26 = vadd.f32 %v3114_v29, %v14809_v39  ;;  %v12011_v0 = vpop.f32.mrf.mxu1  ;;  %v12061_v62 = vpop.f32.mrf.mxu0 }
 0x25d   : >> { %3815 = vst.msk [vmem:[%s14927_s24 + $0x40] sm:$0xff] %vm479_vm0, %v3766_v47  ;;  %v3769_v58 = vsel %vm3672_vm2, %v3624_v12, %v3721_v8  ;;  %vm3670_vm4 = vcmp.gt.f32.partialorder %v3622_v49, 0.0  ;;  %v3719_v10 = vmul.f32 %v14916_v52, %v3622_v49  ;;  %v3627_v31 = vadd.f32 %v17973_v60, %v3573_v23 }
 0x25e   : >> { %3818 = vst.msk [vmem:[%s14927_s24 + $0x58] sm:$0xff] %vm479_vm0, %v3769_v58  ;;  %v3571_v19 = vadd.f32 %v3416_v21, %v3269_v26  ;;  %v3272_v33 = vadd.f32 %v12011_v0, %v14812_v40  ;;  %v3117_v37 = vpop.f32.mrf.mxu1  ;;  %v3419_v9 = vpop.f32.mrf.mxu0 }
 0x25f   : >> { %v3767_v39 = vsel %vm3670_vm4, %v3622_v49, %v3719_v10  ;;  %vm3675_vm6 = vcmp.gt.f32.partialorder %v3627_v31, 0.0  ;;  %v3724_v42 = vmul.f32 %v14916_v52, %v3627_v31  ;;  %v3270_v15 = vadd.f32 %v3117_v37, %v14815_v54 }
 0x260   : >> { %3816 = vst.msk [vmem:[%s14927_s24 + $0x48] sm:$0xff] %vm479_vm0, %v3767_v39  ;;  %v3625_v57 = vadd.f32 %v17973_v60, %v3571_v19  ;;  %v3574_v43 = vadd.f32 %v12061_v62, %v3272_v33  ;;  %v12014_v30 = vpop.f32.mrf.mxu1  ;;  %v12064_v2 = vpop.f32.mrf.mxu0 }
 0x261   : >> { %v3772_v24 = vsel %vm3675_vm6, %v3627_v31, %v3724_v42  ;;  %v3572_v12 = vadd.f32 %v3419_v9, %v3270_v15  ;;  %v3275_v40 = vadd.f32 %v12014_v30, %v14818_v63 }
 0x262   : >> { %3821 = vst.msk [vmem:[%s14927_s24 + $0x70] sm:$0xff] %vm479_vm0, %v3772_v24  ;;  %vm3673_vm7 = vcmp.gt.f32.partialorder %v3625_v57, 0.0  ;;  %v3722_v61 = vmul.f32 %v14916_v52, %v3625_v57  ;;  %v3628_v53 = vadd.f32 %v17973_v60, %v3574_v43  ;;  %v3130_v54 = vpop.f32.mrf.mxu1  ;;  %v3432_v13 = vpop.f32.mrf.mxu0 }
 0x263   : >> { %v3626_v14 = vadd.f32 %v17973_v60, %v3572_v12  ;;  %v3577_v29 = vadd.f32 %v12064_v2, %v3275_v40  ;;  %v3273_v21 = vadd.f32 %v3130_v54, %v14821_v51 }
 0x264   : >> { %v3770_v8 = vsel %vm3673_vm7, %v3625_v57, %v3722_v61  ;;  %vm3676_vm8 = vcmp.gt.f32.partialorder %v3628_v53, 0.0  ;;  %v3725_v49 = vmul.f32 %v14916_v52, %v3628_v53  ;;  %v12015_v63 = vpop.f32.mrf.mxu1  ;;  %v12065_v23 = vpop.f32.mrf.mxu0 }
 0x265   : >> { %3819 = vst.msk [vmem:[%s14927_s24 + $0x60] sm:$0xff] %vm479_vm0, %v3770_v8  ;;  %vm3674_vm9 = vcmp.gt.f32.partialorder %v3626_v14, 0.0  ;;  %v3723_v47 = vmul.f32 %v14916_v52, %v3626_v14  ;;  %v3631_v26 = vadd.f32 %v17973_v60, %v3577_v29  ;;  %v3575_v0 = vadd.f32 %v3432_v13, %v3273_v21 }
 0x266   : >> { %v3773_v62 = vsel %vm3676_vm8, %v3628_v53, %v3725_v49  ;;  %v3276_v58 = vadd.f32 %v12015_v63, %v14824_v41  ;;  %v3133_v10 = vpop.f32.mrf.mxu1  ;;  %v3435_v51 = vpop.f32.mrf.mxu0 }
 0x267   : >> { %3822 = vst.msk [vmem:[%s14927_s24 + $0x78] sm:$0xff] %vm479_vm0, %v3773_v62  ;;  %v3771_v31 = vsel %vm3674_vm9, %v3626_v14, %v3723_v47  ;;  %vm3679_vm10 = vcmp.gt.f32.partialorder %v3631_v26, 0.0  ;;  %v3728_v19 = vmul.f32 %v14916_v52, %v3631_v26  ;;  %v3629_v33 = vadd.f32 %v17973_v60, %v3575_v0 }
 0x268   : >> { %3820 = vst.msk [vmem:[%s14927_s24 + $0x68] sm:$0xff] %vm479_vm0, %v3771_v31  ;;  %v3578_v37 = vadd.f32 %v12065_v23, %v3276_v58  ;;  %v3274_v9 = vadd.f32 %v3133_v10, %v14827_v22  ;;  %v12018_v39 = vpop.f32.mrf.mxu1  ;;  %v12068_v42 = vpop.f32.mrf.mxu0 }
 0x269   : >> { %v3776_v41 = vsel %vm3679_vm10, %v3631_v26, %v3728_v19  ;;  %vm3677_vm11 = vcmp.gt.f32.partialorder %v3629_v33, 0.0  ;;  %v3726_v15 = vmul.f32 %v14916_v52, %v3629_v33  ;;  %v3279_v57 = vadd.f32 %v12018_v39, %v14830_v11 }
 0x26a   : >> { %3825 = vst.msk [vmem:[%s14927_s24 + $0x90] sm:$0xff] %vm479_vm0, %v3776_v41  ;;  %v3632_v43 = vadd.f32 %v17973_v60, %v3578_v37  ;;  %v3576_v30 = vadd.f32 %v3435_v51, %v3274_v9  ;;  %v3146_v2 = vpop.f32.mrf.mxu1  ;;  %v3448_v24 = vpop.f32.mrf.mxu0 }
 0x26b   : >> { %v3774_v12 = vsel %vm3677_vm11, %v3629_v33, %v3726_v15  ;;  %v3581_v40 = vadd.f32 %v12068_v42, %v3279_v57  ;;  %v3277_v22 = vadd.f32 %v3146_v2, %v14833_v55 }
 0x26c   : >> { %3823 = vst.msk [vmem:[%s14927_s24 + $0x80] sm:$0xff] %vm479_vm0, %v3774_v12  ;;  %vm3680_vm12 = vcmp.gt.f32.partialorder %v3632_v43, 0.0  ;;  %v3729_v61 = vmul.f32 %v14916_v52, %v3632_v43  ;;  %v3630_v53 = vadd.f32 %v17973_v60, %v3576_v30  ;;  %v12019_v11 = vpop.f32.mrf.mxu1  ;;  %v12069_v54 = vpop.f32.mrf.mxu0 }
 0x26d   : >> { %v3635_v13 = vadd.f32 %v17973_v60, %v3581_v40  ;;  %v3579_v14 = vadd.f32 %v3448_v24, %v3277_v22  ;;  %v3280_v29 = vadd.f32 %v12019_v11, %v14836_v28 }
 0x26e   : >> { %v3777_v21 = vsel %vm3680_vm12, %v3632_v43, %v3729_v61  ;;  %vm3678_vm13 = vcmp.gt.f32.partialorder %v3630_v53, 0.0  ;;  %v3727_v8 = vmul.f32 %v14916_v52, %v3630_v53  ;;  %v3149_v55 = vpop.f32.mrf.mxu1  ;;  %v3451_v49 = vpop.f32.mrf.mxu0 }
 0x26f   : >> { %3826 = vst.msk [vmem:[%s14927_s24 + $0x98] sm:$0xff] %vm479_vm0, %v3777_v21  ;;  %vm3683_vm14 = vcmp.gt.f32.partialorder %v3635_v13, 0.0  ;;  %v3732_v63 = vmul.f32 %v14916_v52, %v3635_v13  ;;  %v3633_v23 = vadd.f32 %v17973_v60, %v3579_v14  ;;  %v3582_v47 = vadd.f32 %v12069_v54, %v3280_v29 }
 0x270   : >> { %v3775_v26 = vsel %vm3678_vm13, %v3630_v53, %v3727_v8  ;;  %v3278_v0 = vadd.f32 %v3149_v55, %v14839_v4  ;;  %v12022_v62 = vpop.f32.mrf.mxu1  ;;  %v12072_v28 = vpop.f32.mrf.mxu0 }
 0x271   : >> { %3824 = vst.msk [vmem:[%s14927_s24 + $0x88] sm:$0xff] %vm479_vm0, %v3775_v26  ;;  %v3780_v58 = vsel %vm3683_vm14, %v3635_v13, %v3732_v63  ;;  %vm3681_vm15 = vcmp.gt.f32.partialorder %v3633_v23, 0.0  ;;  %v3730_v10 = vmul.f32 %v14916_v52, %v3633_v23  ;;  %v3636_v51 = vadd.f32 %v17973_v60, %v3582_v47 }
 0x272   : >> { %3829 = vst.msk [vmem:[%s14927_s24 + $0xb0] sm:$0xff] %vm479_vm0, %v3780_v58  ;;  %v3580_v31 = vadd.f32 %v3451_v49, %v3278_v0  ;;  %v3283_v19 = vadd.f32 %v12022_v62, %v14842_v59  ;;  %v3162_v33 = vpop.f32.mrf.mxu1  ;;  %v3464_v37 = vpop.f32.mrf.mxu0 }
 0x273   : >> { %v3778_v4 = vsel %vm3681_vm15, %v3633_v23, %v3730_v10  ;;  %vm3684_vm2 = vcmp.gt.f32.partialorder %v3636_v51, 0.0  ;;  %v3733_v9 = vmul.f32 %v14916_v52, %v3636_v51  ;;  %v3281_v39 = vadd.f32 %v3162_v33, %v14845_v46 }
 0x274   : >> { %3827 = vst.msk [vmem:[%s14927_s24 + $0xa0] sm:$0xff] %vm479_vm0, %v3778_v4  ;;  %v3634_v42 = vadd.f32 %v17973_v60, %v3580_v31  ;;  %v3585_v41 = vadd.f32 %v12072_v28, %v3283_v19  ;;  %v12023_v15 = vpop.f32.mrf.mxu1  ;;  %v12073_v57 = vpop.f32.mrf.mxu0 }
 0x275   : >> { %v3781_v43 = vsel %vm3684_vm2, %v3636_v51, %v3733_v9  ;;  %v3583_v30 = vadd.f32 %v3464_v37, %v3281_v39  ;;  %v3284_v59 = vadd.f32 %v12023_v15, %v14848_v38 }
 0x276   : >> { %3830 = vst.msk [vmem:[%s14927_s24 + $0xb8] sm:$0xff] %vm479_vm0, %v3781_v43  ;;  %vm3682_vm4 = vcmp.gt.f32.partialorder %v3634_v42, 0.0  ;;  %v3731_v2 = vmul.f32 %v14916_v52, %v3634_v42  ;;  %v3639_v24 = vadd.f32 %v17973_v60, %v3585_v41  ;;  %v3165_v46 = vpop.f32.mrf.mxu1  ;;  %v3467_v12 = vpop.f32.mrf.mxu0 }
 0x277   : >> { %v3637_v40 = vadd.f32 %v17973_v60, %v3583_v30  ;;  %v3586_v22 = vadd.f32 %v12073_v57, %v3284_v59  ;;  %v3282_v61 = vadd.f32 %v3165_v46, %v14851_v27 }
 0x278   : >> { %v3779_v53 = vsel %vm3682_vm4, %v3634_v42, %v3731_v2  ;;  %vm3687_vm6 = vcmp.gt.f32.partialorder %v3639_v24, 0.0  ;;  %v3736_v11 = vmul.f32 %v14916_v52, %v3639_v24  ;;  %v12026_v38 = vpop.f32.mrf.mxu1  ;;  %v12076_v54 = vpop.f32.mrf.mxu0 }
 0x279   : >> { %3828 = vst.msk [vmem:[%s14927_s24 + $0xa8] sm:$0xff] %vm479_vm0, %v3779_v53  ;;  %vm3685_vm7 = vcmp.gt.f32.partialorder %v3637_v40, 0.0  ;;  %v3734_v13 = vmul.f32 %v14916_v52, %v3637_v40  ;;  %v3640_v14 = vadd.f32 %v17973_v60, %v3586_v22  ;;  %v3584_v29 = vadd.f32 %v3467_v12, %v3282_v61 }
 0x27a   : >> { %v3784_v21 = vsel %vm3687_vm6, %v3639_v24, %v3736_v11  ;;  %v3287_v8 = vadd.f32 %v12026_v38, %v14854_v50  ;;  %v3178_v55 = vpop.f32.mrf.mxu1  ;;  %v3480_v27 = vpop.f32.mrf.mxu0 }
 0x27b   : >> { %3833 = vst.msk [vmem:[%s14927_s24 + $0xd0] sm:$0xff] %vm479_vm0, %v3784_v21  ;;  %v3782_v49 = vsel %vm3685_vm7, %v3637_v40, %v3734_v13  ;;  %vm3688_vm8 = vcmp.gt.f32.partialorder %v3640_v14, 0.0  ;;  %v3737_v63 = vmul.f32 %v14916_v52, %v3640_v14  ;;  %v3638_v23 = vadd.f32 %v17973_v60, %v3584_v29 }
 0x27c   : >> { %3831 = vst.msk [vmem:[%s14927_s24 + $0xc0] sm:$0xff] %vm479_vm0, %v3782_v49  ;;  %v3589_v47 = vadd.f32 %v12076_v54, %v3287_v8  ;;  %v3285_v26 = vadd.f32 %v3178_v55, %v14857_v17  ;;  %v12027_v0 = vpop.f32.mrf.mxu1  ;;  %v12077_v62 = vpop.f32.mrf.mxu0 }
 0x27d   : >> { %v3785_v50 = vsel %vm3688_vm8, %v3640_v14, %v3737_v63  ;;  %vm3686_vm9 = vcmp.gt.f32.partialorder %v3638_v23, 0.0  ;;  %v3735_v28 = vmul.f32 %v14916_v52, %v3638_v23  ;;  %v3288_v58 = vadd.f32 %v12027_v0, %v14860_v6 }
 0x27e   : >> { %3834 = vst.msk [vmem:[%s14927_s24 + $0xd8] sm:$0xff] %vm479_vm0, %v3785_v50  ;;  %v3643_v10 = vadd.f32 %v17973_v60, %v3589_v47  ;;  %v3587_v51 = vadd.f32 %v3480_v27, %v3285_v26  ;;  %v3181_v31 = vpop.f32.mrf.mxu1  ;;  %v3483_v19 = vpop.f32.mrf.mxu0 }
 0x27f   : >> { %v3783_v33 = vsel %vm3686_vm9, %v3638_v23, %v3735_v28  ;;  %v3590_v37 = vadd.f32 %v12077_v62, %v3288_v58  ;;  %v3286_v17 = vadd.f32 %v3181_v31, %v14863_v20 }
 0x280   : >> { %3832 = vst.msk [vmem:[%s14927_s24 + $0xc8] sm:$0xff] %vm479_vm0, %v3783_v33  ;;  %vm3691_vm10 = vcmp.gt.f32.partialorder %v3643_v10, 0.0  ;;  %v3740_v4 = vmul.f32 %v14916_v52, %v3643_v10  ;;  %v3641_v9 = vadd.f32 %v17973_v60, %v3587_v51  ;;  %v12030_v6 = vpop.f32.mrf.mxu1  ;;  %v12080_v39 = vpop.f32.mrf.mxu0 }
 0x281   : >> { %v3644_v42 = vadd.f32 %v17973_v60, %v3590_v37  ;;  %v3588_v41 = vadd.f32 %v3483_v19, %v3286_v17  ;;  %v3291_v15 = vadd.f32 %v12030_v6, %v14866_v45 }
 0x282   : >> { %v3788_v57 = vsel %vm3691_vm10, %v3643_v10, %v3740_v4  ;;  %vm3689_vm11 = vcmp.gt.f32.partialorder %v3641_v9, 0.0  ;;  %v3738_v43 = vmul.f32 %v14916_v52, %v3641_v9  ;;  %v3194_v20 = vpop.f32.mrf.mxu1  ;;  %v3496_v30 = vpop.f32.mrf.mxu0 }
 0x283   : >> { %3837 = vst.msk [vmem:[%s14927_s24 + $0xf0] sm:$0xff] %vm479_vm0, %v3788_v57  ;;  %vm3692_vm12 = vcmp.gt.f32.partialorder %v3644_v42, 0.0  ;;  %v3741_v59 = vmul.f32 %v14916_v52, %v3644_v42  ;;  %v3642_v2 = vadd.f32 %v17973_v60, %v3588_v41  ;;  %v3593_v24 = vadd.f32 %v12080_v39, %v3291_v15 }
 0x284   : >> { %v3786_v46 = vsel %vm3689_vm11, %v3641_v9, %v3738_v43  ;;  %v3289_v12 = vadd.f32 %v3194_v20, %v14869_v44  ;;  %v12031_v40 = vpop.f32.mrf.mxu1  ;;  %v12081_v45 = vpop.f32.mrf.mxu0 }
 0x285   : >> { %3835 = vst.msk [vmem:[%s14927_s24 + $0xe0] sm:$0xff] %vm479_vm0, %v3786_v46  ;;  %v3789_v22 = vsel %vm3692_vm12, %v3644_v42, %v3741_v59  ;;  %vm3690_vm13 = vcmp.gt.f32.partialorder %v3642_v2, 0.0  ;;  %v3739_v61 = vmul.f32 %v14916_v52, %v3642_v2  ;;  %v3647_v53 = vadd.f32 %v17973_v60, %v3593_v24 }
 0x286   : >> { %3838 = vst.msk [vmem:[%s14927_s24 + $0xf8] sm:$0xff] %vm479_vm0, %v3789_v22  ;;  %v3591_v11 = vadd.f32 %v3496_v30, %v3289_v12  ;;  %v3292_v38 = vadd.f32 %v12031_v40, %v14872_v7  ;;  %v3197_v54 = vpop.f32.mrf.mxu1  ;;  %v3499_v13 = vpop.f32.mrf.mxu0 }
 0x287   : >> { %v3787_v44 = vsel %vm3690_vm13, %v3642_v2, %v3739_v61  ;;  %vm3695_vm14 = vcmp.gt.f32.partialorder %v3647_v53, 0.0  ;;  %v3744_v14 = vmul.f32 %v14916_v52, %v3647_v53  ;;  %v3290_v29 = vadd.f32 %v3197_v54, %v14875_v25 }
 0x288   : >> { %3836 = vst.msk [vmem:[%s14927_s24 + $0xe8] sm:$0xff] %vm479_vm0, %v3787_v44  ;;  %v3645_v21 = vadd.f32 %v17973_v60, %v3591_v11  ;;  %v3594_v8 = vadd.f32 %v12081_v45, %v3292_v38  ;;  %v12034_v55 = vpop.f32.mrf.mxu1  ;;  %v12084_v27 = vpop.f32.mrf.mxu0 }
 0x289   : >> { %v3792_v49 = vsel %vm3695_vm14, %v3647_v53, %v3744_v14  ;;  %v3592_v63 = vadd.f32 %v3499_v13, %v3290_v29  ;;  %v3295_v7 = vadd.f32 %v12034_v55, %v14878_v34 }
 0x28a   : >> { %3841 = vst.msk [vmem:[%s14927_s24 + $0x110] sm:$0xff] %vm479_vm0, %v3792_v49  ;;  %vm3693_vm15 = vcmp.gt.f32.partialorder %v3645_v21, 0.0  ;;  %v3742_v23 = vmul.f32 %v14916_v52, %v3645_v21  ;;  %v3648_v47 = vadd.f32 %v17973_v60, %v3594_v8  ;;  %v3210_v25 = vpop.f32.mrf.mxu1  ;;  %v3512_v26 = vpop.f32.mrf.mxu0 }
 0x28b   : >> { %v3646_v0 = vadd.f32 %v17973_v60, %v3592_v63  ;;  %v3597_v62 = vadd.f32 %v12084_v27, %v3295_v7  ;;  %v3293_v50 = vadd.f32 %v3210_v25, %v14881_v3 }
 0x28c   : >> { %v3790_v28 = vsel %vm3693_vm15, %v3645_v21, %v3742_v23  ;;  %vm3696_vm2 = vcmp.gt.f32.partialorder %v3648_v47, 0.0  ;;  %v3745_v58 = vmul.f32 %v14916_v52, %v3648_v47  ;;  %v12035_v34 = vpop.f32.mrf.mxu1  ;;  %v12085_v10 = vpop.f32.mrf.mxu0 }
 0x28d   : >> { %3839 = vst.msk [vmem:[%s14927_s24 + $0x100] sm:$0xff] %vm479_vm0, %v3790_v28  ;;  %vm3694_vm4 = vcmp.gt.f32.partialorder %v3646_v0, 0.0  ;;  %v3743_v51 = vmul.f32 %v14916_v52, %v3646_v0  ;;  %v3651_v31 = vadd.f32 %v17973_v60, %v3597_v62  ;;  %v3595_v19 = vadd.f32 %v3512_v26, %v3293_v50  ;;  %v17974_v26 = vld [vmem:[#allocation61_spill] sm:$0xff] }
 0x28e   : >> { %v3793_v33 = vsel %vm3696_vm2, %v3648_v47, %v3745_v58  ;;  %v3296_v37 = vadd.f32 %v12035_v34, %v14884_v18  ;;  %v3213_v17 = vpop.f32.mrf.mxu1  ;;  %v3515_v3 = vpop.f32.mrf.mxu0 }
 0x28f   : >> { %3842 = vst.msk [vmem:[%s14927_s24 + $0x118] sm:$0xff] %vm479_vm0, %v3793_v33  ;;  %v3791_v4 = vsel %vm3694_vm4, %v3646_v0, %v3743_v51  ;;  %vm3699_vm6 = vcmp.gt.f32.partialorder %v3651_v31, 0.0  ;;  %v3748_v9 = vmul.f32 %v14916_v52, %v3651_v31  ;;  %v3649_v6 = vadd.f32 %v17973_v60, %v3595_v19 }
 0x290   : >> { %3840 = vst.msk [vmem:[%s14927_s24 + $0x108] sm:$0xff] %vm479_vm0, %v3791_v4  ;;  %v3598_v39 = vadd.f32 %v12085_v10, %v3296_v37  ;;  %v3294_v42 = vadd.f32 %v3213_v17, %v14887_v36  ;;  %v12038_v41 = vpop.f32.mrf.mxu1  ;;  %v12088_v15 = vpop.f32.mrf.mxu0 }
 0x291   : >> { %v3796_v18 = vsel %vm3699_vm6, %v3651_v31, %v3748_v9  ;;  %vm3697_vm7 = vcmp.gt.f32.partialorder %v3649_v6, 0.0  ;;  %v3746_v57 = vmul.f32 %v14916_v52, %v3649_v6  ;;  %v3299_v43 = vadd.f32 %v12038_v41, %v14890_v35 }
 0x292   : >> { %3845 = vst.msk [vmem:[%s14927_s24 + $0x130] sm:$0xff] %vm479_vm0, %v3796_v18  ;;  %v3652_v20 = vadd.f32 %v17973_v60, %v3598_v39  ;;  %v3596_v30 = vadd.f32 %v3515_v3, %v3294_v42  ;;  %v3226_v59 = vpop.f32.mrf.mxu1  ;;  %v3528_v2 = vpop.f32.mrf.mxu0 }
 0x293   : >> { %v3794_v24 = vsel %vm3697_vm7, %v3649_v6, %v3746_v57  ;;  %v3601_v46 = vadd.f32 %v12088_v15, %v3299_v43  ;;  %v3297_v36 = vadd.f32 %v3226_v59, %v14893_v5 }
 0x294   : >> { %3843 = vst.msk [vmem:[%s14927_s24 + $0x120] sm:$0xff] %vm479_vm0, %v3794_v24  ;;  %vm3700_vm8 = vcmp.gt.f32.partialorder %v3652_v20, 0.0  ;;  %v3749_v12 = vmul.f32 %v14916_v52, %v3652_v20  ;;  %v3650_v40 = vadd.f32 %v17973_v60, %v3596_v30  ;;  %v12039_v35 = vpop.f32.mrf.mxu1  ;;  %v12089_v45 = vpop.f32.mrf.mxu0 }
 0x295   : >> { %v3655_v22 = vadd.f32 %v17973_v60, %v3601_v46  ;;  %v3599_v61 = vadd.f32 %v3528_v2, %v3297_v36  ;;  %v3300_v53 = vadd.f32 %v12039_v35, %v14896_v56  ;;  %v17982_v35 = vmov (%p494_p1), 0 }
 0x296   : >> { %v3797_v11 = vsel %vm3700_vm8, %v3652_v20, %v3749_v12  ;;  %vm3698_vm9 = vcmp.gt.f32.partialorder %v3650_v40, 0.0  ;;  %v3747_v38 = vmul.f32 %v14916_v52, %v3650_v40  ;;  %v3229_v5 = vpop.f32.mrf.mxu1  ;;  %v3531_v54 = vpop.f32.mrf.mxu0  ;;  %v3855_v20 = vlaneseq (%p494_p1) }
 0x297   : >> { %3846 = vst.msk [vmem:[%s14927_s24 + $0x138] sm:$0xff] %vm479_vm0, %v3797_v11  ;;  %vm3703_vm10 = vcmp.gt.f32.partialorder %v3655_v22, 0.0  ;;  %v3752_v13 = vmul.f32 %v14916_v52, %v3655_v22  ;;  %v3653_v44 = vadd.f32 %v17973_v60, %v3599_v61  ;;  %v3602_v14 = vadd.f32 %v12089_v45, %v3300_v53 }
 0x298   : >> { %v3795_v29 = vsel %vm3698_vm9, %v3650_v40, %v3747_v38  ;;  %v3298_v21 = vadd.f32 %v3229_v5, %v14899_v48  ;;  %v12042_v8 = vpop.f32.mrf.mxu1  ;;  %v12092_v56 = vpop.f32.mrf.mxu0  ;;  %v15163_v30 = vshrl.u32 (%p494_p1), %v3855_v20, 7  ;;  %v3860_v59 = vand.u32 (%p494_p1), 127, %v3855_v20 }
 0x299   : >> { %3844 = vst.msk [vmem:[%s14927_s24 + $0x128] sm:$0xff] %vm479_vm0, %v3795_v29  ;;  %v3800_v55 = vsel %vm3703_vm10, %v3655_v22, %v3752_v13  ;;  %vm3701_vm11 = vcmp.gt.f32.partialorder %v3653_v44, 0.0  ;;  %v3750_v27 = vmul.f32 %v14916_v52, %v3653_v44  ;;  %v3656_v49 = vadd.f32 %v17973_v60, %v3602_v14 }
 0x29a   : >> { %3849 = vst.msk [vmem:[%s14927_s24 + $0x150] sm:$0xff] %vm479_vm0, %v3800_v55  ;;  %v3600_v63 = vadd.f32 %v3531_v54, %v3298_v21  ;;  %v3303_v7 = vadd.f32 %v12042_v8, %v14902_v16  ;;  %v3242_v23 = vpop.f32.mrf.mxu1  ;;  %v3544_v47 = vpop.f32.mrf.mxu0  ;;  %17975 = vst [vmem:[#allocation12_spill] sm:$0xff] (%p494_p1), %v15163_v30  ;;  %v15166_v2 = vadd.s32 (%p494_p1), 8, %v15163_v30  ;;  %v3861_v24 = vmul.u32 (%p494_p1), 2, %v15163_v30 }
 0x29b   : >> { %v3798_v48 = vsel %vm3701_vm11, %v3653_v44, %v3750_v27  ;;  %vm3704_vm12 = vcmp.gt.f32.partialorder %v3656_v49, 0.0  ;;  %v3753_v25 = vmul.f32 %v14916_v52, %v3656_v49  ;;  %v3301_v0 = vadd.f32 %v3242_v23, %v17974_v26 }
 0x29c   : >> { %3847 = vst.msk [vmem:[%s14927_s24 + $0x140] sm:$0xff] %vm479_vm0, %v3798_v48  ;;  %v3654_v62 = vadd.f32 %v17973_v60, %v3600_v63  ;;  %v3605_v50 = vadd.f32 %v12092_v56, %v3303_v7  ;;  %v12043_v28 = vpop.f32.mrf.mxu1  ;;  %v12093_v58 = vpop.f32.mrf.mxu0  ;;  %17976 = vst [vmem:[#allocation75_spill] sm:$0xff] (%p494_p1), %v15166_v2  ;;  %v3862_v46 = vmul.u32 (%p494_p1), 2, %v15166_v2  ;;  %vm15171_vm6 = vcmp.eq.s32.totalorder (%p494_p1), %v3860_v59, %v3861_v24 }
 0x29d   : >> { %v3801_v34 = vsel %vm3704_vm12, %v3656_v49, %v3753_v25  ;;  %v3603_v10 = vadd.f32 %v3544_v47, %v3301_v0  ;;  %v3304_v16 = vadd.f32 %v12043_v28, %v14908_v32  ;;  %v17977_v12 = vmov (%p494_p1), 0 }
 0x29e   : >> { %3850 = vst.msk [vmem:[%s14927_s24 + $0x158] sm:$0xff] %vm479_vm0, %v3801_v34  ;;  %vm3702_vm13 = vcmp.gt.f32.partialorder %v3654_v62, 0.0  ;;  %v3751_v51 = vmul.f32 %v14916_v52, %v3654_v62  ;;  %v3659_v31 = vadd.f32 %v17973_v60, %v3605_v50  ;;  %v3245_v19 = vpop.f32.mrf.mxu1  ;;  %v3547_v32 = vpop.f32.mrf.mxu0  ;;  %v17978_v12 = vsel (%p494_p1), %vm15171_vm6, 4294967295, %v17977_v12 }
 0x29f   : >> { %v3657_v33 = vadd.f32 %v17973_v60, %v3603_v10  ;;  %v3606_v37 = vadd.f32 %v12093_v58, %v3304_v16  ;;  %v3302_v17 = vadd.f32 %v3245_v19, %v14911_v1  ;;  %17979 = vst [vmem:[#allocation76_spill] sm:$0xff] (%p494_p1), %v17978_v12  ;;  %v17980_v40 = vmov (%p494_p1), 0.0  }
 0x2a0   : >> { %v3799_v3 = vsel %vm3702_vm13, %v3654_v62, %v3751_v51  ;;  %vm3707_vm14 = vcmp.gt.f32.partialorder %v3659_v31, 0.0  ;;  %v3756_v4 = vmul.f32 %v14916_v52, %v3659_v31  ;;  %vm15180_vm8 = vcmp.eq.s32.totalorder (%p494_p1), %v3860_v59, %v3862_v46 }
 0x2a1   : >> { %3848 = vst.msk [vmem:[%s14927_s24 + $0x148] sm:$0xff] %vm479_vm0, %v3799_v3  ;;  %vm3705_vm15 = vcmp.gt.f32.partialorder %v3657_v33, 0.0  ;;  %v3754_v9 = vmul.f32 %v14916_v52, %v3657_v33  ;;  %v3660_v6 = vadd.f32 %v17973_v60, %v3606_v37  ;;  %v3604_v39 = vadd.f32 %v3547_v32, %v3302_v17 }
 0x2a2   : >> { %v3804_v42 = vsel %vm3707_vm14, %v3659_v31, %v3756_v4  ;;  %v17983_v35 = vsel (%p494_p1), %vm15180_vm8, 4294967295, %v17982_v35  ;;  %v15187_v45 = vsel (%p494_p1), %vm15180_vm8, 1.0, %v17980_v40 }
 0x2a3   : >> { %3853 = vst.msk [vmem:[%s14927_s24 + $0x170] sm:$0xff] %vm479_vm0, %v3804_v42  ;;  %v3802_v1 = vsel %vm3705_vm15, %v3657_v33, %v3754_v9  ;;  %vm3708_vm2 = vcmp.gt.f32.partialorder %v3660_v6, 0.0  ;;  %v3757_v41 = vmul.f32 %v14916_v52, %v3660_v6  ;;  %v3658_v15 = vadd.f32 %v17973_v60, %v3604_v39  ;;  %17984 = vst [vmem:[#allocation78_spill] sm:$0xff] (%p494_p1), %v17983_v35 }
 0x2a4   : >> { %3851 = vst.msk [vmem:[%s14927_s24 + $0x160] sm:$0xff] %vm479_vm0, %v3802_v1  ;;  %496 = sbr.rel (!%p494_p1) target bundleno = 33 (0x21), region = 191  ;;  %v15178_v60 = vsel (%p494_p1), %vm15171_vm6, 1.0, %v17980_v40 }
 0x2a5   : >> { %v3805_v18 = vsel %vm3708_vm2, %v3660_v6, %v3757_v41  ;;  %vm3706_vm4 = vcmp.gt.f32.partialorder %v3658_v15, 0.0  ;;  %v3755_v57 = vmul.f32 %v14916_v52, %v3658_v15  ;;  %v3858_v52 = vadd.s32 (%p494_p1), 16, %v15163_v30  ;;  %17981 = vst [vmem:[#allocation77_spill] sm:$0xff] (%p494_p1), %v15178_v60 }
 0x2a6   : >> { %3854 = vst.msk [vmem:[%s14927_s24 + $0x178] sm:$0xff] %vm479_vm0, %v3805_v18 }
 0x2a7   : >> { %v3803_v43 = vsel %vm3706_vm4, %v3658_v15, %v3755_v57  ;;  %v3863_v36 = vmul.u32 (%p494_p1), 2, %v3858_v52  ;;  %vm3869_vm7 = vcmp.lt.s32.totalorder (%p494_p1), %v3858_v52, 23 }
 0x2a8   : >> { %3852 = vst.msk [vmem:[%s14927_s24 + $0x168] sm:$0xff] %vm479_vm0, %v3803_v43 }
 0x2a9   : > { %vm3866_vm9 = vcmp.eq.s32.totalorder %v3860_v59, %v3863_v36 }
 0x2aa   : > { %vm3872_vm10 = vmand %vm3866_vm9, %vm3869_vm7 }
 0x2ab   : > { %v15190_v22 = vsel %vm3872_vm10, 1.0, %v17980_v40 }
 0x2ac LB: >> { %v13307_v61 = vmov 0.0   ;;  %s3885_s19 = smul.u32 96, %s13291_s21  ;;  %vm13308_vm11 = vmmov 0   ;;  %vm3970_vm12 = vcmask 392192   ;;  %s13291_s21 = sphi %s15192_s21, %s3884_s21  }
 0x2ad   : >> { %12829 = vmatprep.subr.mxu1 %v13307_v61  ;;  %12094 = vmatprep.subr.mxu0 %v13307_v61  ;;  %s3969_s18 = smul.u32 24, %s13291_s21  ;;  %s3884_s21 = sadd.s32 1, %s13291_s21  }
 0x2ae   : >> { %12109 = vmatprep.mubr.msk.f32.mxu1 %vm13308_vm11, %v13307_v61  ;;  %12106 = vmatprep.mubr.msk.f32.mxu0 %vm13308_vm11, %v13307_v61  ;;  %s3886_s23 = scalar_lea.vmem [#allocation2], %s3885_s19  ;;  %p3881_p2 = scmp.ge.s32.totalorder %s3884_s21, 23  }
 0x2af   : >> { %v3892_v53 = vld [vmem:[%s3886_s23 + $0x28] sm:$0xff]  ;;  %v3893_v11 = vld [vmem:[%s3886_s23 + $0x30] sm:$0xff]  ;;  %v3898_v38 = vld [vmem:[%s3886_s23 + $0x58] sm:$0xff]  ;;  %s4060_s27 = scalar_lea.vmem [#allocation3], %s3969_s18  ;;  %s15243_s30 = smov (%p3881_p2), 0  }
 0x2b0   : >> { %v3899_v5 = vld [vmem:[%s3886_s23 + $0x60] sm:$0xff]  ;;  %v3917_v54 = vrot.slane %v3892_v53, 1  ;;  %v3919_v13 = vrot.slane %v3893_v11, 1  ;;  %v3953_v44 = vrot.slane %v3898_v38, 1  ;;  %v3897_v29 = vld [vmem:[%s3886_s23 + $0x50] sm:$0xff]  ;;  %v3890_v55 = vld [vmem:[%s3886_s23 + $0x18] sm:$0xff] }
 0x2b1   : >> { %v3891_v14 = vld [vmem:[%s3886_s23 + $0x20] sm:$0xff]  ;;  %v3955_v21 = vrot.slane %v3899_v5, 1  ;;  %v3951_v56 = vrot.slane %v3897_v29, 1  ;;  %v3896_v27 = vld [vmem:[%s3886_s23 + $0x48] sm:$0xff]  ;;  %v3889_v49 = vld [vmem:[%s3886_s23 + $0x10] sm:$0xff]  ;;  %v3913_v7 = vrot.slane %v3890_v55, 1 }
 0x2b2   : >> { %v3915_v8 = vrot.slane %v3891_v14, 1  ;;  %v3920_v63 = vsel %vm1391_vm5, %v3917_v54, %v3919_v13  ;;  %v3949_v23 = vrot.slane %v3896_v27, 1  ;;  %v3895_v47 = vld [vmem:[%s3886_s23 + $0x40] sm:$0xff]  ;;  %v3911_v48 = vrot.slane %v3889_v49, 1  ;;  %v3888_v50 = vld [vmem:[%s3886_s23 + $0x8] sm:$0xff]  ;;  %v3894_v28 = vld [vmem:[%s3886_s23 + $0x38] sm:$0xff] }
 0x2b3   : >> { %v3932_v25 = vmax.f32 %v3892_v53, %v3920_v63  ;;  %v3956_v26 = vsel %vm1391_vm5, %v3953_v44, %v3955_v21  ;;  %v3954_v62 = vsel %vm1391_vm5, %v3951_v56, %v3953_v44  ;;  %v3887_v58 = vld [vmem:[%s3886_s23] sm:$0xff]  ;;  %v3947_v37 = vrot.slane %v3895_v47, 1 }
 0x2b4   : >> { %v3918_v0 = vsel %vm1391_vm5, %v3915_v8, %v3917_v54  ;;  %v3916_v10 = vsel %vm1391_vm5, %v3913_v7, %v3915_v8  ;;  %v3952_v16 = vsel %vm1391_vm5, %v3949_v23, %v3951_v56  ;;  %v3914_v51 = vsel %vm1391_vm5, %v3911_v48, %v3913_v7 }
 0x2b5   : >> { %v3931_v34 = vmax.f32 %v3891_v14, %v3918_v0  ;;  %v3938_v31 = vmax.f32 %v3932_v25, %v3898_v38  ;;  %v3930_v19 = vmax.f32 %v3890_v55, %v3916_v10  ;;  %v3929_v33 = vmax.f32 %v3889_v49, %v3914_v51 }
 0x2b6   : >> { %v3909_v3 = vrot.slane %v3888_v50, 1  ;;  %v3945_v4 = vrot.slane %v3894_v28, 1  ;;  %v3908_v32 = vrot.slane %v3887_v58, 1  ;;  %v3950_v1 = vsel %vm1391_vm5, %v3947_v37, %v3949_v23 }
 0x2b7   : >> { %v3937_v17 = vmax.f32 %v3931_v34, %v3897_v29  ;;  %v3968_v9 = vmax.f32 %v3938_v31, %v3956_v26  ;;  %v3936_v6 = vmax.f32 %v3930_v19, %v3896_v27  ;;  %v3935_v39 = vmax.f32 %v3929_v33, %v3895_v47 }
 0x2b8   : >> { %v3912_v41 = vsel %vm1391_vm5, %v3909_v3, %v3911_v48  ;;  %v3910_v15 = vsel %vm1391_vm5, %v3908_v32, %v3909_v3  ;;  %v3948_v43 = vsel %vm1391_vm5, %v3945_v4, %v3947_v37  ;;  %v3946_v46 = vsel %vm1391_vm5, %v3919_v13, %v3945_v4 }
 0x2b9   : >> { %v3967_v42 = vmax.f32 %v3937_v17, %v3954_v62  ;;  %12835 = vmatpush3.msra.mxu1 %v3968_v9  ;;  %12095 = vmatpush3.msra.mxu0 %v3968_v9  ;;  %v3966_v18 = vmax.f32 %v3936_v6, %v3952_v16  ;;  %v3928_v57 = vmax.f32 %v3888_v50, %v3912_v41 }
 0x2ba   : >> { %12830 = vmatprep.subr.mxu1 %v13307_v61  ;;  %12096 = vmatprep.subr.mxu0 %v13307_v61  ;;  %v3927_v20 = vmax.f32 %v3887_v58, %v3910_v15  ;;  %v3965_v59 = vmax.f32 %v3935_v39, %v3950_v1 }
 0x2bb   : >> { %12836 = vmatpush3.msra.mxu1 %v3967_v42  ;;  %12097 = vmatpush3.msra.mxu0 %v3967_v42  ;;  %v3934_v52 = vmax.f32 %v3928_v57, %v3894_v28 }
 0x2bc   : >> { %12831 = vmatprep.subr.mxu1 %v13307_v61  ;;  %12098 = vmatprep.subr.mxu0 %v13307_v61  ;;  %v3933_v24 = vmax.f32 %v3927_v20, %v3893_v11 }
 0x2bd   : >> { %12837 = vmatpush3.msra.mxu1 %v3966_v18  ;;  %12099 = vmatpush3.msra.mxu0 %v3966_v18  ;;  %v3964_v36 = vmax.f32 %v3934_v52, %v3948_v43 }
 0x2be   : >> { %12832 = vmatprep.subr.mxu1 %v13307_v61  ;;  %12100 = vmatprep.subr.mxu0 %v13307_v61  ;;  %v3963_v40 = vmax.f32 %v3933_v24, %v3946_v46 }
 0x2bf   : >> { %12838 = vmatpush3.msra.mxu1 %v3965_v59  ;;  %12101 = vmatpush3.msra.mxu0 %v3965_v59 }
 0x2c0   : >> { %12833 = vmatprep.subr.mxu1 %v13307_v61  ;;  %12102 = vmatprep.subr.mxu0 %v13307_v61 }
 0x2c1   : >> { %12839 = vmatpush3.msra.mxu1 %v3964_v36  ;;  %12103 = vmatpush3.msra.mxu0 %v3964_v36 }
 0x2c2   : >> { %12834 = vmatprep.subr.mxu1 %v13307_v61  ;;  %12104 = vmatprep.subr.mxu0 %v13307_v61 }
 0x2c3   : >> { %12840 = vmatpush3.msra.mxu1 %v3963_v40  ;;  %12105 = vmatpush3.msra.mxu0 %v3963_v40 }
 0x2c4   : >> { %12110 = vmatmul.mubr.msk.f32.vlgmr.msra.gmra.mxu1 %vm3970_vm12, %v15187_v45  ;;  %12107 = vmatmul.mubr.msk.f32.vlgmr.msra.gmra.mxu0 %vm3970_vm12, %v15178_v60 }
 0x2c5   : >> { %12112 = vmatprep.mubr.msk.f32.mxu1 %vm13308_vm11, %v13307_v61  ;;  %v15241_v61 = vld [vmem:[%s17705_s4] ss:$0 sm:$0xff] (%p3881_p2) }
 0x2c6   : > { %17985 = vst [vmem:[#allocation79_spill] sm:$0xff] (%p3881_p2), %v15241_v61 }
 0x2c8   : >> { %12113 = vmatmul.mubr.msk.f32.gmra.mxu1 %vm3970_vm12, %v15190_v22 }
 0x384   : >> { %v4051_v53 = vpop.f32.mrf.mxu1  ;;  %v4046_v11 = vpop.f32.mrf.mxu0 }
 0x385   : >> { %4062 = vst.msk [vmem:[%s4060_s27 + $0x8] sm:$0xff] %vm479_vm0, %v4051_v53  ;;  %4061 = vst.msk [vmem:[%s4060_s27] sm:$0xff] %vm479_vm0, %v4046_v11 }
 0x386   : >> { %v12111_v38 = vpop.f32.mrf.mxu1  ;;  %v12108_v5 = vpop.f32.mrf.mxu0  ;;  %3883 = sbr.rel (!%p3881_p2) target bundleno = 684 (0x2ac), region = 202 }
 0x388   : >> { %v4056_v54 = vpop.f32.mrf.mxu1 }
 0x389   : >> { %4063 = vst.msk [vmem:[%s4060_s27 + $0x10] sm:$0xff] %vm479_vm0, %v4056_v54 }
 0x38a   : >> { %v12114_v13 = vpop.f32.mrf.mxu1 }
 0x38b LB: >> { %v12932_v44 = vld [vmem:[%s17704_s3 + $0x18] sm:$0xff]   ;;  %v17782_v14 = vmov 0.0   ;;  %v12933_v45 = vld [vmem:[%s17704_s3 + $0x10] sm:$0xff]   ;;  %s4071_s23 = smul.u32 168, %s13295_s30  ;;  %vm13310_vm13 = vmmov 0   ;;  %v12934_v37 = vld [vmem:[%s17704_s3 + $0x28] sm:$0xff]   ;;  %s13295_s30 = sphi %s15243_s30, %s4070_s30  }
 0x38c   : >> { %12115 = vmatprep.subr.bf16.mxu0 %v17782_v14  ;;  %12841 = vmatprep.subr.bf16.mxu1 %v17782_v14  ;;  %v12935_v17 = vld [vmem:[%s17704_s3 + $0x8] sm:$0xff]   ;;  %v12936_v24 = vld [vmem:[%s17704_s3 + $0x20] sm:$0xff]   ;;  %s4070_s30 = sadd.s32 1, %s13295_s30  }
 0x38d   : >> { %12116 = vmatpush3.bf16.msra.mxu0 %v12932_v44  ;;  %12843 = vmatpush3.bf16.msra.mxu1 %v12932_v44  ;;  %s15265_s18 = scalar_lea.vmem [#allocation3], %s4071_s23  ;;  %v12937_v53 = vld [vmem:[%s17704_s3] sm:$0xff]   ;;  %p4067_p3 = scmp.ge.s32.totalorder %s4070_s30, 3  }
 0x38e   : >> { %12117 = vmatprep.subr.bf16.mxu0 %v17782_v14  ;;  %12842 = vmatprep.subr.bf16.mxu1 %v17782_v14 }
 0x38f   : >> { %12119 = vmatprep.mubr.msk.bf16.mxu0 %vm13310_vm13, %v17782_v14  ;;  %12143 = vmatprep.mubr.msk.bf16.mxu1 %vm13310_vm13, %v17782_v14 }
 0x390   : >> { %v4073_v22 = vld [vmem:[%s15265_s18] sm:$0xff]  ;;  %v4074_v29 = vld [vmem:[%s15265_s18 + $0x8] sm:$0xff]  ;;  %v4075_v21 = vld [vmem:[%s15265_s18 + $0x10] sm:$0xff] }
 0x391   : >> { %12118 = vmatpush3.bf16.msra.mxu0 %v12933_v45  ;;  %12844 = vmatpush3.bf16.msra.mxu1 %v12933_v45  ;;  %v15271_v8 = vld [vmem:[%s15265_s18 + $0x18] sm:$0xff]  ;;  %v15273_v56 = vpack.c.bf16 %v4074_v29, %v4073_v22  ;;  %v15276_v55 = vld [vmem:[%s15265_s18 + $0x60] sm:$0xff]  ;;  %v15279_v27 = vld [vmem:[%s15265_s18 + $0x68] sm:$0xff] }
 0x392   : >> { %12211 = vmatprep.subr.bf16.mxu0 %v17782_v14  ;;  %v15283_v49 = vpack.c.bf16 %v15271_v8, %v4075_v21  ;;  %v15286_v63 = vld [vmem:[%s15265_s18 + $0x70] sm:$0xff]  ;;  %v15289_v7 = vld [vmem:[%s15265_s18 + $0x78] sm:$0xff]  ;;  %v15293_v23 = vpack.c.bf16 %v15279_v27, %v15276_v55  ;;  %12163 = vmatprep.subr.bf16.mxu1 %v17782_v14  ;;  %v15297_v47 = vld [vmem:[%s15265_s18 + $0x20] sm:$0xff] }
 0x393   : >> { %v4124_v48 = vshrl.u32 %v15273_v56, 16  ;;  %v4126_v25 = vshll.u32 %v15273_v56, 16  ;;  %v15303_v26 = vpack.c.bf16 %v15289_v7, %v15286_v63  ;;  %v15306_v0 = vld [vmem:[%s15265_s18 + $0x28] sm:$0xff]  ;;  %v15309_v62 = vld [vmem:[%s15265_s18 + $0x80] sm:$0xff]  ;;  %v4079_v1 = vld [vmem:[%s15265_s18 + $0x30] sm:$0xff] }
 0x394   : >> { %v15312_v50 = vld [vmem:[%s15265_s18 + $0x88] sm:$0xff]  ;;  %v4131_v28 = vshll.u32 %v15283_v49, 16  ;;  %v4171_v58 = vshll.u32 %v15293_v23, 16  ;;  %v4175_v34 = vshrl.u32 %v15293_v23, 16  ;;  %v15319_v10 = vpack.c.bf16 %v15306_v0, %v15297_v47  ;;  %v4080_v41 = vld [vmem:[%s15265_s18 + $0x38] sm:$0xff]  ;;  %v15342_v15 = vld [vmem:[%s15265_s18 + $0x90] sm:$0xff] }
 0x395   : >> { %v4128_v16 = vrot.slane %v4126_v25, 1  ;;  %v4179_v51 = vshll.u32 %v15303_v26, 16  ;;  %v15324_v31 = vpack.c.bf16 %v15312_v50, %v15309_v62  ;;  %v4135_v3 = vshrl.u32 %v15283_v49, 16  ;;  %v15346_v57 = vld [vmem:[%s15265_s18 + $0x98] sm:$0xff]  ;;  %v4081_v11 = vld [vmem:[%s15265_s18 + $0x40] sm:$0xff]  ;;  %v4082_v13 = vld [vmem:[%s15265_s18 + $0x48] sm:$0xff] }
 0x396   : >> { %v4133_v19 = vrot.slane %v4131_v28, 1  ;;  %v15326_v33 = vrot.slane %v4171_v58, 1  ;;  %v4139_v9 = vshll.u32 %v15319_v10, 16  ;;  %v4183_v39 = vshrl.u32 %v15303_v26, 16  ;;  %v15378_v44 = vld [vmem:[%s15265_s18 + $0xa0] sm:$0xff]  ;;  %v15387_v21 = vld [vmem:[%s15265_s18 + $0xa8] sm:$0xff] }
 0x397   : >> { %v4129_v4 = vor.u32 %v4128_v16, %v4124_v48  ;;  %v4181_v32 = vrot.slane %v4179_v51, 1  ;;  %v4187_v42 = vshll.u32 %v15324_v31, 16  ;;  %v15354_v52 = vpack.c.bf16 %v4080_v41, %v4079_v1  ;;  %v4098_v61 = vld [vmem:[%s15265_s18 + $0xc8] sm:$0xff] }
 0x398   : >> { %v4177_v6 = vor.u32 %v4175_v34, %v15326_v33  ;;  %v4137_v20 = vor.u32 %v4135_v3, %v4133_v19  ;;  %v4141_v59 = vrot.slane %v4139_v9, 1  ;;  %v15363_v40 = vpack.c.bf16 %v15346_v57, %v15342_v15  ;;  %v4083_v9 = vld [vmem:[%s15265_s18 + $0x50] sm:$0xff] }
 0x399   : >> { %v4134_v18 = vsel %vm589_vm3, %v4129_v4, %v4133_v19  ;;  %v4185_v46 = vor.u32 %v4183_v39, %v4181_v32  ;;  %v4189_v36 = vrot.slane %v4187_v42, 1  ;;  %v4143_v5 = vshrl.u32 %v15319_v10, 16 }
 0x39a   : >> { %12120 = vmatmul.mubr.msk.bf16.vlgmr.msra.gmra.mxu0 %vm479_vm0, %v4134_v18  ;;  %v15350_v43 = vsel %vm589_vm3, %v4177_v6, %v4181_v32  ;;  %v4142_v38 = vsel %vm589_vm3, %v4137_v20, %v4141_v59  ;;  %v4147_v54 = vshll.u32 %v15354_v52, 16  ;;  %v4191_v22 = vshrl.u32 %v15324_v31, 16  ;;  %v4084_v6 = vld [vmem:[%s15265_s18 + $0x58] sm:$0xff] }
 0x39b   : >> { %12144 = vmatmul.mubr.msk.bf16.vlgmr.msra.gmra.mxu1 %vm479_vm0, %v15350_v43  ;;  %12212 = vmatpush3.bf16.msra.mxu0 %v12934_v37  ;;  %v15381_v45 = vsel %vm589_vm3, %v4185_v46, %v4189_v36  ;;  %v4195_v29 = vshll.u32 %v15363_v40, 16  ;;  %v4145_v48 = vor.u32 %v4143_v5, %v4141_v59  ;;  %v15395_v28 = vpack.c.bf16 %v4082_v13, %v4081_v11 }
 0x39c   : >> { %12164 = vmatpush3.bf16.msra.mxu1 %v12935_v17  ;;  %12123 = vmatprep.mubr.msk.bf16.mxu0 %vm13310_vm13, %v17782_v14  ;;  %v4149_v25 = vrot.slane %v4147_v54, 1  ;;  %v4193_v58 = vor.u32 %v4191_v22, %v4189_v36  ;;  %v15401_v16 = vpack.c.bf16 %v15387_v21, %v15378_v44  ;;  %v4151_v51 = vshrl.u32 %v15354_v52, 16 }
 0x39d   : >> { %12147 = vmatprep.mubr.msk.bf16.mxu1 %vm13310_vm13, %v17782_v14  ;;  %12213 = vmatprep.subr.bf16.mxu0 %v17782_v14  ;;  %v4197_v34 = vrot.slane %v4195_v29, 1  ;;  %v4155_v37 = vshll.u32 %v15395_v28, 16  ;;  %v4199_v17 = vshrl.u32 %v15363_v40, 16  ;;  %v15409_v3 = vpack.c.bf16 %v15297_v47, %v15271_v8 }
 0x39e   : >> { %12165 = vmatprep.subr.bf16.mxu1 %v17782_v14  ;;  %v4150_v19 = vsel %vm589_vm3, %v4145_v48, %v4149_v25  ;;  %v4203_v32 = vshll.u32 %v15401_v16, 16  ;;  %v15418_v39 = vpack.c.bf16 %v4079_v1, %v15306_v0  ;;  %v15420_v42 = vpack.c.bf16 %v4081_v11, %v4080_v41  ;;  %v12938_v48 = vld [vmem:[%s17704_s3 + $0x38] sm:$0xff]  }
 0x39f   : >> { %12214 = vmatpush3.bf16.msra.mxu0 %v12936_v24  ;;  %v15412_v4 = vsel %vm589_vm3, %v4193_v58, %v4197_v34  ;;  %v4153_v8 = vor.u32 %v4151_v51, %v4149_v25  ;;  %v4157_v47 = vrot.slane %v4155_v37, 1  ;;  %v15427_v18 = vpack.c.bf16 %v4084_v6, %v4083_v9 }
 0x3a0   : >> { %12166 = vmatpush3.bf16.msra.mxu1 %v12937_v53  ;;  %12307 = vmatprep.subr.bf16.mxu0 %v17782_v14  ;;  %v4201_v20 = vor.u32 %v4199_v17, %v4197_v34  ;;  %v4205_v0 = vrot.slane %v4203_v32, 1  ;;  %v15431_v1 = vpack.c.bf16 %v4083_v9, %v4082_v13  ;;  %v4159_v59 = vshrl.u32 %v15395_v28, 16 }
 0x3a1   : >> { %12259 = vmatprep.subr.bf16.mxu1 %v17782_v14  ;;  %v15434_v41 = vsel %vm589_vm3, %v4153_v8, %v4157_v47  ;;  %v4163_v24 = vshll.u32 %v15427_v18, 16  ;;  %v4207_v11 = vshrl.u32 %v15401_v16, 16  ;;  %v4167_v13 = vshrl.u32 %v15427_v18, 16 }
 0x3a2   : >> { %12124 = vmatmul.mubr.msk.bf16.gmra.mxu0 %vm479_vm0, %v4142_v38  ;;  %v15439_v46 = vsel %vm589_vm3, %v4201_v20, %v4205_v0  ;;  %v4161_v36 = vor.u32 %v4159_v59, %v4157_v47  ;;  %v15451_v38 = vpack.c.bf16 %v15276_v55, %v4084_v6  ;;  %v15469_v55 = vpack.c.bf16 %v15286_v63, %v15279_v27 }
 0x3a3   : >> { %12148 = vmatmul.mubr.msk.bf16.gmra.mxu1 %vm479_vm0, %v15381_v45  ;;  %12127 = vmatprep.mubr.msk.bf16.mxu0 %vm13310_vm13, %v17782_v14  ;;  %17986 = vst [vmem:[#allocation80_spill] sm:$0xff] %v15439_v46  ;;  %v4165_v53 = vrot.slane %v4163_v24, 1  ;;  %v15456_v54 = vor.u32 %v4207_v11, %v4205_v0  ;;  %v4547_v27 = vrot.slane %v15273_v56, 1  ;;  %v4548_v63 = vrot.slane %v15283_v49, 1 }
 0x3a4   : >> { %12151 = vmatprep.mubr.msk.bf16.mxu1 %vm13310_vm13, %v17782_v14  ;;  %v15493_v25 = vpack.c.bf16 %v15309_v62, %v15289_v7  ;;  %v4550_v7 = vrot.slane %v15319_v10, 1  ;;  %v12941_v62 = vld [vmem:[%s17704_s3 + $0x40] sm:$0xff]   ;;  %v15514_v34 = vpack.c.bf16 %v15342_v15, %v15312_v50  ;;  %v4552_v51 = vrot.slane %v15354_v52, 1 }
 0x3a5   : >> { %v15454_v5 = vsel %vm589_vm3, %v4161_v36, %v4165_v53  ;;  %17987 = vst [vmem:[#allocation81_spill] sm:$0xff] %v15456_v54  ;;  %v4169_v22 = vor.u32 %v4167_v13, %v4165_v53  ;;  %v4549_v58 = vsel %vm1391_vm5, %v4547_v27, %v4548_v63  ;;  %v15529_v50 = vpack.c.bf16 %v15378_v44, %v15346_v57 }
 0x3a6   : >> { %v4553_v15 = vsel %vm1391_vm5, %v4550_v7, %v4552_v51  ;;  %v4556_v57 = vrot.slane %v15427_v18, 1  ;;  %v4558_v17 = vrot.slane %v15293_v23, 1  ;;  %v4560_v9 = vrot.slane %v15303_v26, 1 }
 0x3a7   : >> { %v15473_v29 = vsel %vm589_vm3, %v4169_v22, %v15326_v33  ;;  %v12940_v33 = vld [vmem:[%s17704_s3 + $0x30] sm:$0xff]   ;;  %v4562_v8 = vrot.slane %v15324_v31, 1  ;;  %v4564_v20 = vrot.slane %v15363_v40, 1  ;;  %v15610_v59 = vrot.slane %v15401_v16, 1  ;;  %v12942_v22 = vld [vmem:[%s17704_s3 + $0x58] sm:$0xff]  }
 0x3a8   : >> { %v15565_v32 = vsel %vm1391_vm5, %v4556_v57, %v4558_v17  ;;  %v15577_v6 = vsel %vm1391_vm5, %v4558_v17, %v4560_v9  ;;  %v4111_v24 = vpack.c.bf16 %v15378_v44, %v15378_v44  ;;  %v4964_v53 = vshll.u32 %v15409_v3, 16 }
 0x3a9   : >> { %v15589_v47 = vsel %vm1391_vm5, %v4560_v9, %v4562_v8  ;;  %v15601_v0 = vsel %vm1391_vm5, %v4562_v8, %v4564_v20  ;;  %17989 = vst [vmem:[#allocation83_spill] sm:$0xff] %v15610_v59  ;;  %v15618_v36 = vsel %vm1391_vm5, %v4564_v20, %v15610_v59  ;;  %v4962_v11 = vshrl.u32 %v15409_v3, 16 }
 0x3aa   : >> { %12128 = vmatmul.mubr.msk.bf16.gmra.mxu0 %vm479_vm0, %v4150_v19  ;;  %17988 = vst [vmem:[#allocation82_spill] sm:$0xff] %v15601_v0  ;;  %17990 = vst [vmem:[#allocation84_spill] sm:$0xff] %v15618_v36  ;;  %v4966_v44 = vrot.slane %v4964_v53, 1  ;;  %v4968_v13 = vshll.u32 %v15418_v39, 16  ;;  %v4986_v20 = vshrl.u32 %v15431_v1, 16 }
 0x3ab   : >> { %12152 = vmatmul.mubr.msk.bf16.gmra.mxu1 %vm479_vm0, %v15412_v4  ;;  %12131 = vmatprep.mubr.msk.bf16.mxu0 %vm13310_vm13, %v17782_v14 }
 0x3ac   : >> { %12155 = vmatprep.mubr.msk.bf16.mxu1 %vm13310_vm13, %v17782_v14  ;;  %v4970_v27 = vrot.slane %v4968_v13, 1  ;;  %v4993_v13 = vshrl.u32 %v15451_v38, 16 }
 0x3b2   : >> { %12132 = vmatmul.mubr.msk.bf16.gmra.mxu0 %vm479_vm0, %v15434_v41 }
 0x3b3   : >> { %12156 = vmatmul.mubr.msk.bf16.gmra.mxu1 %vm479_vm0, %v15439_v46  ;;  %12135 = vmatprep.mubr.msk.bf16.mxu0 %vm13310_vm13, %v17782_v14 }
 0x3b4   : >> { %12159 = vmatprep.mubr.msk.bf16.mxu1 %vm13310_vm13, %v17782_v14 }
 0x3ba   : >> { %12136 = vmatmul.mubr.msk.bf16.gmra.mxu0 %vm479_vm0, %v15454_v5 }
 0x3bb   : >> { %12160 = vmatmul.mubr.msk.bf16.gmra.mxu1 %vm479_vm0, %v15456_v54  ;;  %12139 = vmatprep.mubr.msk.bf16.mxu0 %vm13310_vm13, %v17782_v14 }
 0x3bc   : >> { %12167 = vmatprep.mubr.msk.bf16.mxu1 %vm13310_vm13, %v17782_v14 }
 0x3c2   : >> { %12140 = vmatmul.mubr.msk.bf16.gmra.mxu0 %vm479_vm0, %v15473_v29 }
 0x3c3   : >> { %12168 = vmatmul.mubr.msk.bf16.vlgmr.msra.gmra.mxu1 %vm479_vm0, %v15273_v56  ;;  %12215 = vmatprep.mubr.msk.bf16.mxu0 %vm13310_vm13, %v17782_v14  ;;  %v12939_v56 = vld [vmem:[%s17704_s3 + $0x48] sm:$0xff]  }
 0x3c4   : >> { %12260 = vmatpush3.bf16.msra.mxu1 %v12938_v48  ;;  %12171 = vmatprep.mubr.msk.bf16.mxu1 %vm13310_vm13, %v17782_v14  ;;  %v4967_v48 = vor.u32 %v4966_v44, %v4962_v11 }
 0x3c5   : >> { %12261 = vmatprep.subr.bf16.mxu1 %v17782_v14 }
 0x3c8   : >> { %12262 = vmatpush3.bf16.msra.mxu1 %v12940_v33  ;;  %v4971_v33 = vsel %vm589_vm3, %v4967_v48, %v4970_v27 }
 0x3c9   : >> { %12355 = vmatprep.subr.bf16.mxu1 %v17782_v14 }
 0x3ca   : >> { %12216 = vmatmul.mubr.msk.bf16.vlgmr.msra.gmra.mxu0 %vm479_vm0, %v4549_v58  ;;  %v12943_v58 = vld [vmem:[%s17704_s3 + $0x68] sm:$0xff]  }
 0x3cb   : >> { %12172 = vmatmul.mubr.msk.bf16.gmra.mxu1 %vm479_vm0, %v15283_v49  ;;  %12308 = vmatpush3.bf16.msra.mxu0 %v12939_v56  ;;  %v4551_v49 = vsel %vm1391_vm5, %v4548_v63, %v4550_v7  ;;  %v12944_v63 = vld [vmem:[%s17704_s3 + $0x50] sm:$0xff]   ;;  %v4972_v56 = vshrl.u32 %v15418_v39, 16  ;;  %v4975_v7 = vshll.u32 %v15420_v42, 16 }
 0x3cc   : >> { %12175 = vmatprep.mubr.msk.bf16.mxu1 %vm13310_vm13, %v17782_v14  ;;  %12219 = vmatprep.mubr.msk.bf16.mxu0 %vm13310_vm13, %v17782_v14 }
 0x3cd   : >> { %12309 = vmatprep.subr.bf16.mxu0 %v17782_v14 }
 0x3cf   : >> { %12310 = vmatpush3.bf16.msra.mxu0 %v12941_v62  ;;  %v4974_v62 = vor.u32 %v4972_v56, %v4970_v27 }
 0x3d0   : >> { %12403 = vmatprep.subr.bf16.mxu0 %v17782_v14 }
 0x3d2   : >> { %12220 = vmatmul.mubr.msk.bf16.gmra.mxu0 %vm479_vm0, %v4551_v49  ;;  %v4977_v49 = vrot.slane %v4975_v7, 1 }
 0x3d3   : >> { %12176 = vmatmul.mubr.msk.bf16.gmra.mxu1 %vm479_vm0, %v15319_v10  ;;  %12223 = vmatprep.mubr.msk.bf16.mxu0 %vm13310_vm13, %v17782_v14  ;;  %v4554_v10 = vrot.slane %v15395_v28, 1 }
 0x3d4   : >> { %12179 = vmatprep.mubr.msk.bf16.mxu1 %vm13310_vm13, %v17782_v14 }
 0x3d5   : >> { %v15541_v19 = vsel %vm1391_vm5, %v4552_v51, %v4554_v10  ;;  %v15553_v37 = vsel %vm1391_vm5, %v4554_v10, %v4556_v57  ;;  %v12945_v51 = vld [vmem:[%s17704_s3 + $0x60] sm:$0xff]   ;;  %v4979_v10 = vshrl.u32 %v15420_v42, 16  ;;  %v4982_v57 = vshll.u32 %v15431_v1, 16 }
 0x3d7   : >> { %v4981_v17 = vor.u32 %v4979_v10, %v4977_v49  ;;  %v4984_v9 = vrot.slane %v4982_v57, 1 }
 0x3d9   : >> { %v4985_v8 = vsel %vm589_vm3, %v4981_v17, %v4984_v9  ;;  %v4988_v53 = vor.u32 %v4986_v20, %v4984_v9  ;;  %v5014_v17 = vshrl.u32 %v15514_v34, 16  ;;  %v5017_v9 = vshll.u32 %v15529_v50, 16 }
 0x3da   : >> { %12224 = vmatmul.mubr.msk.bf16.gmra.mxu0 %vm479_vm0, %v4553_v15  ;;  %v4978_v15 = vsel %vm589_vm3, %v4974_v62, %v4977_v49  ;;  %v5007_v49 = vshrl.u32 %v15493_v25, 16 }
 0x3db   : >> { %12180 = vmatmul.mubr.msk.bf16.gmra.mxu1 %vm479_vm0, %v15354_v52  ;;  %12227 = vmatprep.mubr.msk.bf16.mxu0 %vm13310_vm13, %v17782_v14 }
 0x3dc   : >> { %12183 = vmatprep.mubr.msk.bf16.mxu1 %vm13310_vm13, %v17782_v14 }
 0x3e2   : >> { %12228 = vmatmul.mubr.msk.bf16.gmra.mxu0 %vm479_vm0, %v15541_v19 }
 0x3e3   : >> { %12184 = vmatmul.mubr.msk.bf16.gmra.mxu1 %vm479_vm0, %v15395_v28  ;;  %12231 = vmatprep.mubr.msk.bf16.mxu0 %vm13310_vm13, %v17782_v14 }
 0x3e4   : >> { %12187 = vmatprep.mubr.msk.bf16.mxu1 %vm13310_vm13, %v17782_v14 }
 0x3ea   : >> { %12232 = vmatmul.mubr.msk.bf16.gmra.mxu0 %vm479_vm0, %v15553_v37 }
 0x3eb   : >> { %12188 = vmatmul.mubr.msk.bf16.gmra.mxu1 %vm479_vm0, %v15427_v18  ;;  %12235 = vmatprep.mubr.msk.bf16.mxu0 %vm13310_vm13, %v17782_v14 }
 0x3ec   : >> { %12191 = vmatprep.mubr.msk.bf16.mxu1 %vm13310_vm13, %v17782_v14 }
 0x3f2   : >> { %12236 = vmatmul.mubr.msk.bf16.gmra.mxu0 %vm479_vm0, %v15565_v32 }
 0x3f3   : >> { %12192 = vmatmul.mubr.msk.bf16.gmra.mxu1 %vm479_vm0, %v15293_v23  ;;  %12239 = vmatprep.mubr.msk.bf16.mxu0 %vm13310_vm13, %v17782_v14 }
 0x3f4   : >> { %12195 = vmatprep.mubr.msk.bf16.mxu1 %vm13310_vm13, %v17782_v14 }
 0x3fa   : >> { %12240 = vmatmul.mubr.msk.bf16.gmra.mxu0 %vm479_vm0, %v15577_v6 }
 0x3fb   : >> { %12196 = vmatmul.mubr.msk.bf16.gmra.mxu1 %vm479_vm0, %v15303_v26  ;;  %12243 = vmatprep.mubr.msk.bf16.mxu0 %vm13310_vm13, %v17782_v14 }
 0x3fc   : >> { %12199 = vmatprep.mubr.msk.bf16.mxu1 %vm13310_vm13, %v17782_v14 }
 0x402   : >> { %12244 = vmatmul.mubr.msk.bf16.gmra.mxu0 %vm479_vm0, %v15589_v47 }
 0x403   : >> { %12200 = vmatmul.mubr.msk.bf16.gmra.mxu1 %vm479_vm0, %v15324_v31  ;;  %12247 = vmatprep.mubr.msk.bf16.mxu0 %vm13310_vm13, %v17782_v14 }
 0x404   : >> { %12203 = vmatprep.mubr.msk.bf16.mxu1 %vm13310_vm13, %v17782_v14 }
 0x40a   : >> { %12248 = vmatmul.mubr.msk.bf16.gmra.mxu0 %vm479_vm0, %v15601_v0 }
 0x40b   : >> { %12204 = vmatmul.mubr.msk.bf16.gmra.mxu1 %vm479_vm0, %v15363_v40  ;;  %12251 = vmatprep.mubr.msk.bf16.mxu0 %vm13310_vm13, %v17782_v14 }
 0x40c   : >> { %12207 = vmatprep.mubr.msk.bf16.mxu1 %vm13310_vm13, %v17782_v14 }
 0x412   : >> { %12252 = vmatmul.mubr.msk.bf16.gmra.mxu0 %vm479_vm0, %v15618_v36 }
 0x413   : >> { %12208 = vmatmul.mubr.msk.bf16.gmra.mxu1 %vm479_vm0, %v4111_v24  ;;  %12255 = vmatprep.mubr.msk.bf16.mxu0 %vm13310_vm13, %v17782_v14  ;;  %v4989_v24 = vshll.u32 %v15451_v38, 16 }
 0x414   : >> { %12263 = vmatprep.mubr.msk.bf16.mxu1 %vm13310_vm13, %v17782_v14 }
 0x415   : >> { %v4991_v11 = vrot.slane %v4989_v24, 1  ;;  %v5019_v24 = vrot.slane %v5017_v9, 1 }
 0x417   : >> { %v4992_v44 = vsel %vm589_vm3, %v4988_v53, %v4991_v11  ;;  %v4995_v48 = vor.u32 %v4993_v13, %v4991_v11 }
 0x41a   : >> { %12256 = vmatmul.mubr.msk.bf16.gmra.mxu0 %vm479_vm0, %v15610_v59 }
 0x41b   : >> { %12264 = vmatmul.mubr.msk.bf16.vlgmr.msra.gmra.mxu1 %vm479_vm0, %v15409_v3  ;;  %12311 = vmatprep.mubr.msk.bf16.mxu0 %vm13310_vm13, %v17782_v14 }
 0x41c   : >> { %12356 = vmatpush3.bf16.msra.mxu1 %v12942_v22  ;;  %12267 = vmatprep.mubr.msk.bf16.mxu1 %vm13310_vm13, %v17782_v14  ;;  %v4996_v22 = vshll.u32 %v15469_v55, 16 }
 0x41d   : >> { %12357 = vmatprep.subr.bf16.mxu1 %v17782_v14 }
 0x41e   : >> { %v4998_v27 = vrot.slane %v4996_v22, 1  ;;  %v15735_v22 = vld [vmem:[%s15265_s18 + $0xb8] sm:$0xff] }
 0x420   : >> { %12358 = vmatpush3.bf16.msra.mxu1 %v12944_v63  ;;  %v4999_v63 = vsel %vm589_vm3, %v4995_v48, %v4998_v27  ;;  %v15738_v48 = vld [vmem:[%s15265_s18 + $0xc0] sm:$0xff] }
 0x421   : >> { %12451 = vmatprep.subr.bf16.mxu1 %v17782_v14 }
 0x422   : >> { %12312 = vmatmul.mubr.msk.bf16.vlgmr.msra.gmra.mxu0 %vm479_vm0, %v4971_v33  ;;  %v5000_v33 = vshrl.u32 %v15469_v55, 16 }
 0x423   : >> { %12268 = vmatmul.mubr.msk.bf16.gmra.mxu1 %vm479_vm0, %v15418_v39  ;;  %12404 = vmatpush3.bf16.msra.mxu0 %v12943_v58  ;;  %v5003_v58 = vshll.u32 %v15493_v25, 16 }
 0x424   : >> { %12271 = vmatprep.mubr.msk.bf16.mxu1 %vm13310_vm13, %v17782_v14  ;;  %12315 = vmatprep.mubr.msk.bf16.mxu0 %vm13310_vm13, %v17782_v14  ;;  %v5002_v56 = vor.u32 %v5000_v33, %v4998_v27 }
 0x425   : >> { %12405 = vmatprep.subr.bf16.mxu0 %v17782_v14  ;;  %v5005_v7 = vrot.slane %v5003_v58, 1  ;;  %v15751_v58 = vpack.c.bf16 %v15738_v48, %v15735_v22 }
 0x427   : >> { %12406 = vmatpush3.bf16.msra.mxu0 %v12945_v51  ;;  %v5006_v62 = vsel %vm589_vm3, %v5002_v56, %v5005_v7  ;;  %v5010_v51 = vshll.u32 %v15514_v34, 16 }
 0x428   : >> { %12499 = vmatprep.subr.bf16.mxu0 %v17782_v14 }
 0x429   : >> { %v5012_v10 = vrot.slane %v5010_v51, 1 }
 0x42a   : >> { %12316 = vmatmul.mubr.msk.bf16.gmra.mxu0 %vm479_vm0, %v4978_v15  ;;  %v5009_v15 = vor.u32 %v5007_v49, %v5005_v7 }
 0x42b   : >> { %12272 = vmatmul.mubr.msk.bf16.gmra.mxu1 %vm479_vm0, %v15420_v42  ;;  %12319 = vmatprep.mubr.msk.bf16.mxu0 %vm13310_vm13, %v17782_v14  ;;  %v5016_v20 = vor.u32 %v5014_v17, %v5012_v10 }
 0x42c   : >> { %12275 = vmatprep.mubr.msk.bf16.mxu1 %vm13310_vm13, %v17782_v14  ;;  %v5013_v57 = vsel %vm589_vm3, %v5009_v15, %v5012_v10  ;;  %v5032_v10 = vshll.u32 %v15751_v58, 16 }
 0x42d   : >> { %v5020_v11 = vsel %vm589_vm3, %v5016_v20, %v5019_v24 }
 0x432   : >> { %12320 = vmatmul.mubr.msk.bf16.gmra.mxu0 %vm479_vm0, %v4985_v8  ;;  %v15718_v8 = vld [vmem:[%s15265_s18 + $0xb0] sm:$0xff] }
 0x433   : >> { %12276 = vmatmul.mubr.msk.bf16.gmra.mxu1 %vm479_vm0, %v15431_v1  ;;  %12323 = vmatprep.mubr.msk.bf16.mxu0 %vm13310_vm13, %v17782_v14  ;;  %v15727_v53 = vpack.c.bf16 %v15718_v8, %v15387_v21 }
 0x434   : >> { %12279 = vmatprep.mubr.msk.bf16.mxu1 %vm13310_vm13, %v17782_v14 }
 0x435   : >> { %v5024_v13 = vshll.u32 %v15727_v53, 16  ;;  %v5028_v15 = vshrl.u32 %v15727_v53, 16 }
 0x437   : >> { %v5026_v33 = vrot.slane %v5024_v13, 1 }
 0x43a   : >> { %12324 = vmatmul.mubr.msk.bf16.gmra.mxu0 %vm479_vm0, %v4992_v44  ;;  %v5021_v44 = vshrl.u32 %v15529_v50, 16 }
 0x43b   : >> { %12280 = vmatmul.mubr.msk.bf16.gmra.mxu1 %vm479_vm0, %v15451_v38  ;;  %12327 = vmatprep.mubr.msk.bf16.mxu0 %vm13310_vm13, %v17782_v14 }
 0x43c   : >> { %12283 = vmatprep.mubr.msk.bf16.mxu1 %vm13310_vm13, %v17782_v14  ;;  %v5023_v21 = vor.u32 %v5021_v44, %v5019_v24  ;;  %v5030_v24 = vor.u32 %v5028_v15, %v5026_v33 }
 0x43e   : >> { %v5027_v51 = vsel %vm589_vm3, %v5023_v21, %v5026_v33  ;;  %v5036_v33 = vshrl.u32 %v15751_v58, 16 }
 0x442   : >> { %12328 = vmatmul.mubr.msk.bf16.gmra.mxu0 %vm479_vm0, %v4999_v63 }
 0x443   : >> { %12284 = vmatmul.mubr.msk.bf16.gmra.mxu1 %vm479_vm0, %v15469_v55  ;;  %12331 = vmatprep.mubr.msk.bf16.mxu0 %vm13310_vm13, %v17782_v14 }
 0x444   : >> { %12287 = vmatprep.mubr.msk.bf16.mxu1 %vm13310_vm13, %v17782_v14 }
 0x44a   : >> { %12332 = vmatmul.mubr.msk.bf16.gmra.mxu0 %vm479_vm0, %v5006_v62 }
 0x44b   : >> { %12288 = vmatmul.mubr.msk.bf16.gmra.mxu1 %vm479_vm0, %v15493_v25  ;;  %12335 = vmatprep.mubr.msk.bf16.mxu0 %vm13310_vm13, %v17782_v14 }
 0x44c   : >> { %12291 = vmatprep.mubr.msk.bf16.mxu1 %vm13310_vm13, %v17782_v14 }
 0x452   : >> { %12336 = vmatmul.mubr.msk.bf16.gmra.mxu0 %vm479_vm0, %v5013_v57 }
 0x453   : >> { %12292 = vmatmul.mubr.msk.bf16.gmra.mxu1 %vm479_vm0, %v15514_v34  ;;  %12339 = vmatprep.mubr.msk.bf16.mxu0 %vm13310_vm13, %v17782_v14 }
 0x454   : >> { %12295 = vmatprep.mubr.msk.bf16.mxu1 %vm13310_vm13, %v17782_v14 }
 0x45a   : >> { %v15740_v27 = vpop.f32.mrf.mxu0  ;;  %12340 = vmatmul.mubr.msk.bf16.gmra.mxu0 %vm479_vm0, %v5020_v11  ;;  %v5034_v11 = vrot.slane %v5032_v10, 1 }
 0x45b   : >> { %v15743_v63 = vpop.f32.mrf.mxu1  ;;  %12296 = vmatmul.mubr.msk.bf16.gmra.mxu1 %vm479_vm0, %v15529_v50  ;;  %12343 = vmatprep.mubr.msk.bf16.mxu0 %vm13310_vm13, %v17782_v14 }
 0x45c   : >> { %v12121_v56 = vpop.f32.mrf.mxu0  ;;  %12299 = vmatprep.mubr.msk.bf16.mxu1 %vm13310_vm13, %v17782_v14 }
 0x45d   : >> { %v12145_v7 = vpop.f32.mrf.mxu1 }
 0x45e   : >> { %v15755_v62 = vpop.f32.mrf.mxu0  ;;  %v4764_v7 = vpack.c.bf16 %v15735_v22, %v15735_v22 }
 0x45f   : >> { %v15757_v49 = vpop.f32.mrf.mxu1 }
 0x460   : >> { %v12122_v57 = vpop.f32.mrf.mxu0 }
 0x461   : >> { %v12146_v17 = vpop.f32.mrf.mxu1 }
 0x462   : >> { %v15762_v9 = vpop.f32.mrf.mxu0  ;;  %12344 = vmatmul.mubr.msk.bf16.gmra.mxu0 %vm479_vm0, %v5027_v51  ;;  %v5035_v51 = vsel %vm589_vm3, %v5030_v24, %v5034_v11  ;;  %v5241_v24 = vrot.slane %v15409_v3, 1 }
 0x463   : >> { %v15765_v20 = vpop.f32.mrf.mxu1  ;;  %12300 = vmatmul.mubr.msk.bf16.gmra.mxu1 %vm479_vm0, %v15727_v53  ;;  %12347 = vmatprep.mubr.msk.bf16.mxu0 %vm13310_vm13, %v17782_v14 }
 0x464   : >> { %v12125_v44 = vpop.f32.mrf.mxu0  ;;  %12303 = vmatprep.mubr.msk.bf16.mxu1 %vm13310_vm13, %v17782_v14 }
 0x465   : >> { %v12149_v13 = vpop.f32.mrf.mxu1  ;;  %v5242_v44 = vrot.slane %v15418_v39, 1 }
 0x466   : >> { %v15773_v21 = vpop.f32.mrf.mxu0 }
 0x467   : >> { %v15775_v56 = vpop.f32.mrf.mxu1 }
 0x468   : >> { %v12126_v57 = vpop.f32.mrf.mxu0 }
 0x469   : >> { %v12150_v17 = vpop.f32.mrf.mxu1 }
 0x46a   : >> { %v15780_v12 = vpop.f32.mrf.mxu0  ;;  %12348 = vmatmul.mubr.msk.bf16.gmra.mxu0 %vm479_vm0, %v5035_v51  ;;  %v5038_v51 = vor.u32 %v5036_v33, %v5034_v11 }
 0x46b   : >> { %v15784_v15 = vpop.f32.mrf.mxu1  ;;  %12304 = vmatmul.mubr.msk.bf16.gmra.mxu1 %vm479_vm0, %v4764_v7  ;;  %12351 = vmatprep.mubr.msk.bf16.mxu0 %vm13310_vm13, %v17782_v14  ;;  %v5243_v7 = vsel %vm1391_vm5, %v5241_v24, %v5242_v44 }
 0x46c   : >> { %v12129_v10 = vpop.f32.mrf.mxu0  ;;  %12359 = vmatprep.mubr.msk.bf16.mxu1 %vm13310_vm13, %v17782_v14 }
 0x46d   : >> { %v12153_v13 = vpop.f32.mrf.mxu1  ;;  %v12946_v10 = vld [vmem:[%s17704_s3 + $0x78] sm:$0xff]  }
 0x46e   : >> { %v15793_v57 = vpop.f32.mrf.mxu0  ;;  %v12947_v13 = vld [vmem:[%s17704_s3 + $0x88] sm:$0xff]  }
 0x46f   : >> { %v15795_v17 = vpop.f32.mrf.mxu1 }
 0x470   : >> { %v12130_v30 = vpop.f32.mrf.mxu0 }
 0x471   : >> { %v12154_v60 = vpop.f32.mrf.mxu1  ;;  %v5244_v30 = vrot.slane %v15420_v42, 1 }
 0x472   : >> { %v15801_v35 = vpop.f32.mrf.mxu0  ;;  %12352 = vmatmul.mubr.msk.bf16.gmra.mxu0 %vm479_vm0, %v5038_v51  ;;  %v12948_v60 = vld [vmem:[%s17704_s3 + $0x70] sm:$0xff]  }
 0x473   : >> { %v15804_v3 = vpop.f32.mrf.mxu1  ;;  %12360 = vmatmul.mubr.msk.bf16.vlgmr.msra.gmra.mxu1 %vm479_vm0, %v5243_v7  ;;  %12407 = vmatprep.mubr.msk.bf16.mxu0 %vm13310_vm13, %v17782_v14  ;;  %v5245_v7 = vsel %vm1391_vm5, %v5242_v44, %v5244_v30  ;;  %v5246_v44 = vrot.slane %v15431_v1, 1 }
 0x474   : >> { %v12133_v39 = vpop.f32.mrf.mxu0  ;;  %12452 = vmatpush3.bf16.msra.mxu1 %v12946_v10  ;;  %12363 = vmatprep.mubr.msk.bf16.mxu1 %vm13310_vm13, %v17782_v14 }
 0x475   : >> { %v12157_v11 = vpop.f32.mrf.mxu1  ;;  %12453 = vmatprep.subr.bf16.mxu1 %v17782_v14 }
 0x476   : >> { %v15816_v33 = vpop.f32.mrf.mxu0  ;;  %v12949_v11 = vld [vmem:[%s17704_s3 + $0x80] sm:$0xff]  }
 0x477   : >> { %v15818_v24 = vpop.f32.mrf.mxu1 }
 0x478   : >> { %v12134_v51 = vpop.f32.mrf.mxu0  ;;  %12454 = vmatpush3.bf16.msra.mxu1 %v12948_v60 }
 0x479   : >> { %v12158_v42 = vpop.f32.mrf.mxu1 }
 0x47a   : >> { %v15824_v10 = vpop.f32.mrf.mxu0  ;;  %12408 = vmatmul.mubr.msk.bf16.vlgmr.msra.gmra.mxu0 %vm479_vm0, %v15354_v52  ;;  %v5247_v42 = vsel %vm1391_vm5, %v5244_v30, %v5246_v44 }
 0x47b   : >> { %v15828_v39 = vpop.f32.mrf.mxu1  ;;  %12364 = vmatmul.mubr.msk.bf16.gmra.mxu1 %vm479_vm0, %v5245_v7  ;;  %12500 = vmatpush3.bf16.msra.mxu0 %v12947_v13 }
 0x47c   : >> { %v12137_v51 = vpop.f32.mrf.mxu0  ;;  %12367 = vmatprep.mubr.msk.bf16.mxu1 %vm13310_vm13, %v17782_v14  ;;  %12411 = vmatprep.mubr.msk.bf16.mxu0 %vm13310_vm13, %v17782_v14 }
 0x47d   : >> { %v12161_v52 = vpop.f32.mrf.mxu1  ;;  %12501 = vmatprep.subr.bf16.mxu0 %v17782_v14  ;;  %v15845_v51 = vpack.c.bf16 %v15735_v22, %v15718_v8 }
 0x47e   : >> { %v15840_v60 = vpop.f32.mrf.mxu0 }
 0x47f   : >> { %v4372_v7 = vpop.f32.mrf.mxu1  ;;  %12502 = vmatpush3.bf16.msra.mxu0 %v12949_v11  ;;  %v5626_v1 = vshll.u32 %v15845_v51, 16 }
 0x480   : >> { %v12138_v13 = vpop.f32.mrf.mxu0 }
 0x481   : >> { %v12162_v2 = vpop.f32.mrf.mxu1  ;;  %v15865_v7 = vrot.slane %v5626_v1, 1  ;;  %v5630_v13 = vshrl.u32 %v15845_v51, 16 }
 0x482   : >> { %v15848_v59 = vpop.f32.mrf.mxu0  ;;  %12412 = vmatmul.mubr.msk.bf16.gmra.mxu0 %vm479_vm0, %v15395_v28  ;;  %v5248_v2 = vrot.slane %v15451_v38, 1  ;;  %v15861_v28 = vpack.c.bf16 %v4098_v61, %v15738_v48 }
 0x483   : >> { %v4444_v52 = vpop.f32.mrf.mxu1  ;;  %12368 = vmatmul.mubr.msk.bf16.gmra.mxu1 %vm479_vm0, %v5247_v42  ;;  %12415 = vmatprep.mubr.msk.bf16.mxu0 %vm13310_vm13, %v17782_v14  ;;  %17991 = vst [vmem:[#allocation85_spill] sm:$0xff] %v15865_v7  ;;  %v5632_v38 = vor.u32 %v5630_v13, %v15865_v7  ;;  %v5250_v13 = vrot.slane %v15469_v55, 1 }
 0x484   : >> { %v4445_v30 = vadd.f32 %v4444_v52, %v15740_v27  ;;  %v12141_v8 = vpop.f32.mrf.mxu0  ;;  %12371 = vmatprep.mubr.msk.bf16.mxu1 %vm13310_vm13, %v17782_v14  ;;  %v5633_v42 = vshll.u32 %v15861_v28, 16  ;;  %v4100_v52 = vld [vmem:[%s15265_s18 + $0xd8] sm:$0xff]  ;;  %v5249_v36 = vsel %vm1391_vm5, %v5246_v44, %v5248_v2  ;;  %v17993_v44 = vmov 0.0  }
 0x485   : >> { %v12169_v22 = vpop.f32.mrf.mxu1 }
 0x486   : >> { %v15863_v11 = vpop.f32.mrf.mxu0  ;;  %v5635_v61 = vrot.slane %v5633_v42, 1  ;;  %v15874_v22 = vld [vmem:[%s15265_s18 + $0xd0] sm:$0xff]  ;;  %s16265_s18 = scalar_lea.vmem [#allocation4], %s4071_s23  ;;  %s16375_s23 = smov (%p4067_p3), 0  }
 0x487   : >> { %v4447_v27 = vpop.f32.mrf.mxu1  ;;  %v15879_v1 = vpack.c.bf16 %v4100_v52, %v15874_v22 }
 0x488   : >> { %v4448_v8 = vadd.f32 %v4447_v27, %v15755_v62  ;;  %v12142_v14 = vpop.f32.mrf.mxu0  ;;  %v15882_v46 = vsel %vm589_vm3, %v5632_v38, %v5635_v61  ;;  %v5637_v38 = vshrl.u32 %v15861_v28, 16 }
 0x489   : >> { %v12170_v48 = vpop.f32.mrf.mxu1  ;;  %17992 = vst [vmem:[#allocation86_spill] sm:$0xff] %v15882_v46  ;;  %v17789_v46 = vrot.slane %v15845_v51, 1 }
 0x48a   : >> { %v4647_v54 = vpop.f32.mrf.mxu0  ;;  %12416 = vmatmul.mubr.msk.bf16.gmra.mxu0 %vm479_vm0, %v15427_v18 }
 0x48b   : >> { %v4452_v62 = vpop.f32.mrf.mxu1  ;;  %v15884_v14 = vadd.f32 %v4647_v54, %v4445_v30  ;;  %12372 = vmatmul.mubr.msk.bf16.gmra.mxu1 %vm479_vm0, %v5249_v36  ;;  %12419 = vmatprep.mubr.msk.bf16.mxu0 %vm13310_vm13, %v17993_v44  ;;  %v5641_v54 = vshll.u32 %v15879_v1, 16  ;;  %v5251_v36 = vsel %vm1391_vm5, %v5248_v2, %v5250_v13 }
 0x48c   : >> { %v4453_v42 = vadd.f32 %v4452_v62, %v15762_v9  ;;  %v12217_v27 = vpop.f32.mrf.mxu0  ;;  %12375 = vmatprep.mubr.msk.bf16.mxu1 %vm13310_vm13, %v17993_v44  ;;  %v5639_v62 = vor.u32 %v5637_v38, %v5635_v61 }
 0x48d   : >> { %v12173_v18 = vpop.f32.mrf.mxu1  ;;  %v15900_v27 = vrot.slane %v5641_v54, 1 }
 0x48e   : >> { %v4650_v52 = vpop.f32.mrf.mxu0  ;;  %v5823_v18 = vrot.slane %v15861_v28, 1 }
 0x48f   : >> { %v4455_v30 = vpop.f32.mrf.mxu1  ;;  %v15895_v48 = vadd.f32 %v4650_v52, %v4448_v8  ;;  %v15907_v8 = vsel %vm589_vm3, %v5639_v62, %v15900_v27  ;;  %v5252_v52 = vrot.slane %v15493_v25, 1  ;;  %v5825_v62 = vrot.slane %v15879_v1, 1 }
 0x490   : >> { %v4456_v55 = vadd.f32 %v4455_v30, %v15773_v21  ;;  %v12218_v9 = vpop.f32.mrf.mxu0  ;;  %v15912_v2 = vsel %vm1391_vm5, %v17789_v46, %v5823_v18 }
 0x491   : >> { %v12174_v7 = vpop.f32.mrf.mxu1  ;;  %v15933_v25 = vsel %vm1391_vm5, %v5823_v18, %v5825_v62 }
 0x492   : >> { %v4655_v0 = vpop.f32.mrf.mxu0  ;;  %12420 = vmatmul.mubr.msk.bf16.gmra.mxu0 %vm479_vm0, %v15293_v23 }
 0x493   : >> { %v4460_v21 = vpop.f32.mrf.mxu1  ;;  %v15914_v61 = vadd.f32 %v4655_v0, %v4453_v42  ;;  %12376 = vmatmul.mubr.msk.bf16.gmra.mxu1 %vm479_vm0, %v5251_v36  ;;  %12423 = vmatprep.mubr.msk.bf16.mxu0 %vm13310_vm13, %v17993_v44  ;;  %v5253_v36 = vsel %vm1391_vm5, %v5250_v13, %v5252_v52 }
 0x494   : >> { %v4461_v7 = vadd.f32 %v4460_v21, %v15780_v12  ;;  %v12221_v23 = vpop.f32.mrf.mxu0  ;;  %12379 = vmatprep.mubr.msk.bf16.mxu1 %vm13310_vm13, %v17993_v44 }
 0x495   : >> { %v12177_v38 = vpop.f32.mrf.mxu1 }
 0x496   : >> { %v4658_v54 = vpop.f32.mrf.mxu0 }
 0x497   : >> { %v4463_v30 = vpop.f32.mrf.mxu1  ;;  %v15923_v9 = vadd.f32 %v4658_v54, %v4456_v55 }
 0x498   : >> { %v4464_v0 = vadd.f32 %v4463_v30, %v15793_v57  ;;  %v12222_v42 = vpop.f32.mrf.mxu0 }
 0x499   : >> { %v12178_v46 = vpop.f32.mrf.mxu1 }
 0x49a   : >> { %v4663_v12 = vpop.f32.mrf.mxu0  ;;  %12424 = vmatmul.mubr.msk.bf16.gmra.mxu0 %vm479_vm0, %v15303_v26  ;;  %v5254_v26 = vrot.slane %v15514_v34, 1 }
 0x49b   : >> { %v4468_v21 = vpop.f32.mrf.mxu1  ;;  %v15935_v55 = vadd.f32 %v4663_v12, %v4461_v7  ;;  %12380 = vmatmul.mubr.msk.bf16.gmra.mxu1 %vm479_vm0, %v5253_v36  ;;  %12427 = vmatprep.mubr.msk.bf16.mxu0 %vm13310_vm13, %v17993_v44 }
 0x49c   : >> { %v4469_v57 = vadd.f32 %v4468_v21, %v15801_v35  ;;  %v12225_v46 = vpop.f32.mrf.mxu0  ;;  %12383 = vmatprep.mubr.msk.bf16.mxu1 %vm13310_vm13, %v17993_v44  ;;  %v5255_v30 = vsel %vm1391_vm5, %v5252_v52, %v5254_v26 }
 0x49d   : >> { %v12181_v13 = vpop.f32.mrf.mxu1 }
 0x49e   : >> { %v4666_v23 = vpop.f32.mrf.mxu0 }
 0x49f   : >> { %v4471_v18 = vpop.f32.mrf.mxu1  ;;  %v15944_v38 = vadd.f32 %v4666_v23, %v4464_v0 }
 0x4a0   : >> { %v4472_v7 = vadd.f32 %v4471_v18, %v15816_v33  ;;  %v12226_v54 = vpop.f32.mrf.mxu0  ;;  %v5256_v33 = vrot.slane %v15529_v50, 1 }
 0x4a1   : >> { %v12182_v42 = vpop.f32.mrf.mxu1 }
 0x4a2   : >> { %v4671_v36 = vpop.f32.mrf.mxu0  ;;  %12428 = vmatmul.mubr.msk.bf16.gmra.mxu0 %vm479_vm0, %v15324_v31  ;;  %v5257_v23 = vsel %vm1391_vm5, %v5254_v26, %v5256_v33 }
 0x4a3   : >> { %v4476_v35 = vpop.f32.mrf.mxu1  ;;  %v15950_v12 = vadd.f32 %v4671_v36, %v4469_v57  ;;  %12384 = vmatmul.mubr.msk.bf16.gmra.mxu1 %vm479_vm0, %v5255_v30  ;;  %12431 = vmatprep.mubr.msk.bf16.mxu0 %vm13310_vm13, %v17993_v44 }
 0x4a4   : >> { %v4477_v34 = vadd.f32 %v4476_v35, %v15824_v10  ;;  %v12229_v0 = vpop.f32.mrf.mxu0  ;;  %12387 = vmatprep.mubr.msk.bf16.mxu1 %vm13310_vm13, %v17993_v44 }
 0x4a5   : >> { %v12185_v52 = vpop.f32.mrf.mxu1 }
 0x4a6   : >> { %v4674_v21 = vpop.f32.mrf.mxu0 }
 0x4a7   : >> { %v4479_v46 = vpop.f32.mrf.mxu1  ;;  %v15959_v31 = vadd.f32 %v4674_v21, %v4472_v7 }
 0x4a8   : >> { %v4480_v57 = vadd.f32 %v4479_v46, %v15840_v60  ;;  %v12230_v13 = vpop.f32.mrf.mxu0  ;;  %v5258_v60 = vrot.slane %v15727_v53, 1 }
 0x4a9   : >> { %v12186_v18 = vpop.f32.mrf.mxu1 }
 0x4aa   : >> { %v4679_v54 = vpop.f32.mrf.mxu0  ;;  %12432 = vmatmul.mubr.msk.bf16.gmra.mxu0 %vm479_vm0, %v15363_v40  ;;  %v5259_v0 = vsel %vm1391_vm5, %v5256_v33, %v5258_v60 }
 0x4ab   : >> { %v4484_v10 = vpop.f32.mrf.mxu1  ;;  %v15965_v30 = vadd.f32 %v4679_v54, %v4477_v34  ;;  %12388 = vmatmul.mubr.msk.bf16.gmra.mxu1 %vm479_vm0, %v5257_v23  ;;  %12435 = vmatprep.mubr.msk.bf16.mxu0 %vm13310_vm13, %v17993_v44 }
 0x4ac   : >> { %v4485_v50 = vadd.f32 %v4484_v10, %v15848_v59  ;;  %v12233_v7 = vpop.f32.mrf.mxu0  ;;  %12391 = vmatprep.mubr.msk.bf16.mxu1 %vm13310_vm13, %v17993_v44 }
 0x4ad   : >> { %v12189_v26 = vpop.f32.mrf.mxu1 }
 0x4ae   : >> { %v4682_v42 = vpop.f32.mrf.mxu0 }
 0x4af   : >> { %v4487_v36 = vpop.f32.mrf.mxu1  ;;  %v15974_v40 = vadd.f32 %v4682_v42, %v4480_v57 }
 0x4b0   : >> { %v4488_v35 = vadd.f32 %v4487_v36, %v15863_v11  ;;  %v12234_v34 = vpop.f32.mrf.mxu0  ;;  %v5260_v11 = vrot.slane %v15751_v58, 1 }
 0x4b1   : >> { %v12190_v52 = vpop.f32.mrf.mxu1 }
 0x4b2   : >> { %v4687_v21 = vpop.f32.mrf.mxu0  ;;  %12436 = vmatmul.mubr.msk.bf16.gmra.mxu0 %vm479_vm0, %v15401_v16  ;;  %v5261_v18 = vsel %vm1391_vm5, %v5258_v60, %v5260_v11 }
 0x4b3   : >> { %v4492_v59 = vpop.f32.mrf.mxu1  ;;  %v15980_v46 = vadd.f32 %v4687_v21, %v4485_v50  ;;  %12392 = vmatmul.mubr.msk.bf16.gmra.mxu1 %vm479_vm0, %v5259_v0  ;;  %12439 = vmatprep.mubr.msk.bf16.mxu0 %vm13310_vm13, %v17993_v44 }
 0x4b4   : >> { %v12237_v53 = vpop.f32.mrf.mxu0  ;;  %12395 = vmatprep.mubr.msk.bf16.mxu1 %vm13310_vm13, %v17993_v44  ;;  %v4493_v54 = vadd.f32 %v4492_v59, %v15743_v63 }
 0x4b5   : >> { %v12193_v33 = vpop.f32.mrf.mxu1 }
 0x4b6   : >> { %v4690_v57 = vpop.f32.mrf.mxu0 }
 0x4b7   : >> { %v4495_v13 = vpop.f32.mrf.mxu1  ;;  %v15988_v23 = vadd.f32 %v4690_v57, %v4488_v35 }
 0x4b8   : >> { %v12238_v16 = vpop.f32.mrf.mxu0  ;;  %v4496_v60 = vadd.f32 %v4495_v13, %v15757_v49  ;;  %v5450_v13 = vpack.c.bf16 %v15874_v22, %v15874_v22 }
 0x4b9   : >> { %v12194_v10 = vpop.f32.mrf.mxu1 }
 0x4ba   : >> { %v4695_v50 = vpop.f32.mrf.mxu0  ;;  %12440 = vmatmul.mubr.msk.bf16.gmra.mxu0 %vm479_vm0, %v15845_v51 }
 0x4bb   : >> { %v4500_v7 = vpop.f32.mrf.mxu1  ;;  %v15994_v26 = vadd.f32 %v4695_v50, %v4493_v54  ;;  %12396 = vmatmul.mubr.msk.bf16.gmra.mxu1 %vm479_vm0, %v5261_v18  ;;  %12443 = vmatprep.mubr.msk.bf16.mxu0 %vm13310_vm13, %v17993_v44 }
 0x4bc   : >> { %v12241_v58 = vpop.f32.mrf.mxu0  ;;  %12399 = vmatprep.mubr.msk.bf16.mxu1 %vm13310_vm13, %v17993_v44  ;;  %v4501_v0 = vadd.f32 %v4500_v7, %v15765_v20 }
 0x4bd   : >> { %v12197_v63 = vpop.f32.mrf.mxu1 }
 0x4be   : >> { %v4698_v42 = vpop.f32.mrf.mxu0 }
 0x4bf   : >> { %v4503_v36 = vpop.f32.mrf.mxu1  ;;  %v16002_v35 = vadd.f32 %v4698_v42, %v4496_v60 }
 0x4c0   : >> { %v12242_v34 = vpop.f32.mrf.mxu0  ;;  %v4504_v33 = vadd.f32 %v4503_v36, %v15775_v56 }
 0x4c1   : >> { %v12198_v52 = vpop.f32.mrf.mxu1 }
 0x4c2   : >> { %v4703_v21 = vpop.f32.mrf.mxu0  ;;  %12444 = vmatmul.mubr.msk.bf16.gmra.mxu0 %vm479_vm0, %v15861_v28 }
 0x4c3   : >> { %v4508_v59 = vpop.f32.mrf.mxu1  ;;  %v16007_v53 = vadd.f32 %v4703_v21, %v4501_v0  ;;  %12400 = vmatmul.mubr.msk.bf16.gmra.mxu1 %vm479_vm0, %v5260_v11  ;;  %12447 = vmatprep.mubr.msk.bf16.mxu0 %vm13310_vm13, %v17993_v44 }
 0x4c4   : >> { %v12245_v49 = vpop.f32.mrf.mxu0  ;;  %12455 = vmatprep.mubr.msk.bf16.mxu1 %vm13310_vm13, %v17993_v44  ;;  %v4509_v11 = vadd.f32 %v4508_v59, %v15784_v15 }
 0x4c5   : >> { %v12201_v20 = vpop.f32.mrf.mxu1 }
 0x4c6   : >> { %v4706_v57 = vpop.f32.mrf.mxu0 }
 0x4c7   : >> { %v4511_v28 = vpop.f32.mrf.mxu1  ;;  %v16017_v16 = vadd.f32 %v4706_v57, %v4504_v33 }
 0x4c8   : >> { %v12246_v18 = vpop.f32.mrf.mxu0  ;;  %v4512_v22 = vadd.f32 %v4511_v28, %v15795_v17 }
 0x4c9   : >> { %v12202_v54 = vpop.f32.mrf.mxu1 }
 0x4ca   : >> { %v4711_v10 = vpop.f32.mrf.mxu0  ;;  %12448 = vmatmul.mubr.msk.bf16.gmra.mxu0 %vm479_vm0, %v5450_v13 }
 0x4cb   : >> { %v4516_v50 = vpop.f32.mrf.mxu1  ;;  %v16021_v7 = vadd.f32 %v4711_v10, %v4509_v11  ;;  %12456 = vmatmul.mubr.msk.bf16.vlgmr.msra.gmra.mxu1 %vm479_vm0, %v15434_v41  ;;  %12503 = vmatprep.mubr.msk.bf16.mxu0 %vm13310_vm13, %v17993_v44 }
 0x4cc   : >> { %v12249_v56 = vpop.f32.mrf.mxu0  ;;  %12459 = vmatprep.mubr.msk.bf16.mxu1 %vm13310_vm13, %v17993_v44  ;;  %v4517_v36 = vadd.f32 %v4516_v50, %v15804_v3 }
 0x4cd   : >> { %v12205_v15 = vpop.f32.mrf.mxu1 }
 0x4ce   : >> { %v4714_v58 = vpop.f32.mrf.mxu0 }
 0x4cf   : >> { %v4519_v60 = vpop.f32.mrf.mxu1  ;;  %v16030_v63 = vadd.f32 %v4714_v58, %v4512_v22 }
 0x4d0   : >> { %v12250_v42 = vpop.f32.mrf.mxu0  ;;  %v4520_v3 = vadd.f32 %v4519_v60, %v15818_v24 }
 0x4d1   : >> { %v12206_v34 = vpop.f32.mrf.mxu1 }
 0x4d2   : >> { %v4719_v0 = vpop.f32.mrf.mxu0  ;;  %12504 = vmatmul.mubr.msk.bf16.vlgmr.msra.gmra.mxu0 %vm479_vm0, %v15541_v19 }
 0x4d3   : >> { %v4524_v41 = vpop.f32.mrf.mxu1  ;;  %v16035_v52 = vadd.f32 %v4719_v0, %v4517_v36  ;;  %12460 = vmatmul.mubr.msk.bf16.gmra.mxu1 %vm479_vm0, %v15454_v5  ;;  %12507 = vmatprep.mubr.msk.bf16.mxu0 %vm13310_vm13, %v17993_v44 }
 0x4d4   : >> { %v12253_v17 = vpop.f32.mrf.mxu0  ;;  %12463 = vmatprep.mubr.msk.bf16.mxu1 %vm13310_vm13, %v17993_v44  ;;  %v4525_v20 = vadd.f32 %v4524_v41, %v15828_v39 }
 0x4d5   : >> { %v12209_v21 = vpop.f32.mrf.mxu1 }
 0x4d6   : >> { %v4722_v59 = vpop.f32.mrf.mxu0 }
 0x4d7   : >> { %v4527_v49 = vpop.f32.mrf.mxu1  ;;  %v16044_v33 = vadd.f32 %v4722_v59, %v4520_v3 }
 0x4d8   : >> { %v12254_v19 = vpop.f32.mrf.mxu0 }
 0x4d9   : >> { %v12210_v57 = vpop.f32.mrf.mxu1 }
 0x4da   : >> { %v4727_v13 = vpop.f32.mrf.mxu0  ;;  %12508 = vmatmul.mubr.msk.bf16.gmra.mxu0 %vm479_vm0, %v15553_v37 }
 0x4db   : >> { %v16049_v5 = vadd.f32 %v4727_v13, %v4525_v20  ;;  %v4849_v28 = vpop.f32.mrf.mxu1  ;;  %12464 = vmatmul.mubr.msk.bf16.gmra.mxu1 %vm479_vm0, %v15473_v29  ;;  %12511 = vmatprep.mubr.msk.bf16.mxu0 %vm13310_vm13, %v17993_v44 }
 0x4dc   : >> { %v4935_v24 = vadd.f32 %v4849_v28, %v15884_v14  ;;  %v12257_v18 = vpop.f32.mrf.mxu0  ;;  %12467 = vmatprep.mubr.msk.bf16.mxu1 %vm13310_vm13, %v17993_v44 }
 0x4dd   : >> { %v12265_v39 = vpop.f32.mrf.mxu1 }
 0x4de   : >> { %v4730_v11 = vpop.f32.mrf.mxu0 }
 0x4df   : >> { %v4852_v54 = vpop.f32.mrf.mxu1 }
 0x4e0   : >> { %v4936_v37 = vadd.f32 %v4852_v54, %v15895_v48  ;;  %v12258_v10 = vpop.f32.mrf.mxu0 }
 0x4e1   : >> { %v12266_v50 = vpop.f32.mrf.mxu1 }
 0x4e2   : >> { %v5118_v56 = vpop.f32.mrf.mxu0  ;;  %12512 = vmatmul.mubr.msk.bf16.gmra.mxu0 %vm479_vm0, %v15565_v32 }
 0x4e3   : >> { %v4857_v29 = vpop.f32.mrf.mxu1  ;;  %v16061_v22 = vadd.f32 %v5118_v56, %v4935_v24  ;;  %12468 = vmatmul.mubr.msk.bf16.gmra.mxu1 %vm479_vm0, %v15350_v43  ;;  %12515 = vmatprep.mubr.msk.bf16.mxu0 %vm13310_vm13, %v17993_v44 }
 0x4e4   : >> { %v4937_v14 = vadd.f32 %v4857_v29, %v15914_v61  ;;  %v12313_v15 = vpop.f32.mrf.mxu0  ;;  %12471 = vmatprep.mubr.msk.bf16.mxu1 %vm13310_vm13, %v17993_v44 }
 0x4e5   : >> { %v12269_v48 = vpop.f32.mrf.mxu1 }
 0x4e6   : >> { %v5121_v58 = vpop.f32.mrf.mxu0 }
 0x4e7   : >> { %v4860_v60 = vpop.f32.mrf.mxu1  ;;  %v16070_v42 = vadd.f32 %v5121_v58, %v4936_v37 }
 0x4e8   : >> { %v4938_v32 = vadd.f32 %v4860_v60, %v15923_v9  ;;  %v12314_v36 = vpop.f32.mrf.mxu0  ;;  %v17996_v60 = vld [vmem:[#allocation85_spill] sm:$0xff] }
 0x4e9   : >> { %v12270_v34 = vpop.f32.mrf.mxu1 }
 0x4ea   : >> { %v5126_v0 = vpop.f32.mrf.mxu0  ;;  %12516 = vmatmul.mubr.msk.bf16.gmra.mxu0 %vm479_vm0, %v15577_v6 }
 0x4eb   : >> { %v4865_v43 = vpop.f32.mrf.mxu1  ;;  %v16075_v41 = vadd.f32 %v5126_v0, %v4937_v14  ;;  %12472 = vmatmul.mubr.msk.bf16.gmra.mxu1 %vm479_vm0, %v15381_v45  ;;  %12519 = vmatprep.mubr.msk.bf16.mxu0 %vm13310_vm13, %v17993_v44 }
 0x4ec   : >> { %v4939_v61 = vadd.f32 %v4865_v43, %v15935_v55  ;;  %v12317_v17 = vpop.f32.mrf.mxu0  ;;  %12475 = vmatprep.mubr.msk.bf16.mxu1 %vm13310_vm13, %v17993_v44  ;;  %v17998_v43 = vld [vmem:[#allocation84_spill] sm:$0xff] }
 0x4ed   : >> { %v12273_v9 = vpop.f32.mrf.mxu1 }
 0x4ee   : >> { %v5129_v3 = vpop.f32.mrf.mxu0 }
 0x4ef   : >> { %v4868_v21 = vpop.f32.mrf.mxu1  ;;  %v16084_v59 = vadd.f32 %v5129_v3, %v4938_v32  ;;  %v17997_v32 = vld [vmem:[#allocation81_spill] sm:$0xff] }
 0x4f0   : >> { %v4940_v6 = vadd.f32 %v4868_v21, %v15944_v38  ;;  %v12318_v49 = vpop.f32.mrf.mxu0  ;;  %v5629_v36 = vsel %vm589_vm3, %v17997_v32, %v17996_v60 }
 0x4f1   : >> { %v12274_v19 = vpop.f32.mrf.mxu1  ;;  %v17999_v49 = vrot.slane %v15845_v51, 1 }
 0x4f2   : >> { %v5134_v20 = vpop.f32.mrf.mxu0  ;;  %12520 = vmatmul.mubr.msk.bf16.gmra.mxu0 %vm479_vm0, %v15589_v47  ;;  %v18000_v19 = vld [vmem:[#allocation83_spill] sm:$0xff] }
 0x4f3   : >> { %v4873_v45 = vpop.f32.mrf.mxu1  ;;  %v16089_v57 = vadd.f32 %v5134_v20, %v4939_v61  ;;  %12476 = vmatmul.mubr.msk.bf16.gmra.mxu1 %vm479_vm0, %v15412_v4  ;;  %12523 = vmatprep.mubr.msk.bf16.mxu0 %vm13310_vm13, %v17993_v44  ;;  %v17994_v4 = vld [vmem:[#allocation82_spill] sm:$0xff]  ;;  %v5822_v20 = vsel %vm1391_vm5, %v18000_v19, %v17999_v49 }
 0x4f4   : >> { %v4941_v55 = vadd.f32 %v4873_v45, %v15950_v12  ;;  %v12321_v13 = vpop.f32.mrf.mxu0  ;;  %12479 = vmatprep.mubr.msk.bf16.mxu1 %vm13310_vm13, %v17993_v44  ;;  %v17995_v12 = vld [vmem:[#allocation80_spill] sm:$0xff] }
 0x4f5   : >> { %v12277_v38 = vpop.f32.mrf.mxu1 }
 0x4f6   : >> { %v5137_v28 = vpop.f32.mrf.mxu0 }
 0x4f7   : >> { %v4876_v24 = vpop.f32.mrf.mxu1  ;;  %v16098_v18 = vadd.f32 %v5137_v28, %v4940_v6 }
 0x4f8   : >> { %v4942_v47 = vadd.f32 %v4876_v24, %v15959_v31  ;;  %v12322_v39 = vpop.f32.mrf.mxu0  ;;  %v18001_v24 = vld [vmem:[#allocation86_spill] sm:$0xff] }
 0x4f9   : >> { %v12278_v11 = vpop.f32.mrf.mxu1 }
 0x4fa   : >> { %v5142_v54 = vpop.f32.mrf.mxu0  ;;  %12524 = vmatmul.mubr.msk.bf16.gmra.mxu0 %vm479_vm0, %v17994_v4 }
 0x4fb   : >> { %v4881_v37 = vpop.f32.mrf.mxu1  ;;  %v16103_v10 = vadd.f32 %v5142_v54, %v4941_v55  ;;  %12480 = vmatmul.mubr.msk.bf16.gmra.mxu1 %vm479_vm0, %v17995_v12  ;;  %12527 = vmatprep.mubr.msk.bf16.mxu0 %vm13310_vm13, %v17993_v44 }
 0x4fc   : >> { %v4943_v50 = vadd.f32 %v4881_v37, %v15965_v30  ;;  %v12325_v56 = vpop.f32.mrf.mxu0  ;;  %12483 = vmatprep.mubr.msk.bf16.mxu1 %vm13310_vm13, %v17993_v44 }
 0x4fd   : >> { %v12281_v31 = vpop.f32.mrf.mxu1 }
 0x4fe   : >> { %v5145_v29 = vpop.f32.mrf.mxu0 }
 0x4ff   : >> { %v4884_v14 = vpop.f32.mrf.mxu1  ;;  %v16112_v15 = vadd.f32 %v5145_v29, %v4942_v47 }
 0x500   : >> { %v4944_v48 = vadd.f32 %v4884_v14, %v15974_v40  ;;  %v12326_v58 = vpop.f32.mrf.mxu0 }
 0x501   : >> { %v12282_v34 = vpop.f32.mrf.mxu1 }
 0x502   : >> { %v5150_v0 = vpop.f32.mrf.mxu0  ;;  %12528 = vmatmul.mubr.msk.bf16.gmra.mxu0 %vm479_vm0, %v17998_v43 }
 0x503   : >> { %v4889_v30 = vpop.f32.mrf.mxu1  ;;  %v16120_v61 = vadd.f32 %v5150_v0, %v4943_v50  ;;  %12484 = vmatmul.mubr.msk.bf16.gmra.mxu1 %vm479_vm0, %v5629_v36  ;;  %12531 = vmatprep.mubr.msk.bf16.mxu0 %vm13310_vm13, %v17993_v44 }
 0x504   : >> { %v4945_v40 = vadd.f32 %v4889_v30, %v15980_v46  ;;  %v12329_v17 = vpop.f32.mrf.mxu0  ;;  %12487 = vmatprep.mubr.msk.bf16.mxu1 %vm13310_vm13, %v17993_v44 }
 0x505   : >> { %v12285_v9 = vpop.f32.mrf.mxu1 }
 0x506   : >> { %v5153_v3 = vpop.f32.mrf.mxu0 }
 0x507   : >> { %v4892_v21 = vpop.f32.mrf.mxu1  ;;  %v16128_v6 = vadd.f32 %v5153_v3, %v4944_v48 }
 0x508   : >> { %v4946_v45 = vadd.f32 %v4892_v21, %v15988_v23  ;;  %v12330_v55 = vpop.f32.mrf.mxu0 }
 0x509   : >> { %v12286_v13 = vpop.f32.mrf.mxu1 }
 0x50a   : >> { %v5158_v38 = vpop.f32.mrf.mxu0  ;;  %12532 = vmatmul.mubr.msk.bf16.gmra.mxu0 %vm479_vm0, %v5822_v20 }
 0x50b   : >> { %v4897_v46 = vpop.f32.mrf.mxu1  ;;  %v16136_v28 = vadd.f32 %v5158_v38, %v4945_v40  ;;  %12488 = vmatmul.mubr.msk.bf16.gmra.mxu1 %vm479_vm0, %v18001_v24  ;;  %12535 = vmatprep.mubr.msk.bf16.mxu0 %vm13310_vm13, %v17993_v44 }
 0x50c   : >> { %v4947_v51 = vadd.f32 %v4897_v46, %v15994_v26  ;;  %v12333_v47 = vpop.f32.mrf.mxu0  ;;  %12491 = vmatprep.mubr.msk.bf16.mxu1 %vm13310_vm13, %v17993_v44  ;;  %v5645_v26 = vshrl.u32 %v15879_v1, 16 }
 0x50d   : >> { %v12289_v23 = vpop.f32.mrf.mxu1 }
 0x50e   : >> { %v5161_v39 = vpop.f32.mrf.mxu0  ;;  %v5647_v60 = vor.u32 %v5645_v26, %v15900_v27 }
 0x50f   : >> { %v4900_v11 = vpop.f32.mrf.mxu1  ;;  %v16145_v54 = vadd.f32 %v5161_v39, %v4946_v45 }
 0x510   : >> { %v4948_v4 = vadd.f32 %v4900_v11, %v16002_v35  ;;  %v12334_v37 = vpop.f32.mrf.mxu0 }
 0x511   : >> { %v12290_v12 = vpop.f32.mrf.mxu1 }
 0x512   : >> { %v5166_v50 = vpop.f32.mrf.mxu0  ;;  %12536 = vmatmul.mubr.msk.bf16.gmra.mxu0 %vm479_vm0, %v15912_v2 }
 0x513   : >> { %v4905_v56 = vpop.f32.mrf.mxu1  ;;  %v16150_v31 = vadd.f32 %v5166_v50, %v4947_v51  ;;  %12492 = vmatmul.mubr.msk.bf16.gmra.mxu1 %vm479_vm0, %v15907_v8  ;;  %12539 = vmatprep.mubr.msk.bf16.mxu0 %vm13310_vm13, %v17993_v44 }
 0x514   : >> { %v4949_v29 = vadd.f32 %v4905_v56, %v16007_v53  ;;  %v12337_v35 = vpop.f32.mrf.mxu0  ;;  %12495 = vmatprep.mubr.msk.bf16.mxu1 %vm13310_vm13, %v17993_v44 }
 0x515   : >> { %v12293_v14 = vpop.f32.mrf.mxu1 }
 0x516   : >> { %v5169_v48 = vpop.f32.mrf.mxu0 }
 0x517   : >> { %v4908_v2 = vpop.f32.mrf.mxu1  ;;  %v16160_v58 = vadd.f32 %v5169_v48, %v4948_v4 }
 0x518   : >> { %v4950_v8 = vadd.f32 %v4908_v2, %v16017_v16  ;;  %v12338_v32 = vpop.f32.mrf.mxu0 }
 0x519   : >> { %v12294_v36 = vpop.f32.mrf.mxu1 }
 0x51a   : >> { %v5174_v34 = vpop.f32.mrf.mxu0  ;;  %12540 = vmatmul.mubr.msk.bf16.gmra.mxu0 %vm479_vm0, %v15933_v25 }
 0x51b   : >> { %v4913_v53 = vpop.f32.mrf.mxu1  ;;  %v16166_v0 = vadd.f32 %v5174_v34, %v4949_v29  ;;  %12496 = vmatmul.mubr.msk.bf16.gmra.mxu1 %vm479_vm0, %v5647_v60  ;;  %12543 = vmatprep.mubr.msk.bf16.mxu0 %vm13310_vm13, %v17993_v44 }
 0x51c   : >> { %v4951_v43 = vadd.f32 %v4913_v53, %v16021_v7  ;;  %v12341_v30 = vpop.f32.mrf.mxu0 }
 0x51d   : >> { %v12297_v27 = vpop.f32.mrf.mxu1 }
 0x51e   : >> { %v5177_v40 = vpop.f32.mrf.mxu0 }
 0x51f   : >> { %v4916_v16 = vpop.f32.mrf.mxu1  ;;  %v16172_v17 = vadd.f32 %v5177_v40, %v4950_v8 }
 0x520   : >> { %v4952_v9 = vadd.f32 %v4916_v16, %v16030_v63  ;;  %v12342_v3 = vpop.f32.mrf.mxu0 }
 0x521   : >> { %v12298_v25 = vpop.f32.mrf.mxu1 }
 0x522   : >> { %v5182_v21 = vpop.f32.mrf.mxu0  ;;  %12544 = vmatmul.mubr.msk.bf16.gmra.mxu0 %vm479_vm0, %v5825_v62 }
 0x523   : >> { %v4921_v49 = vpop.f32.mrf.mxu1  ;;  %v16178_v19 = vadd.f32 %v5182_v21, %v4951_v43 }
 0x524   : >> { %v4953_v44 = vadd.f32 %v4921_v49, %v16035_v52  ;;  %v12345_v7 = vpop.f32.mrf.mxu0 }
 0x525   : >> { %v12301_v20 = vpop.f32.mrf.mxu1 }
 0x526   : >> { %v5185_v45 = vpop.f32.mrf.mxu0 }
 0x527   : >> { %v4924_v55 = vpop.f32.mrf.mxu1  ;;  %v16181_v13 = vadd.f32 %v5185_v45, %v4952_v9 }
 0x528   : >> { %v4954_v63 = vadd.f32 %v4924_v55, %v16044_v33  ;;  %v12346_v38 = vpop.f32.mrf.mxu0 }
 0x529   : >> { %v12302_v46 = vpop.f32.mrf.mxu1 }
 0x52a   : >> { %v5190_v24 = vpop.f32.mrf.mxu0 }
 0x52b   : >> { %v4929_v51 = vpop.f32.mrf.mxu1  ;;  %v16184_v1 = vadd.f32 %v5190_v24, %v4953_v44 }
 0x52c   : >> { %v4955_v62 = vadd.f32 %v4929_v51, %v16049_v5  ;;  %v12349_v47 = vpop.f32.mrf.mxu0 }
 0x52d   : >> { %v12305_v23 = vpop.f32.mrf.mxu1 }
 0x52e   : >> { %v5193_v39 = vpop.f32.mrf.mxu0 }
 0x52f   : >> { %v4932_v52 = vpop.f32.mrf.mxu1  ;;  %v16187_v11 = vadd.f32 %v5193_v39, %v4954_v63 }
 0x530   : >> { %v12350_v4 = vpop.f32.mrf.mxu0 }
 0x531   : >> { %v12306_v37 = vpop.f32.mrf.mxu1 }
 0x532   : >> { %v5198_v12 = vpop.f32.mrf.mxu0 }
 0x533   : >> { %v16189_v50 = vadd.f32 %v5198_v12, %v4955_v62  ;;  %v5341_v33 = vpop.f32.mrf.mxu1 }
 0x534   : >> { %v5427_v56 = vadd.f32 %v5341_v33, %v16061_v22  ;;  %v12353_v26 = vpop.f32.mrf.mxu0 }
 0x535   : >> { %v12361_v29 = vpop.f32.mrf.mxu1 }
 0x536   : >> { %v5201_v35 = vpop.f32.mrf.mxu0 }
 0x537   : >> { %v5344_v14 = vpop.f32.mrf.mxu1 }
 0x538   : >> { %v5428_v5 = vadd.f32 %v5344_v14, %v16070_v42  ;;  %v12354_v48 = vpop.f32.mrf.mxu0 }
 0x539   : >> { %v12362_v2 = vpop.f32.mrf.mxu1 }
 0x53a   : >> { %v5513_v60 = vpop.f32.mrf.mxu0 }
 0x53b   : >> { %v5349_v8 = vpop.f32.mrf.mxu1  ;;  %v16193_v32 = vadd.f32 %v5513_v60, %v5427_v56 }
 0x53c   : >> { %v5429_v36 = vadd.f32 %v5349_v8, %v16075_v41  ;;  %v12409_v34 = vpop.f32.mrf.mxu0 }
 0x53d   : >> { %v12365_v53 = vpop.f32.mrf.mxu1 }
 0x53e   : >> { %v5516_v43 = vpop.f32.mrf.mxu0 }
 0x53f   : >> { %v5352_v30 = vpop.f32.mrf.mxu1  ;;  %v16196_v27 = vadd.f32 %v5516_v43, %v5428_v5 }
 0x540   : >> { %v5430_v22 = vadd.f32 %v5352_v30, %v16084_v59  ;;  %v12410_v40 = vpop.f32.mrf.mxu0 }
 0x541   : >> { %v12366_v16 = vpop.f32.mrf.mxu1 }
 0x542   : >> { %v5521_v9 = vpop.f32.mrf.mxu0 }
 0x543   : >> { %v5357_v42 = vpop.f32.mrf.mxu1  ;;  %v16199_v3 = vadd.f32 %v5521_v9, %v5429_v36 }
 0x544   : >> { %v5431_v25 = vadd.f32 %v5357_v42, %v16089_v57  ;;  %v12413_v21 = vpop.f32.mrf.mxu0 }
 0x545   : >> { %v12369_v49 = vpop.f32.mrf.mxu1 }
 0x546   : >> { %v5524_v44 = vpop.f32.mrf.mxu0 }
 0x547   : >> { %v5360_v41 = vpop.f32.mrf.mxu1  ;;  %v16202_v7 = vadd.f32 %v5524_v44, %v5430_v22 }
 0x548   : >> { %v5432_v20 = vadd.f32 %v5360_v41, %v16098_v18  ;;  %v12414_v45 = vpop.f32.mrf.mxu0 }
 0x549   : >> { %v12370_v55 = vpop.f32.mrf.mxu1 }
 0x54a   : >> { %v5529_v63 = vpop.f32.mrf.mxu0 }
 0x54b   : >> { %v5365_v59 = vpop.f32.mrf.mxu1  ;;  %v16205_v38 = vadd.f32 %v5529_v63, %v5431_v25 }
 0x54c   : >> { %v5433_v46 = vadd.f32 %v5365_v59, %v16103_v10  ;;  %v12417_v24 = vpop.f32.mrf.mxu0 }
 0x54d   : >> { %v12373_v51 = vpop.f32.mrf.mxu1 }
 0x54e   : >> { %v5532_v62 = vpop.f32.mrf.mxu0 }
 0x54f   : >> { %v5368_v57 = vpop.f32.mrf.mxu1  ;;  %v16208_v47 = vadd.f32 %v5532_v62, %v5432_v20 }
 0x550   : >> { %v5434_v23 = vadd.f32 %v5368_v57, %v16112_v15  ;;  %v12418_v39 = vpop.f32.mrf.mxu0 }
 0x551   : >> { %v12374_v52 = vpop.f32.mrf.mxu1 }
 0x552   : >> { %v5537_v4 = vpop.f32.mrf.mxu0 }
 0x553   : >> { %v5373_v18 = vpop.f32.mrf.mxu1  ;;  %v16211_v37 = vadd.f32 %v5537_v4, %v5433_v46 }
 0x554   : >> { %v5435_v12 = vadd.f32 %v5373_v18, %v16120_v61  ;;  %v12421_v33 = vpop.f32.mrf.mxu0 }
 0x555   : >> { %v12377_v56 = vpop.f32.mrf.mxu1 }
 0x556   : >> { %v5540_v26 = vpop.f32.mrf.mxu0 }
 0x557   : >> { %v5376_v10 = vpop.f32.mrf.mxu1  ;;  %v16214_v29 = vadd.f32 %v5540_v26, %v5434_v23 }
 0x558   : >> { %v5436_v35 = vadd.f32 %v5376_v10, %v16128_v6  ;;  %v12422_v14 = vpop.f32.mrf.mxu0 }
 0x559   : >> { %v12378_v5 = vpop.f32.mrf.mxu1 }
 0x55a   : >> { %v5545_v48 = vpop.f32.mrf.mxu0 }
 0x55b   : >> { %v5381_v15 = vpop.f32.mrf.mxu1  ;;  %v16217_v2 = vadd.f32 %v5545_v48, %v5435_v12 }
 0x55c   : >> { %v5437_v60 = vadd.f32 %v5381_v15, %v16136_v28  ;;  %v12425_v8 = vpop.f32.mrf.mxu0 }
 0x55d   : >> { %v12381_v36 = vpop.f32.mrf.mxu1 }
 0x55e   : >> { %v5548_v34 = vpop.f32.mrf.mxu0 }
 0x55f   : >> { %v5384_v61 = vpop.f32.mrf.mxu1  ;;  %v16220_v53 = vadd.f32 %v5548_v34, %v5436_v35 }
 0x560   : >> { %v5438_v43 = vadd.f32 %v5384_v61, %v16145_v54  ;;  %v12426_v30 = vpop.f32.mrf.mxu0 }
 0x561   : >> { %v12382_v22 = vpop.f32.mrf.mxu1 }
 0x562   : >> { %v5553_v40 = vpop.f32.mrf.mxu0 }
 0x563   : >> { %v5389_v6 = vpop.f32.mrf.mxu1  ;;  %v16223_v16 = vadd.f32 %v5553_v40, %v5437_v60 }
 0x564   : >> { %v5439_v9 = vadd.f32 %v5389_v6, %v16150_v31  ;;  %v12429_v42 = vpop.f32.mrf.mxu0 }
 0x565   : >> { %v12385_v25 = vpop.f32.mrf.mxu1 }
 0x566   : >> { %v5556_v21 = vpop.f32.mrf.mxu0 }
 0x567   : >> { %v5392_v28 = vpop.f32.mrf.mxu1  ;;  %v16226_v49 = vadd.f32 %v5556_v21, %v5438_v43 }
 0x568   : >> { %v5440_v44 = vadd.f32 %v5392_v28, %v16160_v58  ;;  %v12430_v41 = vpop.f32.mrf.mxu0 }
 0x569   : >> { %v12386_v20 = vpop.f32.mrf.mxu1 }
 0x56a   : >> { %v5561_v45 = vpop.f32.mrf.mxu0 }
 0x56b   : >> { %v5397_v54 = vpop.f32.mrf.mxu1  ;;  %v16229_v55 = vadd.f32 %v5561_v45, %v5439_v9 }
 0x56c   : >> { %v5441_v63 = vadd.f32 %v5397_v54, %v16166_v0  ;;  %v12433_v59 = vpop.f32.mrf.mxu0 }
 0x56d   : >> { %v12389_v46 = vpop.f32.mrf.mxu1 }
 0x56e   : >> { %v5564_v24 = vpop.f32.mrf.mxu0 }
 0x56f   : >> { %v5400_v31 = vpop.f32.mrf.mxu1  ;;  %v16232_v51 = vadd.f32 %v5564_v24, %v5440_v44 }
 0x570   : >> { %v5442_v62 = vadd.f32 %v5400_v31, %v16172_v17  ;;  %v12434_v57 = vpop.f32.mrf.mxu0 }
 0x571   : >> { %v12390_v23 = vpop.f32.mrf.mxu1  ;;  %v16256_v57 = vstv %s13431_s22 }
 0x572   : >> { %v5569_v39 = vpop.f32.mrf.mxu0 }
 0x573   : >> { %v5405_v58 = vpop.f32.mrf.mxu1  ;;  %v16235_v52 = vadd.f32 %v5569_v39, %v5441_v63 }
 0x574   : >> { %v5443_v4 = vadd.f32 %v5405_v58, %v16178_v19  ;;  %v12437_v18 = vpop.f32.mrf.mxu0  ;;  %v18002_v58 = vld [vmem:[#allocation79_spill] sm:$0xff] }
 0x575   : >> { %v12393_v12 = vpop.f32.mrf.mxu1 }
 0x576   : >> { %v5572_v33 = vpop.f32.mrf.mxu0 }
 0x577   : >> { %v5408_v0 = vpop.f32.mrf.mxu1  ;;  %v16238_v56 = vadd.f32 %v5572_v33, %v5442_v62 }
 0x578   : >> { %v5444_v26 = vadd.f32 %v5408_v0, %v16181_v13  ;;  %v12438_v10 = vpop.f32.mrf.mxu0 }
 0x579   : >> { %v12394_v35 = vpop.f32.mrf.mxu1 }
 0x57a   : >> { %v5577_v14 = vpop.f32.mrf.mxu0 }
 0x57b   : >> { %v5413_v17 = vpop.f32.mrf.mxu1  ;;  %v16241_v5 = vadd.f32 %v5577_v14, %v5443_v4 }
 0x57c   : >> { %v5445_v48 = vadd.f32 %v5413_v17, %v16184_v1  ;;  %v12441_v15 = vpop.f32.mrf.mxu0 }
 0x57d   : >> { %v12397_v60 = vpop.f32.mrf.mxu1 }
 0x57e   : >> { %v5580_v8 = vpop.f32.mrf.mxu0 }
 0x57f   : >> { %v5416_v19 = vpop.f32.mrf.mxu1  ;;  %v16244_v36 = vadd.f32 %v5580_v8, %v5444_v26 }
 0x580   : >> { %v5446_v34 = vadd.f32 %v5416_v19, %v16187_v11  ;;  %v12442_v61 = vpop.f32.mrf.mxu0 }
 0x581   : >> { %v12398_v43 = vpop.f32.mrf.mxu1 }
 0x582   : >> { %v5585_v30 = vpop.f32.mrf.mxu0 }
 0x583   : >> { %v5421_v13 = vpop.f32.mrf.mxu1  ;;  %v16247_v22 = vadd.f32 %v5585_v30, %v5445_v48 }
 0x584   : >> { %v5447_v40 = vadd.f32 %v5421_v13, %v16189_v50  ;;  %v12445_v6 = vpop.f32.mrf.mxu0 }
 0x585   : >> { %v12401_v9 = vpop.f32.mrf.mxu1 }
 0x586   : >> { %v5588_v42 = vpop.f32.mrf.mxu0 }
 0x587   : >> { %v5424_v1 = vpop.f32.mrf.mxu1  ;;  %v16250_v25 = vadd.f32 %v5588_v42, %v5446_v34 }
 0x588   : >> { %v12446_v21 = vpop.f32.mrf.mxu0 }
 0x589   : >> { %v12402_v28 = vpop.f32.mrf.mxu1 }
 0x58a   : >> { %v5593_v44 = vpop.f32.mrf.mxu0 }
 0x58b   : >> { %v16252_v41 = vadd.f32 %v5593_v44, %v5447_v40  ;;  %v5706_v11 = vpop.f32.mrf.mxu1 }
 0x58c   : >> { %v12449_v20 = vpop.f32.mrf.mxu0  ;;  %v5792_v50 = vadd.f32 %v5706_v11, %v16193_v32 }
 0x58d   : >> { %v12457_v45 = vpop.f32.mrf.mxu1 }
 0x58e   : >> { %v5596_v54 = vpop.f32.mrf.mxu0 }
 0x58f   : >> { %v5709_v63 = vpop.f32.mrf.mxu1 }
 0x590   : >> { %v12450_v59 = vpop.f32.mrf.mxu0  ;;  %v5793_v39 = vadd.f32 %v5709_v63, %v16196_v27 }
 0x591   : >> { %v12458_v46 = vpop.f32.mrf.mxu1 }
 0x592   : >> { %v5885_v24 = vpop.f32.mrf.mxu0 }
 0x593   : >> { %v5714_v31 = vpop.f32.mrf.mxu1  ;;  %v5971_v62 = vadd.f32 %v5885_v24, %v5792_v50 }
 0x594   : >> { %v12505_v23 = vpop.f32.mrf.mxu0  ;;  %v5794_v10 = vadd.f32 %v5714_v31, %v16199_v3 }
 0x595   : >> { %v5998_v4 = vadd.f32 %v18002_v58, %v5971_v62  ;;  %v12461_v18 = vpop.f32.mrf.mxu1 }
 0x596   : >> { %v5888_v12 = vpop.f32.mrf.mxu0 }
 0x597   : >> { %vm6019_vm14 = vcmp.gt.f32.partialorder %v5998_v4, 0.0  ;;  %v6041_v33 = vmul.f32 %v16256_v57, %v5998_v4  ;;  %v5717_v0 = vpop.f32.mrf.mxu1  ;;  %v5972_v26 = vadd.f32 %v5888_v12, %v5793_v39 }
 0x598   : >> { %v12506_v32 = vpop.f32.mrf.mxu0  ;;  %v5795_v3 = vadd.f32 %v5717_v0, %v16202_v7 }
 0x599   : >> { %v6062_v35 = vsel %vm6019_vm14, %v5998_v4, %v6041_v33  ;;  %v5999_v14 = vadd.f32 %v18002_v58, %v5972_v26  ;;  %v12462_v17 = vpop.f32.mrf.mxu1 }
 0x59a   : >> { %6084 = vst.msk [vmem:[%s16265_s18] sm:$0xff] %vm481_vm1, %v6062_v35  ;;  %v5893_v27 = vpop.f32.mrf.mxu0 }
 0x59b   : >> { %vm6020_vm15 = vcmp.gt.f32.partialorder %v5999_v14, 0.0  ;;  %v6042_v48 = vmul.f32 %v16256_v57, %v5999_v14  ;;  %v5722_v15 = vpop.f32.mrf.mxu1  ;;  %v5973_v60 = vadd.f32 %v5893_v27, %v5794_v10 }
 0x59c   : >> { %v12509_v8 = vpop.f32.mrf.mxu0  ;;  %v5796_v9 = vadd.f32 %v5722_v15, %v16205_v38 }
 0x59d   : >> { %v6063_v19 = vsel %vm6020_vm15, %v5999_v14, %v6042_v48  ;;  %v6000_v34 = vadd.f32 %v18002_v58, %v5973_v60  ;;  %v12465_v61 = vpop.f32.mrf.mxu1 }
 0x59e   : >> { %6085 = vst.msk [vmem:[%s16265_s18 + $0x8] sm:$0xff] %vm481_vm1, %v6063_v19  ;;  %v5896_v43 = vpop.f32.mrf.mxu0 }
 0x59f   : >> { %vm6021_vm2 = vcmp.gt.f32.partialorder %v6000_v34, 0.0  ;;  %v6043_v30 = vmul.f32 %v16256_v57, %v6000_v34  ;;  %v5725_v13 = vpop.f32.mrf.mxu1  ;;  %v5974_v40 = vadd.f32 %v5896_v43, %v5795_v3 }
 0x5a0   : >> { %v12510_v6 = vpop.f32.mrf.mxu0  ;;  %v5797_v45 = vadd.f32 %v5725_v13, %v16208_v47 }
 0x5a1   : >> { %v6064_v42 = vsel %vm6021_vm2, %v6000_v34, %v6043_v30  ;;  %v6001_v1 = vadd.f32 %v18002_v58, %v5974_v40  ;;  %v12466_v7 = vpop.f32.mrf.mxu1 }
 0x5a2   : >> { %6086 = vst.msk [vmem:[%s16265_s18 + $0x10] sm:$0xff] %vm481_vm1, %v6064_v42  ;;  %v5901_v21 = vpop.f32.mrf.mxu0 }
 0x5a3   : >> { %vm6022_vm4 = vcmp.gt.f32.partialorder %v6001_v1, 0.0  ;;  %v6044_v28 = vmul.f32 %v16256_v57, %v6001_v1  ;;  %v5730_v44 = vpop.f32.mrf.mxu1  ;;  %v5975_v11 = vadd.f32 %v5901_v21, %v5796_v9 }
 0x5a4   : >> { %v12513_v20 = vpop.f32.mrf.mxu0  ;;  %v5798_v62 = vadd.f32 %v5730_v44, %v16211_v37 }
 0x5a5   : >> { %v6065_v54 = vsel %vm6022_vm4, %v6001_v1, %v6044_v28  ;;  %v6002_v63 = vadd.f32 %v18002_v58, %v5975_v11  ;;  %v12469_v38 = vpop.f32.mrf.mxu1 }
 0x5a6   : >> { %6087 = vst.msk [vmem:[%s16265_s18 + $0x18] sm:$0xff] %vm481_vm1, %v6065_v54  ;;  %v5904_v59 = vpop.f32.mrf.mxu0 }
 0x5a7   : >> { %vm6023_vm7 = vcmp.gt.f32.partialorder %v6002_v63, 0.0  ;;  %v6045_v50 = vmul.f32 %v16256_v57, %v6002_v63  ;;  %v5733_v46 = vpop.f32.mrf.mxu1  ;;  %v5976_v24 = vadd.f32 %v5904_v59, %v5797_v45 }
 0x5a8   : >> { %v12514_v31 = vpop.f32.mrf.mxu0  ;;  %v5799_v26 = vadd.f32 %v5733_v46, %v16214_v29 }
 0x5a9   : >> { %v6066_v23 = vsel %vm6023_vm7, %v6002_v63, %v6045_v50  ;;  %v6003_v39 = vadd.f32 %v18002_v58, %v5976_v24  ;;  %v12470_v47 = vpop.f32.mrf.mxu1 }
 0x5aa   : >> { %6088 = vst.msk [vmem:[%s16265_s18 + $0x20] sm:$0xff] %vm481_vm1, %v6066_v23  ;;  %v5909_v4 = vpop.f32.mrf.mxu0 }
 0x5ab   : >> { %vm6024_vm9 = vcmp.gt.f32.partialorder %v6003_v39, 0.0  ;;  %v6046_v18 = vmul.f32 %v16256_v57, %v6003_v39  ;;  %v5738_v12 = vpop.f32.mrf.mxu1  ;;  %v5977_v33 = vadd.f32 %v5909_v4, %v5798_v62 }
 0x5ac   : >> { %v12517_v0 = vpop.f32.mrf.mxu0  ;;  %v5800_v15 = vadd.f32 %v5738_v12, %v16217_v2 }
 0x5ad   : >> { %v6067_v32 = vsel %vm6024_vm9, %v6003_v39, %v6046_v18  ;;  %v6004_v10 = vadd.f32 %v18002_v58, %v5977_v33  ;;  %v12473_v37 = vpop.f32.mrf.mxu1 }
 0x5ae   : >> { %6089 = vst.msk [vmem:[%s16265_s18 + $0x28] sm:$0xff] %vm481_vm1, %v6067_v32  ;;  %v5912_v35 = vpop.f32.mrf.mxu0 }
 0x5af   : >> { %vm6025_vm10 = vcmp.gt.f32.partialorder %v6004_v10, 0.0  ;;  %v6047_v14 = vmul.f32 %v16256_v57, %v6004_v10  ;;  %v5741_v17 = vpop.f32.mrf.mxu1  ;;  %v5978_v27 = vadd.f32 %v5912_v35, %v5799_v26 }
 0x5b0   : >> { %v12518_v48 = vpop.f32.mrf.mxu0  ;;  %v5801_v30 = vadd.f32 %v5741_v17, %v16220_v53 }
 0x5b1   : >> { %v6068_v60 = vsel %vm6025_vm10, %v6004_v10, %v6047_v14  ;;  %v6005_v8 = vadd.f32 %v18002_v58, %v5978_v27  ;;  %v12474_v29 = vpop.f32.mrf.mxu1 }
 0x5b2   : >> { %6090 = vst.msk [vmem:[%s16265_s18 + $0x30] sm:$0xff] %vm481_vm1, %v6068_v60  ;;  %v5917_v3 = vpop.f32.mrf.mxu0 }
 0x5b3   : >> { %vm6026_vm11 = vcmp.gt.f32.partialorder %v6005_v8, 0.0  ;;  %v6048_v19 = vmul.f32 %v16256_v57, %v6005_v8  ;;  %v5746_v34 = vpop.f32.mrf.mxu1  ;;  %v5979_v61 = vadd.f32 %v5917_v3, %v5800_v15 }
 0x5b4   : >> { %v12521_v43 = vpop.f32.mrf.mxu0  ;;  %v5802_v21 = vadd.f32 %v5746_v34, %v16223_v16 }
 0x5b5   : >> { %v6069_v13 = vsel %vm6026_vm11, %v6005_v8, %v6048_v19  ;;  %v6006_v40 = vadd.f32 %v18002_v58, %v5979_v61  ;;  %v12477_v2 = vpop.f32.mrf.mxu1 }
 0x5b6   : >> { %6091 = vst.msk [vmem:[%s16265_s18 + $0x38] sm:$0xff] %vm481_vm1, %v6069_v13  ;;  %v5920_v6 = vpop.f32.mrf.mxu0 }
 0x5b7   : >> { %vm6027_vm12 = vcmp.gt.f32.partialorder %v6006_v40, 0.0  ;;  %v6049_v9 = vmul.f32 %v16256_v57, %v6006_v40  ;;  %v5749_v42 = vpop.f32.mrf.mxu1  ;;  %v5980_v1 = vadd.f32 %v5920_v6, %v5801_v30 }
 0x5b8   : >> { %v12522_v7 = vpop.f32.mrf.mxu0  ;;  %v5803_v38 = vadd.f32 %v5749_v42, %v16226_v49 }
 0x5b9   : >> { %v6070_v28 = vsel %vm6027_vm12, %v6006_v40, %v6049_v9  ;;  %v6007_v44 = vadd.f32 %v18002_v58, %v5980_v1  ;;  %v12478_v53 = vpop.f32.mrf.mxu1 }
 0x5ba   : >> { %6092 = vst.msk [vmem:[%s16265_s18 + $0x40] sm:$0xff] %vm481_vm1, %v6070_v28  ;;  %v5925_v11 = vpop.f32.mrf.mxu0 }
 0x5bb   : >> { %vm6028_vm13 = vcmp.gt.f32.partialorder %v6007_v44, 0.0  ;;  %v6050_v20 = vmul.f32 %v16256_v57, %v6007_v44  ;;  %v5754_v45 = vpop.f32.mrf.mxu1  ;;  %v5981_v54 = vadd.f32 %v5925_v11, %v5802_v21 }
 0x5bc   : >> { %v12525_v63 = vpop.f32.mrf.mxu0  ;;  %v5804_v39 = vadd.f32 %v5754_v45, %v16229_v55 }
 0x5bd   : >> { %v6071_v59 = vsel %vm6028_vm13, %v6007_v44, %v6050_v20  ;;  %v6008_v50 = vadd.f32 %v18002_v58, %v5981_v54  ;;  %v12481_v16 = vpop.f32.mrf.mxu1 }
 0x5be   : >> { %6093 = vst.msk [vmem:[%s16265_s18 + $0x48] sm:$0xff] %vm481_vm1, %v6071_v59  ;;  %v5928_v46 = vpop.f32.mrf.mxu0 }
 0x5bf   : >> { %vm6029_vm14 = vcmp.gt.f32.partialorder %v6008_v50, 0.0  ;;  %v6051_v24 = vmul.f32 %v16256_v57, %v6008_v50  ;;  %v5757_v31 = vpop.f32.mrf.mxu1  ;;  %v5982_v62 = vadd.f32 %v5928_v46, %v5803_v38 }
 0x5c0   : >> { %v12526_v23 = vpop.f32.mrf.mxu0  ;;  %v5805_v32 = vadd.f32 %v5757_v31, %v16232_v51 }
 0x5c1   : >> { %v6072_v47 = vsel %vm6029_vm14, %v6008_v50, %v6051_v24  ;;  %v6009_v4 = vadd.f32 %v18002_v58, %v5982_v62  ;;  %v12482_v49 = vpop.f32.mrf.mxu1 }
 0x5c2   : >> { %6094 = vst.msk [vmem:[%s16265_s18 + $0x50] sm:$0xff] %vm481_vm1, %v6072_v47  ;;  %v5933_v18 = vpop.f32.mrf.mxu0 }
 0x5c3   : >> { %vm6030_vm15 = vcmp.gt.f32.partialorder %v6009_v4, 0.0  ;;  %v6052_v12 = vmul.f32 %v16256_v57, %v6009_v4  ;;  %v5762_v33 = vpop.f32.mrf.mxu1  ;;  %v5983_v0 = vadd.f32 %v5933_v18, %v5804_v39 }
 0x5c4   : >> { %v12529_v26 = vpop.f32.mrf.mxu0  ;;  %v5806_v15 = vadd.f32 %v5762_v33, %v16235_v52 }
 0x5c5   : >> { %v6073_v10 = vsel %vm6030_vm15, %v6009_v4, %v6052_v12  ;;  %v6010_v37 = vadd.f32 %v18002_v58, %v5983_v0  ;;  %v12485_v55 = vpop.f32.mrf.mxu1 }
 0x5c6   : >> { %6095 = vst.msk [vmem:[%s16265_s18 + $0x58] sm:$0xff] %vm481_vm1, %v6073_v10  ;;  %v5936_v35 = vpop.f32.mrf.mxu0 }
 0x5c7   : >> { %vm6031_vm2 = vcmp.gt.f32.partialorder %v6010_v37, 0.0  ;;  %v6053_v14 = vmul.f32 %v16256_v57, %v6010_v37  ;;  %v5765_v17 = vpop.f32.mrf.mxu1  ;;  %v5984_v27 = vadd.f32 %v5936_v35, %v5805_v32 }
 0x5c8   : >> { %v12530_v48 = vpop.f32.mrf.mxu0  ;;  %v5807_v43 = vadd.f32 %v5765_v17, %v16238_v56 }
 0x5c9   : >> { %v6074_v60 = vsel %vm6031_vm2, %v6010_v37, %v6053_v14  ;;  %v6011_v8 = vadd.f32 %v18002_v58, %v5984_v27  ;;  %v12486_v51 = vpop.f32.mrf.mxu1 }
 0x5ca   : >> { %6096 = vst.msk [vmem:[%s16265_s18 + $0x60] sm:$0xff] %vm481_vm1, %v6074_v60  ;;  %v5941_v29 = vpop.f32.mrf.mxu0 }
 0x5cb   : >> { %vm6032_vm4 = vcmp.gt.f32.partialorder %v6011_v8, 0.0  ;;  %v6054_v3 = vmul.f32 %v16256_v57, %v6011_v8  ;;  %v5770_v19 = vpop.f32.mrf.mxu1  ;;  %v5985_v34 = vadd.f32 %v5941_v29, %v5806_v15 }
 0x5cc   : >> { %v12533_v61 = vpop.f32.mrf.mxu0  ;;  %v5808_v1 = vadd.f32 %v5770_v19, %v16241_v5  ;;  %v18003_v19 = vld [vmem:[#allocation75_spill] sm:$0xff] (%p4067_p3) }
 0x5cd   : >> { %v6075_v30 = vsel %vm6032_vm4, %v6011_v8, %v6054_v3  ;;  %v6012_v13 = vadd.f32 %v18002_v58, %v5985_v34  ;;  %v12489_v52 = vpop.f32.mrf.mxu1  ;;  %vm6106_vm15 = vcmp.lt.s32.totalorder (%p4067_p3), %v18003_v19, 10  ;;  %v18005_v61 = vmov (%p4067_p3), 0.0  }
 0x5ce   : >> { %6097 = vst.msk [vmem:[%s16265_s18 + $0x68] sm:$0xff] %vm481_vm1, %v6075_v30  ;;  %v5944_v40 = vpop.f32.mrf.mxu0  ;;  %vm6108_vm2 = vmand (%p4067_p3), %vm15180_vm8, %vm6106_vm15 }
 0x5cf   : >> { %vm6033_vm7 = vcmp.gt.f32.partialorder %v6012_v13, 0.0  ;;  %v6055_v2 = vmul.f32 %v16256_v57, %v6012_v13  ;;  %v5773_v6 = vpop.f32.mrf.mxu1  ;;  %v5986_v9 = vadd.f32 %v5944_v40, %v5807_v43  ;;  %v16373_v43 = vsel (%p4067_p3), %vm6108_vm2, 1.0, %v18005_v61 }
 0x5d0   : >> { %v12534_v42 = vpop.f32.mrf.mxu0  ;;  %v5809_v45 = vadd.f32 %v5773_v6, %v16244_v36 }
 0x5d1   : >> { %v6076_v7 = vsel %vm6033_vm7, %v6012_v13, %v6055_v2  ;;  %v6013_v21 = vadd.f32 %v18002_v58, %v5986_v9  ;;  %v12490_v56 = vpop.f32.mrf.mxu1 }
 0x5d2   : >> { %6098 = vst.msk [vmem:[%s16265_s18 + $0x70] sm:$0xff] %vm481_vm1, %v6076_v7  ;;  %v5949_v28 = vpop.f32.mrf.mxu0 }
 0x5d3   : >> { %vm6034_vm9 = vcmp.gt.f32.partialorder %v6013_v21, 0.0  ;;  %v6056_v44 = vmul.f32 %v16256_v57, %v6013_v21  ;;  %v5778_v53 = vpop.f32.mrf.mxu1  ;;  %v5987_v11 = vadd.f32 %v5949_v28, %v5808_v1 }
 0x5d4   : >> { %v12537_v20 = vpop.f32.mrf.mxu0  ;;  %v5810_v24 = vadd.f32 %v5778_v53, %v16247_v22 }
 0x5d5   : >> { %v6077_v54 = vsel %vm6034_vm9, %v6013_v21, %v6056_v44  ;;  %v6014_v63 = vadd.f32 %v18002_v58, %v5987_v11  ;;  %v12493_v5 = vpop.f32.mrf.mxu1 }
 0x5d6   : >> { %6099 = vst.msk [vmem:[%s16265_s18 + $0x78] sm:$0xff] %vm481_vm1, %v6077_v54  ;;  %v5952_v38 = vpop.f32.mrf.mxu0 }
 0x5d7   : >> { %vm6035_vm10 = vcmp.gt.f32.partialorder %v6014_v63, 0.0  ;;  %v6057_v59 = vmul.f32 %v16256_v57, %v6014_v63  ;;  %v5781_v50 = vpop.f32.mrf.mxu1  ;;  %v5988_v16 = vadd.f32 %v5952_v38, %v5809_v45 }
 0x5d8   : >> { %v12538_v46 = vpop.f32.mrf.mxu0  ;;  %v5811_v18 = vadd.f32 %v5781_v50, %v16250_v25 }
 0x5d9   : >> { %v6078_v31 = vsel %vm6035_vm10, %v6014_v63, %v6057_v59  ;;  %v6015_v62 = vadd.f32 %v18002_v58, %v5988_v16  ;;  %v12494_v36 = vpop.f32.mrf.mxu1 }
 0x5da   : >> { %6100 = vst.msk [vmem:[%s16265_s18 + $0x80] sm:$0xff] %vm481_vm1, %v6078_v31  ;;  %v5957_v23 = vpop.f32.mrf.mxu0 }
 0x5db   : >> { %vm6036_vm11 = vcmp.gt.f32.partialorder %v6015_v62, 0.0  ;;  %v6058_v39 = vmul.f32 %v16256_v57, %v6015_v62  ;;  %v5786_v47 = vpop.f32.mrf.mxu1  ;;  %v5989_v4 = vadd.f32 %v5957_v23, %v5810_v24 }
 0x5dc   : >> { %v12541_v49 = vpop.f32.mrf.mxu0  ;;  %v5812_v55 = vadd.f32 %v5786_v47, %v16252_v41 }
 0x5dd   : >> { %v6079_v12 = vsel %vm6036_vm11, %v6015_v62, %v6058_v39  ;;  %v6016_v33 = vadd.f32 %v18002_v58, %v5989_v4  ;;  %v12497_v22 = vpop.f32.mrf.mxu1 }
 0x5de   : >> { %6101 = vst.msk [vmem:[%s16265_s18 + $0x88] sm:$0xff] %vm481_vm1, %v6079_v12  ;;  %v5960_v0 = vpop.f32.mrf.mxu0 }
 0x5df   : >> { %vm6037_vm12 = vcmp.gt.f32.partialorder %v6016_v33, 0.0  ;;  %v6059_v26 = vmul.f32 %v16256_v57, %v6016_v33  ;;  %v5789_v32 = vpop.f32.mrf.mxu1  ;;  %v5990_v10 = vadd.f32 %v5960_v0, %v5811_v18 }
 0x5e0   : >> { %v12542_v37 = vpop.f32.mrf.mxu0 }
 0x5e1   : >> { %v6080_v35 = vsel %vm6037_vm12, %v6016_v33, %v6059_v26  ;;  %v6017_v14 = vadd.f32 %v18002_v58, %v5990_v10  ;;  %v12498_v25 = vpop.f32.mrf.mxu1 }
 0x5e2   : >> { %6102 = vst.msk [vmem:[%s16265_s18 + $0x90] sm:$0xff] %vm481_vm1, %v6080_v35  ;;  %v5965_v17 = vpop.f32.mrf.mxu0 }
 0x5e3   : >> { %vm6038_vm13 = vcmp.gt.f32.partialorder %v6017_v14, 0.0  ;;  %v6060_v27 = vmul.f32 %v16256_v57, %v6017_v14  ;;  %v5991_v48 = vadd.f32 %v5965_v17, %v5812_v55 }
 0x5e4   : >> { %v12545_v15 = vpop.f32.mrf.mxu0 }
 0x5e5   : >> { %v6081_v60 = vsel %vm6038_vm13, %v6017_v14, %v6060_v27  ;;  %v6018_v8 = vadd.f32 %v18002_v58, %v5991_v48 }
 0x5e6   : >> { %6103 = vst.msk [vmem:[%s16265_s18 + $0x98] sm:$0xff] %vm481_vm1, %v6081_v60  ;;  %v5968_v51 = vpop.f32.mrf.mxu0  ;;  %4069 = sbr.rel (!%p4067_p3) target bundleno = 907 (0x38b), region = 213 }
 0x5e7   : >> { %vm6039_vm14 = vcmp.gt.f32.partialorder %v6018_v8, 0.0  ;;  %v6061_v41 = vmul.f32 %v16256_v57, %v6018_v8 }
 0x5e8   : >> { %v12546_v29 = vpop.f32.mrf.mxu0 }
 0x5e9   : >> { %v6082_v3 = vsel %vm6039_vm14, %v6018_v8, %v6061_v41 }
 0x5ea   : >> { %6104 = vst.msk [vmem:[%s16265_s18 + $0xa0] sm:$0xff] %vm481_vm1, %v6082_v3 }
 0x5eb LB: >> { %vm6224_vm4 = vcmask 195584   ;;  %v18006_v57 = vld [vmem:[#allocation77_spill] sm:$0xff]  ;;  %s6119_s22 = smul.u32 48, %s13299_s23  ;;  %vm6149_vm0 = vcmask 1045504   ;;  %s10612_s24 = sshll.u32 %s13299_s23, 4  ;;  %s13299_s23 = sphi %s16375_s23, %s6118_s23  }
 0x5ec   : >> { %12553 = vmatprep.mubr.msk.f32.mxu0 %vm6224_vm4, %v18006_v57  ;;  %s6306_s21 = scalar_lea.vmem [#allocation5], %s10612_s24  ;;  %s6118_s23 = sadd.s32 1, %s13299_s23  }
 0x5ed   : >> { %s16383_s30 = scalar_lea.vmem [#allocation4], %s6119_s22  ;;  %p6115_p4 = scmp.ge.s32.totalorder %s6118_s23, 10  }
 0x5ee   : > { %s17066_s22 = smov (%p6115_p4), 0  }
 0x5f1   : >> { %v6123_v58 = vld [vmem:[%s16383_s30 + $0x10] sm:$0xff]  ;;  %v16387_v30 = vld [vmem:[%s16383_s30 + $0x18] sm:$0xff]  ;;  %v6126_v13 = vld [vmem:[%s16383_s30 + $0x28] sm:$0xff] }
 0x5f2   : >> { %v16391_v52 = vld [vmem:[%s16383_s30 + $0x30] sm:$0xff]  ;;  %v6139_v40 = vrot.slane %v6123_v58, 1  ;;  %v6141_v2 = vrot.slane %v16387_v30, 1  ;;  %v6153_v6 = vrot.slane %v6123_v58, 2  ;;  %v6155_v9 = vrot.slane %v16387_v30, 2  ;;  %v6122_v42 = vld [vmem:[%s16383_s30 + $0x8] sm:$0xff] }
 0x5f3   : >> { %v6171_v7 = vrot.slane %v6126_v13, 1  ;;  %v6173_v21 = vrot.slane %v16391_v52, 1  ;;  %v6125_v44 = vld [vmem:[%s16383_s30 + $0x20] sm:$0xff]  ;;  %v6183_v11 = vrot.slane %v6126_v13, 2  ;;  %v6185_v20 = vrot.slane %v16391_v52, 2  ;;  %v6130_v54 = vld [vmem:[%s16383_s30 + $0x48] sm:$0xff] }
 0x5f4   : >> { %v6142_v1 = vsel %vm1391_vm5, %v6139_v40, %v6141_v2  ;;  %v6156_v28 = vsel %vm6149_vm0, %v6153_v6, %v6155_v9  ;;  %v6129_v53 = vld [vmem:[%s16383_s30 + $0x40] sm:$0xff]  ;;  %v6137_v45 = vrot.slane %v6122_v42, 1  ;;  %v6151_v5 = vrot.slane %v6122_v42, 2  ;;  %v6128_v49 = vld [vmem:[%s16383_s30 + $0x38] sm:$0xff] }
 0x5f5   : >> { %v6148_v56 = vmax.f32 %v6123_v58, %v6142_v1  ;;  %v6121_v38 = vld [vmem:[%s16383_s30] sm:$0xff]  ;;  %v6174_v59 = vsel %vm1391_vm5, %v6171_v7, %v6173_v21  ;;  %v6169_v16 = vrot.slane %v6125_v44, 1  ;;  %v6201_v24 = vrot.slane %v6129_v53, 1 }
 0x5f6   : >> { %v6140_v50 = vsel %vm1391_vm5, %v6137_v45, %v6139_v40  ;;  %v6154_v62 = vsel %vm6149_vm0, %v6151_v5, %v6153_v6  ;;  %v6186_v36 = vsel %vm6149_vm0, %v6183_v11, %v6185_v20  ;;  %v6203_v23 = vrot.slane %v6130_v54, 1 }
 0x5f7   : >> { %v6162_v63 = vmax.f32 %v6148_v56, %v6156_v28  ;;  %v6147_v31 = vmax.f32 %v6122_v42, %v6140_v50  ;;  %v6181_v39 = vrot.slane %v6125_v44, 2  ;;  %v6136_v47 = vrot.slane %v6121_v38, 1  ;;  %v12951_v56 = vld [vmem:[%s17706_s5 + $0x30] sm:$0xff] (%p6115_p4)   ;;  %v12952_v28 = vld [vmem:[%s17706_s5 + $0x28] sm:$0xff] (%p6115_p4)  }
 0x5f8   : >> { %v6150_v12 = vrot.slane %v6121_v38, 2  ;;  %v6213_v33 = vrot.slane %v6129_v53, 2  ;;  %v6215_v22 = vrot.slane %v6130_v54, 2  ;;  %v6172_v0 = vsel %vm1391_vm5, %v6169_v16, %v6171_v7 }
 0x5f9   : >> { %v6165_v46 = vmax.f32 %v6162_v63, %v6126_v13  ;;  %v6161_v18 = vmax.f32 %v6147_v31, %v6154_v62  ;;  %v6138_v26 = vsel %vm1391_vm5, %v6136_v47, %v6137_v45  ;;  %v6204_v35 = vsel %vm1391_vm5, %v6201_v24, %v6203_v23  ;;  %v12953_v23 = vld [vmem:[%s17706_s5 + $0x20] sm:$0xff] (%p6115_p4)  }
 0x5fa   : >> { %v6146_v37 = vmax.f32 %v6121_v38, %v6138_v26  ;;  %v6152_v55 = vsel %vm6149_vm0, %v6150_v12, %v6151_v5  ;;  %v6184_v14 = vsel %vm6149_vm0, %v6181_v39, %v6183_v11  ;;  %v6199_v25 = vrot.slane %v6128_v49, 1 }
 0x5fb   : >> { %v6180_v4 = vmax.f32 %v6165_v46, %v6174_v59  ;;  %v6164_v10 = vmax.f32 %v6161_v18, %v6125_v44  ;;  %v6216_v15 = vsel %vm6149_vm0, %v6213_v33, %v6215_v22  ;;  %v6211_v60 = vrot.slane %v6128_v49, 2 }
 0x5fc   : >> { %v6160_v48 = vmax.f32 %v6146_v37, %v6152_v55  ;;  %v6170_v8 = vsel %vm1391_vm5, %v6141_v2, %v6169_v16  ;;  %v6202_v3 = vsel %vm1391_vm5, %v6199_v25, %v6201_v24  ;;  %v6182_v19 = vsel %vm6149_vm0, %v6155_v9, %v6181_v39 }
 0x5fd   : >> { %v6192_v32 = vmax.f32 %v6180_v4, %v6186_v36  ;;  %v6179_v27 = vmax.f32 %v6164_v10, %v6172_v0  ;;  %v6214_v58 = vsel %vm6149_vm0, %v6211_v60, %v6213_v33  ;;  %v6200_v2 = vsel %vm1391_vm5, %v6173_v21, %v6199_v25 }
 0x5fe   : >> { %v6163_v29 = vmax.f32 %v6160_v48, %v16387_v30  ;;  %v6212_v30 = vsel %vm6149_vm0, %v6185_v20, %v6211_v60 }
 0x5ff   : >> { %v6195_v17 = vmax.f32 %v6192_v32, %v6129_v53  ;;  %v6191_v41 = vmax.f32 %v6179_v27, %v6184_v14  ;;  %v12954_v27 = vld [vmem:[%s17706_s5 + $0x18] sm:$0xff] (%p6115_p4)  }
 0x600   : >> { %v6178_v57 = vmax.f32 %v6163_v29, %v6170_v8  ;;  %v12955_v8 = vld [vmem:[%s17706_s5 + $0x58] sm:$0xff] (%p6115_p4)  }
 0x601   : >> { %v6210_v51 = vmax.f32 %v6195_v17, %v6204_v35  ;;  %v6194_v61 = vmax.f32 %v6191_v41, %v6128_v49 }
 0x602   : >> { %v6190_v40 = vmax.f32 %v6178_v57, %v6182_v19 }
 0x603   : >> { %v6222_v34 = vmax.f32 %v6210_v51, %v6216_v15  ;;  %v6209_v13 = vmax.f32 %v6194_v61, %v6202_v3 }
 0x604   : >> { %v6193_v42 = vmax.f32 %v6190_v40, %v16391_v52  ;;  %v12950_v52 = vld [vmem:[%s17706_s5 + $0x38] sm:$0xff] (%p6115_p4)  }
 0x605   : >> { %12547 = vmatprep.subr.mxu0 %v6222_v34  ;;  %v6221_v6 = vmax.f32 %v6209_v13, %v6214_v58  ;;  %12845 = vmatprep.subr.bf16.mxu1 (%p6115_p4), %v12950_v52  ;;  %v12956_v13 = vld [vmem:[%s17706_s5 + $0x10] sm:$0xff] (%p6115_p4)  }
 0x606   : >> { %12548 = vmatpush3.msra.mxu0 %v6222_v34  ;;  %v6208_v1 = vmax.f32 %v6193_v42, %v6200_v2  ;;  %12849 = vmatpush3.bf16.msra.mxu1 (%p6115_p4), %v12950_v52 }
 0x607   : >> { %12549 = vmatprep.subr.mxu0 %v6221_v6  ;;  %12846 = vmatprep.subr.bf16.mxu1 (%p6115_p4), %v12951_v56 }
 0x608   : >> { %12550 = vmatpush3.msra.mxu0 %v6221_v6  ;;  %v6220_v9 = vmax.f32 %v6208_v1, %v6212_v30  ;;  %v12957_v6 = vld [vmem:[%s17706_s5 + $0x50] sm:$0xff] (%p6115_p4)  }
 0x60a   : >> { %12551 = vmatprep.subr.mxu0 %v6220_v9  ;;  %12850 = vmatpush3.bf16.msra.mxu1 (%p6115_p4), %v12951_v56 }
 0x60b   : >> { %12552 = vmatpush3.msra.mxu0 %v6220_v9  ;;  %12847 = vmatprep.subr.bf16.mxu1 (%p6115_p4), %v12952_v28 }
 0x60c   : >> { %12554 = vmatmul.mubr.msk.f32.vlgmr.msra.gmra.mxu0 %vm6224_vm4, %v16373_v43  ;;  %12556 = vmatprep.subr.bf16.mxu0 (%p6115_p4), %v12950_v52 }
 0x60d   : > { %12557 = vmatpush3.bf16.msra.mxu0 (%p6115_p4), %v12950_v52 }
 0x60e   : > { %12558 = vmatprep.subr.bf16.mxu0 (%p6115_p4), %v12951_v56  ;;  %12851 = vmatpush3.bf16.msra.mxu1 (%p6115_p4), %v12952_v28 }
 0x60f   : > { %12848 = vmatprep.subr.bf16.mxu1 (%p6115_p4), %v12953_v23 }
 0x611   : > { %12559 = vmatpush3.bf16.msra.mxu0 (%p6115_p4), %v12951_v56 }
 0x612   : > { %12560 = vmatprep.subr.bf16.mxu0 (%p6115_p4), %v12952_v28  ;;  %12852 = vmatpush3.bf16.msra.mxu1 (%p6115_p4), %v12953_v23 }
 0x613   : > { %12580 = vmatprep.subr.bf16.mxu1 (%p6115_p4), %v12954_v27 }
 0x615   : > { %12561 = vmatpush3.bf16.msra.mxu0 (%p6115_p4), %v12952_v28 }
 0x616   : > { %12562 = vmatprep.subr.bf16.mxu0 (%p6115_p4), %v12953_v23 }
 0x619   : > { %12563 = vmatpush3.bf16.msra.mxu0 (%p6115_p4), %v12953_v23  ;;  %v12961_v23 = vld [vmem:[%s17706_s5 + $0x40] sm:$0xff] (%p6115_p4)  }
 0x61a   : > { %12604 = vmatprep.subr.bf16.mxu0 (%p6115_p4), %v12955_v8 }
 0x6cb   : > { %6117 = sbr.rel (!%p6115_p4) target bundleno = 1515 (0x5eb), region = 224 }
 0x6cc   : >> { %v12555_v7 = vpop.f32.mrf.mxu0 }
 0x6cd   : >> { %6308 = vst.msk [vmem:[%s6306_s21 + $0x8] sm:$0xff] %vm481_vm1, %v12555_v7 }
 0x6ce   : >> { %v6297_v21 = vpop.f32.mrf.mxu0 }
 0x6cf   : >> { %6307 = vst.msk [vmem:[%s6306_s21] sm:$0xff] %vm481_vm1, %v6297_v21 }
 0x6d6   : > { %v6310_v44 = vld [vmem:[#allocation5] sm:$0xff]  ;;  %v6311_v53 = vld [vmem:[#allocation5 + $0x8] sm:$0xff]  ;;  %v6312_v43 = vld [vmem:[#allocation5 + $0x10] sm:$0xff] }
 0x6d7   : > { %v6313_v11 = vld [vmem:[#allocation5 + $0x18] sm:$0xff]  ;;  %v16440_v20 = vpack.c.bf16 %v6311_v53, %v6310_v44  ;;  %v6318_v45 = vld [vmem:[#allocation5 + $0x40] sm:$0xff]  ;;  %v6319_v54 = vld [vmem:[#allocation5 + $0x48] sm:$0xff] }
 0x6d8   : > { %v16442_v63 = vpack.c.bf16 %v6313_v11, %v6312_v43  ;;  %v6320_v5 = vld [vmem:[#allocation5 + $0x50] sm:$0xff]  ;;  %v6321_v38 = vld [vmem:[#allocation5 + $0x58] sm:$0xff]  ;;  %v16444_v59 = vpack.c.bf16 %v6319_v54, %v6318_v45  ;;  %v6314_v50 = vld [vmem:[#allocation5 + $0x20] sm:$0xff] }
 0x6d9   : > { %v6359_v16 = vshrl.u32 %v16440_v20, 16  ;;  %v6361_v46 = vshll.u32 %v16440_v20, 16  ;;  %v16448_v24 = vpack.c.bf16 %v6321_v38, %v6320_v5  ;;  %v6315_v31 = vld [vmem:[#allocation5 + $0x28] sm:$0xff]  ;;  %v6322_v62 = vld [vmem:[#allocation5 + $0x60] sm:$0xff]  ;;  %v6316_v51 = vld [vmem:[#allocation5 + $0x30] sm:$0xff] }
 0x6da   : > { %v6323_v36 = vld [vmem:[#allocation5 + $0x68] sm:$0xff]  ;;  %v6366_v39 = vshll.u32 %v16442_v63, 16  ;;  %v6390_v47 = vshll.u32 %v16444_v59, 16  ;;  %v6394_v4 = vshrl.u32 %v16444_v59, 16  ;;  %v16456_v49 = vpack.c.bf16 %v6315_v31, %v6314_v50  ;;  %v6317_v3 = vld [vmem:[#allocation5 + $0x38] sm:$0xff]  ;;  %v6324_v19 = vld [vmem:[#allocation5 + $0x70] sm:$0xff] }
 0x6db   : > { %v6363_v18 = vrot.slane %v6361_v46, 1  ;;  %v6398_v12 = vshll.u32 %v16448_v24, 16  ;;  %v6370_v33 = vshrl.u32 %v16442_v63, 16  ;;  %v16460_v22 = vpack.c.bf16 %v6323_v36, %v6322_v62  ;;  %v6325_v34 = vld [vmem:[#allocation5 + $0x78] sm:$0xff]  ;;  %v16492_v2 = vld [vmem:[#allocation5 + $0x80] sm:$0xff]  ;;  %v12960_v62 = vld [vmem:[%s17706_s5] sm:$0xff]  }
 0x6dc   : > { %v6368_v0 = vrot.slane %v6366_v39, 1  ;;  %v16462_v26 = vrot.slane %v6390_v47, 1  ;;  %v6374_v32 = vshll.u32 %v16456_v49, 16  ;;  %v6402_v10 = vshrl.u32 %v16448_v24, 16  ;;  %v12958_v44 = vld [vmem:[%s17706_s5 + $0x8] sm:$0xff]  }
 0x6dd   : > { %v6364_v37 = vor.u32 %v6363_v18, %v6359_v16  ;;  %v6400_v55 = vrot.slane %v6398_v12, 1  ;;  %v6406_v35 = vshll.u32 %v16460_v22, 16  ;;  %v6378_v41 = vshrl.u32 %v16456_v49, 16  ;;  %v12959_v43 = vld [vmem:[%s17706_s5 + $0x48] sm:$0xff]   ;;  %v12963_v18 = vld [vmem:[%s17706_s5 + $0x98] sm:$0xff]  }
 0x6de   : > { %v6396_v14 = vor.u32 %v6394_v4, %v16462_v26  ;;  %v6372_v25 = vor.u32 %v6370_v33, %v6368_v0  ;;  %v6376_v17 = vrot.slane %v6374_v32, 1  ;;  %v6410_v61 = vshrl.u32 %v16460_v22, 16  ;;  %v12962_v4 = vld [vmem:[%s17706_s5 + $0x78] sm:$0xff]  }
 0x6df   : > { %v6369_v48 = vsel %vm589_vm3, %v6364_v37, %v6368_v0  ;;  %v6404_v15 = vor.u32 %v6402_v10, %v6400_v55  ;;  %v6408_v60 = vrot.slane %v6406_v35, 1  ;;  %v16490_v40 = vpack.c.bf16 %v6317_v3, %v6316_v51  ;;  %v12964_v0 = vld [vmem:[%s17706_s5 + $0x70] sm:$0xff]   ;;  %v12966_v10 = vld [vmem:[%s17706_s5 + $0x68] sm:$0xff]  }
 0x6e0   : > { %12564 = vmatprep.mubr.msk.bf16.mxu0 %vm481_vm1, %v6369_v48  ;;  %v16478_v29 = vsel %vm589_vm3, %v6396_v14, %v6400_v55  ;;  %v16482_v57 = vsel %vm589_vm3, %v6372_v25, %v6376_v17  ;;  %v16499_v42 = vpack.c.bf16 %v6325_v34, %v6324_v19  ;;  %v16503_v30 = vpack.c.bf16 %v16492_v2, %v16492_v2  ;;  %v12967_v55 = vld [vmem:[%s17706_s5 + $0x88] sm:$0xff]   ;;  %v12968_v25 = vld [vmem:[%s17706_s5 + $0x60] sm:$0xff]   ;;  %v6327_v19 = vld [vmem:[#allocation5 + $0x88] sm:$0xff] }
 0x6e1   : > { %v16485_v58 = vsel %vm589_vm3, %v6404_v15, %v6408_v60  ;;  %12572 = vmatprep.mubr.msk.bf16.mxu1 %vm481_vm1, %v16478_v29  ;;  %v6380_v1 = vor.u32 %v6378_v41, %v6376_v17  ;;  %v6382_v9 = vshll.u32 %v16490_v40, 16  ;;  %v6386_v7 = vshrl.u32 %v16490_v40, 16  ;;  %12565 = vmatmul.mubr.msk.bf16.vlgmr.msra.gmra.mxu0 %vm481_vm1, %v16482_v57  ;;  %v12969_v17 = vld [vmem:[%s17706_s5 + $0x80] sm:$0xff]   ;;  %v12970_v15 = vld [vmem:[%s17706_s5 + $0xb8] sm:$0xff]   ;;  %v12972_v34 = vld [vmem:[%s17706_s5 + $0xb0] sm:$0xff]  }
 0x6e2   : > { %12573 = vmatmul.mubr.msk.bf16.vlgmr.msra.gmra.mxu1 %vm481_vm1, %v16485_v58  ;;  %v6412_v21 = vor.u32 %v6410_v61, %v6408_v60  ;;  %v6414_v52 = vshll.u32 %v16499_v42, 16  ;;  %v6418_v56 = vshrl.u32 %v16499_v42, 16  ;;  %v6422_v28 = vshll.u32 %v16503_v30, 16  ;;  %12605 = vmatpush3.bf16.msra.mxu0 %v12955_v8  ;;  %v12971_v60 = vld [vmem:[%s17706_s5 + $0xd8] sm:$0xff]   ;;  %v12973_v61 = vld [vmem:[%s17706_s5 + $0xd0] sm:$0xff]  }
 0x6e3   : > { %12581 = vmatpush3.bf16.msra.mxu1 %v12954_v27  ;;  %v6384_v53 = vrot.slane %v6382_v9, 1  ;;  %12606 = vmatprep.subr.bf16.mxu0 %v12957_v6  ;;  %v6727_v16 = vrot.slane %v16440_v20, 1  ;;  %v6728_v46 = vrot.slane %v16442_v63, 1  ;;  %v6730_v47 = vrot.slane %v16456_v49, 1 }
 0x6e4   : > { %12582 = vmatprep.subr.bf16.mxu1 %v12956_v13  ;;  %v6416_v11 = vrot.slane %v6414_v52, 1  ;;  %v6424_v45 = vrot.slane %v6422_v28, 1  ;;  %v6732_v12 = vrot.slane %v16490_v40, 1  ;;  %v6734_v32 = vrot.slane %v16444_v59, 1  ;;  %v12979_v52 = vld [vmem:[%s17706_s5 + $0x118] sm:$0xff]  }
 0x6e5   : > { %v16521_v54 = vsel %vm589_vm3, %v6380_v1, %v6384_v53  ;;  %v6388_v5 = vor.u32 %v6386_v7, %v6384_v53  ;;  %v6729_v39 = vsel %vm1391_vm5, %v6727_v16, %v6728_v46  ;;  %v16562_v33 = vsel %vm1391_vm5, %v6728_v46, %v6730_v47  ;;  %v12977_v1 = vld [vmem:[%s17706_s5 + $0xc0] sm:$0xff]  }
 0x6e6   : > { %12568 = vmatprep.mubr.msk.bf16.mxu0 %vm481_vm1, %v16521_v54  ;;  %v16526_v38 = vsel %vm589_vm3, %v6412_v21, %v6416_v11  ;;  %v16528_v50 = vor.u32 %v6418_v56, %v6416_v11  ;;  %12607 = vmatpush3.bf16.msra.mxu0 %v12957_v6  ;;  %v6736_v37 = vrot.slane %v16448_v24, 1  ;;  %v16590_v35 = vsel %vm1391_vm5, %v6732_v12, %v6734_v32  ;;  %v16668_v6 = vld [vmem:[#allocation5 + $0x90] sm:$0xff]  ;;  %v12978_v21 = vld [vmem:[%s17706_s5 + $0xf8] sm:$0xff]  }
 0x6e7   : > { %12583 = vmatpush3.bf16.msra.mxu1 %v12956_v13  ;;  %v16534_v31 = vsel %vm589_vm3, %v6388_v5, %v16462_v26  ;;  %12576 = vmatprep.mubr.msk.bf16.mxu1 %vm481_vm1, %v16526_v38  ;;  %v16568_v26 = vsel %vm1391_vm5, %v6730_v47, %v6732_v12  ;;  %v6738_v27 = vrot.slane %v16460_v22, 1  ;;  %v16611_v48 = vrot.slane %v16499_v42, 1  ;;  %v12975_v13 = vld [vmem:[%s17706_s5 + $0xc8] sm:$0xff]   ;;  %v12981_v5 = vld [vmem:[%s17706_s5 + $0x110] sm:$0xff]  }
 0x6e8   : > { %v6425_v36 = vsel %vm589_vm3, %v16528_v50, %v6424_v45  ;;  %12584 = vmatprep.subr.bf16.mxu1 %v12958_v44  ;;  %12608 = vmatprep.subr.bf16.mxu0 %v12959_v43  ;;  %v16593_v14 = vsel %vm1391_vm5, %v6734_v32, %v6736_v37  ;;  %v6742_v41 = vrot.slane %v16503_v30, 1  ;;  %v12976_v30 = vld [vmem:[%s17706_s5 + $0xa0] sm:$0xff]   ;;  %v16686_v9 = vpack.c.bf16 %v16668_v6, %v16668_v6  ;;  %v12980_v45 = vld [vmem:[%s17706_s5 + $0xf0] sm:$0xff]  }
 0x6e9   : > { %12569 = vmatmul.mubr.msk.bf16.gmra.mxu0 %vm481_vm1, %v16534_v31  ;;  %v16620_v8 = vsel %vm1391_vm5, %v6736_v37, %v6738_v27  ;;  %v16624_v51 = vsel %vm1391_vm5, %v6738_v27, %v16611_v48 }
 0x6ea   : > { %12577 = vmatmul.mubr.msk.bf16.gmra.mxu1 %vm481_vm1, %v6425_v36  ;;  %12609 = vmatpush3.bf16.msra.mxu0 %v12959_v43  ;;  %v6743_v3 = vsel %vm1391_vm5, %v16611_v48, %v6742_v41  ;;  %v7073_v28 = vshll.u32 %v16686_v9, 16 }
 0x6eb   : > { %12585 = vmatpush3.bf16.msra.mxu1 %v12958_v44  ;;  %12610 = vmatprep.subr.bf16.mxu0 %v12961_v23 }
 0x6ec   : > { %12586 = vmatprep.subr.bf16.mxu1 %v12960_v62  ;;  %12588 = vmatprep.mubr.msk.bf16.mxu1 %vm481_vm1, %v16440_v20  ;;  %v12965_v20 = vld [vmem:[%s17706_s5 + $0x90] sm:$0xff]   ;;  %v7075_v43 = vrot.slane %v7073_v28, 1 }
 0x6ed   : > { %12612 = vmatprep.mubr.msk.bf16.mxu0 %vm481_vm1, %v6729_v39 }
 0x6ee   : > { %12611 = vmatpush3.bf16.msra.mxu0 %v12961_v23  ;;  %v6330_v23 = vld [vmem:[#allocation5 + $0xa0] sm:$0xff] }
 0x6ef   : > { %12587 = vmatpush3.bf16.msra.mxu1 %v12960_v62  ;;  %12652 = vmatprep.subr.bf16.mxu0 %v12963_v18 }
 0x6f0   : > { %12628 = vmatprep.subr.bf16.mxu1 %v12962_v4 }
 0x6f1   : > { %12613 = vmatmul.mubr.msk.bf16.vlgmr.msra.gmra.mxu0 %vm481_vm1, %v16562_v33 }
 0x6f2   : > { %12589 = vmatmul.mubr.msk.bf16.vlgmr.msra.gmra.mxu1 %vm481_vm1, %v16442_v63  ;;  %12653 = vmatpush3.bf16.msra.mxu0 %v12963_v18 }
 0x6f3   : > { %12629 = vmatpush3.bf16.msra.mxu1 %v12962_v4  ;;  %12592 = vmatprep.mubr.msk.bf16.mxu1 %vm481_vm1, %v16456_v49 }
 0x6f4   : > { %12616 = vmatprep.mubr.msk.bf16.mxu0 %vm481_vm1, %v16568_v26  ;;  %12630 = vmatprep.subr.bf16.mxu1 %v12964_v0 }
 0x6f5   : > { %12654 = vmatprep.subr.bf16.mxu0 %v12965_v20 }
 0x6f6   : > { %12655 = vmatpush3.bf16.msra.mxu0 %v12965_v20 }
 0x6f7   : > { %12631 = vmatpush3.bf16.msra.mxu1 %v12964_v0  ;;  %12656 = vmatprep.subr.bf16.mxu0 %v12967_v55 }
 0x6f8   : > { %12632 = vmatprep.subr.bf16.mxu1 %v12966_v10 }
 0x6f9   : > { %12617 = vmatmul.mubr.msk.bf16.gmra.mxu0 %vm481_vm1, %v16590_v35 }
 0x6fa   : > { %12593 = vmatmul.mubr.msk.bf16.gmra.mxu1 %vm481_vm1, %v16490_v40  ;;  %12620 = vmatprep.mubr.msk.bf16.mxu0 %vm481_vm1, %v16593_v14 }
 0x6fb   : > { %12596 = vmatprep.mubr.msk.bf16.mxu1 %vm481_vm1, %v16444_v59  ;;  %12633 = vmatpush3.bf16.msra.mxu1 %v12966_v10 }
 0x6fc   : > { %12657 = vmatpush3.bf16.msra.mxu0 %v12967_v55  ;;  %12634 = vmatprep.subr.bf16.mxu1 %v12968_v25 }
 0x6fd   : > { %12658 = vmatprep.subr.bf16.mxu0 %v12969_v17 }
 0x6ff   : > { %12635 = vmatpush3.bf16.msra.mxu1 %v12968_v25 }
 0x700   : > { %12659 = vmatpush3.bf16.msra.mxu0 %v12969_v17  ;;  %12676 = vmatprep.subr.bf16.mxu1 %v12970_v15 }
 0x701   : > { %12700 = vmatprep.subr.bf16.mxu0 %v12971_v60  ;;  %12621 = vmatmul.mubr.msk.bf16.gmra.mxu0 %vm481_vm1, %v16620_v8 }
 0x702   : > { %12597 = vmatmul.mubr.msk.bf16.gmra.mxu1 %vm481_vm1, %v16448_v24  ;;  %12624 = vmatprep.mubr.msk.bf16.mxu0 %vm481_vm1, %v16624_v51 }
 0x703   : > { %12600 = vmatprep.mubr.msk.bf16.mxu1 %vm481_vm1, %v16460_v22 }
 0x709   : > { %12625 = vmatmul.mubr.msk.bf16.gmra.mxu0 %vm481_vm1, %v6743_v3 }
 0x70a   : > { %12601 = vmatmul.mubr.msk.bf16.gmra.mxu1 %vm481_vm1, %v16499_v42  ;;  %12660 = vmatprep.mubr.msk.bf16.mxu0 %vm481_vm1, %v16482_v57  ;;  %v12974_v57 = vld [vmem:[%s17706_s5 + $0xa8] sm:$0xff]  }
 0x70b   : > { %12636 = vmatprep.mubr.msk.bf16.mxu1 %vm481_vm1, %v16442_v63  ;;  %v16655_v63 = vpack.c.bf16 %v6327_v19, %v16492_v2 }
 0x70d   : > { %v7065_v2 = vshll.u32 %v16655_v63, 16  ;;  %v7069_v56 = vshrl.u32 %v16655_v63, 16  ;;  %v7231_v16 = vrot.slane %v16655_v63, 1 }
 0x70f   : > { %v7067_v7 = vrot.slane %v7065_v2, 1  ;;  %v7232_v46 = vsel %vm1391_vm5, %v16611_v48, %v7231_v16 }
 0x711   : > { %12661 = vmatmul.mubr.msk.bf16.vlgmr.msra.gmra.mxu0 %vm481_vm1, %v16521_v54  ;;  %v16698_v44 = vsel %vm589_vm3, %v16528_v50, %v7067_v7  ;;  %v16708_v53 = vor.u32 %v7069_v56, %v7067_v7  ;;  %v12983_v50 = vld [vmem:[%s17706_s5 + $0x108] sm:$0xff]  }
 0x712   : > { %12637 = vmatmul.mubr.msk.bf16.vlgmr.msra.gmra.mxu1 %vm481_vm1, %v16456_v49  ;;  %12701 = vmatpush3.bf16.msra.mxu0 %v12971_v60 }
 0x713   : > { %12677 = vmatpush3.bf16.msra.mxu1 %v12970_v15  ;;  %12640 = vmatprep.mubr.msk.bf16.mxu1 %vm481_vm1, %v16490_v40  ;;  %v7076_v11 = vsel %vm589_vm3, %v16708_v53, %v7075_v43 }
 0x714   : > { %12664 = vmatprep.mubr.msk.bf16.mxu0 %vm481_vm1, %v16534_v31  ;;  %12678 = vmatprep.subr.bf16.mxu1 %v12972_v34 }
 0x715   : > { %12702 = vmatprep.subr.bf16.mxu0 %v12973_v61 }
 0x716   : > { %12703 = vmatpush3.bf16.msra.mxu0 %v12973_v61 }
 0x717   : > { %12679 = vmatpush3.bf16.msra.mxu1 %v12972_v34  ;;  %12704 = vmatprep.subr.bf16.mxu0 %v12975_v13 }
 0x718   : > { %12680 = vmatprep.subr.bf16.mxu1 %v12974_v57 }
 0x719   : > { %12665 = vmatmul.mubr.msk.bf16.gmra.mxu0 %vm481_vm1, %v16478_v29 }
 0x71a   : > { %12641 = vmatmul.mubr.msk.bf16.gmra.mxu1 %vm481_vm1, %v16444_v59  ;;  %12668 = vmatprep.mubr.msk.bf16.mxu0 %vm481_vm1, %v16485_v58 }
 0x71b   : > { %12644 = vmatprep.mubr.msk.bf16.mxu1 %vm481_vm1, %v16448_v24  ;;  %12681 = vmatpush3.bf16.msra.mxu1 %v12974_v57 }
 0x71c   : > { %12705 = vmatpush3.bf16.msra.mxu0 %v12975_v13  ;;  %12682 = vmatprep.subr.bf16.mxu1 %v12976_v30 }
 0x71d   : > { %12706 = vmatprep.subr.bf16.mxu0 %v12977_v1 }
 0x71f   : > { %12683 = vmatpush3.bf16.msra.mxu1 %v12976_v30 }
 0x720   : > { %12707 = vmatpush3.bf16.msra.mxu0 %v12977_v1  ;;  %12724 = vmatprep.subr.bf16.mxu1 %v12978_v21 }
 0x721   : > { %12748 = vmatprep.subr.bf16.mxu0 %v12979_v52  ;;  %12669 = vmatmul.mubr.msk.bf16.gmra.mxu0 %vm481_vm1, %v16526_v38 }
 0x722   : > { %12645 = vmatmul.mubr.msk.bf16.gmra.mxu1 %vm481_vm1, %v16460_v22  ;;  %12672 = vmatprep.mubr.msk.bf16.mxu0 %vm481_vm1, %v16698_v44 }
 0x723   : > { %12648 = vmatprep.mubr.msk.bf16.mxu1 %vm481_vm1, %v16499_v42 }
 0x729   : > { %12673 = vmatmul.mubr.msk.bf16.gmra.mxu0 %vm481_vm1, %v7076_v11  ;;  %v18009_v11 = vmov 0.0  }
 0x72a   : > { %12649 = vmatmul.mubr.msk.bf16.gmra.mxu1 %vm481_vm1, %v16655_v63  ;;  %12708 = vmatprep.mubr.msk.bf16.mxu0 %vm481_vm1, %v16456_v49  ;;  %v12982_v49 = vld [vmem:[%s17706_s5 + $0xe8] sm:$0xff]  }
 0x72b   : > { %12684 = vmatprep.mubr.msk.bf16.mxu1 %vm481_vm1, %v16562_v33 }
 0x731   : > { %12709 = vmatmul.mubr.msk.bf16.vlgmr.msra.gmra.mxu0 %vm481_vm1, %v16490_v40  ;;  %v12984_v40 = vld [vmem:[%s17706_s5 + $0xe0] sm:$0xff]  }
 0x732   : > { %12685 = vmatmul.mubr.msk.bf16.vlgmr.msra.gmra.mxu1 %vm481_vm1, %v16568_v26  ;;  %12749 = vmatpush3.bf16.msra.mxu0 %v12979_v52  ;;  %v18007_v52 = vld [vmem:[#allocation12_spill] sm:$0xff] }
 0x733   : > { %12725 = vmatpush3.bf16.msra.mxu1 %v12978_v21  ;;  %12688 = vmatprep.mubr.msk.bf16.mxu1 %vm481_vm1, %v16590_v35  ;;  %vm7938_vm8 = vcmp.lt.s32.totalorder %v18007_v52, 4 }
 0x734   : > { %12712 = vmatprep.mubr.msk.bf16.mxu0 %vm481_vm1, %v16444_v59  ;;  %12726 = vmatprep.subr.bf16.mxu1 %v12980_v45  ;;  %v12985_v59 = vld [vmem:[%s17706_s5 + $0x100] sm:$0xff]   ;;  %vm7939_vm7 = vmand %vm15171_vm6, %vm7938_vm8 }
 0x735   : > { %12750 = vmatprep.subr.bf16.mxu0 %v12981_v5 }
 0x736   : > { %12751 = vmatpush3.bf16.msra.mxu0 %v12981_v5 }
 0x737   : > { %12727 = vmatpush3.bf16.msra.mxu1 %v12980_v45  ;;  %12752 = vmatprep.subr.bf16.mxu0 %v12983_v50  ;;  %v16816_v45 = vsel %vm7939_vm7, 1.0, %v18009_v11 }
 0x738   : > { %12728 = vmatprep.subr.bf16.mxu1 %v12982_v49  ;;  %18010 = vst [vmem:[#allocation75_spill] sm:$0xff] %v16816_v45 }
 0x739   : > { %12713 = vmatmul.mubr.msk.bf16.gmra.mxu0 %vm481_vm1, %v16448_v24  ;;  %v7233_v24 = vrot.slane %v16686_v9, 1 }
 0x73a   : > { %12689 = vmatmul.mubr.msk.bf16.gmra.mxu1 %vm481_vm1, %v16593_v14  ;;  %12716 = vmatprep.mubr.msk.bf16.mxu0 %vm481_vm1, %v16460_v22  ;;  %v6329_v22 = vld [vmem:[#allocation5 + $0x98] sm:$0xff] }
 0x73b   : > { %12692 = vmatprep.mubr.msk.bf16.mxu1 %vm481_vm1, %v16620_v8  ;;  %12729 = vmatpush3.bf16.msra.mxu1 %v12982_v49  ;;  %v7378_v62 = vpack.c.bf16 %v6329_v22, %v16668_v6  ;;  %v7234_v36 = vsel %vm1391_vm5, %v7231_v16, %v7233_v24 }
 0x73c   : > { %12753 = vmatpush3.bf16.msra.mxu0 %v12983_v50  ;;  %12730 = vmatprep.subr.bf16.mxu1 %v12984_v40 }
 0x73d   : > { %12754 = vmatprep.subr.bf16.mxu0 %v12985_v59  ;;  %v7542_v39 = vshrl.u32 %v7378_v62, 16 }
 0x73f   : > { %12731 = vmatpush3.bf16.msra.mxu1 %v12984_v40 }
 0x740   : > { %12755 = vmatpush3.bf16.msra.mxu0 %v12985_v59 }
 0x741   : > { %12717 = vmatmul.mubr.msk.bf16.gmra.mxu0 %vm481_vm1, %v16499_v42  ;;  %v7538_v42 = vshll.u32 %v7378_v62, 16 }
 0x742   : > { %12693 = vmatmul.mubr.msk.bf16.gmra.mxu1 %vm481_vm1, %v16624_v51  ;;  %12720 = vmatprep.mubr.msk.bf16.mxu0 %vm481_vm1, %v16655_v63 }
 0x743   : > { %12696 = vmatprep.mubr.msk.bf16.mxu1 %vm481_vm1, %v7232_v46 }
 0x749   : > { %12721 = vmatmul.mubr.msk.bf16.gmra.mxu0 %vm481_vm1, %v7378_v62 }
 0x74a   : > { %12697 = vmatmul.mubr.msk.bf16.gmra.mxu1 %vm481_vm1, %v7234_v36  ;;  %12756 = vmatprep.mubr.msk.bf16.mxu0 %vm481_vm1, %v16568_v26 }
 0x74b   : > { %12732 = vmatprep.mubr.msk.bf16.mxu1 %vm481_vm1, %v16521_v54  ;;  %v7528_v54 = vpack.c.bf16 %v6330_v23, %v6330_v23 }
 0x74d   : > { %v7546_v47 = vshll.u32 %v7528_v54, 16  ;;  %v7706_v12 = vrot.slane %v7528_v54, 1 }
 0x751   : > { %12757 = vmatmul.mubr.msk.bf16.vlgmr.msra.gmra.mxu0 %vm481_vm1, %v16590_v35 }
 0x752   : > { %12733 = vmatmul.mubr.msk.bf16.vlgmr.msra.gmra.mxu1 %vm481_vm1, %v16534_v31  ;;  %12760 = vmatprep.mubr.msk.bf16.mxu0 %vm481_vm1, %v16593_v14  ;;  %v7540_v31 = vrot.slane %v7538_v42, 1 }
 0x753   : > { %12736 = vmatprep.mubr.msk.bf16.mxu1 %vm481_vm1, %v16478_v29  ;;  %v7704_v29 = vrot.slane %v7378_v62, 1 }
 0x754   : > { %v7541_v4 = vsel %vm589_vm3, %v16708_v53, %v7540_v31 }
 0x755   : > { %v7705_v18 = vsel %vm1391_vm5, %v7231_v16, %v7704_v29  ;;  %v7707_v0 = vsel %vm1391_vm5, %v7704_v29, %v7706_v12 }
 0x759   : > { %12761 = vmatmul.mubr.msk.bf16.gmra.mxu0 %vm481_vm1, %v16620_v8 }
 0x75a   : > { %12737 = vmatmul.mubr.msk.bf16.gmra.mxu1 %vm481_vm1, %v16485_v58  ;;  %12764 = vmatprep.mubr.msk.bf16.mxu0 %vm481_vm1, %v16624_v51  ;;  %v7544_v58 = vor.u32 %v7542_v39, %v7540_v31 }
 0x75b   : > { %12740 = vmatprep.mubr.msk.bf16.mxu1 %vm481_vm1, %v16526_v38  ;;  %v7548_v38 = vrot.slane %v7546_v47, 1 }
 0x75d   : > { %v7549_v33 = vsel %vm589_vm3, %v7544_v58, %v7548_v38 }
 0x761   : > { %12765 = vmatmul.mubr.msk.bf16.gmra.mxu0 %vm481_vm1, %v7232_v46 }
 0x762   : > { %12741 = vmatmul.mubr.msk.bf16.gmra.mxu1 %vm481_vm1, %v16698_v44  ;;  %12768 = vmatprep.mubr.msk.bf16.mxu0 %vm481_vm1, %v7705_v18 }
 0x763   : > { %12744 = vmatprep.mubr.msk.bf16.mxu1 %vm481_vm1, %v7541_v4 }
 0x769   : > { %12769 = vmatmul.mubr.msk.bf16.gmra.mxu0 %vm481_vm1, %v7707_v0 }
 0x76a   : > { %12745 = vmatmul.mubr.msk.bf16.gmra.mxu1 %vm481_vm1, %v7549_v33 }
 0x7a1   : > { %v12566_v26 = vpop.f32.mrf.mxu0 }
 0x7a2   : > { %v12574_v20 = vpop.f32.mrf.mxu1 }
 0x7a3   : > { %v6508_v32 = vpop.f32.mrf.mxu0 }
 0x7a4   : > { %v6540_v10 = vpop.f32.mrf.mxu1 }
 0x7a5   : > { %v12567_v37 = vpop.f32.mrf.mxu0 }
 0x7a6   : > { %v12575_v55 = vpop.f32.mrf.mxu1 }
 0x7a7   : > { %v6511_v35 = vpop.f32.mrf.mxu0 }
 0x7a8   : > { %v6543_v14 = vpop.f32.mrf.mxu1 }
 0x7a9   : > { %v12570_v25 = vpop.f32.mrf.mxu0 }
 0x7aa   : > { %v12578_v17 = vpop.f32.mrf.mxu1 }
 0x7ab   : > { %v6524_v27 = vpop.f32.mrf.mxu0 }
 0x7ac   : > { %v6556_v48 = vpop.f32.mrf.mxu1 }
 0x7ad   : > { %v12571_v15 = vpop.f32.mrf.mxu0 }
 0x7ae   : > { %v16800_v60 = vpop.f32.mrf.mxu1 }
 0x7af   : > { %v6527_v8 = vpop.f32.mrf.mxu0 }
 0x7b0   : > { %v16802_v51 = vpop.f32.mrf.mxu1 }
 0x7b1   : > { %v12614_v3 = vpop.f32.mrf.mxu0 }
 0x7b2   : > { %v12590_v41 = vpop.f32.mrf.mxu1 }
 0x7b3   : > { %v6654_v19 = vadd.f32 %v12590_v41, %v12566_v26  ;;  %v6826_v61 = vpop.f32.mrf.mxu0 }
 0x7b4   : > { %v6645_v34 = vpop.f32.mrf.mxu1 }
 0x7b5   : > { %v16804_v63 = vadd.f32 %v12614_v3, %v6654_v19  ;;  %v6646_v57 = vadd.f32 %v6645_v34, %v6508_v32  ;;  %v12615_v2 = vpop.f32.mrf.mxu0 }
 0x7b6   : > { %v12591_v13 = vpop.f32.mrf.mxu1 }
 0x7b7   : > { %v16806_v6 = vadd.f32 %v6826_v61, %v6646_v57  ;;  %v6657_v30 = vadd.f32 %v12591_v13, %v12567_v37  ;;  %v6829_v9 = vpop.f32.mrf.mxu0 }
 0x7b8   : > { %v6648_v1 = vpop.f32.mrf.mxu1 }
 0x7b9   : > { %v16808_v7 = vadd.f32 %v12615_v2, %v6657_v30  ;;  %v6649_v21 = vadd.f32 %v6648_v1, %v6511_v35  ;;  %v12618_v28 = vpop.f32.mrf.mxu0 }
 0x7ba   : > { %v12594_v56 = vpop.f32.mrf.mxu1 }
 0x7bb   : > { %v16813_v53 = vadd.f32 %v6829_v9, %v6649_v21  ;;  %v6670_v43 = vadd.f32 %v12594_v56, %v12570_v25  ;;  %v6842_v49 = vpop.f32.mrf.mxu0 }
 0x7bc   : > { %v6661_v5 = vpop.f32.mrf.mxu1 }
 0x7bd   : > { %v16818_v50 = vadd.f32 %v12618_v28, %v6670_v43  ;;  %v6662_v40 = vadd.f32 %v6661_v5, %v6524_v27  ;;  %v12619_v16 = vpop.f32.mrf.mxu0 }
 0x7be   : > { %v12595_v59 = vpop.f32.mrf.mxu1 }
 0x7bf   : > { %v16820_v46 = vadd.f32 %v6842_v49, %v6662_v40  ;;  %v6673_v24 = vadd.f32 %v12595_v59, %v12571_v15  ;;  %v6845_v62 = vpop.f32.mrf.mxu0 }
 0x7c0   : > { %v6664_v22 = vpop.f32.mrf.mxu1 }
 0x7c1   : > { %v16822_v36 = vadd.f32 %v12619_v16, %v6673_v24  ;;  %v6665_v42 = vadd.f32 %v6664_v22, %v6527_v8  ;;  %v12622_v54 = vpop.f32.mrf.mxu0 }
 0x7c2   : > { %v12598_v23 = vpop.f32.mrf.mxu1 }
 0x7c3   : > { %v16824_v31 = vadd.f32 %v6845_v62, %v6665_v42  ;;  %v6686_v29 = vadd.f32 %v12598_v23, %v12574_v20  ;;  %v6858_v47 = vpop.f32.mrf.mxu0 }
 0x7c4   : > { %v6677_v39 = vpop.f32.mrf.mxu1 }
 0x7c5   : > { %v16826_v4 = vadd.f32 %v12622_v54, %v6686_v29  ;;  %v6678_v18 = vadd.f32 %v6677_v39, %v6540_v10  ;;  %v12623_v38 = vpop.f32.mrf.mxu0 }
 0x7c6   : > { %v12599_v58 = vpop.f32.mrf.mxu1 }
 0x7c7   : > { %v16828_v12 = vadd.f32 %v6858_v47, %v6678_v18  ;;  %v6689_v33 = vadd.f32 %v12599_v58, %v12575_v55  ;;  %v6861_v26 = vpop.f32.mrf.mxu0 }
 0x7c8   : > { %v6680_v0 = vpop.f32.mrf.mxu1 }
 0x7c9   : > { %v16830_v32 = vadd.f32 %v12623_v38, %v6689_v33  ;;  %v6681_v37 = vadd.f32 %v6680_v0, %v6543_v14  ;;  %v12626_v25 = vpop.f32.mrf.mxu0 }
 0x7ca   : > { %v12602_v35 = vpop.f32.mrf.mxu1 }
 0x7cb   : > { %v16832_v27 = vadd.f32 %v6861_v26, %v6681_v37  ;;  %v6702_v20 = vadd.f32 %v12602_v35, %v12578_v17  ;;  %v6874_v8 = vpop.f32.mrf.mxu0 }
 0x7cc   : > { %v6693_v15 = vpop.f32.mrf.mxu1 }
 0x7cd   : > { %v16834_v41 = vadd.f32 %v12626_v25, %v6702_v20  ;;  %v6694_v10 = vadd.f32 %v6693_v15, %v6556_v48  ;;  %v12627_v19 = vpop.f32.mrf.mxu0 }
 0x7ce   : > { %v12603_v3 = vpop.f32.mrf.mxu1 }
 0x7cf   : > { %v16836_v34 = vadd.f32 %v6874_v8, %v6694_v10  ;;  %v6705_v55 = vadd.f32 %v12603_v3, %v16800_v60  ;;  %v6877_v57 = vpop.f32.mrf.mxu0 }
 0x7d0   : > { %v6696_v61 = vpop.f32.mrf.mxu1 }
 0x7d1   : > { %v16839_v13 = vadd.f32 %v12627_v19, %v6705_v55  ;;  %v6697_v14 = vadd.f32 %v6696_v61, %v16802_v51  ;;  %v12662_v30 = vpop.f32.mrf.mxu0 }
 0x7d2   : > { %v12638_v2 = vpop.f32.mrf.mxu1 }
 0x7d3   : > { %v16842_v17 = vadd.f32 %v6877_v57, %v6697_v14  ;;  %v16844_v9 = vpop.f32.mrf.mxu0 }
 0x7d4   : > { %v6976_v1 = vpop.f32.mrf.mxu1 }
 0x7d5   : > { %18011 = vst [vmem:[#allocation79_spill] sm:$0xff] %v16842_v17  ;;  %v16846_v21 = vpop.f32.mrf.mxu0 }
 0x7d6   : > { %v12639_v48 = vpop.f32.mrf.mxu1 }
 0x7d7   : > { %v16848_v56 = vpop.f32.mrf.mxu0 }
 0x7d8   : > { %v6979_v52 = vpop.f32.mrf.mxu1 }
 0x7d9   : > { %v16850_v28 = vpop.f32.mrf.mxu0 }
 0x7da   : > { %v12642_v60 = vpop.f32.mrf.mxu1 }
 0x7db   : > { %v16852_v43 = vpop.f32.mrf.mxu0 }
 0x7dc   : > { %v6992_v44 = vpop.f32.mrf.mxu1 }
 0x7dd   : > { %v16854_v11 = vpop.f32.mrf.mxu0 }
 0x7de   : > { %v12643_v51 = vpop.f32.mrf.mxu1 }
 0x7df   : > { %v16856_v49 = vpop.f32.mrf.mxu0 }
 0x7e0   : > { %v6995_v5 = vpop.f32.mrf.mxu1 }
 0x7e1   : > { %v16858_v59 = vpop.f32.mrf.mxu0 }
 0x7e2   : > { %v12646_v40 = vpop.f32.mrf.mxu1 }
 0x7e3   : > { %v16862_v24 = vpop.f32.mrf.mxu0 }
 0x7e4   : > { %v16860_v16 = vpop.f32.mrf.mxu1 }
 0x7e5   : > { %v16866_v62 = vpop.f32.mrf.mxu0 }
 0x7e6   : > { %v16864_v22 = vpop.f32.mrf.mxu1 }
 0x7e7   : > { %v16870_v23 = vpop.f32.mrf.mxu0 }
 0x7e8   : > { %v16868_v42 = vpop.f32.mrf.mxu1 }
 0x7e9   : > { %v16874_v29 = vpop.f32.mrf.mxu0 }
 0x7ea   : > { %v16872_v54 = vpop.f32.mrf.mxu1 }
 0x7eb   : > { %v16878_v47 = vpop.f32.mrf.mxu0 }
 0x7ec   : > { %v16876_v39 = vpop.f32.mrf.mxu1 }
 0x7ed   : > { %v16882_v58 = vpop.f32.mrf.mxu0 }
 0x7ee   : > { %v16880_v18 = vpop.f32.mrf.mxu1  ;;  %18012 = vst [vmem:[#allocation78_spill] sm:$0xff] %v16882_v58 }
 0x7ef   : > { %v16886_v33 = vpop.f32.mrf.mxu0 }
 0x7f0   : > { %v16884_v38 = vpop.f32.mrf.mxu1  ;;  %18014 = vst [vmem:[#allocation76_spill] sm:$0xff] %v16886_v33 }
 0x7f1   : > { %18013 = vst [vmem:[#allocation77_spill] sm:$0xff] %v16884_v38  ;;  %v12710_v26 = vpop.f32.mrf.mxu0 }
 0x7f2   : > { %v12686_v0 = vpop.f32.mrf.mxu1 }
 0x7f3   : > { %v7449_v35 = vpop.f32.mrf.mxu0 }
 0x7f4   : > { %v7299_v37 = vpop.f32.mrf.mxu1 }
 0x7f5   : > { %v16888_v20 = vpop.f32.mrf.mxu0 }
 0x7f6   : > { %v12687_v25 = vpop.f32.mrf.mxu1 }
 0x7f7   : > { %v16890_v8 = vpop.f32.mrf.mxu0 }
 0x7f8   : > { %v7302_v15 = vpop.f32.mrf.mxu1  ;;  %18015 = vst [vmem:[#allocation87_spill] sm:$0xff] %v16890_v8 }
 0x7f9   : > { %v16892_v3 = vpop.f32.mrf.mxu0 }
 0x7fa   : > { %v12690_v10 = vpop.f32.mrf.mxu1  ;;  %18016 = vst [vmem:[#allocation88_spill] sm:$0xff] %v16892_v3 }
 0x7fb   : > { %v16896_v55 = vpop.f32.mrf.mxu0 }
 0x7fc   : > { %v16894_v19 = vpop.f32.mrf.mxu1  ;;  %18017 = vst [vmem:[#allocation89_spill] sm:$0xff] %v16896_v55  ;;  %v7041_v55 = vadd.f32 %v12638_v2, %v16804_v63 }
 0x7fd   : > { %v16900_v57 = vpop.f32.mrf.mxu0 }
 0x7fe   : > { %v16898_v61 = vpop.f32.mrf.mxu1  ;;  %18019 = vst [vmem:[#allocation91_spill] sm:$0xff] %v16900_v57 }
 0x7ff   : > { %18018 = vst [vmem:[#allocation90_spill] sm:$0xff] %v16898_v61  ;;  %v16904_v45 = vpop.f32.mrf.mxu0 }
 0x800   : > { %v16902_v14 = vpop.f32.mrf.mxu1  ;;  %18021 = vst [vmem:[#allocation93_spill] sm:$0xff] %v16904_v45  ;;  %v7039_v45 = vadd.f32 %v6976_v1, %v16806_v6  ;;  %v7043_v6 = vadd.f32 %v6992_v44, %v16820_v46 }
 0x801   : > { %18020 = vst [vmem:[#allocation92_spill] sm:$0xff] %v16902_v14  ;;  %v16908_v38 = vpop.f32.mrf.mxu0 }
 0x802   : > { %v16906_v33 = vpop.f32.mrf.mxu1  ;;  %18023 = vst [vmem:[#allocation95_spill] sm:$0xff] %v16908_v38  ;;  %v7206_v38 = vadd.f32 %v12662_v30, %v7041_v55  ;;  %v7204_v2 = vadd.f32 %v16844_v9, %v7039_v45  ;;  %v7049_v45 = vadd.f32 %v12646_v40, %v16826_v4  ;;  %v7048_v4 = vadd.f32 %v16868_v42, %v16832_v27  ;;  %v16973_v27 = vld [vmem:[%s17707_s6] ss:$0 sm:$0xff] }
 0x803   : > { %18022 = vst [vmem:[#allocation94_spill] sm:$0xff] %v16906_v33  ;;  %v16912_v8 = vpop.f32.mrf.mxu0 }
 0x804   : > { %v16910_v17 = vpop.f32.mrf.mxu1  ;;  %18025 = vst [vmem:[#allocation97_spill] sm:$0xff] %v16912_v8  ;;  %v7040_v8 = vadd.f32 %v6979_v52, %v16813_v53  ;;  %v7364_v1 = vadd.f32 %v12686_v0, %v7206_v38  ;;  %v7044_v53 = vadd.f32 %v6995_v5, %v16824_v31  ;;  %v7213_v0 = vadd.f32 %v16870_v23, %v7048_v4  ;;  %v18032_v23 = vld [vmem:[#allocation88_spill] sm:$0xff] }
 0x805   : > { %18024 = vst [vmem:[#allocation96_spill] sm:$0xff] %v16910_v17  ;;  %v16916_v58 = vpop.f32.mrf.mxu0  ;;  %v7042_v17 = vadd.f32 %v12639_v48, %v16808_v7 }
 0x806   : > { %v16914_v3 = vpop.f32.mrf.mxu1  ;;  %18027 = vst [vmem:[#allocation99_spill] sm:$0xff] %v16916_v58  ;;  %v7205_v48 = vadd.f32 %v16848_v56, %v7040_v8  ;;  %v7050_v56 = vadd.f32 %v16864_v22, %v16830_v32  ;;  %v7054_v32 = vadd.f32 %v16880_v18, %v16839_v13 }
 0x807   : > { %18026 = vst [vmem:[#allocation98_spill] sm:$0xff] %v16914_v3  ;;  %v16921_v57 = vpop.f32.mrf.mxu0  ;;  %v7045_v3 = vadd.f32 %v12642_v60, %v16818_v50  ;;  %v7207_v7 = vadd.f32 %v16846_v21, %v7042_v17  ;;  %v7362_v50 = vadd.f32 %v7299_v37, %v7204_v2  ;;  %v7208_v60 = vadd.f32 %v16852_v43, %v7043_v6 }
 0x808   : > { %v16919_v61 = vpop.f32.mrf.mxu1  ;;  %18028 = vst [vmem:[#allocation100_spill] sm:$0xff] %v16921_v57  ;;  %v7046_v57 = vadd.f32 %v12643_v51, %v16822_v36  ;;  %v16952_v36 = vstv %s13439_s25  ;;  %v7047_v17 = vadd.f32 %v16860_v16, %v16828_v12  ;;  %v7514_v21 = vadd.f32 %v12710_v26, %v7364_v1  ;;  %v18034_v1 = vld [vmem:[#allocation89_spill] sm:$0xff] }
 0x809   : > { %v16926_v33 = vpop.f32.mrf.mxu0  ;;  %v7210_v52 = vadd.f32 %v16850_v28, %v7045_v3  ;;  %v7365_v31 = vadd.f32 %v12687_v25, %v7207_v7  ;;  %v7053_v28 = vadd.f32 %v16872_v54, %v16834_v41  ;;  %v7209_v43 = vadd.f32 %v16856_v49, %v7044_v53  ;;  %v18035_v53 = vld [vmem:[#allocation92_spill] sm:$0xff] }
 0x80a   : > { %v16924_v14 = vpop.f32.mrf.mxu1  ;;  %18029 = vst [vmem:[#allocation101_spill] sm:$0xff] %v16926_v33  ;;  %v7211_v44 = vadd.f32 %v16854_v11, %v7046_v57  ;;  %v7051_v12 = vadd.f32 %v16876_v39, %v16836_v34  ;;  %v7512_v40 = vadd.f32 %v7449_v35, %v7362_v50  ;;  %v7214_v11 = vadd.f32 %v16858_v59, %v7049_v45 }
 0x80b   : > { %v16933_v63 = vpop.f32.mrf.mxu0  ;;  %v7363_v22 = vadd.f32 %v7302_v15, %v7205_v48  ;;  %v7368_v38 = vadd.f32 %v12690_v10, %v7210_v52  ;;  %v7212_v49 = vadd.f32 %v16862_v24, %v7047_v17  ;;  %v7515_v34 = vadd.f32 %v16888_v20, %v7365_v31  ;;  %v18030_v15 = vld [vmem:[#allocation78_spill] sm:$0xff]  ;;  %v18036_v48 = vld [vmem:[#allocation94_spill] sm:$0xff] }
 0x80c   : > { %v16931_v58 = vpop.f32.mrf.mxu1  ;;  %v7215_v59 = vadd.f32 %v16866_v62, %v7050_v56  ;;  %v16980_v13 = vadd.f32 %v16874_v29, %v7053_v28  ;;  %v7366_v18 = vadd.f32 %v16894_v19, %v7208_v60  ;;  %v16984_v35 = vadd.f32 %v16878_v47, %v7051_v12  ;;  %v18031_v62 = vld [vmem:[#allocation87_spill] sm:$0xff]  ;;  %v18033_v29 = vld [vmem:[#allocation90_spill] sm:$0xff]  ;;  %v18038_v28 = vld [vmem:[#allocation96_spill] sm:$0xff] }
 0x80d   : > { %v16940_v30 = vpop.f32.mrf.mxu0  ;;  %v16988_v8 = vadd.f32 %v18030_v15, %v7054_v32  ;;  %v7513_v10 = vadd.f32 %v18031_v62, %v7363_v22  ;;  %v7518_v3 = vadd.f32 %v18032_v23, %v7368_v38  ;;  %v7369_v55 = vadd.f32 %v18033_v29, %v7211_v44  ;;  %v18037_v56 = vld [vmem:[#allocation91_spill] sm:$0xff]  ;;  %v18039_v22 = vld [vmem:[#allocation79_spill] sm:$0xff]  ;;  %v18040_v38 = vld [vmem:[#allocation77_spill] sm:$0xff] }
 0x80e   : > { %v16938_v33 = vpop.f32.mrf.mxu1  ;;  %v7516_v7 = vadd.f32 %v18034_v1, %v7366_v18  ;;  %v7367_v50 = vadd.f32 %v18035_v53, %v7209_v43  ;;  %v7372_v52 = vadd.f32 %v18036_v48, %v7214_v11  ;;  %v18043_v15 = vld [vmem:[#allocation98_spill] sm:$0xff] }
 0x80f   : > { %v16949_v46 = vpop.f32.mrf.mxu0  ;;  %v7519_v4 = vadd.f32 %v18037_v56, %v7369_v55  ;;  %v7373_v62 = vadd.f32 %v18043_v15, %v7215_v59  ;;  %v18044_v55 = vld [vmem:[#allocation97_spill] sm:$0xff] }
 0x810   : > { %v16947_v9 = vpop.f32.mrf.mxu1 }
 0x811   : > { %v12758_v5 = vpop.f32.mrf.mxu0 }
 0x812   : > { %v12734_v51 = vpop.f32.mrf.mxu1 }
 0x813   : > { %v7679_v16 = vadd.f32 %v12734_v51, %v7514_v21  ;;  %v7772_v42 = vpop.f32.mrf.mxu0  ;;  %v7370_v51 = vadd.f32 %v18038_v28, %v7212_v49  ;;  %v18046_v28 = vld [vmem:[#allocation76_spill] sm:$0xff] }
 0x814   : > { %v7614_v41 = vpop.f32.mrf.mxu1 }
 0x815   : > { %v7837_v54 = vadd.f32 %v12758_v5, %v7679_v16  ;;  %v7677_v39 = vadd.f32 %v7614_v41, %v7512_v40  ;;  %v12759_v37 = vpop.f32.mrf.mxu0  ;;  %v7052_v41 = vadd.f32 %v18040_v38, %v18039_v22  ;;  %v18048_v22 = vld [vmem:[#allocation101_spill] sm:$0xff] }
 0x816   : > { %v12735_v26 = vpop.f32.mrf.mxu1 }
 0x817   : > { %v7859_v24 = vadd.f32 %v16973_v27, %v7837_v54  ;;  %v7835_v25 = vadd.f32 %v7772_v42, %v7677_v39  ;;  %v7680_v20 = vadd.f32 %v12735_v26, %v7515_v34  ;;  %v7775_v19 = vpop.f32.mrf.mxu0  ;;  %v18041_v42 = vld [vmem:[#allocation93_spill] sm:$0xff]  ;;  %v18042_v26 = vld [vmem:[#allocation95_spill] sm:$0xff] }
 0x818   : > { %v7617_v57 = vpop.f32.mrf.mxu1  ;;  %v7517_v34 = vadd.f32 %v18041_v42, %v7367_v50  ;;  %v7374_v42 = vadd.f32 %v16931_v58, %v16984_v35 }
 0x819   : > { %vm7875_vm6 = vcmp.gt.f32.partialorder %v7859_v24, 0.0  ;;  %v7892_v2 = vmul.f32 %v16952_v36, %v7859_v24  ;;  %v7857_v47 = vadd.f32 %v16973_v27, %v7835_v25  ;;  %v7838_v6 = vadd.f32 %v12759_v37, %v7680_v20  ;;  %v12762_v17 = vpop.f32.mrf.mxu0 }
 0x81a   : > { %v7678_v45 = vadd.f32 %v7617_v57, %v7513_v10  ;;  %v12738_v60 = vpop.f32.mrf.mxu1  ;;  %v7522_v37 = vadd.f32 %v18042_v26, %v7372_v52  ;;  %v7520_v57 = vadd.f32 %v18044_v55, %v7370_v51  ;;  %v7217_v51 = vadd.f32 %v18046_v28, %v7052_v41 }
 0x81b   : > { %v7908_v21 = vsel %vm7875_vm6, %v7859_v24, %v7892_v2  ;;  %vm7873_vm9 = vcmp.gt.f32.partialorder %v7857_v47, 0.0  ;;  %v7890_v31 = vmul.f32 %v16952_v36, %v7857_v47  ;;  %v7860_v44 = vadd.f32 %v16973_v27, %v7838_v6  ;;  %v7788_v40 = vpop.f32.mrf.mxu0 }
 0x81c   : > { %7924 = vst.msk [vmem:[#allocation6 + $0x10] sm:$0xff] %vm481_vm1, %v7908_v21  ;;  %v7836_v5 = vadd.f32 %v7775_v19, %v7678_v45  ;;  %v7683_v12 = vadd.f32 %v12738_v60, %v7518_v3  ;;  %v7630_v43 = vpop.f32.mrf.mxu1  ;;  %v7371_v6 = vadd.f32 %v16919_v61, %v7213_v0  ;;  %v18045_v45 = vld [vmem:[#allocation99_spill] sm:$0xff] }
 0x81d   : > { %v7906_v16 = vsel %vm7873_vm9, %v7857_v47, %v7890_v31  ;;  %vm7876_vm10 = vcmp.gt.f32.partialorder %v7860_v44, 0.0  ;;  %v7893_v11 = vmul.f32 %v16952_v36, %v7860_v44  ;;  %v7681_v32 = vadd.f32 %v7630_v43, %v7516_v7  ;;  %v12763_v18 = vpop.f32.mrf.mxu0 }
 0x81e   : > { %7922 = vst.msk [vmem:[#allocation6] sm:$0xff] %vm481_vm1, %v7906_v16  ;;  %v7858_v49 = vadd.f32 %v16973_v27, %v7836_v5  ;;  %v7841_v54 = vadd.f32 %v12762_v17, %v7683_v12  ;;  %v12739_v39 = vpop.f32.mrf.mxu1  ;;  %v7523_v60 = vadd.f32 %v18045_v45, %v7373_v62  ;;  %v7376_v17 = vadd.f32 %v16924_v14, %v16980_v13  ;;  %v18047_v5 = vld [vmem:[#allocation100_spill] sm:$0xff] }
 0x81f   : > { %v7909_v24 = vsel %vm7876_vm10, %v7860_v44, %v7893_v11  ;;  %v7839_v25 = vadd.f32 %v7788_v40, %v7681_v32  ;;  %v7684_v20 = vadd.f32 %v12739_v39, %v7519_v4  ;;  %v7791_v29 = vpop.f32.mrf.mxu0  ;;  %v7521_v12 = vadd.f32 %v18047_v5, %v7371_v6 }
 0x820   : > { %7925 = vst.msk [vmem:[#allocation6 + $0x18] sm:$0xff] %vm481_vm1, %v7909_v24  ;;  %vm7874_vm11 = vcmp.gt.f32.partialorder %v7858_v49, 0.0  ;;  %v7891_v10 = vmul.f32 %v16952_v36, %v7858_v49  ;;  %v7863_v23 = vadd.f32 %v16973_v27, %v7841_v54  ;;  %v7633_v3 = vpop.f32.mrf.mxu1  ;;  %v7526_v38 = vadd.f32 %v18048_v22, %v7376_v17 }
 0x821   : > { %v7861_v19 = vadd.f32 %v16973_v27, %v7839_v25  ;;  %v7842_v2 = vadd.f32 %v12763_v18, %v7684_v20  ;;  %v7682_v47 = vadd.f32 %v7633_v3, %v7517_v34  ;;  %v12766_v53 = vpop.f32.mrf.mxu0  ;;  %v7377_v39 = vadd.f32 %v16938_v33, %v16988_v8 }
 0x822   : > { %v7907_v1 = vsel %vm7874_vm11, %v7858_v49, %v7891_v10  ;;  %vm7879_vm12 = vcmp.gt.f32.partialorder %v7863_v23, 0.0  ;;  %v7896_v59 = vmul.f32 %v16952_v36, %v7863_v23  ;;  %v12742_v7 = vpop.f32.mrf.mxu1  ;;  %v7375_v24 = vadd.f32 %v16947_v9, %v7217_v51 }
 0x823   : > { %7923 = vst.msk [vmem:[#allocation6 + $0x8] sm:$0xff] %vm481_vm1, %v7907_v1  ;;  %vm7877_vm13 = vcmp.gt.f32.partialorder %v7861_v19, 0.0  ;;  %v7894_v50 = vmul.f32 %v16952_v36, %v7861_v19  ;;  %v7864_v48 = vadd.f32 %v16973_v27, %v7842_v2  ;;  %v7840_v52 = vadd.f32 %v7791_v29, %v7682_v47  ;;  %v7804_v31 = vpop.f32.mrf.mxu0 }
 0x824   : > { %v7912_v61 = vsel %vm7879_vm12, %v7863_v23, %v7896_v59  ;;  %v7687_v0 = vadd.f32 %v12742_v7, %v7522_v37  ;;  %v7646_v21 = vpop.f32.mrf.mxu1  ;;  %v7524_v33 = vadd.f32 %v16933_v63, %v7374_v42  ;;  %v7525_v2 = vadd.f32 %v16949_v46, %v7375_v24 }
 0x825   : > { %7928 = vst.msk [vmem:[#allocation6 + $0x30] sm:$0xff] %vm481_vm1, %v7912_v61  ;;  %v7910_v44 = vsel %vm7877_vm13, %v7861_v19, %v7894_v50  ;;  %vm7880_vm14 = vcmp.gt.f32.partialorder %v7864_v48, 0.0  ;;  %v7897_v56 = vmul.f32 %v16952_v36, %v7864_v48  ;;  %v7862_v4 = vadd.f32 %v16973_v27, %v7840_v52  ;;  %v12767_v40 = vpop.f32.mrf.mxu0 }
 0x826   : > { %7926 = vst.msk [vmem:[#allocation6 + $0x20] sm:$0xff] %vm481_vm1, %v7910_v44  ;;  %v7845_v43 = vadd.f32 %v12766_v53, %v7687_v0  ;;  %v7685_v14 = vadd.f32 %v7646_v21, %v7520_v57  ;;  %v12743_v13 = vpop.f32.mrf.mxu1  ;;  %v7527_v19 = vadd.f32 %v16940_v30, %v7377_v39 }
 0x827   : > { %v7913_v16 = vsel %vm7880_vm14, %v7864_v48, %v7897_v56  ;;  %vm7878_vm15 = vcmp.gt.f32.partialorder %v7862_v4, 0.0  ;;  %v7895_v11 = vmul.f32 %v16952_v36, %v7862_v4  ;;  %v7688_v32 = vadd.f32 %v12743_v13, %v7523_v60  ;;  %v7807_v54 = vpop.f32.mrf.mxu0 }
 0x828   : > { %7929 = vst.msk [vmem:[#allocation6 + $0x38] sm:$0xff] %vm481_vm1, %v7913_v16  ;;  %v7867_v41 = vadd.f32 %v16973_v27, %v7845_v43  ;;  %v7843_v34 = vadd.f32 %v7804_v31, %v7685_v14  ;;  %v7649_v49 = vpop.f32.mrf.mxu1 }
 0x829   : > { %v7911_v18 = vsel %vm7878_vm15, %v7862_v4, %v7895_v11  ;;  %v7846_v26 = vadd.f32 %v12767_v40, %v7688_v32  ;;  %v7686_v37 = vadd.f32 %v7649_v49, %v7521_v12  ;;  %v12770_v20 = vpop.f32.mrf.mxu0 }
 0x82a   : > { %7927 = vst.msk [vmem:[#allocation6 + $0x28] sm:$0xff] %vm481_vm1, %v7911_v18  ;;  %vm7883_vm2 = vcmp.gt.f32.partialorder %v7867_v41, 0.0  ;;  %v7900_v58 = vmul.f32 %v16952_v36, %v7867_v41  ;;  %v7865_v35 = vadd.f32 %v16973_v27, %v7843_v34  ;;  %v12746_v25 = vpop.f32.mrf.mxu1 }
 0x82b   : > { %v7868_v15 = vadd.f32 %v16973_v27, %v7846_v26  ;;  %v7844_v62 = vadd.f32 %v7807_v54, %v7686_v37  ;;  %v7691_v10 = vadd.f32 %v12746_v25, %v7526_v38  ;;  %v7820_v3 = vpop.f32.mrf.mxu0 }
 0x82c   : > { %v7916_v8 = vsel %vm7883_vm2, %v7867_v41, %v7900_v58  ;;  %vm7881_vm4 = vcmp.gt.f32.partialorder %v7865_v35, 0.0  ;;  %v7898_v23 = vmul.f32 %v16952_v36, %v7865_v35  ;;  %v7662_v9 = vpop.f32.mrf.mxu1 }
 0x82d   : > { %7932 = vst.msk [vmem:[#allocation6 + $0x50] sm:$0xff] %vm481_vm1, %v7916_v8  ;;  %vm7884_vm0 = vcmp.gt.f32.partialorder %v7868_v15, 0.0  ;;  %v7901_v29 = vmul.f32 %v16952_v36, %v7868_v15  ;;  %v7866_v55 = vadd.f32 %v16973_v27, %v7844_v62  ;;  %v7849_v57 = vadd.f32 %v12770_v20, %v7691_v10  ;;  %v12771_v1 = vpop.f32.mrf.mxu0 }
 0x82e   : > { %v7914_v47 = vsel %vm7881_vm4, %v7865_v35, %v7898_v23  ;;  %v7689_v63 = vadd.f32 %v7662_v9, %v7524_v33  ;;  %v12747_v6 = vpop.f32.mrf.mxu1 }
 0x82f   : > { %7930 = vst.msk [vmem:[#allocation6 + $0x40] sm:$0xff] %vm481_vm1, %v7914_v47  ;;  %v7917_v59 = vsel %vm7884_vm0, %v7868_v15, %v7901_v29  ;;  %vm7882_vm8 = vcmp.gt.f32.partialorder %v7866_v55, 0.0  ;;  %v7899_v7 = vmul.f32 %v16952_v36, %v7866_v55  ;;  %v7871_v53 = vadd.f32 %v16973_v27, %v7849_v57  ;;  %v7823_v61 = vpop.f32.mrf.mxu0 }
 0x830   : > { %7933 = vst.msk [vmem:[#allocation6 + $0x58] sm:$0xff] %vm481_vm1, %v7917_v59  ;;  %v7847_v50 = vadd.f32 %v7820_v3, %v7689_v63  ;;  %v7692_v48 = vadd.f32 %v12747_v6, %v7527_v19  ;;  %v7665_v52 = vpop.f32.mrf.mxu1 }
 0x831   : > { %v7915_v30 = vsel %vm7882_vm8, %v7866_v55, %v7899_v7  ;;  %vm7887_vm7 = vcmp.gt.f32.partialorder %v7871_v53, 0.0  ;;  %v7904_v46 = vmul.f32 %v16952_v36, %v7871_v53  ;;  %v7690_v45 = vadd.f32 %v7665_v52, %v7525_v2 }
 0x832   : > { %7931 = vst.msk [vmem:[#allocation6 + $0x48] sm:$0xff] %vm481_vm1, %v7915_v30  ;;  %v7869_v60 = vadd.f32 %v16973_v27, %v7847_v50  ;;  %v7850_v17 = vadd.f32 %v12771_v1, %v7692_v48 }
 0x833   : > { %v7920_v0 = vsel %vm7887_vm7, %v7871_v53, %v7904_v46  ;;  %v7848_v21 = vadd.f32 %v7823_v61, %v7690_v45 }
 0x834   : > { %7936 = vst.msk [vmem:[#allocation6 + $0x70] sm:$0xff] %vm481_vm1, %v7920_v0  ;;  %vm7885_vm6 = vcmp.gt.f32.partialorder %v7869_v60, 0.0  ;;  %v7902_v31 = vmul.f32 %v16952_v36, %v7869_v60  ;;  %v7872_v44 = vadd.f32 %v16973_v27, %v7850_v17 }
 0x835   : > { %v7870_v56 = vadd.f32 %v16973_v27, %v7848_v21 }
 0x836   : > { %v7918_v4 = vsel %vm7885_vm6, %v7869_v60, %v7902_v31  ;;  %vm7888_vm9 = vcmp.gt.f32.partialorder %v7872_v44, 0.0  ;;  %v7905_v28 = vmul.f32 %v16952_v36, %v7872_v44 }
 0x837   : > { %7934 = vst.msk [vmem:[#allocation6 + $0x60] sm:$0xff] %vm481_vm1, %v7918_v4  ;;  %vm7886_vm10 = vcmp.gt.f32.partialorder %v7870_v56, 0.0  ;;  %v7903_v51 = vmul.f32 %v16952_v36, %v7870_v56 }
 0x838   : > { %v7921_v5 = vsel %vm7888_vm9, %v7872_v44, %v7905_v28 }
 0x839   : > { %7937 = vst.msk [vmem:[#allocation6 + $0x78] sm:$0xff] %vm481_vm1, %v7921_v5  ;;  %v7919_v12 = vsel %vm7886_vm10, %v7870_v56, %v7903_v51 }
 0x83a   : > { %7935 = vst.msk [vmem:[#allocation6 + $0x68] sm:$0xff] %vm481_vm1, %v7919_v12 }
 0x83b LB: >> { %v13311_v27 = vmov 0.0   ;;  %vm13312_vm11 = vmmov 0   ;;  %s10789_s30 = sshll.u32 %s13303_s22, 5  ;;  %vm7981_vm12 = vcmask 130048   ;;  %v18049_v58 = vld [vmem:[#allocation75_spill] sm:$0xff]  ;;  %s10790_s21 = sshll.u32 %s13303_s22, 3  ;;  %s13303_s22 = sphi %s17066_s22, %s7947_s22  }
 0x83c   : >> { %12772 = vmatprep.subr.mxu0 %v13311_v27  ;;  %12776 = vmatprep.mubr.msk.f32.mxu0 %vm13312_vm11, %v13311_v27  ;;  %s7949_s24 = scalar_lea.vmem [#allocation6], %s10789_s30  ;;  %s8055_s19 = scalar_lea.vmem [#allocation7], %s10790_s21 }
 0x83d   : >> { %s7947_s22 = sadd.s32 1, %s13303_s22  }
 0x83e   : >> { %p7944_p5 = scmp.ge.s32.totalorder %s7947_s22, 4  }
 0x83f   : > { %v12986_v20 = vld [vmem:[%s17708_s7 + $0x38] sm:$0xff] (%p7944_p5)   ;;  %v12988_v62 = vld [vmem:[%s17708_s7 + $0x30] sm:$0xff] (%p7944_p5)   ;;  %v12990_v33 = vld [vmem:[%s17708_s7 + $0x28] sm:$0xff] (%p7944_p5)   ;;  %vm10110_vm14 = vcmask (%p7944_p5), 57344   ;;  %vm10098_vm15 = vcmask (%p7944_p5), 8192  }
 0x840   : > { %v12987_v15 = vld [vmem:[%s17708_s7 + $0x18] sm:$0xff] (%p7944_p5)   ;;  %v12989_v10 = vld [vmem:[%s17708_s7 + $0x10] sm:$0xff] (%p7944_p5)   ;;  %v12991_v8 = vld [vmem:[%s17708_s7 + $0x8] sm:$0xff] (%p7944_p5)  }
 0x841   : >> { %v7951_v36 = vld [vmem:[%s7949_s24 + $0x8] sm:$0xff]  ;;  %v7952_v43 = vld [vmem:[%s7949_s24 + $0x10] sm:$0xff]  ;;  %v7953_v14 = vld [vmem:[%s7949_s24 + $0x18] sm:$0xff]  ;;  %12791 = vmatprep.subr.bf16.mxu1 (%p7944_p5), %v12987_v15 }
 0x842   : >> { %v7954_v13 = vld [vmem:[%s7949_s24 + $0x20] sm:$0xff]  ;;  %v7960_v40 = vrot.slane %v7951_v36, 1  ;;  %v7962_v16 = vrot.slane %v7952_v43, 1  ;;  %v7972_v11 = vrot.slane %v7953_v14, 1  ;;  %12792 = vmatpush3.bf16.msra.mxu1 (%p7944_p5), %v12987_v15  ;;  %v12994_v6 = vld [vmem:[%s17708_s7 + $0x58] sm:$0xff] (%p7944_p5)   ;;  %v12996_v46 = vld [vmem:[%s17708_s7 + $0x50] sm:$0xff] (%p7944_p5)  }
 0x843   : >> { %v7950_v32 = vld [vmem:[%s7949_s24] sm:$0xff]  ;;  %v7974_v22 = vrot.slane %v7954_v13, 1  ;;  %12793 = vmatprep.subr.bf16.mxu1 (%p7944_p5), %v12989_v10  ;;  %v12995_v50 = vld [vmem:[%s17708_s7 + $0x78] sm:$0xff] (%p7944_p5)   ;;  %v12997_v0 = vld [vmem:[%s17708_s7 + $0x70] sm:$0xff] (%p7944_p5)  }
 0x844   : >> { %v7959_v38 = vrot.slane %v7950_v32, 1  ;;  %v7963_v42 = vsel %vm1391_vm5, %v7960_v40, %v7962_v16  ;;  %v7973_v18 = vsel %vm1391_vm5, %v7962_v16, %v7972_v11  ;;  %v12992_v23 = vld [vmem:[%s17708_s7 + $0x20] sm:$0xff] (%p7944_p5)   ;;  %v12998_v56 = vld [vmem:[%s17708_s7 + $0x48] sm:$0xff] (%p7944_p5)   ;;  %v13007_v13 = vld [vmem:[%s17710_s9 + $0xf4] ss:$8 sps:$4 sm:$0xff] (%p7944_p5)  }
 0x845   : >> { %v7967_v41 = vmax.f32 %v7951_v36, %v7963_v42  ;;  %v7975_v49 = vsel %vm1391_vm5, %v7972_v11, %v7974_v22  ;;  %v12993_v9 = vld [vmem:[%s17708_s7] sm:$0xff] (%p7944_p5)   ;;  %v12999_v4 = vld [vmem:[%s17708_s7 + $0x68] sm:$0xff] (%p7944_p5)   ;;  %v13005_v16 = vld [vmem:[%s17710_s9 + $0xf0] ss:$8 sps:$4 sm:$0xff] (%p7944_p5)  }
 0x846   : >> { %v7961_v34 = vsel %vm1391_vm5, %v7959_v38, %v7960_v40  ;;  %12794 = vmatpush3.bf16.msra.mxu1 (%p7944_p5), %v12989_v10  ;;  %v13000_v12 = vld [vmem:[%s17708_s7 + $0x40] sm:$0xff] (%p7944_p5)   ;;  %v13002_v40 = vld [vmem:[%s17710_s9 + $0x70] ss:$8 sps:$4 sm:$0xff] (%p7944_p5)  }
 0x847   : >> { %v7966_v54 = vmax.f32 %v7950_v32, %v7961_v34  ;;  %v7969_v39 = vmax.f32 %v7967_v41, %v7953_v14  ;;  %12795 = vmatprep.subr.bf16.mxu1 (%p7944_p5), %v12991_v8  ;;  %v13004_v14 = vld [vmem:[%s17710_s9 + $0x74] ss:$8 sps:$4 sm:$0xff] (%p7944_p5)   ;;  %v13010_v22 = vld [vmem:[%s17710_s9 + $0x64] ss:$8 sps:$4 sm:$0xff] (%p7944_p5)   ;;  %v13008_v38 = vld [vmem:[%s17710_s9 + $0x60] ss:$8 sps:$4 sm:$0xff] (%p7944_p5)  }
 0x848   : > { %v13013_v42 = vld [vmem:[%s17710_s9 + $0xe4] ss:$8 sps:$4 sm:$0xff] (%p7944_p5)   ;;  %v13011_v41 = vld [vmem:[%s17710_s9 + $0xe0] ss:$8 sps:$4 sm:$0xff] (%p7944_p5)   ;;  %v13016_v34 = vld [vmem:[%s17710_s9 + $0x54] ss:$8 sps:$4 sm:$0xff] (%p7944_p5)  }
 0x849   : >> { %v7968_v26 = vmax.f32 %v7966_v54, %v7952_v43  ;;  %v7979_v37 = vmax.f32 %v7969_v39, %v7975_v49  ;;  %v13014_v49 = vld [vmem:[%s17710_s9 + $0x50] ss:$8 sps:$4 sm:$0xff] (%p7944_p5)   ;;  %v13019_v54 = vld [vmem:[%s17710_s9 + $0xd4] ss:$8 sps:$4 sm:$0xff] (%p7944_p5)   ;;  %v13034_v15 = vld [vmem:[%s17710_s9 + $0x24] ss:$8 sps:$4 sm:$0xff] (%p7944_p5)  }
 0x84a   : > { %12796 = vmatpush3.bf16.msra.mxu1 (%p7944_p5), %v12991_v8  ;;  %v13017_v39 = vld [vmem:[%s17710_s9 + $0xd0] ss:$8 sps:$4 sm:$0xff] (%p7944_p5)   ;;  %v13037_v10 = vld [vmem:[%s17710_s9 + $0xa4] ss:$8 sps:$4 sm:$0xff] (%p7944_p5)   ;;  %v13040_v8 = vld [vmem:[%s17710_s9 + $0x14] ss:$8 sps:$4 sm:$0xff] (%p7944_p5)  }
 0x84b   : >> { %v7978_v24 = vmax.f32 %v7968_v26, %v7973_v18  ;;  %12773 = vmatpush3.msra.mxu0 %v7979_v37  ;;  %12797 = vmatprep.subr.bf16.mxu1 (%p7944_p5), %v12993_v9  ;;  %v13020_v18 = vld [vmem:[%s17710_s9 + $0x40] ss:$8 sps:$4 sm:$0xff] (%p7944_p5)   ;;  %v13022_v26 = vld [vmem:[%s17710_s9 + $0x44] ss:$8 sps:$4 sm:$0xff] (%p7944_p5)  }
 0x84c   : >> { %12774 = vmatprep.subr.mxu0 %v13311_v27  ;;  %v13001_v27 = vld [vmem:[%s17708_s7 + $0x60] sm:$0xff] (%p7944_p5)  }
 0x84d   : >> { %12775 = vmatpush3.msra.mxu0 %v7978_v24  ;;  %v13023_v37 = vld [vmem:[%s17710_s9 + $0xc0] ss:$8 sps:$4 sm:$0xff] (%p7944_p5)   ;;  %v13025_v24 = vld [vmem:[%s17710_s9 + $0xc4] ss:$8 sps:$4 sm:$0xff] (%p7944_p5)  }
 0x84e   : >> { %12777 = vmatmul.mubr.msk.f32.vlgmr.msra.gmra.mxu0 %vm7981_vm12, %v18049_v58  ;;  %12779 = vmatprep.subr.bf16.mxu0 (%p7944_p5), %v12986_v20  ;;  %v13028_v58 = vld [vmem:[%s17710_s9 + $0x34] ss:$8 sps:$4 sm:$0xff] (%p7944_p5)  }
 0x84f   : > { %12780 = vmatpush3.bf16.msra.mxu0 (%p7944_p5), %v12986_v20  ;;  %12798 = vmatpush3.bf16.msra.mxu1 (%p7944_p5), %v12993_v9  ;;  %v13029_v20 = vld [vmem:[%s17710_s9 + $0xb0] ss:$8 sps:$4 sm:$0xff] (%p7944_p5)   ;;  %v13043_v9 = vld [vmem:[%s17710_s9 + $0x94] ss:$8 sps:$4 sm:$0xff] (%p7944_p5)  }
 0x850   : > { %12781 = vmatprep.subr.bf16.mxu0 (%p7944_p5), %v12988_v62  ;;  %12815 = vmatprep.subr.bf16.mxu1 (%p7944_p5), %v12995_v50 }
 0x853   : > { %12782 = vmatpush3.bf16.msra.mxu0 (%p7944_p5), %v12988_v62  ;;  %v13032_v62 = vld [vmem:[%s17710_s9 + $0x20] ss:$8 sps:$4 sm:$0xff] (%p7944_p5)  }
 0x854   : > { %12783 = vmatprep.subr.bf16.mxu0 (%p7944_p5), %v12990_v33 }
 0x857   : > { %12784 = vmatpush3.bf16.msra.mxu0 (%p7944_p5), %v12990_v33  ;;  %v13035_v33 = vld [vmem:[%s17710_s9 + $0xa0] ss:$8 sps:$4 sm:$0xff] (%p7944_p5)  }
 0x858   : > { %12785 = vmatprep.subr.bf16.mxu0 (%p7944_p5), %v12992_v23 }
 0x85b   : > { %12786 = vmatpush3.bf16.msra.mxu0 (%p7944_p5), %v12992_v23  ;;  %v13038_v23 = vld [vmem:[%s17710_s9 + $0x10] ss:$8 sps:$4 sm:$0xff] (%p7944_p5)  }
 0x85c   : > { %12803 = vmatprep.subr.bf16.mxu0 (%p7944_p5), %v12994_v6 }
 0x90c   : > { %7946 = sbr.rel (!%p7944_p5) target bundleno = 2107 (0x83b), region = 235 }
 0x90e   : >> { %v8051_v35 = vpop.f32.mrf.mxu0 }
 0x90f   : >> { %8056 = vst.msk [vmem:[%s8055_s19] sm:$0xff] %vm481_vm1, %v8051_v35  ;;  %v13031_v35 = vld [vmem:[%s17710_s9 + $0xb4] ss:$8 sps:$4 sm:$0xff] (%p7944_p5)  }
 0x910   : >> { %v12778_v25 = vpop.f32.mrf.mxu0 }
 0x911   : > { %v13026_v25 = vld [vmem:[%s17710_s9 + $0x30] ss:$8 sps:$4 sm:$0xff]  }
 0x916   : > { %v8058_v3 = vld [vmem:[#allocation7] sm:$0xff]  ;;  %v8059_v29 = vld [vmem:[#allocation7 + $0x8] sm:$0xff]  ;;  %v8060_v55 = vld [vmem:[#allocation7 + $0x10] sm:$0xff] }
 0x917   : > { %v17106_v57 = vld [vmem:[#allocation7 + $0x18] sm:$0xff]  ;;  %v8063_v19 = vpack.c.bf16 %v8059_v29, %v8058_v3  ;;  %v8253_v7 = vpack.c.bf16 %v8060_v55, %v8059_v29  ;;  %v8064_v30 = vpack.c.bf16 %v8060_v55, %v8060_v55  ;;  %v8062_v21 = vld [vmem:[#allocation7 + $0x20] sm:$0xff] }
 0x918   : > { %v8073_v2 = vpack.c.bf16 %v17106_v57, %v8060_v55  ;;  %v8345_v31 = vpack.c.bf16 %v8062_v21, %v17106_v57  ;;  %v8254_v32 = vpack.c.bf16 %v17106_v57, %v17106_v57  ;;  %v13041_v3 = vld [vmem:[%s17710_s9 + $0x90] ss:$8 sps:$4 sm:$0xff]   ;;  %v13046_v29 = vld [vmem:[%s17710_s9 + $0x4] ss:$8 sps:$4 sm:$0xff]   ;;  %v13044_v55 = vld [vmem:[%s17710_s9] ss:$8 sps:$4 sm:$0xff]  }
 0x919   : > { %v8084_v47 = vshrl.u32 %v8063_v19, 16  ;;  %v8086_v63 = vshll.u32 %v8063_v19, 16  ;;  %12799 = vmatprep.mubr.msk.bf16.mxu1 %vm481_vm1, %v8063_v19  ;;  %v8355_v60 = vshrl.u32 %v8253_v7, 16  ;;  %v8357_v17 = vshll.u32 %v8253_v7, 16  ;;  %v13049_v57 = vld [vmem:[%s17710_s9 + $0x84] ss:$8 sps:$4 sm:$0xff]  }
 0x91a   : > { %v8091_v1 = vshll.u32 %v8073_v2, 16  ;;  %v8095_v59 = vshrl.u32 %v8073_v2, 16  ;;  %12800 = vmatmul.mubr.msk.bf16.vlgmr.msra.gmra.mxu1 %vm481_vm1, %v8064_v30  ;;  %v8362_v51 = vshll.u32 %v8345_v31, 16  ;;  %v8366_v43 = vshrl.u32 %v8345_v31, 16  ;;  %v13047_v19 = vld [vmem:[%s17710_s9 + $0x80] ss:$8 sps:$4 sm:$0xff]  }
 0x91b   : > { %v8088_v53 = vrot.slane %v8086_v63, 1  ;;  %v8359_v44 = vrot.slane %v8357_v17, 1  ;;  %12816 = vmatpush3.bf16.msra.mxu1 %v12995_v50  ;;  %v13052_v2 = vld [vmem:[%s17710_s9 + $0x174] ss:$8 sps:$4 sm:$0xff]  }
 0x91c   : > { %v8093_v48 = vrot.slane %v8091_v1, 1  ;;  %12817 = vmatprep.subr.bf16.mxu1 %v12997_v0  ;;  %v8364_v5 = vrot.slane %v8362_v51, 1  ;;  %v13055_v63 = vld [vmem:[%s17710_s9 + $0x1f4] ss:$8 sps:$4 sm:$0xff]  }
 0x91d   : > { %v8089_v52 = vor.u32 %v8088_v53, %v8084_v47  ;;  %v8360_v28 = vor.u32 %v8359_v44, %v8355_v60  ;;  %v13313_v47 = vmov 0  }
 0x91e   : > { %v8097_v45 = vor.u32 %v8095_v59, %v8093_v48  ;;  %v8368_v11 = vor.u32 %v8366_v43, %v8364_v5 }
 0x91f   : > { %v8094_v61 = vsel %vm589_vm3, %v8089_v52, %v8093_v48  ;;  %12818 = vmatpush3.bf16.msra.mxu1 %v12997_v0  ;;  %v8365_v36 = vsel %vm589_vm3, %v8360_v28, %v8364_v5 }
 0x920   : > { %12787 = vmatprep.mubr.msk.bf16.mxu0 %vm481_vm1, %v8094_v61  ;;  %12819 = vmatprep.subr.bf16.mxu1 %v12999_v4  ;;  %v17253_v61 = vld [vmem:[%s17709_s8] ss:$0 sm:$0xff] }
 0x921   : > { %12788 = vmatmul.mubr.msk.bf16.vlgmr.msra.gmra.mxu0 %vm481_vm1, %v8097_v45  ;;  %12823 = vmatprep.mubr.msk.bf16.mxu1 %vm481_vm1, %v8365_v36 }
 0x922   : > { %12804 = vmatpush3.bf16.msra.mxu0 %v12994_v6  ;;  %12811 = vmatprep.mubr.msk.bf16.mxu0 %vm481_vm1, %v8253_v7 }
 0x923   : > { %12805 = vmatprep.subr.bf16.mxu0 %v12996_v46  ;;  %12820 = vmatpush3.bf16.msra.mxu1 %v12999_v4 }
 0x924   : > { %12821 = vmatprep.subr.bf16.mxu1 %v13001_v27 }
 0x926   : > { %12806 = vmatpush3.bf16.msra.mxu0 %v12996_v46 }
 0x927   : > { %12807 = vmatprep.subr.bf16.mxu0 %v12998_v56  ;;  %12822 = vmatpush3.bf16.msra.mxu1 %v13001_v27 }
 0x928   : > { %8734 = vmatprep.subr.bf16.mxu1 %v13007_v13  ;;  %v13050_v13 = vld [vmem:[%s17710_s9 + $0x170] ss:$8 sps:$4 sm:$0xff]  }
 0x92a   : > { %12808 = vmatpush3.bf16.msra.mxu0 %v12998_v56  ;;  %12824 = vmatmul.mubr.msk.bf16.vlgmr.msra.gmra.mxu1 %vm481_vm1, %v8368_v11  ;;  %v17256_v56 = vstv %s13446_s16  ;;  %v13053_v11 = vld [vmem:[%s17710_s9 + $0x1f0] ss:$8 sps:$4 sm:$0xff]  }
 0x92b   : > { %12809 = vmatprep.subr.bf16.mxu0 %v13000_v12  ;;  %8735 = vmatpush1.bf16.msra.mxu1 %v13005_v16  ;;  %v13058_v16 = vld [vmem:[%s17710_s9 + $0x164] ss:$8 sps:$4 sm:$0xff]  }
 0x92c   : > { %8736 = vmatprep.subr.bf16.mxu1 %v13013_v42  ;;  %8766 = vmatprep.mubr.bf16.mxu1 %v13313_v47  ;;  %v13064_v42 = vld [vmem:[%s17710_s9 + $0x154] ss:$8 sps:$4 sm:$0xff]  }
 0x92e   : > { %12810 = vmatpush3.bf16.msra.mxu0 %v13000_v12 }
 0x92f   : > { %8573 = vmatprep.subr.bf16.mxu0 %v13004_v14  ;;  %8737 = vmatpush1.bf16.msra.mxu1 %v13011_v41  ;;  %v13059_v41 = vld [vmem:[%s17710_s9 + $0x1e0] ss:$8 sps:$4 sm:$0xff]  }
 0x930   : > { %8738 = vmatprep.subr.bf16.mxu1 %v13019_v54  ;;  %v13070_v54 = vld [vmem:[%s17710_s9 + $0x144] ss:$8 sps:$4 sm:$0xff]  }
 0x931   : > { %12812 = vmatmul.mubr.msk.bf16.vlgmr.msra.gmra.mxu0 %vm481_vm1, %v8254_v32 }
 0x932   : > { %8574 = vmatpush1.bf16.msra.mxu0 %v13002_v40  ;;  %8605 = vmatprep.mubr.bf16.mxu0 %v13313_v47 }
 0x933   : > { %8575 = vmatprep.subr.bf16.mxu0 %v13010_v22  ;;  %8739 = vmatpush1.bf16.msra.mxu1 %v13017_v39  ;;  %v13061_v22 = vld [vmem:[%s17710_s9 + $0x1e4] ss:$8 sps:$4 sm:$0xff]   ;;  %v13065_v39 = vld [vmem:[%s17710_s9 + $0x1d0] ss:$8 sps:$4 sm:$0xff]  }
 0x934   : > { %8740 = vmatprep.subr.bf16.mxu1 %v13025_v24  ;;  %v13076_v24 = vld [vmem:[%s17710_s9 + $0x134] ss:$8 sps:$4 sm:$0xff]  }
 0x936   : > { %8576 = vmatpush1.bf16.msra.mxu0 %v13008_v38  ;;  %v13056_v38 = vld [vmem:[%s17710_s9 + $0x160] ss:$8 sps:$4 sm:$0xff]  }
 0x937   : > { %8577 = vmatprep.subr.bf16.mxu0 %v13016_v34  ;;  %8741 = vmatpush1.bf16.msra.mxu1 %v13023_v37  ;;  %v13067_v34 = vld [vmem:[%s17710_s9 + $0x1d4] ss:$8 sps:$4 sm:$0xff]  }
 0x938   : > { %8742 = vmatprep.subr.bf16.mxu1 %v13031_v35  ;;  %v13071_v35 = vld [vmem:[%s17710_s9 + $0x1c0] ss:$8 sps:$4 sm:$0xff]  }
 0x93a   : > { %8578 = vmatpush1.bf16.msra.mxu0 %v13014_v49  ;;  %v13062_v49 = vld [vmem:[%s17710_s9 + $0x150] ss:$8 sps:$4 sm:$0xff]  }
 0x93b   : > { %8579 = vmatprep.subr.bf16.mxu0 %v13022_v26  ;;  %8743 = vmatpush1.bf16.msra.mxu1 %v13029_v20  ;;  %v13068_v26 = vld [vmem:[%s17710_s9 + $0x140] ss:$8 sps:$4 sm:$0xff]  }
 0x93c   : > { %8744 = vmatprep.subr.bf16.mxu1 %v13037_v10  ;;  %v13077_v10 = vld [vmem:[%s17710_s9 + $0x1b0] ss:$8 sps:$4 sm:$0xff]  }
 0x93e   : > { %8580 = vmatpush1.bf16.msra.mxu0 %v13020_v18  ;;  %v13073_v18 = vld [vmem:[%s17710_s9 + $0x1c4] ss:$8 sps:$4 sm:$0xff]  }
 0x93f   : > { %8581 = vmatprep.subr.bf16.mxu0 %v13028_v58  ;;  %8745 = vmatpush1.bf16.msra.mxu1 %v13035_v33 }
 0x940   : > { %8746 = vmatprep.subr.bf16.mxu1 %v13043_v9  ;;  %v13080_v9 = vld [vmem:[%s17710_s9 + $0x120] ss:$8 sps:$4 sm:$0xff]  }
 0x942   : > { %8582 = vmatpush1.bf16.msra.mxu0 %v13026_v25  ;;  %v13079_v25 = vld [vmem:[%s17710_s9 + $0x1b4] ss:$8 sps:$4 sm:$0xff]  }
 0x943   : > { %8583 = vmatprep.subr.bf16.mxu0 %v13034_v15  ;;  %8747 = vmatpush1.bf16.msra.mxu1 %v13041_v3  ;;  %v13074_v15 = vld [vmem:[%s17710_s9 + $0x130] ss:$8 sps:$4 sm:$0xff]   ;;  %v13088_v3 = vld [vmem:[%s17710_s9 + $0x114] ss:$8 sps:$4 sm:$0xff]  }
 0x944   : > { %8748 = vmatprep.subr.bf16.mxu1 %v13049_v57 }
 0x946   : > { %8584 = vmatpush1.bf16.msra.mxu0 %v13032_v62  ;;  %v13082_v62 = vld [vmem:[%s17710_s9 + $0x124] ss:$8 sps:$4 sm:$0xff]  }
 0x947   : > { %8585 = vmatprep.subr.bf16.mxu0 %v13040_v8  ;;  %8749 = vmatpush1.bf16.msra.mxu1 %v13047_v19  ;;  %v13085_v8 = vld [vmem:[%s17710_s9 + $0x1a4] ss:$8 sps:$4 sm:$0xff]   ;;  %v13086_v19 = vld [vmem:[%s17710_s9 + $0x110] ss:$8 sps:$4 sm:$0xff]  }
 0x948   : > { %9052 = vmatprep.subr.bf16.mxu1 %v13055_v63  ;;  %v13089_v63 = vld [vmem:[%s17710_s9 + $0x190] ss:$8 sps:$4 sm:$0xff]  }
 0x94a   : > { %8586 = vmatpush1.bf16.msra.mxu0 %v13038_v23 }
 0x94b   : > { %8587 = vmatprep.subr.bf16.mxu0 %v13046_v29  ;;  %v13083_v29 = vld [vmem:[%s17710_s9 + $0x1a0] ss:$8 sps:$4 sm:$0xff]  }
 0x94e   : > { %8588 = vmatpush1.bf16.msra.mxu0 %v13044_v55  ;;  %v13091_v55 = vld [vmem:[%s17710_s9 + $0x194] ss:$8 sps:$4 sm:$0xff]  }
 0x94f   : > { %8894 = vmatprep.subr.bf16.mxu0 %v13052_v2  ;;  %v13094_v2 = vld [vmem:[%s17710_s9 + $0x104] ss:$8 sps:$4 sm:$0xff]  }
 0x9da   : > { %v12801_v1 = vpop.f32.mrf.mxu1 }
 0x9dc   : > { %v8239_v53 = vpop.f32.mrf.mxu1 }
 0x9de   : > { %v12802_v48 = vpop.f32.mrf.mxu1 }
 0x9e0   : > { %v8242_v30 = vpop.f32.mrf.mxu1 }
 0x9e1   : > { %v12789_v6 = vpop.f32.mrf.mxu0 }
 0x9e2   : > { %v8248_v59 = vadd.f32 %v12801_v1, %v12789_v6  ;;  %v13097_v6 = vld [vmem:[%s17710_s9 + $0x184] ss:$8 sps:$4 sm:$0xff]  }
 0x9e3   : > { %v8162_v7 = vpop.f32.mrf.mxu0 }
 0x9e4   : > { %v8240_v60 = vadd.f32 %v8239_v53, %v8162_v7  ;;  %v13100_v7 = vld [vmem:[%s17710_s9 + $0x274] ss:$8 sps:$4 sm:$0xff]   ;;  %v13095_v53 = vld [vmem:[%s17710_s9 + $0x180] ss:$8 sps:$4 sm:$0xff]  }
 0x9e5   : > { %v12790_v50 = vpop.f32.mrf.mxu0 }
 0x9e6   : > { %v13103_v50 = vld [vmem:[%s17710_s9 + $0x2f4] ss:$8 sps:$4 sm:$0xff]  }
 0x9e7   : > { %v8165_v52 = vpop.f32.mrf.mxu0 }
 0x9e8   : > { %v8243_v58 = vadd.f32 %v8242_v30, %v8165_v52  ;;  %v13098_v52 = vld [vmem:[%s17710_s9 + $0x270] ss:$8 sps:$4 sm:$0xff]  }
 0x9ea   : > { %v12825_v45 = vpop.f32.mrf.mxu1 }
 0x9ec   : > { %v8433_v21 = vpop.f32.mrf.mxu1 }
 0x9ee   : > { %v12826_v28 = vpop.f32.mrf.mxu1 }
 0x9ef   : > { %v13121_v28 = vld [vmem:[%s17710_s9 + $0x2c4] ss:$8 sps:$4 sm:$0xff]  }
 0x9f0   : > { %v8436_v33 = vpop.f32.mrf.mxu1 }
 0x9f1   : > { %v12813_v46 = vpop.f32.mrf.mxu0 }
 0x9f2   : > { %v8344_v17 = vadd.f32 %v12813_v46, %v8248_v59  ;;  %v13092_v59 = vld [vmem:[%s17710_s9 + $0x100] ss:$8 sps:$4 sm:$0xff]   ;;  %v13106_v46 = vld [vmem:[%s17710_s9 + $0x264] ss:$8 sps:$4 sm:$0xff]  }
 0x9f3   : > { %v8328_v0 = vpop.f32.mrf.mxu0 }
 0x9f4   : > { %v8449_v31 = vadd.f32 %v12825_v45, %v8344_v17  ;;  %v8342_v44 = vadd.f32 %v8328_v0, %v8240_v60  ;;  %v13101_v45 = vld [vmem:[%s17710_s9 + $0x2f0] ss:$8 sps:$4 sm:$0xff]   ;;  %v13109_v17 = vld [vmem:[%s17710_s9 + $0x2e4] ss:$8 sps:$4 sm:$0xff]   ;;  %v13112_v0 = vld [vmem:[%s17710_s9 + $0x254] ss:$8 sps:$4 sm:$0xff]  }
 0x9f5   : > { %v12814_v4 = vpop.f32.mrf.mxu0 }
 0x9f6   : > { %v8458_v51 = vadd.f32 %v17253_v61, %v8449_v31  ;;  %v8447_v5 = vadd.f32 %v8433_v21, %v8342_v44  ;;  %v13107_v21 = vld [vmem:[%s17710_s9 + $0x2e0] ss:$8 sps:$4 sm:$0xff]   ;;  %v13115_v31 = vld [vmem:[%s17710_s9 + $0x2d4] ss:$8 sps:$4 sm:$0xff]   ;;  %v13110_v44 = vld [vmem:[%s17710_s9 + $0x250] ss:$8 sps:$4 sm:$0xff]  }
 0x9f7   : > { %v8331_v37 = vpop.f32.mrf.mxu0  ;;  %v13113_v4 = vld [vmem:[%s17710_s9 + $0x2d0] ss:$8 sps:$4 sm:$0xff]  }
 0x9f8   : > { %vm8461_vm1 = vcmp.gt.f32.partialorder %v8458_v51, 0.0  ;;  %v8465_v12 = vmul.f32 %v17256_v56, %v8458_v51  ;;  %v8456_v27 = vadd.f32 %v17253_v61, %v8447_v5  ;;  %v8343_v20 = vadd.f32 %v8331_v37, %v8243_v58  ;;  %v13124_v5 = vld [vmem:[%s17710_s9 + $0x234] ss:$8 sps:$4 sm:$0xff]   ;;  %v13149_v58 = vld [vmem:[%s17710_s9 + $0x3f0] ss:$8 sps:$4 sm:$0xff]  }
 0x9fa   : > { %v17261_v36 = vsel %vm8461_vm1, %v8458_v51, %v8465_v12  ;;  %vm8459_vm3 = vcmp.gt.f32.partialorder %v8456_v27, 0.0  ;;  %v8463_v43 = vmul.f32 %v17256_v56, %v8456_v27  ;;  %v8448_v23 = vadd.f32 %v8436_v33, %v8343_v20  ;;  %v13116_v51 = vld [vmem:[%s17710_s9 + $0x240] ss:$8 sps:$4 sm:$0xff]   ;;  %v13158_v33 = vld [vmem:[%s17710_s9 + $0x350] ss:$8 sps:$4 sm:$0xff]  }
 0x9fb   : > { %v13119_v12 = vld [vmem:[%s17710_s9 + $0x2c0] ss:$8 sps:$4 sm:$0xff]  }
 0x9fc   : > { %v8466_v14 = vsel %vm8459_vm3, %v8456_v27, %v8463_v43  ;;  %v8457_v57 = vadd.f32 %v17253_v61, %v8448_v23  ;;  %v13104_v61 = vld [vmem:[%s17710_s9 + $0x260] ss:$8 sps:$4 sm:$0xff]   ;;  %v13127_v27 = vld [vmem:[%s17710_s9 + $0x2b4] ss:$8 sps:$4 sm:$0xff]   ;;  %v13122_v43 = vld [vmem:[%s17710_s9 + $0x230] ss:$8 sps:$4 sm:$0xff]  }
 0x9fd   : > { %v17267_v40 = vpack.c.bf16 %v8466_v14, %v8466_v14  ;;  %v13130_v14 = vld [vmem:[%s17710_s9 + $0x224] ss:$8 sps:$4 sm:$0xff]   ;;  %v13152_v20 = vld [vmem:[%s17710_s9 + $0x360] ss:$8 sps:$4 sm:$0xff]   ;;  %v13161_v23 = vld [vmem:[%s17710_s9 + $0x3d0] ss:$8 sps:$4 sm:$0xff]  }
 0x9fe   : > { %v8464_v1 = vmul.f32 %v17256_v56, %v8457_v57  ;;  %vm8460_vm5 = vcmp.gt.f32.partialorder %v8457_v57, 0.0  ;;  %v13118_v56 = vld [vmem:[%s17710_s9 + $0x244] ss:$8 sps:$4 sm:$0xff]  }
 0x9ff   : > { %8606 = vmatmul.mubr.bf16.vlgmr.msra.gmra.mxu0 %v17267_v40  ;;  %v8651_v32 = vshrl.u32 %v17267_v40, 16  ;;  %v8812_v30 = vrot.slane %v17267_v40, 1  ;;  %v13133_v40 = vld [vmem:[%s17710_s9 + $0x2a4] ss:$8 sps:$4 sm:$0xff]  }
 0xa00   : > { %8895 = vmatpush1.bf16.msra.mxu0 %v13050_v13  ;;  %8926 = vmatprep.mubr.bf16.mxu0 %v13313_v47  ;;  %v8467_v48 = vsel %vm8460_vm5, %v8457_v57, %v8464_v1  ;;  %v13125_v13 = vld [vmem:[%s17710_s9 + $0x2b0] ss:$8 sps:$4 sm:$0xff]   ;;  %v13175_v57 = vld [vmem:[%s17710_s9 + $0x3b4] ss:$8 sps:$4 sm:$0xff]   ;;  %v13176_v1 = vld [vmem:[%s17710_s9 + $0x320] ss:$8 sps:$4 sm:$0xff]  }
 0xa01   : > { %8767 = vmatmul.mubr.bf16.vlgmr.msra.gmra.mxu1 %v8651_v32  ;;  %8896 = vmatprep.subr.bf16.mxu0 %v13058_v16  ;;  %v17378_v60 = vpack.c.bf16 %v8467_v48, %v8467_v48  ;;  %v13128_v16 = vld [vmem:[%s17710_s9 + $0x220] ss:$8 sps:$4 sm:$0xff]   ;;  %v13190_v48 = vld [vmem:[%s17710_s9 + $0x304] ss:$8 sps:$4 sm:$0xff]  }
 0xa02   : > { %9053 = vmatpush1.bf16.msra.mxu1 %v13053_v11  ;;  %9084 = vmatprep.mubr.bf16.mxu1 %v13313_v47  ;;  %v13136_v11 = vld [vmem:[%s17710_s9 + $0x214] ss:$8 sps:$4 sm:$0xff]   ;;  %v13131_v32 = vld [vmem:[%s17710_s9 + $0x2a0] ss:$8 sps:$4 sm:$0xff]  }
 0xa03   : > { %9054 = vmatprep.subr.bf16.mxu1 %v13061_v22  ;;  %v13139_v22 = vld [vmem:[%s17710_s9 + $0x294] ss:$8 sps:$4 sm:$0xff]   ;;  %v9130_v37 = vshrl.u32 %v17378_v60, 16 }
 0xa04   : > { %8897 = vmatpush1.bf16.msra.mxu0 %v13056_v38  ;;  %v13134_v38 = vld [vmem:[%s17710_s9 + $0x210] ss:$8 sps:$4 sm:$0xff]  }
 0xa05   : > { %8898 = vmatprep.subr.bf16.mxu0 %v13064_v42  ;;  %v13142_v42 = vld [vmem:[%s17710_s9 + $0x204] ss:$8 sps:$4 sm:$0xff]  }
 0xa06   : > { %9055 = vmatpush1.bf16.msra.mxu1 %v13059_v41  ;;  %v13137_v41 = vld [vmem:[%s17710_s9 + $0x290] ss:$8 sps:$4 sm:$0xff]  }
 0xa07   : > { %9056 = vmatprep.subr.bf16.mxu1 %v13067_v34  ;;  %v13145_v34 = vld [vmem:[%s17710_s9 + $0x284] ss:$8 sps:$4 sm:$0xff]  }
 0xa08   : > { %8899 = vmatpush1.bf16.msra.mxu0 %v13062_v49  ;;  %v13140_v49 = vld [vmem:[%s17710_s9 + $0x200] ss:$8 sps:$4 sm:$0xff]  }
 0xa09   : > { %8900 = vmatprep.subr.bf16.mxu0 %v13070_v54  ;;  %v13148_v54 = vld [vmem:[%s17710_s9 + $0x374] ss:$8 sps:$4 sm:$0xff]  }
 0xa0a   : > { %9057 = vmatpush1.bf16.msra.mxu1 %v13065_v39  ;;  %v13143_v39 = vld [vmem:[%s17710_s9 + $0x280] ss:$8 sps:$4 sm:$0xff]  }
 0xa0b   : > { %9058 = vmatprep.subr.bf16.mxu1 %v13073_v18  ;;  %v13151_v18 = vld [vmem:[%s17710_s9 + $0x3f4] ss:$8 sps:$4 sm:$0xff]  }
 0xa0c   : > { %8901 = vmatpush1.bf16.msra.mxu0 %v13068_v26  ;;  %v13146_v26 = vld [vmem:[%s17710_s9 + $0x370] ss:$8 sps:$4 sm:$0xff]  }
 0xa0d   : > { %8902 = vmatprep.subr.bf16.mxu0 %v13076_v24  ;;  %v13154_v24 = vld [vmem:[%s17710_s9 + $0x364] ss:$8 sps:$4 sm:$0xff]  }
 0xa0e   : > { %9059 = vmatpush1.bf16.msra.mxu1 %v13071_v35  ;;  %v9291_v35 = vrot.slane %v17378_v60, 1 }
 0xa0f   : > { %9060 = vmatprep.subr.bf16.mxu1 %v13079_v25  ;;  %v13157_v25 = vld [vmem:[%s17710_s9 + $0x3e4] ss:$8 sps:$4 sm:$0xff]  }
 0xa10   : > { %8903 = vmatpush1.bf16.msra.mxu0 %v13074_v15  ;;  %v13160_v15 = vld [vmem:[%s17710_s9 + $0x354] ss:$8 sps:$4 sm:$0xff]  }
 0xa11   : > { %8904 = vmatprep.subr.bf16.mxu0 %v13082_v62  ;;  %v13155_v62 = vld [vmem:[%s17710_s9 + $0x3e0] ss:$8 sps:$4 sm:$0xff]  }
 0xa12   : > { %9061 = vmatpush1.bf16.msra.mxu1 %v13077_v10  ;;  %v13163_v10 = vld [vmem:[%s17710_s9 + $0x3d4] ss:$8 sps:$4 sm:$0xff]  }
 0xa13   : > { %9062 = vmatprep.subr.bf16.mxu1 %v13085_v8  ;;  %v13166_v8 = vld [vmem:[%s17710_s9 + $0x344] ss:$8 sps:$4 sm:$0xff]  }
 0xa14   : > { %8905 = vmatpush1.bf16.msra.mxu0 %v13080_v9  ;;  %v13169_v9 = vld [vmem:[%s17710_s9 + $0x3c4] ss:$8 sps:$4 sm:$0xff]  }
 0xa15   : > { %8906 = vmatprep.subr.bf16.mxu0 %v13088_v3  ;;  %v13164_v3 = vld [vmem:[%s17710_s9 + $0x340] ss:$8 sps:$4 sm:$0xff]  }
 0xa16   : > { %9063 = vmatpush1.bf16.msra.mxu1 %v13083_v29  ;;  %v13172_v29 = vld [vmem:[%s17710_s9 + $0x334] ss:$8 sps:$4 sm:$0xff]  }
 0xa17   : > { %9064 = vmatprep.subr.bf16.mxu1 %v13091_v55  ;;  %v13167_v55 = vld [vmem:[%s17710_s9 + $0x3c0] ss:$8 sps:$4 sm:$0xff]  }
 0xa18   : > { %8907 = vmatpush1.bf16.msra.mxu0 %v13086_v19  ;;  %v13170_v19 = vld [vmem:[%s17710_s9 + $0x330] ss:$8 sps:$4 sm:$0xff]  }
 0xa19   : > { %8908 = vmatprep.subr.bf16.mxu0 %v13094_v2  ;;  %v13178_v2 = vld [vmem:[%s17710_s9 + $0x324] ss:$8 sps:$4 sm:$0xff]  }
 0xa1a   : > { %9065 = vmatpush1.bf16.msra.mxu1 %v13089_v63  ;;  %v13173_v63 = vld [vmem:[%s17710_s9 + $0x3b0] ss:$8 sps:$4 sm:$0xff]  }
 0xa1b   : > { %9066 = vmatprep.subr.bf16.mxu1 %v13097_v6  ;;  %v13181_v6 = vld [vmem:[%s17710_s9 + $0x3a4] ss:$8 sps:$4 sm:$0xff]  }
 0xa1c   : > { %8909 = vmatpush1.bf16.msra.mxu0 %v13092_v59  ;;  %v13184_v59 = vld [vmem:[%s17710_s9 + $0x314] ss:$8 sps:$4 sm:$0xff]  }
 0xa1d   : > { %9213 = vmatprep.subr.bf16.mxu0 %v13100_v7  ;;  %v13179_v7 = vld [vmem:[%s17710_s9 + $0x3a0] ss:$8 sps:$4 sm:$0xff]  }
 0xa1e   : > { %9067 = vmatpush1.bf16.msra.mxu1 %v13095_v53  ;;  %v13187_v53 = vld [vmem:[%s17710_s9 + $0x394] ss:$8 sps:$4 sm:$0xff]  }
 0xa1f   : > { %8927 = vmatmul.mubr.bf16.vlgmr.msra.gmra.mxu0 %v8812_v30  ;;  %9373 = vmatprep.subr.bf16.mxu1 %v13103_v50  ;;  %v13182_v50 = vld [vmem:[%s17710_s9 + $0x310] ss:$8 sps:$4 sm:$0xff]   ;;  %v13193_v30 = vld [vmem:[%s17710_s9 + $0x384] ss:$8 sps:$4 sm:$0xff]  }
 0xa20   : > { %9214 = vmatpush1.bf16.msra.mxu0 %v13098_v52  ;;  %9245 = vmatprep.mubr.bf16.mxu0 %v13313_v47  ;;  %v13185_v52 = vld [vmem:[%s17710_s9 + $0x390] ss:$8 sps:$4 sm:$0xff]  }
 0xa21   : > { %9085 = vmatmul.mubr.bf16.vlgmr.msra.gmra.mxu1 %v17378_v60  ;;  %9215 = vmatprep.subr.bf16.mxu0 %v13106_v46  ;;  %v13188_v46 = vld [vmem:[%s17710_s9 + $0x300] ss:$8 sps:$4 sm:$0xff]  }
 0xa22   : > { %9374 = vmatpush1.bf16.msra.mxu1 %v13101_v45  ;;  %9405 = vmatprep.mubr.bf16.mxu1 %v13313_v47  ;;  %v13196_v45 = vld [vmem:[%s17710_s9 + $0x474] ss:$8 sps:$4 sm:$0xff]   ;;  %v13191_v60 = vld [vmem:[%s17710_s9 + $0x380] ss:$8 sps:$4 sm:$0xff]  }
 0xa23   : > { %9375 = vmatprep.subr.bf16.mxu1 %v13109_v17  ;;  %v9433_v17 = vpack.c.bf16 %v17261_v36, %v17261_v36  ;;  %v13202_v36 = vld [vmem:[%s17710_s9 + $0x454] ss:$8 sps:$4 sm:$0xff]  }
 0xa24   : > { %9216 = vmatpush1.bf16.msra.mxu0 %v13104_v61  ;;  %v13194_v61 = vld [vmem:[%s17710_s9 + $0x470] ss:$8 sps:$4 sm:$0xff]  }
 0xa25   : > { %9217 = vmatprep.subr.bf16.mxu0 %v13112_v0  ;;  %v13199_v0 = vld [vmem:[%s17710_s9 + $0x464] ss:$8 sps:$4 sm:$0xff]  }
 0xa26   : > { %9376 = vmatpush1.bf16.msra.mxu1 %v13107_v21  ;;  %v9609_v21 = vshrl.u32 %v9433_v17, 16 }
 0xa27   : > { %9377 = vmatprep.subr.bf16.mxu1 %v13115_v31  ;;  %v13197_v31 = vld [vmem:[%s17710_s9 + $0x460] ss:$8 sps:$4 sm:$0xff]  }
 0xa28   : > { %9218 = vmatpush1.bf16.msra.mxu0 %v13110_v44  ;;  %v13200_v44 = vld [vmem:[%s17710_s9 + $0x450] ss:$8 sps:$4 sm:$0xff]  }
 0xa29   : > { %9219 = vmatprep.subr.bf16.mxu0 %v13118_v56  ;;  %v13205_v56 = vld [vmem:[%s17710_s9 + $0x444] ss:$8 sps:$4 sm:$0xff]  }
 0xa2a   : > { %9378 = vmatpush1.bf16.msra.mxu1 %v13113_v4  ;;  %v13208_v4 = vld [vmem:[%s17710_s9 + $0x434] ss:$8 sps:$4 sm:$0xff]  }
 0xa2b   : > { %9379 = vmatprep.subr.bf16.mxu1 %v13121_v28  ;;  %v13206_v28 = vld [vmem:[%s17710_s9 + $0x430] ss:$8 sps:$4 sm:$0xff]  }
 0xa2c   : > { %9220 = vmatpush1.bf16.msra.mxu0 %v13116_v51  ;;  %v13211_v51 = vld [vmem:[%s17710_s9 + $0x424] ss:$8 sps:$4 sm:$0xff]  }
 0xa2d   : > { %9221 = vmatprep.subr.bf16.mxu0 %v13124_v5  ;;  %v13209_v5 = vld [vmem:[%s17710_s9 + $0x420] ss:$8 sps:$4 sm:$0xff]  }
 0xa2e   : > { %9380 = vmatpush1.bf16.msra.mxu1 %v13119_v12  ;;  %v13214_v12 = vld [vmem:[%s17710_s9 + $0x414] ss:$8 sps:$4 sm:$0xff]  }
 0xa2f   : > { %9381 = vmatprep.subr.bf16.mxu1 %v13127_v27  ;;  %v13212_v27 = vld [vmem:[%s17710_s9 + $0x410] ss:$8 sps:$4 sm:$0xff]  }
 0xa30   : > { %9222 = vmatpush1.bf16.msra.mxu0 %v13122_v43  ;;  %v13217_v43 = vld [vmem:[%s17710_s9 + $0x404] ss:$8 sps:$4 sm:$0xff]  }
 0xa31   : > { %9223 = vmatprep.subr.bf16.mxu0 %v13130_v14  ;;  %v13215_v14 = vld [vmem:[%s17710_s9 + $0x400] ss:$8 sps:$4 sm:$0xff]  }
 0xa32   : > { %9382 = vmatpush1.bf16.msra.mxu1 %v13125_v13  ;;  %v9770_v13 = vrot.slane %v9433_v17, 1 }
 0xa33   : > { %9383 = vmatprep.subr.bf16.mxu1 %v13133_v40  ;;  %v13218_v40 = vld [vmem:[%s17712_s11 + $0x78] sm:$0xff]  }
 0xa34   : > { %9224 = vmatpush1.bf16.msra.mxu0 %v13128_v16  ;;  %v13219_v16 = vld [vmem:[%s17712_s11 + $0x38] sm:$0xff]  }
 0xa35   : > { %9225 = vmatprep.subr.bf16.mxu0 %v13136_v11  ;;  %v13220_v11 = vld [vmem:[%s17712_s11 + $0x70] sm:$0xff]  }
 0xa36   : > { %9384 = vmatpush1.bf16.msra.mxu1 %v13131_v32  ;;  %v13221_v32 = vld [vmem:[%s17712_s11 + $0x30] sm:$0xff]  }
 0xa37   : > { %9385 = vmatprep.subr.bf16.mxu1 %v13139_v22  ;;  %v13222_v22 = vld [vmem:[%s17712_s11 + $0x68] sm:$0xff]  }
 0xa38   : > { %9226 = vmatpush1.bf16.msra.mxu0 %v13134_v38  ;;  %v13223_v38 = vld [vmem:[%s17712_s11 + $0x28] sm:$0xff]  }
 0xa39   : > { %9227 = vmatprep.subr.bf16.mxu0 %v13142_v42  ;;  %v13224_v42 = vld [vmem:[%s17712_s11 + $0x60] sm:$0xff]  }
 0xa3a   : > { %9386 = vmatpush1.bf16.msra.mxu1 %v13137_v41  ;;  %v13314_v41 = vmov 1966171168  }
 0xa3b   : > { %9387 = vmatprep.subr.bf16.mxu1 %v13145_v34  ;;  %v8618_v34 = vunpack.c.l.s4 %v13314_v41 }
 0xa3c   : > { %9228 = vmatpush1.bf16.msra.mxu0 %v13140_v49 }
 0xa3d   : > { %9531 = vmatprep.subr.bf16.mxu0 %v13148_v54  ;;  %v8619_v49 = vunpack.c.0.s8 %v8618_v34  ;;  %v13225_v54 = vld [vmem:[%s17712_s11 + $0x20] sm:$0xff]  }
 0xa3e   : > { %9388 = vmatpush1.bf16.msra.mxu1 %v13143_v39 }
 0xa3f   : > { %9246 = vmatmul.mubr.bf16.vlgmr.msra.gmra.mxu0 %v9130_v37  ;;  %9692 = vmatprep.subr.bf16.mxu1 %v13151_v18  ;;  %v18050_v18 = vld [vmem:[#allocation12_spill] sm:$0xff]  ;;  %v13226_v37 = vld [vmem:[%s17712_s11 + $0x58] sm:$0xff]  }
 0xa40   : > { %9532 = vmatpush1.bf16.msra.mxu0 %v13146_v26  ;;  %9563 = vmatprep.mubr.bf16.mxu0 %v13313_v47  ;;  %v17640_v26 = vsub.s32 %v8619_v49, %v18050_v18 }
 0xa41   : > { %9406 = vmatmul.mubr.bf16.vlgmr.msra.gmra.mxu1 %v9291_v35  ;;  %9533 = vmatprep.subr.bf16.mxu0 %v13154_v24  ;;  %v13227_v35 = vld [vmem:[%s17712_s11 + $0x18] sm:$0xff]  }
 0xa42   : > { %9693 = vmatpush1.bf16.msra.mxu1 %v13149_v58  ;;  %9724 = vmatprep.mubr.bf16.mxu1 %v13313_v47 }
 0xa43   : > { %9694 = vmatprep.subr.bf16.mxu1 %v13157_v25 }
 0xa44   : > { %9534 = vmatpush1.bf16.msra.mxu0 %v13152_v20 }
 0xa45   : > { %9535 = vmatprep.subr.bf16.mxu0 %v13160_v15 }
 0xa46   : > { %9695 = vmatpush1.bf16.msra.mxu1 %v13155_v62 }
 0xa47   : > { %9696 = vmatprep.subr.bf16.mxu1 %v13163_v10 }
 0xa48   : > { %9536 = vmatpush1.bf16.msra.mxu0 %v13158_v33  ;;  %v13228_v33 = vld [vmem:[%s17712_s11 + $0x50] sm:$0xff]  }
 0xa49   : > { %9537 = vmatprep.subr.bf16.mxu0 %v13166_v8  ;;  %v8475_v8 = vld [vmem:[%s17711_s10] sm:$0x3] }
 0xa4a   : > { %9697 = vmatpush1.bf16.msra.mxu1 %v13161_v23 }
 0xa4b   : > { %9698 = vmatprep.subr.bf16.mxu1 %v13169_v9 }
 0xa4c   : > { %9538 = vmatpush1.bf16.msra.mxu0 %v13164_v3  ;;  %v13229_v3 = vld [vmem:[%s17712_s11 + $0x10] sm:$0xff]  }
 0xa4d   : > { %9539 = vmatprep.subr.bf16.mxu0 %v13172_v29 }
 0xa4e   : > { %9699 = vmatpush1.bf16.msra.mxu1 %v13167_v55 }
 0xa4f   : > { %9700 = vmatprep.subr.bf16.mxu1 %v13175_v57 }
 0xa50   : > { %9540 = vmatpush1.bf16.msra.mxu0 %v13170_v19 }
 0xa51   : > { %9541 = vmatprep.subr.bf16.mxu0 %v13178_v2 }
 0xa52   : > { %9701 = vmatpush1.bf16.msra.mxu1 %v13173_v63  ;;  %v13230_v63 = vld [vmem:[%s17712_s11 + $0x48] sm:$0xff]  }
 0xa53   : > { %9702 = vmatprep.subr.bf16.mxu1 %v13181_v6  ;;  %v13231_v6 = vld [vmem:[%s17712_s11 + $0x8] sm:$0xff]  }
 0xa54   : > { %9542 = vmatpush1.bf16.msra.mxu0 %v13176_v1  ;;  %v13232_v1 = vld [vmem:[%s17712_s11 + $0x40] sm:$0xff]  }
 0xa55   : > { %9543 = vmatprep.subr.bf16.mxu0 %v13184_v59 }
 0xa56   : > { %9703 = vmatpush1.bf16.msra.mxu1 %v13179_v7  ;;  %v13233_v7 = vld [vmem:[%s17712_s11] sm:$0xff]  }
 0xa57   : > { %9704 = vmatprep.subr.bf16.mxu1 %v13187_v53 }
 0xa58   : > { %9544 = vmatpush1.bf16.msra.mxu0 %v13182_v50 }
 0xa59   : > { %9545 = vmatprep.subr.bf16.mxu0 %v13190_v48 }
 0xa5a   : > { %9705 = vmatpush1.bf16.msra.mxu1 %v13185_v52 }
 0xa5b   : > { %9706 = vmatprep.subr.bf16.mxu1 %v13193_v30 }
 0xa5c   : > { %9546 = vmatpush1.bf16.msra.mxu0 %v13188_v46 }
 0xa5d   : > { %9852 = vmatprep.subr.bf16.mxu0 %v13196_v45 }
 0xa5e   : > { %9707 = vmatpush1.bf16.msra.mxu1 %v13191_v60 }
 0xa5f   : > { %9564 = vmatmul.mubr.bf16.vlgmr.msra.gmra.mxu0 %v9433_v17  ;;  %11622 = vmatprep.subr.bf16.mxu1 %v13218_v40 }
 0xa60   : > { %9853 = vmatpush1.bf16.msra.mxu0 %v13194_v61  ;;  %9884 = vmatprep.mubr.bf16.mxu0 %v13313_v47  ;;  %v13203_v47 = vld [vmem:[%s17710_s9 + $0x440] ss:$8 sps:$4 sm:$0xff]  }
 0xa61   : > { %9725 = vmatmul.mubr.bf16.vlgmr.msra.gmra.mxu1 %v9609_v21  ;;  %9854 = vmatprep.subr.bf16.mxu0 %v13199_v0 }
 0xa62   : > { %11623 = vmatpush3.bf16.msra.mxu1 %v13219_v16 }
 0xa63   : > { %11624 = vmatprep.subr.bf16.mxu1 %v13220_v11 }
 0xa64   : > { %9855 = vmatpush1.bf16.msra.mxu0 %v13197_v31 }
 0xa65   : > { %9856 = vmatprep.subr.bf16.mxu0 %v13202_v36 }
 0xa66   : > { %11625 = vmatpush3.bf16.msra.mxu1 %v13221_v32 }
 0xa67   : > { %11626 = vmatprep.subr.bf16.mxu1 %v13222_v22 }
 0xa68   : > { %9857 = vmatpush1.bf16.msra.mxu0 %v13200_v44 }
 0xa69   : > { %9858 = vmatprep.subr.bf16.mxu0 %v13205_v56 }
 0xa6a   : > { %11627 = vmatpush3.bf16.msra.mxu1 %v13223_v38 }
 0xa6b   : > { %11628 = vmatprep.subr.bf16.mxu1 %v13224_v42 }
 0xa6c   : > { %9859 = vmatpush1.bf16.msra.mxu0 %v13203_v47 }
 0xa6d   : > { %9860 = vmatprep.subr.bf16.mxu0 %v13208_v4 }
 0xa6e   : > { %11629 = vmatpush3.bf16.msra.mxu1 %v13225_v54 }
 0xa6f   : > { %11630 = vmatprep.subr.bf16.mxu1 %v13226_v37 }
 0xa70   : > { %9861 = vmatpush1.bf16.msra.mxu0 %v13206_v28 }
 0xa71   : > { %9862 = vmatprep.subr.bf16.mxu0 %v13211_v51 }
 0xa72   : > { %11631 = vmatpush3.bf16.msra.mxu1 %v13227_v35 }
 0xa73   : > { %11632 = vmatprep.subr.bf16.mxu1 %v13228_v33 }
 0xa74   : > { %9863 = vmatpush1.bf16.msra.mxu0 %v13209_v5 }
 0xa75   : > { %9864 = vmatprep.subr.bf16.mxu0 %v13214_v12 }
 0xa76   : > { %11633 = vmatpush3.bf16.msra.mxu1 %v13229_v3 }
 0xa77   : > { %11634 = vmatprep.subr.bf16.mxu1 %v13230_v63  ;;  %v9919_v63 = vsub.s32 0, %v18050_v18 }
 0xa78   : > { %9865 = vmatpush1.bf16.msra.mxu0 %v13212_v27 }
 0xa79   : > { %9866 = vmatprep.subr.bf16.mxu0 %v13217_v43 }
 0xa7a   : > { %11635 = vmatpush3.bf16.msra.mxu1 %v13231_v6  ;;  %v9923_v6 = vsub.s32 1, %v18050_v18 }
 0xa7b   : > { %11636 = vmatprep.subr.bf16.mxu1 %v13232_v1 }
 0xa7c   : > { %9867 = vmatpush1.bf16.msra.mxu0 %v13215_v14 }
 0xa7e   : > { %11637 = vmatpush3.bf16.msra.mxu1 %v13233_v7 }
 0xa7f   : > { %9885 = vmatmul.mubr.bf16.vlgmr.msra.gmra.mxu0 %v9770_v13 }
 0xabf   : > { %v8607_v39 = vpop.f32.mrf.mxu0 }
 0xac1   : > { %v8609_v24 = vpop.f32.mrf.mxu0  ;;  %v8768_v58 = vpop.f32.mrf.mxu1 }
 0xac2   : > { %v8616_v25 = vcombine.low %v8607_v39, %v8609_v24 }
 0xac3   : > { %v8611_v20 = vpop.f32.mrf.mxu0  ;;  %v8770_v15 = vpop.f32.mrf.mxu1 }
 0xac4   : > { %v8623_v62 = vrot.slane %v8616_v25, %v17640_v26  ;;  %v8777_v10 = vcombine.low %v8768_v58, %v8770_v15 }
 0xac5   : > { %v8612_v23 = vpop.f32.mrf.mxu0  ;;  %v8772_v9 = vpop.f32.mrf.mxu1 }
 0xac6   : > { %v8630_v29 = vrot.slane %v8623_v62, %v17640_v26  ;;  %v8784_v55 = vrot.slane %v8777_v10, %v17640_v26 }
 0xac7   : > { %v8773_v57 = vpop.f32.mrf.mxu1 }
 0xac8   : > { %v8632_v19 = vadd.f32 %v8630_v29, %v8475_v8  ;;  %v8791_v2 = vrot.slane %v8784_v55, %v17640_v26 }
 0xaca   : > { %v8793_v59 = vadd.f32 %v8791_v2, %v8632_v19  ;;  %v9913_v19 = vstv %s13453_s20 }
 0xadf   : > { %v8928_v53 = vpop.f32.mrf.mxu0 }
 0xae1   : > { %v8930_v50 = vpop.f32.mrf.mxu0  ;;  %v9086_v48 = vpop.f32.mrf.mxu1 }
 0xae2   : > { %v8937_v52 = vcombine.low %v8928_v53, %v8930_v50 }
 0xae3   : > { %v8932_v30 = vpop.f32.mrf.mxu0  ;;  %v9088_v46 = vpop.f32.mrf.mxu1 }
 0xae4   : > { %v8944_v45 = vrot.slane %v8937_v52, %v17640_v26  ;;  %v9095_v60 = vcombine.low %v9086_v48, %v9088_v46 }
 0xae5   : > { %v8933_v17 = vpop.f32.mrf.mxu0  ;;  %v9090_v61 = vpop.f32.mrf.mxu1 }
 0xae6   : > { %v8951_v0 = vrot.slane %v8944_v45, %v17640_v26  ;;  %v9102_v21 = vrot.slane %v9095_v60, %v17640_v26 }
 0xae7   : > { %v9091_v31 = vpop.f32.mrf.mxu1 }
 0xae8   : > { %v8953_v36 = vadd.f32 %v8951_v0, %v8793_v59  ;;  %v9109_v44 = vrot.slane %v9102_v21, %v17640_v26 }
 0xaea   : > { %v9111_v56 = vadd.f32 %v9109_v44, %v8953_v36 }
 0xaff   : > { %v9247_v47 = vpop.f32.mrf.mxu0 }
 0xb01   : > { %v9249_v4 = vpop.f32.mrf.mxu0  ;;  %v9407_v28 = vpop.f32.mrf.mxu1 }
 0xb02   : > { %v9256_v42 = vcombine.low %v9247_v47, %v9249_v4 }
 0xb03   : > { %v9251_v51 = vpop.f32.mrf.mxu0  ;;  %v9409_v5 = vpop.f32.mrf.mxu1 }
 0xb04   : > { %v9263_v41 = vrot.slane %v9256_v42, %v17640_v26  ;;  %v9416_v34 = vcombine.low %v9407_v28, %v9409_v5 }
 0xb05   : > { %v9252_v12 = vpop.f32.mrf.mxu0  ;;  %v9411_v27 = vpop.f32.mrf.mxu1 }
 0xb06   : > { %v9270_v54 = vrot.slane %v9263_v41, %v17640_v26  ;;  %v9423_v39 = vrot.slane %v9416_v34, %v17640_v26 }
 0xb07   : > { %v9412_v43 = vpop.f32.mrf.mxu1 }
 0xb08   : > { %v9272_v58 = vadd.f32 %v9270_v54, %v9111_v56  ;;  %v9430_v35 = vrot.slane %v9423_v39, %v17640_v26 }
 0xb0a   : > { %v9432_v62 = vadd.f32 %v9430_v35, %v9272_v58 }
 0xb1f   : > { %v9565_v14 = vpop.f32.mrf.mxu0 }
 0xb21   : > { %v9567_v13 = vpop.f32.mrf.mxu0  ;;  %v9726_v40 = vpop.f32.mrf.mxu1 }
 0xb22   : > { %v9574_v49 = vcombine.low %v9565_v14, %v9567_v13 }
 0xb23   : > { %v9569_v16 = vpop.f32.mrf.mxu0  ;;  %v9728_v11 = vpop.f32.mrf.mxu1 }
 0xb24   : > { %v9581_v37 = vrot.slane %v9574_v49, %v17640_v26  ;;  %v9735_v24 = vcombine.low %v9726_v40, %v9728_v11 }
 0xb25   : > { %v9570_v32 = vpop.f32.mrf.mxu0  ;;  %v9730_v22 = vpop.f32.mrf.mxu1 }
 0xb26   : > { %v9588_v25 = vrot.slane %v9581_v37, %v17640_v26  ;;  %v9742_v20 = vrot.slane %v9735_v24, %v17640_v26 }
 0xb27   : > { %v9731_v38 = vpop.f32.mrf.mxu1 }
 0xb28   : > { %v9590_v33 = vadd.f32 %v9588_v25, %v9432_v62  ;;  %v9749_v8 = vrot.slane %v9742_v20, %v17640_v26 }
 0xb2a   : > { %v9751_v55 = vadd.f32 %v9749_v8, %v9590_v33 }
 0xb3f   : > { %v9886_v15 = vpop.f32.mrf.mxu0 }
 0xb41   : > { %v9888_v10 = vpop.f32.mrf.mxu0 }
 0xb42   : > { %v9895_v23 = vcombine.low %v9886_v15, %v9888_v10 }
 0xb43   : > { %v9890_v9 = vpop.f32.mrf.mxu0 }
 0xb44   : > { %v9902_v3 = vrot.slane %v9895_v23, %v17640_v26 }
 0xb45   : > { %v9891_v29 = vpop.f32.mrf.mxu0 }
 0xb46   : > { %v9909_v57 = vrot.slane %v9902_v3, %v17640_v26  ;;  %v9961_v26 = vld [vmem:[%s17713_s12] sm:$0x1] }
 0xb48   : > { %v9911_v2 = vadd.f32 %v9909_v57, %v9751_v55 }
 0xb4a   : > { %vm9912_vm13 = vcmp.gt.f32.partialorder %v9911_v2, 0.0  ;;  %v9914_v1 = vmul.f32 %v9913_v19, %v9911_v2 }
 0xb4c   : > { %v9915_v59 = vsel %vm9912_vm13, %v9911_v2, %v9914_v1 }
 0xb4d   : > { %v9920_v7 = vrot.slane %v9915_v59, %v9919_v63  ;;  %v9924_v53 = vrot.slane %v9915_v59, %v9923_v6 }
 0xb4f   : > { %v9927_v50 = vpack.c.bf16 %v9920_v7, %v9920_v7  ;;  %v9928_v48 = vpack.c.bf16 %v9924_v53, %v9924_v53 }
 0xb51   : > { %10090 = vmatprep.mubr.bf16.mxu1 %v9928_v48 }
 0xb52   : > { %10091 = vmatmul.mubr.bf16.vlgmr.msra.gmra.mxu1 %v9927_v50 }
 0xc12   : > { %v11638_v52 = vpop.f32.mrf.mxu1 }
 0xc14   : > { %v11639_v30 = vpop.f32.mrf.mxu1 }
 0xc15   : > { %v11640_v46 = vadd.f32 %v11639_v30, %v11638_v52 }
 0xc16   : > { %v11641_v45 = vpop.f32.mrf.mxu1 }
 0xc17   : > { %v10093_v18 = vadd.f32 %v11640_v46, %v9961_v26 }
 0xc18   : > { %v11642_v60 = vpop.f32.mrf.mxu1 }
 0xc19   : > { %10111 = vst.msk [vmem:[%s13444_s15] sm:$0x1] %vm10110_vm14, %v10093_v18  ;;  %v10099_v17 = vsel %vm10098_vm15, %v10093_v18, -inf }
 0xc1a   : > { %10100 = vmax.xlane.f32.xlu0 %v10099_v17 }
 0xca3   : > { %v10101_v61 = vpop.xlane.xlu0 %10100 }
 0xca4   : > { %v10102_v0 = vsub.f32 %v10093_v18, %v10101_v61 }
 0xca6   : > { %v10103_v21 = vmul.f32 1.442695, %v10102_v0 }
 0xca8   : > { %13234 = vpow2.f32 %v10103_v21 }
 0xcb5   : > { %v13235_v31 = vpop.eup %13234 }
 0xcb6   : > { %v10105_v36 = vsel %vm10098_vm15, %v13235_v31, 0.0 }
 0xcb7   : > { %10106 = vadd.xlane.f32.xlu0 %v10105_v36 }
 0xd40   : > { %v10107_v44 = vpop.xlane.xlu0 %10106 }
 0xd41   : > { %13236 = vrcp.f32 %v10107_v44 }
 0xd4e   : > { %v13237_v56 = vpop.eup %13236 }
 0xd4f   : > { %v10109_v47 = vmul.f32 %v13237_v56, %v13235_v31 }
 0xd51   : > { %10112 = vst.msk [vmem:[%s13444_s15] sm:$0x1] %vm10098_vm15, %v10109_v47 }
 0xd52 PF: > { %s25_s29 = sadd.s32 1, %s13283_s29  }
 0xd53   : > { %p22_p6 = scmp.ge.s32.totalorder %s25_s29, 4  }
 0xd55   :  { %24 = sbr.rel (!%p22_p6) target bundleno = 1 (0x1), region = 246 }
 0xd5a   :  { %10130 = vsyncpa [#allocation10], 1 }
 0xd5b   :  { %10132 = vsyncpa [#allocation10 + $0x1], 1 }

</bundles_post_ra>
